<compile_context>
chip_gen: v7x
topology: tpu7x:2x2x1
jax: 0.10.0
libtpu: 0.0.40
codegen_flags: <defaults>
</compile_context>

<pallas_src>
import functools
import numpy as np

import jax
import jax.numpy as jnp
from jax.experimental import pallas as pl
from jax.experimental.pallas import tpu as pltpu


_TIME_BLOCK = 8                      # timesteps per grid step in the recurrence


def _default_vmem_limit():
    """Per-generation VMEM budget: ~85% of physical (v5e/v6e ~108MiB, v7x ~54MiB)."""
    try:
        cap = int(getattr(pltpu.get_tpu_info(), "vmem_capacity_bytes", 0))
        if cap > 0:
            return int(cap * 0.85)
    except Exception:
        pass
    return 48 * 1024 * 1024          # fits every generation


_VMEM_LIMIT = _default_vmem_limit()


# ----------------------------------------------------------------------------
# Pallas kernels
# ----------------------------------------------------------------------------
def _gate_proj_kernel(x_ref, w_ref, b_ref, g_ref):
    """Hoisted input projection for both LSTM directions: g[d] = x @ W_ih[d] + b[d].

    x : (TM, D)      input rows (cast to bf16 for the MXU)
    w : (2, D, TN)   bf16 stacked fwd/bwd weight column-tiles
    b : (2, 1, TN)   f32 stacked biases
    g : (2, TM, TN)  bf16 gate pre-activations
    """
    x = x_ref[...].astype(jnp.bfloat16)
    for d in range(2):
        g_ref[d] = (jnp.dot(x, w_ref[d], preferred_element_type=jnp.float32)
                    + b_ref[d]).astype(g_ref.dtype)


def _bilstm_dir_kernel(g_ref, lens_ref, whh_ref, o_ref, h_sc, c_sc):
    """TB masked LSTM steps of ONE direction (grid axis 0) on ONE time chunk.

    Grid = (direction, time-chunk).  The direction axis is 'parallel' (v7x: one
    TensorCore per direction); the backward direction consumes time chunks in
    reverse purely through the BlockSpec index_map and walks each chunk backward.

    g    : (TB, B, 4H) bf16 precomputed x@W_ih + b, PyTorch gate order [i, f, g, o]
    lens : (B, 1) int32 valid lengths (packed-sequence mask built in-kernel)
    whh  : (H, 4H) bf16 recurrent weights of this direction
    o    : (TB, B, H) bf16 -> this direction's lane-aligned half of (T, B, 2H)
    h/c  : (B, H) f32 VMEM scratch carried across time chunks
    """
    d = pl.program_id(0)
    c = pl.program_id(1)
    nc = pl.num_programs(1)

    @pl.when(c == 0)
    def _():
        h_sc[...] = jnp.zeros_like(h_sc)
        c_sc[...] = jnp.zeros_like(c_sc)

    tb, _, four_h = g_ref.shape
    hdim = four_h // 4
    whh = whh_ref[...]                        # hoisted: read once per chunk
    lens = lens_ref[...]                      # (B, 1) int32
    chunk = c + d * (nc - 1 - 2 * c)          # fwd: c, bwd: nc-1-c (matches index_map)
    base_t = chunk * tb

    h = h_sc[...]
    c_state = c_sc[...]
    for step in range(tb):                    # fully unrolled (TB small & static)
        j = step + d * (tb - 1 - 2 * step)    # fwd walks 0..TB-1, bwd walks TB-1..0
        gates = g_ref[j].astype(jnp.float32) + jnp.dot(
            h.astype(jnp.bfloat16), whh, preferred_element_type=jnp.float32)
        i_g = jax.nn.sigmoid(gates[:, 0 * hdim:1 * hdim])
        f_g = jax.nn.sigmoid(gates[:, 1 * hdim:2 * hdim])
        g_g = jnp.tanh(gates[:, 2 * hdim:3 * hdim])
        o_g = jax.nn.sigmoid(gates[:, 3 * hdim:4 * hdim])
        c_new = f_g * c_state + i_g * g_g
        h_new = o_g * jnp.tanh(c_new)
        valid = (base_t + j) < lens           # (B, 1) in-kernel validity mask
        h = jnp.where(valid, h_new, h)        # state frozen on padded steps
        c_state = jnp.where(valid, c_new, c_state)
        o_ref[j] = jnp.where(valid, h_new, 0.0).astype(o_ref.dtype)

    h_sc[...] = h
    c_sc[...] = c_state


def _proj_ctc_kernel(x_ref, w1_ref, b1_ref, w2_ref, b2_ref, p_ref, c_ref):
    """Fused Linear(2H -> eprojs) followed by Linear(eprojs -> nchar_pad)."""
    x = x_ref[...].astype(jnp.bfloat16)
    p = jnp.dot(x, w1_ref[...], preferred_element_type=jnp.float32) + b1_ref[...]
    p_ref[...] = p.astype(p_ref.dtype)
    c_ref[...] = (jnp.dot(p.astype(jnp.bfloat16), w2_ref[...],
                          preferred_element_type=jnp.float32)
                  + b2_ref[...]).astype(c_ref.dtype)


# ----------------------------------------------------------------------------
# Pallas wrappers
# ----------------------------------------------------------------------------
def _pick_tile_m(m):
    for t in (512, 256, 128, 64, 32, 16, 8):
        if m % t == 0:
            return t
    return m                                  # callers guarantee m % 8 == 0


def _pick_tile_n(n):
    for t in (1024, 512, 256, 128):
        if n % t == 0:
            return t
    return n


def gate_proj(x2d, w_stack, b_stack):
    """x2d: (M, D) -> (2, M, 4H) bf16 gate pre-activations (fwd, bwd stacked)."""
    m, d_in = x2d.shape
    four_h = w_stack.shape[-1]
    tm = _pick_tile_m(m)
    tn = _pick_tile_n(four_h)
    return pl.pallas_call(
        _gate_proj_kernel,
        out_shape=jax.ShapeDtypeStruct((2, m, four_h), jnp.bfloat16),
        grid_spec=pltpu.PrefetchScalarGridSpec(
            num_scalar_prefetch=0,
            # N (4H) tiles on the outer axis so each weight column-tile is DMA'd
            # exactly once; the x row-tile cycles on the inner axis.
            grid=(four_h // tn, m // tm),
            in_specs=[pl.BlockSpec((tm, d_in), lambda j, i: (i, 0)),
                      pl.BlockSpec((2, d_in, tn), lambda j, i: (0, 0, j)),
                      pl.BlockSpec((2, 1, tn), lambda j, i: (0, 0, j))],
            out_specs=pl.BlockSpec((2, tm, tn), lambda j, i: (0, i, j))),
        compiler_params=pltpu.CompilerParams(
            dimension_semantics=("parallel", "parallel"),
            vmem_limit_bytes=_VMEM_LIMIT),
    )(x2d, w_stack, b_stack)


def bilstm_recurrence(gates, lens_col, whh_stack, tb):
    """Fused fwd+bwd masked LSTM recurrence -> (T_pad, B, 2H) bf16 (concat fused)."""
    _, t_pad, b, four_h = gates.shape
    h = four_h // 4
    nc = t_pad // tb
    # fwd (d=0) visits chunk c, bwd (d=1) visits chunk nc-1-c (pure arithmetic so
    # the index maps stay trivially scalar-lowerable).
    chunk = lambda d, c: c + d * (nc - 1 - 2 * c)
    return pl.pallas_call(
        _bilstm_dir_kernel,
        out_shape=jax.ShapeDtypeStruct((t_pad, b, 2 * h), jnp.bfloat16),
        grid_spec=pltpu.PrefetchScalarGridSpec(
            num_scalar_prefetch=0,
            grid=(2, nc),
            in_specs=[pl.BlockSpec((None, tb, b, four_h),
                                   lambda d, c: (d, chunk(d, c), 0, 0)),
                      pl.BlockSpec((b, 1), lambda d, c: (0, 0)),
                      pl.BlockSpec((None, h, four_h), lambda d, c: (d, 0, 0))],
            # each direction writes its own lane-dense H-half of the (T, B, 2H) slab
            out_specs=pl.BlockSpec((tb, b, h), lambda d, c: (chunk(d, c), 0, d)),
            scratch_shapes=[pltpu.VMEM((b, h), jnp.float32),
                            pltpu.VMEM((b, h), jnp.float32)]),
        compiler_params=pltpu.CompilerParams(
            dimension_semantics=("parallel", "arbitrary"),
            vmem_limit_bytes=_VMEM_LIMIT),
    )(gates, lens_col, whh_stack)


def proj_ctc(x2d, w1, b1, w2, b2):
    """Fused projection + CTC projection, tiled over (8-padded) rows."""
    m, k = x2d.shape
    n1 = w1.shape[1]
    n2 = w2.shape[1]                          # already lane-padded to 128 multiple
    m_pad = pl.cdiv(m, 8) * 8
    if m_pad != m:
        x2d = jnp.pad(x2d, ((0, m_pad - m), (0, 0)))
    tm = _pick_tile_m(m_pad)
    full = lambda i: (0, 0)
    p, c = pl.pallas_call(
        _proj_ctc_kernel,
        out_shape=(jax.ShapeDtypeStruct((m_pad, n1), jnp.float32),
                   jax.ShapeDtypeStruct((m_pad, n2), jnp.float32)),
        grid_spec=pltpu.PrefetchScalarGridSpec(
            num_scalar_prefetch=0,
            grid=(m_pad // tm,),
            in_specs=[pl.BlockSpec((tm, k), lambda i: (i, 0)),
                      pl.BlockSpec((k, n1), full),
                      pl.BlockSpec((1, n1), full),
                      pl.BlockSpec((n1, n2), full),
                      pl.BlockSpec((1, n2), full)],
            out_specs=[pl.BlockSpec((tm, n1), lambda i: (i, 0)),
                       pl.BlockSpec((tm, n2), lambda i: (i, 0))]),
        compiler_params=pltpu.CompilerParams(
            dimension_semantics=("parallel",),
            vmem_limit_bytes=_VMEM_LIMIT),
    )(x2d, w1, b1, w2, b2)
    return p[:m], c[:m]


# ----------------------------------------------------------------------------
# Encoder glue (plain JAX, time-major): packing semantics via length masks
# ----------------------------------------------------------------------------
def bilstm_tm(x_tb, lens, p):
    """Bidirectional masked LSTM on a time-major (T, B, D) slab -> (T, B, 2H) bf16."""
    t, b, d = x_tb.shape
    h = p["whh"].shape[1]
    tb = _TIME_BLOCK
    t_pad = pl.cdiv(t, tb) * tb
    if t_pad != t:
        x_tb = jnp.pad(x_tb, ((0, t_pad - t), (0, 0), (0, 0)))
    # Hoisted input projection for both directions in one pass (shared x tile),
    # gate pre-activations stored bf16 (halves the dominant HBM slab traffic).
    gates = gate_proj(x_tb.reshape(t_pad * b, d), p["wih"], p["b"])
    gates = gates.reshape(2, t_pad, b, 4 * h)
    lens_col = lens.astype(jnp.int32).reshape(b, 1)
    y = bilstm_recurrence(gates, lens_col, p["whh"], tb)
    return y[:t]


def pblstm_tm(x_tb, lens, p, factor):
    """Pyramidal step: merge `factor` frames into features, shrink time, BLSTM."""
    t, b, f = x_tb.shape
    t_trunc = (t // factor) * factor
    x_tb = x_tb[:t_trunc]
    new_t = t_trunc // factor
    # TODO(synk): this merge transpose could be folded into the next gate_proj by
    #             reading (new_t, factor, b, f) blocks directly; kept explicit.
    x_merged = (x_tb.reshape(new_t, factor, b, f)
                .transpose(0, 2, 1, 3)
                .reshape(new_t, b, factor * f))
    lens = jnp.minimum(lens // factor, new_t)    # matches reference length handling
    return bilstm_tm(x_merged, lens, p), lens


def listener_forward(params, x_btd, inp_lens, *, elayers, pfactor, nchar):
    # (B, T, D) -> time-major (T, B, D): the only full transpose of the input.
    x_tb = jnp.transpose(x_btd, (1, 0, 2))
    lens = inp_lens

    # Layer 0: plain BLSTM.  dropout0 -> identity (eval mode).
    y = bilstm_tm(x_tb, lens, params["rnn0"])

    # Pyramidal BLSTM stack.  LockedDropout between layers -> identity (eval).
    for i in range(elayers):
        y, lens = pblstm_tm(y, lens, params["pblstm"][i], pfactor)

    # Fused projection + CTC projection on the final time-major slab.
    t_f, b, f = y.shape
    proj2d, ctc2d = proj_ctc(y.reshape(t_f * b, f),
                             *params["proj"], *params["ctc"])
    proj = jnp.transpose(proj2d.reshape(t_f, b, -1), (1, 0, 2))
    ctc = jnp.transpose(ctc2d.reshape(t_f, b, -1), (1, 0, 2))[:, :, :nchar]
    return proj, lens, ctc


# ----------------------------------------------------------------------------
# Parameter init (deterministic, synthetic)
# ----------------------------------------------------------------------------
def _init_bilstm(key, d, h):
    """Direction-stacked LSTM params (PyTorch gate order [i, f, g, o])."""
    def one_dir(k):
        k1, k2, k3, k4 = jax.random.split(k, 4)
        s = 1.0 / float(np.sqrt(h))
        w_ih = jax.random.uniform(k1, (d, 4 * h), jnp.float32, -s, s)
        w_hh = jax.random.uniform(k2, (h, 4 * h), jnp.float32, -s, s)
        # PyTorch has b_ih + b_hh; combine them (kept f32).
        bias = (jax.random.uniform(k3, (1, 4 * h), jnp.float32, -s, s)
                + jax.random.uniform(k4, (1, 4 * h), jnp.float32, -s, s))
        return w_ih, w_hh, bias
    kf, kb = jax.random.split(key)
    wf, whf, bf = one_dir(kf)
    wb, whb, bb = one_dir(kb)
    # Matmul operands stored bf16 (MXU peak dtype); f32 accumulation in-kernel.
    return {"wih": jnp.stack([wf, wb]).astype(jnp.bfloat16),      # (2, D, 4H)
            "whh": jnp.stack([whf, whb]).astype(jnp.bfloat16),    # (2, H, 4H)
            "b": jnp.stack([bf, bb])}                             # (2, 1, 4H) f32


def _init_linear(key, d, n, n_pad=None):
    k1, k2 = jax.random.split(key)
    s = 1.0 / float(np.sqrt(d))
    w = jax.random.uniform(k1, (d, n), jnp.float32, -s, s)
    b = jax.random.uniform(k2, (1, n), jnp.float32, -s, s)
    if n_pad is not None and n_pad != n:      # lane-pad the CTC head to 128 columns
        w = jnp.pad(w, ((0, 0), (0, n_pad - n)))
        b = jnp.pad(b, ((0, 0), (0, n_pad - n)))
    return w.astype(jnp.bfloat16), b


class Listener:
    """Pallas/JAX re-implementation of the PyTorch Listener (eval mode)."""

    def __init__(self, key, idim, ehiddens, elayers, eprojs, nchar, pfactor=2):
        assert elayers >= 1, "Listener requires at least one pBLSTM layer"
        assert ehiddens % 128 == 0, "hidden size must be a multiple of 128 (lanes)"
        self.elayers = elayers
        self.pfactor = pfactor
        nchar_pad = pl.cdiv(nchar, 128) * 128          # lane-dense CTC head
        keys = jax.random.split(key, elayers + 3)
        self.params = {
            "rnn0": _init_bilstm(keys[0], idim, ehiddens),
            "pblstm": [_init_bilstm(keys[1 + i], pfactor * 2 * ehiddens, ehiddens)
                       for i in range(elayers)],
            "proj": _init_linear(keys[elayers + 1], 2 * ehiddens, eprojs),
            "ctc": _init_linear(keys[elayers + 2], eprojs, nchar, nchar_pad),
        }
        self._forward = jax.jit(functools.partial(
            listener_forward, elayers=elayers, pfactor=pfactor, nchar=nchar))

    def __call__(self, x, inp_lens):
        # Lengths are returned as a device array (no host sync inside the jitted
        # forward); callers can convert to a Python list if they need one.
        return self._forward(self.params, x, inp_lens)


# ----------------------------------------------------------------------------
# Demo
# ----------------------------------------------------------------------------
if __name__ == "__main__":
    key = jax.random.PRNGKey(0)
    k_param, k_x = jax.random.split(key)

    # Small demo shapes (H kept at 128 so gate/output blocks stay lane-aligned).
    B, T, IDIM = 2, 16, 16
    EHID, ELAYERS, EPROJS, NCHAR, PFACTOR = 128, 2, 128, 30, 2

    x = jax.random.normal(k_x, (B, T, IDIM), jnp.float32)
    inp_lens = jnp.array([16, 12], jnp.int32)   # sorted descending (pack semantics)

    model = Listener(k_param, IDIM, EHID, ELAYERS, EPROJS, NCHAR, PFACTOR)
    out, out_lens, ctc_out = model(x, inp_lens)
    out, out_lens, ctc_out = jax.block_until_ready((out, out_lens, ctc_out))

    T_OUT = T // (PFACTOR ** ELAYERS)
    assert out.shape == (B, T_OUT, EPROJS), out.shape
    assert ctc_out.shape == (B, T_OUT, NCHAR), ctc_out.shape
    assert [int(v) for v in np.asarray(out_lens)] == [4, 3], out_lens
    assert bool(jnp.all(jnp.isfinite(out))) and bool(jnp.all(jnp.isfinite(ctc_out)))
    print("KERNEL_OK")
</pallas_src>

<mosaic_0001>
module attributes {stable_mosaic.version = 11 : i64} {
  func.func @_gate_proj_kernel(%arg0: i32, %arg1: i32, %arg2: memref<32x16xf32, #tpu.memory_space<vmem>>, %arg3: memref<2x16x512xbf16, #tpu.memory_space<vmem>>, %arg4: memref<2x1x512xf32, #tpu.memory_space<vmem>>, %arg5: memref<2x32x512xbf16, #tpu.memory_space<vmem>>) attributes {dimension_semantics = [#tpu.dimension_semantics<parallel>, #tpu.dimension_semantics<parallel>], iteration_bounds = array<i64: 1, 1>, scalar_prefetch = 0 : i64, scratch_operands = 0 : i64, tpu.core_type = #tpu.core_type<tc>, window_params = [{transform_indices = @transform_0, window_bounds = array<i64: 32, 16>}, {transform_indices = @transform_1, window_bounds = array<i64: 2, 16, 512>}, {transform_indices = @transform_2, window_bounds = array<i64: 2, 1, 512>}, {transform_indices = @transform_3, window_bounds = array<i64: 2, 32, 512>}]} {
    %c0 = arith.constant 0 : index
    %c0_0 = arith.constant 0 : index
    %0 = vector.load %arg2[%c0, %c0_0] : memref<32x16xf32, #tpu.memory_space<vmem>>, vector<32x16xf32>
    %1 = arith.truncf %0 : vector<32x16xf32> to vector<32x16xbf16>
    %c0_1 = arith.constant 0 : index
    %c0_2 = arith.constant 0 : index
    %c0_3 = arith.constant 0 : index
    %2 = vector.load %arg3[%c0_1, %c0_2, %c0_3] : memref<2x16x512xbf16, #tpu.memory_space<vmem>>, vector<1x16x512xbf16>
    %3 = vector.shape_cast %2 : vector<1x16x512xbf16> to vector<16x512xbf16>
    %cst = arith.constant dense<0.000000e+00> : vector<32x512xf32>
    %4 = tpu.matmul %1, %3, %cst {dimension_numbers = #tpu.dot_dimension_numbers<[1], [0], [0], [1], [0, 0, 1, 1], [], []>} : vector<32x16xbf16>, vector<16x512xbf16>, vector<32x512xf32> -> vector<32x512xf32>
    %c0_4 = arith.constant 0 : index
    %c0_5 = arith.constant 0 : index
    %c0_6 = arith.constant 0 : index
    %5 = vector.load %arg4[%c0_4, %c0_5, %c0_6] : memref<2x1x512xf32, #tpu.memory_space<vmem>>, vector<1x1x512xf32>
    %6 = vector.shape_cast %5 : vector<1x1x512xf32> to vector<1x512xf32>
    %7 = vector.broadcast %6 : vector<1x512xf32> to vector<32x512xf32>
    %8 = arith.addf %4, %7 : vector<32x512xf32>
    %9 = arith.truncf %8 : vector<32x512xf32> to vector<32x512xbf16>
    %c0_7 = arith.constant 0 : index
    %c0_8 = arith.constant 0 : index
    %c0_9 = arith.constant 0 : index
    %10 = vector.load %arg5[%c0_7, %c0_8, %c0_9] : memref<2x32x512xbf16, #tpu.memory_space<vmem>>, vector<1x32x512xbf16>
    %11 = vector.shape_cast %10 : vector<1x32x512xbf16> to vector<32x512xbf16>
    %12 = vector.shape_cast %9 : vector<32x512xbf16> to vector<1x32x512xbf16>
    tpu.vector_store %arg5[%c0_7, %c0_8, %c0_9], %12 {strides = array<i32>} : memref<2x32x512xbf16, #tpu.memory_space<vmem>>, vector<1x32x512xbf16>,
    %c1 = arith.constant 1 : index
    %c0_10 = arith.constant 0 : index
    %c0_11 = arith.constant 0 : index
    %13 = vector.load %arg3[%c1, %c0_10, %c0_11] : memref<2x16x512xbf16, #tpu.memory_space<vmem>>, vector<1x16x512xbf16>
    %14 = vector.shape_cast %13 : vector<1x16x512xbf16> to vector<16x512xbf16>
    %cst_12 = arith.constant dense<0.000000e+00> : vector<32x512xf32>
    %15 = tpu.matmul %1, %14, %cst_12 {dimension_numbers = #tpu.dot_dimension_numbers<[1], [0], [0], [1], [0, 0, 1, 1], [], []>} : vector<32x16xbf16>, vector<16x512xbf16>, vector<32x512xf32> -> vector<32x512xf32>
    %c1_13 = arith.constant 1 : index
    %c0_14 = arith.constant 0 : index
    %c0_15 = arith.constant 0 : index
    %16 = vector.load %arg4[%c1_13, %c0_14, %c0_15] : memref<2x1x512xf32, #tpu.memory_space<vmem>>, vector<1x1x512xf32>
    %17 = vector.shape_cast %16 : vector<1x1x512xf32> to vector<1x512xf32>
    %18 = vector.broadcast %17 : vector<1x512xf32> to vector<32x512xf32>
    %19 = arith.addf %15, %18 : vector<32x512xf32>
    %20 = arith.truncf %19 : vector<32x512xf32> to vector<32x512xbf16>
    %c1_16 = arith.constant 1 : index
    %c0_17 = arith.constant 0 : index
    %c0_18 = arith.constant 0 : index
    %21 = vector.load %arg5[%c1_16, %c0_17, %c0_18] : memref<2x32x512xbf16, #tpu.memory_space<vmem>>, vector<1x32x512xbf16>
    %22 = vector.shape_cast %21 : vector<1x32x512xbf16> to vector<32x512xbf16>
    %23 = vector.shape_cast %20 : vector<32x512xbf16> to vector<1x32x512xbf16>
    tpu.vector_store %arg5[%c1_16, %c0_17, %c0_18], %23 {strides = array<i32>} : memref<2x32x512xbf16, #tpu.memory_space<vmem>>, vector<1x32x512xbf16>,
    return
  }
  func.func @transform_0(%arg0: i32, %arg1: i32) -> (i32, i32) {
    %c0_i32 = arith.constant 0 : i32
    %c0_i32_0 = arith.constant 0 : i32
    return %arg1, %c0_i32 : i32, i32
  }
  func.func @transform_1(%arg0: i32, %arg1: i32) -> (i32, i32, i32) {
    %c0_i32 = arith.constant 0 : i32
    %c0_i32_0 = arith.constant 0 : i32
    %c0_i32_1 = arith.constant 0 : i32
    return %c0_i32, %c0_i32_0, %arg0 : i32, i32, i32
  }
  func.func @transform_2(%arg0: i32, %arg1: i32) -> (i32, i32, i32) {
    %c0_i32 = arith.constant 0 : i32
    %c0_i32_0 = arith.constant 0 : i32
    %c0_i32_1 = arith.constant 0 : i32
    return %c0_i32, %c0_i32_0, %arg0 : i32, i32, i32
  }
  func.func @transform_3(%arg0: i32, %arg1: i32) -> (i32, i32, i32) {
    %c0_i32 = arith.constant 0 : i32
    %c0_i32_0 = arith.constant 0 : i32
    return %c0_i32, %arg1, %arg0 : i32, i32, i32
  }
}

module attributes {stable_mosaic.version = 11 : i64} {
  func.func @_bilstm_dir_kernel(%arg0: i32, %arg1: i32, %arg2: memref<1x8x2x512xbf16, #tpu.memory_space<vmem>>, %arg3: memref<2x1xi32, #tpu.memory_space<vmem>>, %arg4: memref<1x128x512xbf16, #tpu.memory_space<vmem>>, %arg5: memref<8x2x128xbf16, #tpu.memory_space<vmem>>, %arg6: memref<2x128xf32, #tpu.memory_space<vmem>>, %arg7: memref<2x128xf32, #tpu.memory_space<vmem>>) attributes {dimension_semantics = [#tpu.dimension_semantics<parallel>, #tpu.dimension_semantics<arbitrary>], iteration_bounds = array<i64: 2, 2>, scalar_prefetch = 0 : i64, scratch_operands = 2 : i64, tpu.core_type = #tpu.core_type<tc>, window_params = [{transform_indices = @transform_0, window_bounds = array<i64: 1, 8, 2, 512>}, {pipeline_mode = #tpu.pipeline_mode<synchronous>, transform_indices = @transform_1, window_bounds = array<i64: 2, 1>}, {transform_indices = @transform_2, window_bounds = array<i64: 1, 128, 512>}, {transform_indices = @transform_3, window_bounds = array<i64: 8, 2, 128>}]} {
    %c0_i32 = arith.constant 0 : i32
    %0 = arith.cmpi eq, %arg1, %c0_i32 : i32
    %1 = arith.extui %0 : i1 to i32
    %c0_i32_0 = arith.constant 0 : i32
    %2 = arith.cmpi ne, %1, %c0_i32_0 : i32
    scf.if %2 {
      %cst_99 = arith.constant 0.000000e+00 : f32
      %431 = vector.broadcast %cst_99 : f32 to vector<2x128xf32>
      %c0_100 = arith.constant 0 : index
      %c0_101 = arith.constant 0 : index
      %432 = vector.load %arg6[%c0_100, %c0_101] : memref<2x128xf32, #tpu.memory_space<vmem>>, vector<2x128xf32>
      tpu.vector_store %arg6[%c0_100, %c0_101], %431 {strides = array<i32>} : memref<2x128xf32, #tpu.memory_space<vmem>>, vector<2x128xf32>,
      %cst_102 = arith.constant 0.000000e+00 : f32
      %433 = vector.broadcast %cst_102 : f32 to vector<2x128xf32>
      %c0_103 = arith.constant 0 : index
      %c0_104 = arith.constant 0 : index
      %434 = vector.load %arg7[%c0_103, %c0_104] : memref<2x128xf32, #tpu.memory_space<vmem>>, vector<2x128xf32>
      tpu.vector_store %arg7[%c0_103, %c0_104], %433 {strides = array<i32>} : memref<2x128xf32, #tpu.memory_space<vmem>>, vector<2x128xf32>,
    } else {
    }
    %c0 = arith.constant 0 : index
    %c0_1 = arith.constant 0 : index
    %c0_2 = arith.constant 0 : index
    %3 = vector.load %arg4[%c0, %c0_1, %c0_2] : memref<1x128x512xbf16, #tpu.memory_space<vmem>>, vector<1x128x512xbf16>
    %4 = vector.shape_cast %3 : vector<1x128x512xbf16> to vector<128x512xbf16>
    %c0_3 = arith.constant 0 : index
    %c0_4 = arith.constant 0 : index
    %5 = vector.load %arg3[%c0_3, %c0_4] : memref<2x1xi32, #tpu.memory_space<vmem>>, vector<2x1xi32>
    %c2_i32 = arith.constant 2 : i32
    %6 = arith.muli %c2_i32, %arg1 : i32
    %c1_i32 = arith.constant 1 : i32
    %7 = arith.subi %c1_i32, %6 : i32
    %8 = arith.muli %arg0, %7 : i32
    %9 = arith.addi %arg1, %8 : i32
    %c8_i32 = arith.constant 8 : i32
    %10 = arith.muli %9, %c8_i32 : i32
    %c0_5 = arith.constant 0 : index
    %c0_6 = arith.constant 0 : index
    %11 = vector.load %arg6[%c0_5, %c0_6] : memref<2x128xf32, #tpu.memory_space<vmem>>, vector<2x128xf32>
    %c0_7 = arith.constant 0 : index
    %c0_8 = arith.constant 0 : index
    %12 = vector.load %arg7[%c0_7, %c0_8] : memref<2x128xf32, #tpu.memory_space<vmem>>, vector<2x128xf32>
    %c7_i32 = arith.constant 7 : i32
    %13 = arith.muli %arg0, %c7_i32 : i32
    %c0_i32_9 = arith.constant 0 : i32
    %14 = arith.addi %c0_i32_9, %13 : i32
    %c0_10 = arith.constant 0 : index
    %15 = arith.index_cast %14 : i32 to index
    %c0_11 = arith.constant 0 : index
    %c0_12 = arith.constant 0 : index
    %16 = vector.load %arg2[%c0_10, %15, %c0_11, %c0_12] : memref<1x8x2x512xbf16, #tpu.memory_space<vmem>>, vector<1x1x2x512xbf16>
    %17 = vector.shape_cast %16 : vector<1x1x2x512xbf16> to vector<2x512xbf16>
    %18 = arith.extf %17 : vector<2x512xbf16> to vector<2x512xf32>
    %19 = arith.truncf %11 : vector<2x128xf32> to vector<2x128xbf16>
    %cst = arith.constant dense<0.000000e+00> : vector<2x512xf32>
    %20 = tpu.matmul %19, %4, %cst {dimension_numbers = #tpu.dot_dimension_numbers<[1], [0], [0], [1], [0, 0, 1, 1], [], []>} : vector<2x128xbf16>, vector<128x512xbf16>, vector<2x512xf32> -> vector<2x512xf32>
    %21 = arith.addf %18, %20 : vector<2x512xf32>
    %22 = vector.extract_strided_slice %21 {offsets = [0, 0], sizes = [2, 128], strides = [1, 1]} : vector<2x512xf32> to vector<2x128xf32>
    %23 = arith.negf %22 : vector<2x128xf32>
    %24 = math.exp %23 : vector<2x128xf32>
    %cst_13 = arith.constant 1.000000e+00 : f32
    %25 = vector.broadcast %cst_13 : f32 to vector<2x128xf32>
    %26 = arith.addf %25, %24 : vector<2x128xf32>
    %27 = arith.divf %25, %26 : vector<2x128xf32>
    %28 = vector.extract_strided_slice %21 {offsets = [0, 128], sizes = [2, 128], strides = [1, 1]} : vector<2x512xf32> to vector<2x128xf32>
    %29 = arith.negf %28 : vector<2x128xf32>
    %30 = math.exp %29 : vector<2x128xf32>
    %cst_14 = arith.constant 1.000000e+00 : f32
    %31 = vector.broadcast %cst_14 : f32 to vector<2x128xf32>
    %32 = arith.addf %31, %30 : vector<2x128xf32>
    %33 = arith.divf %31, %32 : vector<2x128xf32>
    %34 = vector.extract_strided_slice %21 {offsets = [0, 256], sizes = [2, 128], strides = [1, 1]} : vector<2x512xf32> to vector<2x128xf32>
    %35 = math.tanh %34 : vector<2x128xf32>
    %36 = vector.extract_strided_slice %21 {offsets = [0, 384], sizes = [2, 128], strides = [1, 1]} : vector<2x512xf32> to vector<2x128xf32>
    %37 = arith.negf %36 : vector<2x128xf32>
    %38 = math.exp %37 : vector<2x128xf32>
    %cst_15 = arith.constant 1.000000e+00 : f32
    %39 = vector.broadcast %cst_15 : f32 to vector<2x128xf32>
    %40 = arith.addf %39, %38 : vector<2x128xf32>
    %41 = arith.divf %39, %40 : vector<2x128xf32>
    %42 = arith.mulf %33, %12 : vector<2x128xf32>
    %43 = arith.mulf %27, %35 : vector<2x128xf32>
    %44 = arith.addf %42, %43 : vector<2x128xf32>
    %45 = math.tanh %44 : vector<2x128xf32>
    %46 = arith.mulf %41, %45 : vector<2x128xf32>
    %47 = arith.addi %10, %14 : i32
    %48 = vector.broadcast %47 : i32 to vector<2x1xi32>
    %49 = arith.cmpi slt, %48, %5 : vector<2x1xi32>
    %50 = vector.shape_cast %49 : vector<2x1xi1> to vector<2x1xi1>
    %51 = vector.broadcast %50 : vector<2x1xi1> to vector<2x128xi1>
    %52 = arith.select %51, %46, %11 : vector<2x128xi1>, vector<2x128xf32>
    %53 = vector.shape_cast %49 : vector<2x1xi1> to vector<2x1xi1>
    %54 = vector.broadcast %53 : vector<2x1xi1> to vector<2x128xi1>
    %55 = arith.select %54, %44, %12 : vector<2x128xi1>, vector<2x128xf32>
    %cst_16 = arith.constant 0.000000e+00 : f32
    %56 = vector.shape_cast %49 : vector<2x1xi1> to vector<2x1xi1>
    %57 = vector.broadcast %56 : vector<2x1xi1> to vector<2x128xi1>
    %58 = vector.broadcast %cst_16 : f32 to vector<2x128xf32>
    %59 = arith.select %57, %46, %58 : vector<2x128xi1>, vector<2x128xf32>
    %60 = arith.truncf %59 : vector<2x128xf32> to vector<2x128xbf16>
    %61 = arith.index_cast %14 : i32 to index
    %c0_17 = arith.constant 0 : index
    %c0_18 = arith.constant 0 : index
    %62 = vector.load %arg5[%61, %c0_17, %c0_18] : memref<8x2x128xbf16, #tpu.memory_space<vmem>>, vector<1x2x128xbf16>
    %63 = vector.shape_cast %62 : vector<1x2x128xbf16> to vector<2x128xbf16>
    %64 = vector.shape_cast %60 : vector<2x128xbf16> to vector<1x2x128xbf16>
    tpu.vector_store %arg5[%61, %c0_17, %c0_18], %64 {strides = array<i32>} : memref<8x2x128xbf16, #tpu.memory_space<vmem>>, vector<1x2x128xbf16>,
    %c5_i32 = arith.constant 5 : i32
    %65 = arith.muli %arg0, %c5_i32 : i32
    %c1_i32_19 = arith.constant 1 : i32
    %66 = arith.addi %c1_i32_19, %65 : i32
    %c0_20 = arith.constant 0 : index
    %67 = arith.index_cast %66 : i32 to index
    %c0_21 = arith.constant 0 : index
    %c0_22 = arith.constant 0 : index
    %68 = vector.load %arg2[%c0_20, %67, %c0_21, %c0_22] : memref<1x8x2x512xbf16, #tpu.memory_space<vmem>>, vector<1x1x2x512xbf16>
    %69 = vector.shape_cast %68 : vector<1x1x2x512xbf16> to vector<2x512xbf16>
    %70 = arith.extf %69 : vector<2x512xbf16> to vector<2x512xf32>
    %71 = arith.truncf %52 : vector<2x128xf32> to vector<2x128xbf16>
    %cst_23 = arith.constant dense<0.000000e+00> : vector<2x512xf32>
    %72 = tpu.matmul %71, %4, %cst_23 {dimension_numbers = #tpu.dot_dimension_numbers<[1], [0], [0], [1], [0, 0, 1, 1], [], []>} : vector<2x128xbf16>, vector<128x512xbf16>, vector<2x512xf32> -> vector<2x512xf32>
    %73 = arith.addf %70, %72 : vector<2x512xf32>
    %74 = vector.extract_strided_slice %73 {offsets = [0, 0], sizes = [2, 128], strides = [1, 1]} : vector<2x512xf32> to vector<2x128xf32>
    %75 = arith.negf %74 : vector<2x128xf32>
    %76 = math.exp %75 : vector<2x128xf32>
    %cst_24 = arith.constant 1.000000e+00 : f32
    %77 = vector.broadcast %cst_24 : f32 to vector<2x128xf32>
    %78 = arith.addf %77, %76 : vector<2x128xf32>
    %79 = arith.divf %77, %78 : vector<2x128xf32>
    %80 = vector.extract_strided_slice %73 {offsets = [0, 128], sizes = [2, 128], strides = [1, 1]} : vector<2x512xf32> to vector<2x128xf32>
    %81 = arith.negf %80 : vector<2x128xf32>
    %82 = math.exp %81 : vector<2x128xf32>
    %cst_25 = arith.constant 1.000000e+00 : f32
    %83 = vector.broadcast %cst_25 : f32 to vector<2x128xf32>
    %84 = arith.addf %83, %82 : vector<2x128xf32>
    %85 = arith.divf %83, %84 : vector<2x128xf32>
    %86 = vector.extract_strided_slice %73 {offsets = [0, 256], sizes = [2, 128], strides = [1, 1]} : vector<2x512xf32> to vector<2x128xf32>
    %87 = math.tanh %86 : vector<2x128xf32>
    %88 = vector.extract_strided_slice %73 {offsets = [0, 384], sizes = [2, 128], strides = [1, 1]} : vector<2x512xf32> to vector<2x128xf32>
    %89 = arith.negf %88 : vector<2x128xf32>
    %90 = math.exp %89 : vector<2x128xf32>
    %cst_26 = arith.constant 1.000000e+00 : f32
    %91 = vector.broadcast %cst_26 : f32 to vector<2x128xf32>
    %92 = arith.addf %91, %90 : vector<2x128xf32>
    %93 = arith.divf %91, %92 : vector<2x128xf32>
    %94 = arith.mulf %85, %55 : vector<2x128xf32>
    %95 = arith.mulf %79, %87 : vector<2x128xf32>
    %96 = arith.addf %94, %95 : vector<2x128xf32>
    %97 = math.tanh %96 : vector<2x128xf32>
    %98 = arith.mulf %93, %97 : vector<2x128xf32>
    %99 = arith.addi %10, %66 : i32
    %100 = vector.broadcast %99 : i32 to vector<2x1xi32>
    %101 = arith.cmpi slt, %100, %5 : vector<2x1xi32>
    %102 = vector.shape_cast %101 : vector<2x1xi1> to vector<2x1xi1>
    %103 = vector.broadcast %102 : vector<2x1xi1> to vector<2x128xi1>
    %104 = arith.select %103, %98, %52 : vector<2x128xi1>, vector<2x128xf32>
    %105 = vector.shape_cast %101 : vector<2x1xi1> to vector<2x1xi1>
    %106 = vector.broadcast %105 : vector<2x1xi1> to vector<2x128xi1>
    %107 = arith.select %106, %96, %55 : vector<2x128xi1>, vector<2x128xf32>
    %cst_27 = arith.constant 0.000000e+00 : f32
    %108 = vector.shape_cast %101 : vector<2x1xi1> to vector<2x1xi1>
    %109 = vector.broadcast %108 : vector<2x1xi1> to vector<2x128xi1>
    %110 = vector.broadcast %cst_27 : f32 to vector<2x128xf32>
    %111 = arith.select %109, %98, %110 : vector<2x128xi1>, vector<2x128xf32>
    %112 = arith.truncf %111 : vector<2x128xf32> to vector<2x128xbf16>
    %113 = arith.index_cast %66 : i32 to index
    %c0_28 = arith.constant 0 : index
    %c0_29 = arith.constant 0 : index
    %114 = vector.load %arg5[%113, %c0_28, %c0_29] : memref<8x2x128xbf16, #tpu.memory_space<vmem>>, vector<1x2x128xbf16>
    %115 = vector.shape_cast %114 : vector<1x2x128xbf16> to vector<2x128xbf16>
    %116 = vector.shape_cast %112 : vector<2x128xbf16> to vector<1x2x128xbf16>
    tpu.vector_store %arg5[%113, %c0_28, %c0_29], %116 {strides = array<i32>} : memref<8x2x128xbf16, #tpu.memory_space<vmem>>, vector<1x2x128xbf16>,
    %c3_i32 = arith.constant 3 : i32
    %117 = arith.muli %arg0, %c3_i32 : i32
    %c2_i32_30 = arith.constant 2 : i32
    %118 = arith.addi %c2_i32_30, %117 : i32
    %c0_31 = arith.constant 0 : index
    %119 = arith.index_cast %118 : i32 to index
    %c0_32 = arith.constant 0 : index
    %c0_33 = arith.constant 0 : index
    %120 = vector.load %arg2[%c0_31, %119, %c0_32, %c0_33] : memref<1x8x2x512xbf16, #tpu.memory_space<vmem>>, vector<1x1x2x512xbf16>
    %121 = vector.shape_cast %120 : vector<1x1x2x512xbf16> to vector<2x512xbf16>
    %122 = arith.extf %121 : vector<2x512xbf16> to vector<2x512xf32>
    %123 = arith.truncf %104 : vector<2x128xf32> to vector<2x128xbf16>
    %cst_34 = arith.constant dense<0.000000e+00> : vector<2x512xf32>
    %124 = tpu.matmul %123, %4, %cst_34 {dimension_numbers = #tpu.dot_dimension_numbers<[1], [0], [0], [1], [0, 0, 1, 1], [], []>} : vector<2x128xbf16>, vector<128x512xbf16>, vector<2x512xf32> -> vector<2x512xf32>
    %125 = arith.addf %122, %124 : vector<2x512xf32>
    %126 = vector.extract_strided_slice %125 {offsets = [0, 0], sizes = [2, 128], strides = [1, 1]} : vector<2x512xf32> to vector<2x128xf32>
    %127 = arith.negf %126 : vector<2x128xf32>
    %128 = math.exp %127 : vector<2x128xf32>
    %cst_35 = arith.constant 1.000000e+00 : f32
    %129 = vector.broadcast %cst_35 : f32 to vector<2x128xf32>
    %130 = arith.addf %129, %128 : vector<2x128xf32>
    %131 = arith.divf %129, %130 : vector<2x128xf32>
    %132 = vector.extract_strided_slice %125 {offsets = [0, 128], sizes = [2, 128], strides = [1, 1]} : vector<2x512xf32> to vector<2x128xf32>
    %133 = arith.negf %132 : vector<2x128xf32>
    %134 = math.exp %133 : vector<2x128xf32>
    %cst_36 = arith.constant 1.000000e+00 : f32
    %135 = vector.broadcast %cst_36 : f32 to vector<2x128xf32>
    %136 = arith.addf %135, %134 : vector<2x128xf32>
    %137 = arith.divf %135, %136 : vector<2x128xf32>
    %138 = vector.extract_strided_slice %125 {offsets = [0, 256], sizes = [2, 128], strides = [1, 1]} : vector<2x512xf32> to vector<2x128xf32>
    %139 = math.tanh %138 : vector<2x128xf32>
    %140 = vector.extract_strided_slice %125 {offsets = [0, 384], sizes = [2, 128], strides = [1, 1]} : vector<2x512xf32> to vector<2x128xf32>
    %141 = arith.negf %140 : vector<2x128xf32>
    %142 = math.exp %141 : vector<2x128xf32>
    %cst_37 = arith.constant 1.000000e+00 : f32
    %143 = vector.broadcast %cst_37 : f32 to vector<2x128xf32>
    %144 = arith.addf %143, %142 : vector<2x128xf32>
    %145 = arith.divf %143, %144 : vector<2x128xf32>
    %146 = arith.mulf %137, %107 : vector<2x128xf32>
    %147 = arith.mulf %131, %139 : vector<2x128xf32>
    %148 = arith.addf %146, %147 : vector<2x128xf32>
    %149 = math.tanh %148 : vector<2x128xf32>
    %150 = arith.mulf %145, %149 : vector<2x128xf32>
    %151 = arith.addi %10, %118 : i32
    %152 = vector.broadcast %151 : i32 to vector<2x1xi32>
    %153 = arith.cmpi slt, %152, %5 : vector<2x1xi32>
    %154 = vector.shape_cast %153 : vector<2x1xi1> to vector<2x1xi1>
    %155 = vector.broadcast %154 : vector<2x1xi1> to vector<2x128xi1>
    %156 = arith.select %155, %150, %104 : vector<2x128xi1>, vector<2x128xf32>
    %157 = vector.shape_cast %153 : vector<2x1xi1> to vector<2x1xi1>
    %158 = vector.broadcast %157 : vector<2x1xi1> to vector<2x128xi1>
    %159 = arith.select %158, %148, %107 : vector<2x128xi1>, vector<2x128xf32>
    %cst_38 = arith.constant 0.000000e+00 : f32
    %160 = vector.shape_cast %153 : vector<2x1xi1> to vector<2x1xi1>
    %161 = vector.broadcast %160 : vector<2x1xi1> to vector<2x128xi1>
    %162 = vector.broadcast %cst_38 : f32 to vector<2x128xf32>
    %163 = arith.select %161, %150, %162 : vector<2x128xi1>, vector<2x128xf32>
    %164 = arith.truncf %163 : vector<2x128xf32> to vector<2x128xbf16>
    %165 = arith.index_cast %118 : i32 to index
    %c0_39 = arith.constant 0 : index
    %c0_40 = arith.constant 0 : index
    %166 = vector.load %arg5[%165, %c0_39, %c0_40] : memref<8x2x128xbf16, #tpu.memory_space<vmem>>, vector<1x2x128xbf16>
    %167 = vector.shape_cast %166 : vector<1x2x128xbf16> to vector<2x128xbf16>
    %168 = vector.shape_cast %164 : vector<2x128xbf16> to vector<1x2x128xbf16>
    tpu.vector_store %arg5[%165, %c0_39, %c0_40], %168 {strides = array<i32>} : memref<8x2x128xbf16, #tpu.memory_space<vmem>>, vector<1x2x128xbf16>,
    %c1_i32_41 = arith.constant 1 : i32
    %169 = arith.muli %arg0, %c1_i32_41 : i32
    %c3_i32_42 = arith.constant 3 : i32
    %170 = arith.addi %c3_i32_42, %169 : i32
    %c0_43 = arith.constant 0 : index
    %171 = arith.index_cast %170 : i32 to index
    %c0_44 = arith.constant 0 : index
    %c0_45 = arith.constant 0 : index
    %172 = vector.load %arg2[%c0_43, %171, %c0_44, %c0_45] : memref<1x8x2x512xbf16, #tpu.memory_space<vmem>>, vector<1x1x2x512xbf16>
    %173 = vector.shape_cast %172 : vector<1x1x2x512xbf16> to vector<2x512xbf16>
    %174 = arith.extf %173 : vector<2x512xbf16> to vector<2x512xf32>
    %175 = arith.truncf %156 : vector<2x128xf32> to vector<2x128xbf16>
    %cst_46 = arith.constant dense<0.000000e+00> : vector<2x512xf32>
    %176 = tpu.matmul %175, %4, %cst_46 {dimension_numbers = #tpu.dot_dimension_numbers<[1], [0], [0], [1], [0, 0, 1, 1], [], []>} : vector<2x128xbf16>, vector<128x512xbf16>, vector<2x512xf32> -> vector<2x512xf32>
    %177 = arith.addf %174, %176 : vector<2x512xf32>
    %178 = vector.extract_strided_slice %177 {offsets = [0, 0], sizes = [2, 128], strides = [1, 1]} : vector<2x512xf32> to vector<2x128xf32>
    %179 = arith.negf %178 : vector<2x128xf32>
    %180 = math.exp %179 : vector<2x128xf32>
    %cst_47 = arith.constant 1.000000e+00 : f32
    %181 = vector.broadcast %cst_47 : f32 to vector<2x128xf32>
    %182 = arith.addf %181, %180 : vector<2x128xf32>
    %183 = arith.divf %181, %182 : vector<2x128xf32>
    %184 = vector.extract_strided_slice %177 {offsets = [0, 128], sizes = [2, 128], strides = [1, 1]} : vector<2x512xf32> to vector<2x128xf32>
    %185 = arith.negf %184 : vector<2x128xf32>
    %186 = math.exp %185 : vector<2x128xf32>
    %cst_48 = arith.constant 1.000000e+00 : f32
    %187 = vector.broadcast %cst_48 : f32 to vector<2x128xf32>
    %188 = arith.addf %187, %186 : vector<2x128xf32>
    %189 = arith.divf %187, %188 : vector<2x128xf32>
    %190 = vector.extract_strided_slice %177 {offsets = [0, 256], sizes = [2, 128], strides = [1, 1]} : vector<2x512xf32> to vector<2x128xf32>
    %191 = math.tanh %190 : vector<2x128xf32>
    %192 = vector.extract_strided_slice %177 {offsets = [0, 384], sizes = [2, 128], strides = [1, 1]} : vector<2x512xf32> to vector<2x128xf32>
    %193 = arith.negf %192 : vector<2x128xf32>
    %194 = math.exp %193 : vector<2x128xf32>
    %cst_49 = arith.constant 1.000000e+00 : f32
    %195 = vector.broadcast %cst_49 : f32 to vector<2x128xf32>
    %196 = arith.addf %195, %194 : vector<2x128xf32>
    %197 = arith.divf %195, %196 : vector<2x128xf32>
    %198 = arith.mulf %189, %159 : vector<2x128xf32>
    %199 = arith.mulf %183, %191 : vector<2x128xf32>
    %200 = arith.addf %198, %199 : vector<2x128xf32>
    %201 = math.tanh %200 : vector<2x128xf32>
    %202 = arith.mulf %197, %201 : vector<2x128xf32>
    %203 = arith.addi %10, %170 : i32
    %204 = vector.broadcast %203 : i32 to vector<2x1xi32>
    %205 = arith.cmpi slt, %204, %5 : vector<2x1xi32>
    %206 = vector.shape_cast %205 : vector<2x1xi1> to vector<2x1xi1>
    %207 = vector.broadcast %206 : vector<2x1xi1> to vector<2x128xi1>
    %208 = arith.select %207, %202, %156 : vector<2x128xi1>, vector<2x128xf32>
    %209 = vector.shape_cast %205 : vector<2x1xi1> to vector<2x1xi1>
    %210 = vector.broadcast %209 : vector<2x1xi1> to vector<2x128xi1>
    %211 = arith.select %210, %200, %159 : vector<2x128xi1>, vector<2x128xf32>
    %cst_50 = arith.constant 0.000000e+00 : f32
    %212 = vector.shape_cast %205 : vector<2x1xi1> to vector<2x1xi1>
    %213 = vector.broadcast %212 : vector<2x1xi1> to vector<2x128xi1>
    %214 = vector.broadcast %cst_50 : f32 to vector<2x128xf32>
    %215 = arith.select %213, %202, %214 : vector<2x128xi1>, vector<2x128xf32>
    %216 = arith.truncf %215 : vector<2x128xf32> to vector<2x128xbf16>
    %217 = arith.index_cast %170 : i32 to index
    %c0_51 = arith.constant 0 : index
    %c0_52 = arith.constant 0 : index
    %218 = vector.load %arg5[%217, %c0_51, %c0_52] : memref<8x2x128xbf16, #tpu.memory_space<vmem>>, vector<1x2x128xbf16>
    %219 = vector.shape_cast %218 : vector<1x2x128xbf16> to vector<2x128xbf16>
    %220 = vector.shape_cast %216 : vector<2x128xbf16> to vector<1x2x128xbf16>
    tpu.vector_store %arg5[%217, %c0_51, %c0_52], %220 {strides = array<i32>} : memref<8x2x128xbf16, #tpu.memory_space<vmem>>, vector<1x2x128xbf16>,
    %c-1_i32 = arith.constant -1 : i32
    %221 = arith.muli %arg0, %c-1_i32 : i32
    %c4_i32 = arith.constant 4 : i32
    %222 = arith.addi %c4_i32, %221 : i32
    %c0_53 = arith.constant 0 : index
    %223 = arith.index_cast %222 : i32 to index
    %c0_54 = arith.constant 0 : index
    %c0_55 = arith.constant 0 : index
    %224 = vector.load %arg2[%c0_53, %223, %c0_54, %c0_55] : memref<1x8x2x512xbf16, #tpu.memory_space<vmem>>, vector<1x1x2x512xbf16>
    %225 = vector.shape_cast %224 : vector<1x1x2x512xbf16> to vector<2x512xbf16>
    %226 = arith.extf %225 : vector<2x512xbf16> to vector<2x512xf32>
    %227 = arith.truncf %208 : vector<2x128xf32> to vector<2x128xbf16>
    %cst_56 = arith.constant dense<0.000000e+00> : vector<2x512xf32>
    %228 = tpu.matmul %227, %4, %cst_56 {dimension_numbers = #tpu.dot_dimension_numbers<[1], [0], [0], [1], [0, 0, 1, 1], [], []>} : vector<2x128xbf16>, vector<128x512xbf16>, vector<2x512xf32> -> vector<2x512xf32>
    %229 = arith.addf %226, %228 : vector<2x512xf32>
    %230 = vector.extract_strided_slice %229 {offsets = [0, 0], sizes = [2, 128], strides = [1, 1]} : vector<2x512xf32> to vector<2x128xf32>
    %231 = arith.negf %230 : vector<2x128xf32>
    %232 = math.exp %231 : vector<2x128xf32>
    %cst_57 = arith.constant 1.000000e+00 : f32
    %233 = vector.broadcast %cst_57 : f32 to vector<2x128xf32>
    %234 = arith.addf %233, %232 : vector<2x128xf32>
    %235 = arith.divf %233, %234 : vector<2x128xf32>
    %236 = vector.extract_strided_slice %229 {offsets = [0, 128], sizes = [2, 128], strides = [1, 1]} : vector<2x512xf32> to vector<2x128xf32>
    %237 = arith.negf %236 : vector<2x128xf32>
    %238 = math.exp %237 : vector<2x128xf32>
    %cst_58 = arith.constant 1.000000e+00 : f32
    %239 = vector.broadcast %cst_58 : f32 to vector<2x128xf32>
    %240 = arith.addf %239, %238 : vector<2x128xf32>
    %241 = arith.divf %239, %240 : vector<2x128xf32>
    %242 = vector.extract_strided_slice %229 {offsets = [0, 256], sizes = [2, 128], strides = [1, 1]} : vector<2x512xf32> to vector<2x128xf32>
    %243 = math.tanh %242 : vector<2x128xf32>
    %244 = vector.extract_strided_slice %229 {offsets = [0, 384], sizes = [2, 128], strides = [1, 1]} : vector<2x512xf32> to vector<2x128xf32>
    %245 = arith.negf %244 : vector<2x128xf32>
    %246 = math.exp %245 : vector<2x128xf32>
    %cst_59 = arith.constant 1.000000e+00 : f32
    %247 = vector.broadcast %cst_59 : f32 to vector<2x128xf32>
    %248 = arith.addf %247, %246 : vector<2x128xf32>
    %249 = arith.divf %247, %248 : vector<2x128xf32>
    %250 = arith.mulf %241, %211 : vector<2x128xf32>
    %251 = arith.mulf %235, %243 : vector<2x128xf32>
    %252 = arith.addf %250, %251 : vector<2x128xf32>
    %253 = math.tanh %252 : vector<2x128xf32>
    %254 = arith.mulf %249, %253 : vector<2x128xf32>
    %255 = arith.addi %10, %222 : i32
    %256 = vector.broadcast %255 : i32 to vector<2x1xi32>
    %257 = arith.cmpi slt, %256, %5 : vector<2x1xi32>
    %258 = vector.shape_cast %257 : vector<2x1xi1> to vector<2x1xi1>
    %259 = vector.broadcast %258 : vector<2x1xi1> to vector<2x128xi1>
    %260 = arith.select %259, %254, %208 : vector<2x128xi1>, vector<2x128xf32>
    %261 = vector.shape_cast %257 : vector<2x1xi1> to vector<2x1xi1>
    %262 = vector.broadcast %261 : vector<2x1xi1> to vector<2x128xi1>
    %263 = arith.select %262, %252, %211 : vector<2x128xi1>, vector<2x128xf32>
    %cst_60 = arith.constant 0.000000e+00 : f32
    %264 = vector.shape_cast %257 : vector<2x1xi1> to vector<2x1xi1>
    %265 = vector.broadcast %264 : vector<2x1xi1> to vector<2x128xi1>
    %266 = vector.broadcast %cst_60 : f32 to vector<2x128xf32>
    %267 = arith.select %265, %254, %266 : vector<2x128xi1>, vector<2x128xf32>
    %268 = arith.truncf %267 : vector<2x128xf32> to vector<2x128xbf16>
    %269 = arith.index_cast %222 : i32 to index
    %c0_61 = arith.constant 0 : index
    %c0_62 = arith.constant 0 : index
    %270 = vector.load %arg5[%269, %c0_61, %c0_62] : memref<8x2x128xbf16, #tpu.memory_space<vmem>>, vector<1x2x128xbf16>
    %271 = vector.shape_cast %270 : vector<1x2x128xbf16> to vector<2x128xbf16>
    %272 = vector.shape_cast %268 : vector<2x128xbf16> to vector<1x2x128xbf16>
    tpu.vector_store %arg5[%269, %c0_61, %c0_62], %272 {strides = array<i32>} : memref<8x2x128xbf16, #tpu.memory_space<vmem>>, vector<1x2x128xbf16>,
    %c-3_i32 = arith.constant -3 : i32
    %273 = arith.muli %arg0, %c-3_i32 : i32
    %c5_i32_63 = arith.constant 5 : i32
    %274 = arith.addi %c5_i32_63, %273 : i32
    %c0_64 = arith.constant 0 : index
    %275 = arith.index_cast %274 : i32 to index
    %c0_65 = arith.constant 0 : index
    %c0_66 = arith.constant 0 : index
    %276 = vector.load %arg2[%c0_64, %275, %c0_65, %c0_66] : memref<1x8x2x512xbf16, #tpu.memory_space<vmem>>, vector<1x1x2x512xbf16>
    %277 = vector.shape_cast %276 : vector<1x1x2x512xbf16> to vector<2x512xbf16>
    %278 = arith.extf %277 : vector<2x512xbf16> to vector<2x512xf32>
    %279 = arith.truncf %260 : vector<2x128xf32> to vector<2x128xbf16>
    %cst_67 = arith.constant dense<0.000000e+00> : vector<2x512xf32>
    %280 = tpu.matmul %279, %4, %cst_67 {dimension_numbers = #tpu.dot_dimension_numbers<[1], [0], [0], [1], [0, 0, 1, 1], [], []>} : vector<2x128xbf16>, vector<128x512xbf16>, vector<2x512xf32> -> vector<2x512xf32>
    %281 = arith.addf %278, %280 : vector<2x512xf32>
    %282 = vector.extract_strided_slice %281 {offsets = [0, 0], sizes = [2, 128], strides = [1, 1]} : vector<2x512xf32> to vector<2x128xf32>
    %283 = arith.negf %282 : vector<2x128xf32>
    %284 = math.exp %283 : vector<2x128xf32>
    %cst_68 = arith.constant 1.000000e+00 : f32
    %285 = vector.broadcast %cst_68 : f32 to vector<2x128xf32>
    %286 = arith.addf %285, %284 : vector<2x128xf32>
    %287 = arith.divf %285, %286 : vector<2x128xf32>
    %288 = vector.extract_strided_slice %281 {offsets = [0, 128], sizes = [2, 128], strides = [1, 1]} : vector<2x512xf32> to vector<2x128xf32>
    %289 = arith.negf %288 : vector<2x128xf32>
    %290 = math.exp %289 : vector<2x128xf32>
    %cst_69 = arith.constant 1.000000e+00 : f32
    %291 = vector.broadcast %cst_69 : f32 to vector<2x128xf32>
    %292 = arith.addf %291, %290 : vector<2x128xf32>
    %293 = arith.divf %291, %292 : vector<2x128xf32>
    %294 = vector.extract_strided_slice %281 {offsets = [0, 256], sizes = [2, 128], strides = [1, 1]} : vector<2x512xf32> to vector<2x128xf32>
    %295 = math.tanh %294 : vector<2x128xf32>
    %296 = vector.extract_strided_slice %281 {offsets = [0, 384], sizes = [2, 128], strides = [1, 1]} : vector<2x512xf32> to vector<2x128xf32>
    %297 = arith.negf %296 : vector<2x128xf32>
    %298 = math.exp %297 : vector<2x128xf32>
    %cst_70 = arith.constant 1.000000e+00 : f32
    %299 = vector.broadcast %cst_70 : f32 to vector<2x128xf32>
    %300 = arith.addf %299, %298 : vector<2x128xf32>
    %301 = arith.divf %299, %300 : vector<2x128xf32>
    %302 = arith.mulf %293, %263 : vector<2x128xf32>
    %303 = arith.mulf %287, %295 : vector<2x128xf32>
    %304 = arith.addf %302, %303 : vector<2x128xf32>
    %305 = math.tanh %304 : vector<2x128xf32>
    %306 = arith.mulf %301, %305 : vector<2x128xf32>
    %307 = arith.addi %10, %274 : i32
    %308 = vector.broadcast %307 : i32 to vector<2x1xi32>
    %309 = arith.cmpi slt, %308, %5 : vector<2x1xi32>
    %310 = vector.shape_cast %309 : vector<2x1xi1> to vector<2x1xi1>
    %311 = vector.broadcast %310 : vector<2x1xi1> to vector<2x128xi1>
    %312 = arith.select %311, %306, %260 : vector<2x128xi1>, vector<2x128xf32>
    %313 = vector.shape_cast %309 : vector<2x1xi1> to vector<2x1xi1>
    %314 = vector.broadcast %313 : vector<2x1xi1> to vector<2x128xi1>
    %315 = arith.select %314, %304, %263 : vector<2x128xi1>, vector<2x128xf32>
    %cst_71 = arith.constant 0.000000e+00 : f32
    %316 = vector.shape_cast %309 : vector<2x1xi1> to vector<2x1xi1>
    %317 = vector.broadcast %316 : vector<2x1xi1> to vector<2x128xi1>
    %318 = vector.broadcast %cst_71 : f32 to vector<2x128xf32>
    %319 = arith.select %317, %306, %318 : vector<2x128xi1>, vector<2x128xf32>
    %320 = arith.truncf %319 : vector<2x128xf32> to vector<2x128xbf16>
    %321 = arith.index_cast %274 : i32 to index
    %c0_72 = arith.constant 0 : index
    %c0_73 = arith.constant 0 : index
    %322 = vector.load %arg5[%321, %c0_72, %c0_73] : memref<8x2x128xbf16, #tpu.memory_space<vmem>>, vector<1x2x128xbf16>
    %323 = vector.shape_cast %322 : vector<1x2x128xbf16> to vector<2x128xbf16>
    %324 = vector.shape_cast %320 : vector<2x128xbf16> to vector<1x2x128xbf16>
    tpu.vector_store %arg5[%321, %c0_72, %c0_73], %324 {strides = array<i32>} : memref<8x2x128xbf16, #tpu.memory_space<vmem>>, vector<1x2x128xbf16>,
    %c-5_i32 = arith.constant -5 : i32
    %325 = arith.muli %arg0, %c-5_i32 : i32
    %c6_i32 = arith.constant 6 : i32
    %326 = arith.addi %c6_i32, %325 : i32
    %c0_74 = arith.constant 0 : index
    %327 = arith.index_cast %326 : i32 to index
    %c0_75 = arith.constant 0 : index
    %c0_76 = arith.constant 0 : index
    %328 = vector.load %arg2[%c0_74, %327, %c0_75, %c0_76] : memref<1x8x2x512xbf16, #tpu.memory_space<vmem>>, vector<1x1x2x512xbf16>
    %329 = vector.shape_cast %328 : vector<1x1x2x512xbf16> to vector<2x512xbf16>
    %330 = arith.extf %329 : vector<2x512xbf16> to vector<2x512xf32>
    %331 = arith.truncf %312 : vector<2x128xf32> to vector<2x128xbf16>
    %cst_77 = arith.constant dense<0.000000e+00> : vector<2x512xf32>
    %332 = tpu.matmul %331, %4, %cst_77 {dimension_numbers = #tpu.dot_dimension_numbers<[1], [0], [0], [1], [0, 0, 1, 1], [], []>} : vector<2x128xbf16>, vector<128x512xbf16>, vector<2x512xf32> -> vector<2x512xf32>
    %333 = arith.addf %330, %332 : vector<2x512xf32>
    %334 = vector.extract_strided_slice %333 {offsets = [0, 0], sizes = [2, 128], strides = [1, 1]} : vector<2x512xf32> to vector<2x128xf32>
    %335 = arith.negf %334 : vector<2x128xf32>
    %336 = math.exp %335 : vector<2x128xf32>
    %cst_78 = arith.constant 1.000000e+00 : f32
    %337 = vector.broadcast %cst_78 : f32 to vector<2x128xf32>
    %338 = arith.addf %337, %336 : vector<2x128xf32>
    %339 = arith.divf %337, %338 : vector<2x128xf32>
    %340 = vector.extract_strided_slice %333 {offsets = [0, 128], sizes = [2, 128], strides = [1, 1]} : vector<2x512xf32> to vector<2x128xf32>
    %341 = arith.negf %340 : vector<2x128xf32>
    %342 = math.exp %341 : vector<2x128xf32>
    %cst_79 = arith.constant 1.000000e+00 : f32
    %343 = vector.broadcast %cst_79 : f32 to vector<2x128xf32>
    %344 = arith.addf %343, %342 : vector<2x128xf32>
    %345 = arith.divf %343, %344 : vector<2x128xf32>
    %346 = vector.extract_strided_slice %333 {offsets = [0, 256], sizes = [2, 128], strides = [1, 1]} : vector<2x512xf32> to vector<2x128xf32>
    %347 = math.tanh %346 : vector<2x128xf32>
    %348 = vector.extract_strided_slice %333 {offsets = [0, 384], sizes = [2, 128], strides = [1, 1]} : vector<2x512xf32> to vector<2x128xf32>
    %349 = arith.negf %348 : vector<2x128xf32>
    %350 = math.exp %349 : vector<2x128xf32>
    %cst_80 = arith.constant 1.000000e+00 : f32
    %351 = vector.broadcast %cst_80 : f32 to vector<2x128xf32>
    %352 = arith.addf %351, %350 : vector<2x128xf32>
    %353 = arith.divf %351, %352 : vector<2x128xf32>
    %354 = arith.mulf %345, %315 : vector<2x128xf32>
    %355 = arith.mulf %339, %347 : vector<2x128xf32>
    %356 = arith.addf %354, %355 : vector<2x128xf32>
    %357 = math.tanh %356 : vector<2x128xf32>
    %358 = arith.mulf %353, %357 : vector<2x128xf32>
    %359 = arith.addi %10, %326 : i32
    %360 = vector.broadcast %359 : i32 to vector<2x1xi32>
    %361 = arith.cmpi slt, %360, %5 : vector<2x1xi32>
    %362 = vector.shape_cast %361 : vector<2x1xi1> to vector<2x1xi1>
    %363 = vector.broadcast %362 : vector<2x1xi1> to vector<2x128xi1>
    %364 = arith.select %363, %358, %312 : vector<2x128xi1>, vector<2x128xf32>
    %365 = vector.shape_cast %361 : vector<2x1xi1> to vector<2x1xi1>
    %366 = vector.broadcast %365 : vector<2x1xi1> to vector<2x128xi1>
    %367 = arith.select %366, %356, %315 : vector<2x128xi1>, vector<2x128xf32>
    %cst_81 = arith.constant 0.000000e+00 : f32
    %368 = vector.shape_cast %361 : vector<2x1xi1> to vector<2x1xi1>
    %369 = vector.broadcast %368 : vector<2x1xi1> to vector<2x128xi1>
    %370 = vector.broadcast %cst_81 : f32 to vector<2x128xf32>
    %371 = arith.select %369, %358, %370 : vector<2x128xi1>, vector<2x128xf32>
    %372 = arith.truncf %371 : vector<2x128xf32> to vector<2x128xbf16>
    %373 = arith.index_cast %326 : i32 to index
    %c0_82 = arith.constant 0 : index
    %c0_83 = arith.constant 0 : index
    %374 = vector.load %arg5[%373, %c0_82, %c0_83] : memref<8x2x128xbf16, #tpu.memory_space<vmem>>, vector<1x2x128xbf16>
    %375 = vector.shape_cast %374 : vector<1x2x128xbf16> to vector<2x128xbf16>
    %376 = vector.shape_cast %372 : vector<2x128xbf16> to vector<1x2x128xbf16>
    tpu.vector_store %arg5[%373, %c0_82, %c0_83], %376 {strides = array<i32>} : memref<8x2x128xbf16, #tpu.memory_space<vmem>>, vector<1x2x128xbf16>,
    %c-7_i32 = arith.constant -7 : i32
    %377 = arith.muli %arg0, %c-7_i32 : i32
    %c7_i32_84 = arith.constant 7 : i32
    %378 = arith.addi %c7_i32_84, %377 : i32
    %c0_85 = arith.constant 0 : index
    %379 = arith.index_cast %378 : i32 to index
    %c0_86 = arith.constant 0 : index
    %c0_87 = arith.constant 0 : index
    %380 = vector.load %arg2[%c0_85, %379, %c0_86, %c0_87] : memref<1x8x2x512xbf16, #tpu.memory_space<vmem>>, vector<1x1x2x512xbf16>
    %381 = vector.shape_cast %380 : vector<1x1x2x512xbf16> to vector<2x512xbf16>
    %382 = arith.extf %381 : vector<2x512xbf16> to vector<2x512xf32>
    %383 = arith.truncf %364 : vector<2x128xf32> to vector<2x128xbf16>
    %cst_88 = arith.constant dense<0.000000e+00> : vector<2x512xf32>
    %384 = tpu.matmul %383, %4, %cst_88 {dimension_numbers = #tpu.dot_dimension_numbers<[1], [0], [0], [1], [0, 0, 1, 1], [], []>} : vector<2x128xbf16>, vector<128x512xbf16>, vector<2x512xf32> -> vector<2x512xf32>
    %385 = arith.addf %382, %384 : vector<2x512xf32>
    %386 = vector.extract_strided_slice %385 {offsets = [0, 0], sizes = [2, 128], strides = [1, 1]} : vector<2x512xf32> to vector<2x128xf32>
    %387 = arith.negf %386 : vector<2x128xf32>
    %388 = math.exp %387 : vector<2x128xf32>
    %cst_89 = arith.constant 1.000000e+00 : f32
    %389 = vector.broadcast %cst_89 : f32 to vector<2x128xf32>
    %390 = arith.addf %389, %388 : vector<2x128xf32>
    %391 = arith.divf %389, %390 : vector<2x128xf32>
    %392 = vector.extract_strided_slice %385 {offsets = [0, 128], sizes = [2, 128], strides = [1, 1]} : vector<2x512xf32> to vector<2x128xf32>
    %393 = arith.negf %392 : vector<2x128xf32>
    %394 = math.exp %393 : vector<2x128xf32>
    %cst_90 = arith.constant 1.000000e+00 : f32
    %395 = vector.broadcast %cst_90 : f32 to vector<2x128xf32>
    %396 = arith.addf %395, %394 : vector<2x128xf32>
    %397 = arith.divf %395, %396 : vector<2x128xf32>
    %398 = vector.extract_strided_slice %385 {offsets = [0, 256], sizes = [2, 128], strides = [1, 1]} : vector<2x512xf32> to vector<2x128xf32>
    %399 = math.tanh %398 : vector<2x128xf32>
    %400 = vector.extract_strided_slice %385 {offsets = [0, 384], sizes = [2, 128], strides = [1, 1]} : vector<2x512xf32> to vector<2x128xf32>
    %401 = arith.negf %400 : vector<2x128xf32>
    %402 = math.exp %401 : vector<2x128xf32>
    %cst_91 = arith.constant 1.000000e+00 : f32
    %403 = vector.broadcast %cst_91 : f32 to vector<2x128xf32>
    %404 = arith.addf %403, %402 : vector<2x128xf32>
    %405 = arith.divf %403, %404 : vector<2x128xf32>
    %406 = arith.mulf %397, %367 : vector<2x128xf32>
    %407 = arith.mulf %391, %399 : vector<2x128xf32>
    %408 = arith.addf %406, %407 : vector<2x128xf32>
    %409 = math.tanh %408 : vector<2x128xf32>
    %410 = arith.mulf %405, %409 : vector<2x128xf32>
    %411 = arith.addi %10, %378 : i32
    %412 = vector.broadcast %411 : i32 to vector<2x1xi32>
    %413 = arith.cmpi slt, %412, %5 : vector<2x1xi32>
    %414 = vector.shape_cast %413 : vector<2x1xi1> to vector<2x1xi1>
    %415 = vector.broadcast %414 : vector<2x1xi1> to vector<2x128xi1>
    %416 = arith.select %415, %410, %364 : vector<2x128xi1>, vector<2x128xf32>
    %417 = vector.shape_cast %413 : vector<2x1xi1> to vector<2x1xi1>
    %418 = vector.broadcast %417 : vector<2x1xi1> to vector<2x128xi1>
    %419 = arith.select %418, %408, %367 : vector<2x128xi1>, vector<2x128xf32>
    %cst_92 = arith.constant 0.000000e+00 : f32
    %420 = vector.shape_cast %413 : vector<2x1xi1> to vector<2x1xi1>
    %421 = vector.broadcast %420 : vector<2x1xi1> to vector<2x128xi1>
    %422 = vector.broadcast %cst_92 : f32 to vector<2x128xf32>
    %423 = arith.select %421, %410, %422 : vector<2x128xi1>, vector<2x128xf32>
    %424 = arith.truncf %423 : vector<2x128xf32> to vector<2x128xbf16>
    %425 = arith.index_cast %378 : i32 to index
    %c0_93 = arith.constant 0 : index
    %c0_94 = arith.constant 0 : index
    %426 = vector.load %arg5[%425, %c0_93, %c0_94] : memref<8x2x128xbf16, #tpu.memory_space<vmem>>, vector<1x2x128xbf16>
    %427 = vector.shape_cast %426 : vector<1x2x128xbf16> to vector<2x128xbf16>
    %428 = vector.shape_cast %424 : vector<2x128xbf16> to vector<1x2x128xbf16>
    tpu.vector_store %arg5[%425, %c0_93, %c0_94], %428 {strides = array<i32>} : memref<8x2x128xbf16, #tpu.memory_space<vmem>>, vector<1x2x128xbf16>,
    %c0_95 = arith.constant 0 : index
    %c0_96 = arith.constant 0 : index
    %429 = vector.load %arg6[%c0_95, %c0_96] : memref<2x128xf32, #tpu.memory_space<vmem>>, vector<2x128xf32>
    tpu.vector_store %arg6[%c0_95, %c0_96], %416 {strides = array<i32>} : memref<2x128xf32, #tpu.memory_space<vmem>>, vector<2x128xf32>,
    %c0_97 = arith.constant 0 : index
    %c0_98 = arith.constant 0 : index
    %430 = vector.load %arg7[%c0_97, %c0_98] : memref<2x128xf32, #tpu.memory_space<vmem>>, vector<2x128xf32>
    tpu.vector_store %arg7[%c0_97, %c0_98], %419 {strides = array<i32>} : memref<2x128xf32, #tpu.memory_space<vmem>>, vector<2x128xf32>,
    return
  }
  func.func @transform_0(%arg0: i32, %arg1: i32) -> (i32, i32, i32, i32) {
    %c2_i32 = arith.constant 2 : i32
    %0 = arith.muli %c2_i32, %arg1 : i32
    %c1_i32 = arith.constant 1 : i32
    %1 = arith.subi %c1_i32, %0 : i32
    %2 = arith.muli %arg0, %1 : i32
    %3 = arith.addi %arg1, %2 : i32
    %c0_i32 = arith.constant 0 : i32
    %c0_i32_0 = arith.constant 0 : i32
    %c0_i32_1 = arith.constant 0 : i32
    return %arg0, %3, %c0_i32, %c0_i32_0 : i32, i32, i32, i32
  }
  func.func @transform_1(%arg0: i32, %arg1: i32) -> (i32, i32) {
    %c0_i32 = arith.constant 0 : i32
    %c0_i32_0 = arith.constant 0 : i32
    %c0_i32_1 = arith.constant 0 : i32
    return %c0_i32, %c0_i32_0 : i32, i32
  }
  func.func @transform_2(%arg0: i32, %arg1: i32) -> (i32, i32, i32) {
    %c0_i32 = arith.constant 0 : i32
    %c0_i32_0 = arith.constant 0 : i32
    %c0_i32_1 = arith.constant 0 : i32
    return %arg0, %c0_i32, %c0_i32_0 : i32, i32, i32
  }
  func.func @transform_3(%arg0: i32, %arg1: i32) -> (i32, i32, i32) {
    %c2_i32 = arith.constant 2 : i32
    %0 = arith.muli %c2_i32, %arg1 : i32
    %c1_i32 = arith.constant 1 : i32
    %1 = arith.subi %c1_i32, %0 : i32
    %2 = arith.muli %arg0, %1 : i32
    %3 = arith.addi %arg1, %2 : i32
    %c0_i32 = arith.constant 0 : i32
    %c0_i32_0 = arith.constant 0 : i32
    return %3, %c0_i32, %arg0 : i32, i32, i32
  }
}

module attributes {stable_mosaic.version = 11 : i64} {
  func.func @_gate_proj_kernel(%arg0: i32, %arg1: i32, %arg2: memref<16x512xbf16, #tpu.memory_space<vmem>>, %arg3: memref<2x512x512xbf16, #tpu.memory_space<vmem>>, %arg4: memref<2x1x512xf32, #tpu.memory_space<vmem>>, %arg5: memref<2x16x512xbf16, #tpu.memory_space<vmem>>) attributes {dimension_semantics = [#tpu.dimension_semantics<parallel>, #tpu.dimension_semantics<parallel>], iteration_bounds = array<i64: 1, 1>, scalar_prefetch = 0 : i64, scratch_operands = 0 : i64, tpu.core_type = #tpu.core_type<tc>, window_params = [{transform_indices = @transform_0, window_bounds = array<i64: 16, 512>}, {transform_indices = @transform_1, window_bounds = array<i64: 2, 512, 512>}, {transform_indices = @transform_2, window_bounds = array<i64: 2, 1, 512>}, {transform_indices = @transform_3, window_bounds = array<i64: 2, 16, 512>}]} {
    %c0 = arith.constant 0 : index
    %c0_0 = arith.constant 0 : index
    %0 = vector.load %arg2[%c0, %c0_0] : memref<16x512xbf16, #tpu.memory_space<vmem>>, vector<16x512xbf16>
    %c0_1 = arith.constant 0 : index
    %c0_2 = arith.constant 0 : index
    %c0_3 = arith.constant 0 : index
    %1 = vector.load %arg3[%c0_1, %c0_2, %c0_3] : memref<2x512x512xbf16, #tpu.memory_space<vmem>>, vector<1x512x512xbf16>
    %2 = vector.shape_cast %1 : vector<1x512x512xbf16> to vector<512x512xbf16>
    %cst = arith.constant dense<0.000000e+00> : vector<16x512xf32>
    %3 = tpu.matmul %0, %2, %cst {dimension_numbers = #tpu.dot_dimension_numbers<[1], [0], [0], [1], [0, 0, 1, 1], [], []>} : vector<16x512xbf16>, vector<512x512xbf16>, vector<16x512xf32> -> vector<16x512xf32>
    %c0_4 = arith.constant 0 : index
    %c0_5 = arith.constant 0 : index
    %c0_6 = arith.constant 0 : index
    %4 = vector.load %arg4[%c0_4, %c0_5, %c0_6] : memref<2x1x512xf32, #tpu.memory_space<vmem>>, vector<1x1x512xf32>
    %5 = vector.shape_cast %4 : vector<1x1x512xf32> to vector<1x512xf32>
    %6 = vector.broadcast %5 : vector<1x512xf32> to vector<16x512xf32>
    %7 = arith.addf %3, %6 : vector<16x512xf32>
    %8 = arith.truncf %7 : vector<16x512xf32> to vector<16x512xbf16>
    %c0_7 = arith.constant 0 : index
    %c0_8 = arith.constant 0 : index
    %c0_9 = arith.constant 0 : index
    %9 = vector.load %arg5[%c0_7, %c0_8, %c0_9] : memref<2x16x512xbf16, #tpu.memory_space<vmem>>, vector<1x16x512xbf16>
    %10 = vector.shape_cast %9 : vector<1x16x512xbf16> to vector<16x512xbf16>
    %11 = vector.shape_cast %8 : vector<16x512xbf16> to vector<1x16x512xbf16>
    tpu.vector_store %arg5[%c0_7, %c0_8, %c0_9], %11 {strides = array<i32>} : memref<2x16x512xbf16, #tpu.memory_space<vmem>>, vector<1x16x512xbf16>,
    %c1 = arith.constant 1 : index
    %c0_10 = arith.constant 0 : index
    %c0_11 = arith.constant 0 : index
    %12 = vector.load %arg3[%c1, %c0_10, %c0_11] : memref<2x512x512xbf16, #tpu.memory_space<vmem>>, vector<1x512x512xbf16>
    %13 = vector.shape_cast %12 : vector<1x512x512xbf16> to vector<512x512xbf16>
    %cst_12 = arith.constant dense<0.000000e+00> : vector<16x512xf32>
    %14 = tpu.matmul %0, %13, %cst_12 {dimension_numbers = #tpu.dot_dimension_numbers<[1], [0], [0], [1], [0, 0, 1, 1], [], []>} : vector<16x512xbf16>, vector<512x512xbf16>, vector<16x512xf32> -> vector<16x512xf32>
    %c1_13 = arith.constant 1 : index
    %c0_14 = arith.constant 0 : index
    %c0_15 = arith.constant 0 : index
    %15 = vector.load %arg4[%c1_13, %c0_14, %c0_15] : memref<2x1x512xf32, #tpu.memory_space<vmem>>, vector<1x1x512xf32>
    %16 = vector.shape_cast %15 : vector<1x1x512xf32> to vector<1x512xf32>
    %17 = vector.broadcast %16 : vector<1x512xf32> to vector<16x512xf32>
    %18 = arith.addf %14, %17 : vector<16x512xf32>
    %19 = arith.truncf %18 : vector<16x512xf32> to vector<16x512xbf16>
    %c1_16 = arith.constant 1 : index
    %c0_17 = arith.constant 0 : index
    %c0_18 = arith.constant 0 : index
    %20 = vector.load %arg5[%c1_16, %c0_17, %c0_18] : memref<2x16x512xbf16, #tpu.memory_space<vmem>>, vector<1x16x512xbf16>
    %21 = vector.shape_cast %20 : vector<1x16x512xbf16> to vector<16x512xbf16>
    %22 = vector.shape_cast %19 : vector<16x512xbf16> to vector<1x16x512xbf16>
    tpu.vector_store %arg5[%c1_16, %c0_17, %c0_18], %22 {strides = array<i32>} : memref<2x16x512xbf16, #tpu.memory_space<vmem>>, vector<1x16x512xbf16>,
    return
  }
  func.func @transform_0(%arg0: i32, %arg1: i32) -> (i32, i32) {
    %c0_i32 = arith.constant 0 : i32
    %c0_i32_0 = arith.constant 0 : i32
    return %arg1, %c0_i32 : i32, i32
  }
  func.func @transform_1(%arg0: i32, %arg1: i32) -> (i32, i32, i32) {
    %c0_i32 = arith.constant 0 : i32
    %c0_i32_0 = arith.constant 0 : i32
    %c0_i32_1 = arith.constant 0 : i32
    return %c0_i32, %c0_i32_0, %arg0 : i32, i32, i32
  }
  func.func @transform_2(%arg0: i32, %arg1: i32) -> (i32, i32, i32) {
    %c0_i32 = arith.constant 0 : i32
    %c0_i32_0 = arith.constant 0 : i32
    %c0_i32_1 = arith.constant 0 : i32
    return %c0_i32, %c0_i32_0, %arg0 : i32, i32, i32
  }
  func.func @transform_3(%arg0: i32, %arg1: i32) -> (i32, i32, i32) {
    %c0_i32 = arith.constant 0 : i32
    %c0_i32_0 = arith.constant 0 : i32
    return %c0_i32, %arg1, %arg0 : i32, i32, i32
  }
}

module attributes {stable_mosaic.version = 11 : i64} {
  func.func @_bilstm_dir_kernel(%arg0: i32, %arg1: i32, %arg2: memref<1x8x2x512xbf16, #tpu.memory_space<vmem>>, %arg3: memref<2x1xi32, #tpu.memory_space<vmem>>, %arg4: memref<1x128x512xbf16, #tpu.memory_space<vmem>>, %arg5: memref<8x2x128xbf16, #tpu.memory_space<vmem>>, %arg6: memref<2x128xf32, #tpu.memory_space<vmem>>, %arg7: memref<2x128xf32, #tpu.memory_space<vmem>>) attributes {dimension_semantics = [#tpu.dimension_semantics<parallel>, #tpu.dimension_semantics<arbitrary>], iteration_bounds = array<i64: 2, 1>, scalar_prefetch = 0 : i64, scratch_operands = 2 : i64, tpu.core_type = #tpu.core_type<tc>, window_params = [{transform_indices = @transform_0, window_bounds = array<i64: 1, 8, 2, 512>}, {pipeline_mode = #tpu.pipeline_mode<synchronous>, transform_indices = @transform_1, window_bounds = array<i64: 2, 1>}, {transform_indices = @transform_2, window_bounds = array<i64: 1, 128, 512>}, {transform_indices = @transform_3, window_bounds = array<i64: 8, 2, 128>}]} {
    %c0_i32 = arith.constant 0 : i32
    %0 = arith.cmpi eq, %arg1, %c0_i32 : i32
    %1 = arith.extui %0 : i1 to i32
    %c0_i32_0 = arith.constant 0 : i32
    %2 = arith.cmpi ne, %1, %c0_i32_0 : i32
    scf.if %2 {
      %cst_99 = arith.constant 0.000000e+00 : f32
      %431 = vector.broadcast %cst_99 : f32 to vector<2x128xf32>
      %c0_100 = arith.constant 0 : index
      %c0_101 = arith.constant 0 : index
      %432 = vector.load %arg6[%c0_100, %c0_101] : memref<2x128xf32, #tpu.memory_space<vmem>>, vector<2x128xf32>
      tpu.vector_store %arg6[%c0_100, %c0_101], %431 {strides = array<i32>} : memref<2x128xf32, #tpu.memory_space<vmem>>, vector<2x128xf32>,
      %cst_102 = arith.constant 0.000000e+00 : f32
      %433 = vector.broadcast %cst_102 : f32 to vector<2x128xf32>
      %c0_103 = arith.constant 0 : index
      %c0_104 = arith.constant 0 : index
      %434 = vector.load %arg7[%c0_103, %c0_104] : memref<2x128xf32, #tpu.memory_space<vmem>>, vector<2x128xf32>
      tpu.vector_store %arg7[%c0_103, %c0_104], %433 {strides = array<i32>} : memref<2x128xf32, #tpu.memory_space<vmem>>, vector<2x128xf32>,
    } else {
    }
    %c0 = arith.constant 0 : index
    %c0_1 = arith.constant 0 : index
    %c0_2 = arith.constant 0 : index
    %3 = vector.load %arg4[%c0, %c0_1, %c0_2] : memref<1x128x512xbf16, #tpu.memory_space<vmem>>, vector<1x128x512xbf16>
    %4 = vector.shape_cast %3 : vector<1x128x512xbf16> to vector<128x512xbf16>
    %c0_3 = arith.constant 0 : index
    %c0_4 = arith.constant 0 : index
    %5 = vector.load %arg3[%c0_3, %c0_4] : memref<2x1xi32, #tpu.memory_space<vmem>>, vector<2x1xi32>
    %c2_i32 = arith.constant 2 : i32
    %6 = arith.muli %c2_i32, %arg1 : i32
    %c0_i32_5 = arith.constant 0 : i32
    %7 = arith.subi %c0_i32_5, %6 : i32
    %8 = arith.muli %arg0, %7 : i32
    %9 = arith.addi %arg1, %8 : i32
    %c8_i32 = arith.constant 8 : i32
    %10 = arith.muli %9, %c8_i32 : i32
    %c0_6 = arith.constant 0 : index
    %c0_7 = arith.constant 0 : index
    %11 = vector.load %arg6[%c0_6, %c0_7] : memref<2x128xf32, #tpu.memory_space<vmem>>, vector<2x128xf32>
    %c0_8 = arith.constant 0 : index
    %c0_9 = arith.constant 0 : index
    %12 = vector.load %arg7[%c0_8, %c0_9] : memref<2x128xf32, #tpu.memory_space<vmem>>, vector<2x128xf32>
    %c7_i32 = arith.constant 7 : i32
    %13 = arith.muli %arg0, %c7_i32 : i32
    %c0_i32_10 = arith.constant 0 : i32
    %14 = arith.addi %c0_i32_10, %13 : i32
    %c0_11 = arith.constant 0 : index
    %15 = arith.index_cast %14 : i32 to index
    %c0_12 = arith.constant 0 : index
    %c0_13 = arith.constant 0 : index
    %16 = vector.load %arg2[%c0_11, %15, %c0_12, %c0_13] : memref<1x8x2x512xbf16, #tpu.memory_space<vmem>>, vector<1x1x2x512xbf16>
    %17 = vector.shape_cast %16 : vector<1x1x2x512xbf16> to vector<2x512xbf16>
    %18 = arith.extf %17 : vector<2x512xbf16> to vector<2x512xf32>
    %19 = arith.truncf %11 : vector<2x128xf32> to vector<2x128xbf16>
    %cst = arith.constant dense<0.000000e+00> : vector<2x512xf32>
    %20 = tpu.matmul %19, %4, %cst {dimension_numbers = #tpu.dot_dimension_numbers<[1], [0], [0], [1], [0, 0, 1, 1], [], []>} : vector<2x128xbf16>, vector<128x512xbf16>, vector<2x512xf32> -> vector<2x512xf32>
    %21 = arith.addf %18, %20 : vector<2x512xf32>
    %22 = vector.extract_strided_slice %21 {offsets = [0, 0], sizes = [2, 128], strides = [1, 1]} : vector<2x512xf32> to vector<2x128xf32>
    %23 = arith.negf %22 : vector<2x128xf32>
    %24 = math.exp %23 : vector<2x128xf32>
    %cst_14 = arith.constant 1.000000e+00 : f32
    %25 = vector.broadcast %cst_14 : f32 to vector<2x128xf32>
    %26 = arith.addf %25, %24 : vector<2x128xf32>
    %27 = arith.divf %25, %26 : vector<2x128xf32>
    %28 = vector.extract_strided_slice %21 {offsets = [0, 128], sizes = [2, 128], strides = [1, 1]} : vector<2x512xf32> to vector<2x128xf32>
    %29 = arith.negf %28 : vector<2x128xf32>
    %30 = math.exp %29 : vector<2x128xf32>
    %cst_15 = arith.constant 1.000000e+00 : f32
    %31 = vector.broadcast %cst_15 : f32 to vector<2x128xf32>
    %32 = arith.addf %31, %30 : vector<2x128xf32>
    %33 = arith.divf %31, %32 : vector<2x128xf32>
    %34 = vector.extract_strided_slice %21 {offsets = [0, 256], sizes = [2, 128], strides = [1, 1]} : vector<2x512xf32> to vector<2x128xf32>
    %35 = math.tanh %34 : vector<2x128xf32>
    %36 = vector.extract_strided_slice %21 {offsets = [0, 384], sizes = [2, 128], strides = [1, 1]} : vector<2x512xf32> to vector<2x128xf32>
    %37 = arith.negf %36 : vector<2x128xf32>
    %38 = math.exp %37 : vector<2x128xf32>
    %cst_16 = arith.constant 1.000000e+00 : f32
    %39 = vector.broadcast %cst_16 : f32 to vector<2x128xf32>
    %40 = arith.addf %39, %38 : vector<2x128xf32>
    %41 = arith.divf %39, %40 : vector<2x128xf32>
    %42 = arith.mulf %33, %12 : vector<2x128xf32>
    %43 = arith.mulf %27, %35 : vector<2x128xf32>
    %44 = arith.addf %42, %43 : vector<2x128xf32>
    %45 = math.tanh %44 : vector<2x128xf32>
    %46 = arith.mulf %41, %45 : vector<2x128xf32>
    %47 = arith.addi %10, %14 : i32
    %48 = vector.broadcast %47 : i32 to vector<2x1xi32>
    %49 = arith.cmpi slt, %48, %5 : vector<2x1xi32>
    %50 = vector.shape_cast %49 : vector<2x1xi1> to vector<2x1xi1>
    %51 = vector.broadcast %50 : vector<2x1xi1> to vector<2x128xi1>
    %52 = arith.select %51, %46, %11 : vector<2x128xi1>, vector<2x128xf32>
    %53 = vector.shape_cast %49 : vector<2x1xi1> to vector<2x1xi1>
    %54 = vector.broadcast %53 : vector<2x1xi1> to vector<2x128xi1>
    %55 = arith.select %54, %44, %12 : vector<2x128xi1>, vector<2x128xf32>
    %cst_17 = arith.constant 0.000000e+00 : f32
    %56 = vector.shape_cast %49 : vector<2x1xi1> to vector<2x1xi1>
    %57 = vector.broadcast %56 : vector<2x1xi1> to vector<2x128xi1>
    %58 = vector.broadcast %cst_17 : f32 to vector<2x128xf32>
    %59 = arith.select %57, %46, %58 : vector<2x128xi1>, vector<2x128xf32>
    %60 = arith.truncf %59 : vector<2x128xf32> to vector<2x128xbf16>
    %61 = arith.index_cast %14 : i32 to index
    %c0_18 = arith.constant 0 : index
    %c0_19 = arith.constant 0 : index
    %62 = vector.load %arg5[%61, %c0_18, %c0_19] : memref<8x2x128xbf16, #tpu.memory_space<vmem>>, vector<1x2x128xbf16>
    %63 = vector.shape_cast %62 : vector<1x2x128xbf16> to vector<2x128xbf16>
    %64 = vector.shape_cast %60 : vector<2x128xbf16> to vector<1x2x128xbf16>
    tpu.vector_store %arg5[%61, %c0_18, %c0_19], %64 {strides = array<i32>} : memref<8x2x128xbf16, #tpu.memory_space<vmem>>, vector<1x2x128xbf16>,
    %c5_i32 = arith.constant 5 : i32
    %65 = arith.muli %arg0, %c5_i32 : i32
    %c1_i32 = arith.constant 1 : i32
    %66 = arith.addi %c1_i32, %65 : i32
    %c0_20 = arith.constant 0 : index
    %67 = arith.index_cast %66 : i32 to index
    %c0_21 = arith.constant 0 : index
    %c0_22 = arith.constant 0 : index
    %68 = vector.load %arg2[%c0_20, %67, %c0_21, %c0_22] : memref<1x8x2x512xbf16, #tpu.memory_space<vmem>>, vector<1x1x2x512xbf16>
    %69 = vector.shape_cast %68 : vector<1x1x2x512xbf16> to vector<2x512xbf16>
    %70 = arith.extf %69 : vector<2x512xbf16> to vector<2x512xf32>
    %71 = arith.truncf %52 : vector<2x128xf32> to vector<2x128xbf16>
    %cst_23 = arith.constant dense<0.000000e+00> : vector<2x512xf32>
    %72 = tpu.matmul %71, %4, %cst_23 {dimension_numbers = #tpu.dot_dimension_numbers<[1], [0], [0], [1], [0, 0, 1, 1], [], []>} : vector<2x128xbf16>, vector<128x512xbf16>, vector<2x512xf32> -> vector<2x512xf32>
    %73 = arith.addf %70, %72 : vector<2x512xf32>
    %74 = vector.extract_strided_slice %73 {offsets = [0, 0], sizes = [2, 128], strides = [1, 1]} : vector<2x512xf32> to vector<2x128xf32>
    %75 = arith.negf %74 : vector<2x128xf32>
    %76 = math.exp %75 : vector<2x128xf32>
    %cst_24 = arith.constant 1.000000e+00 : f32
    %77 = vector.broadcast %cst_24 : f32 to vector<2x128xf32>
    %78 = arith.addf %77, %76 : vector<2x128xf32>
    %79 = arith.divf %77, %78 : vector<2x128xf32>
    %80 = vector.extract_strided_slice %73 {offsets = [0, 128], sizes = [2, 128], strides = [1, 1]} : vector<2x512xf32> to vector<2x128xf32>
    %81 = arith.negf %80 : vector<2x128xf32>
    %82 = math.exp %81 : vector<2x128xf32>
    %cst_25 = arith.constant 1.000000e+00 : f32
    %83 = vector.broadcast %cst_25 : f32 to vector<2x128xf32>
    %84 = arith.addf %83, %82 : vector<2x128xf32>
    %85 = arith.divf %83, %84 : vector<2x128xf32>
    %86 = vector.extract_strided_slice %73 {offsets = [0, 256], sizes = [2, 128], strides = [1, 1]} : vector<2x512xf32> to vector<2x128xf32>
    %87 = math.tanh %86 : vector<2x128xf32>
    %88 = vector.extract_strided_slice %73 {offsets = [0, 384], sizes = [2, 128], strides = [1, 1]} : vector<2x512xf32> to vector<2x128xf32>
    %89 = arith.negf %88 : vector<2x128xf32>
    %90 = math.exp %89 : vector<2x128xf32>
    %cst_26 = arith.constant 1.000000e+00 : f32
    %91 = vector.broadcast %cst_26 : f32 to vector<2x128xf32>
    %92 = arith.addf %91, %90 : vector<2x128xf32>
    %93 = arith.divf %91, %92 : vector<2x128xf32>
    %94 = arith.mulf %85, %55 : vector<2x128xf32>
    %95 = arith.mulf %79, %87 : vector<2x128xf32>
    %96 = arith.addf %94, %95 : vector<2x128xf32>
    %97 = math.tanh %96 : vector<2x128xf32>
    %98 = arith.mulf %93, %97 : vector<2x128xf32>
    %99 = arith.addi %10, %66 : i32
    %100 = vector.broadcast %99 : i32 to vector<2x1xi32>
    %101 = arith.cmpi slt, %100, %5 : vector<2x1xi32>
    %102 = vector.shape_cast %101 : vector<2x1xi1> to vector<2x1xi1>
    %103 = vector.broadcast %102 : vector<2x1xi1> to vector<2x128xi1>
    %104 = arith.select %103, %98, %52 : vector<2x128xi1>, vector<2x128xf32>
    %105 = vector.shape_cast %101 : vector<2x1xi1> to vector<2x1xi1>
    %106 = vector.broadcast %105 : vector<2x1xi1> to vector<2x128xi1>
    %107 = arith.select %106, %96, %55 : vector<2x128xi1>, vector<2x128xf32>
    %cst_27 = arith.constant 0.000000e+00 : f32
    %108 = vector.shape_cast %101 : vector<2x1xi1> to vector<2x1xi1>
    %109 = vector.broadcast %108 : vector<2x1xi1> to vector<2x128xi1>
    %110 = vector.broadcast %cst_27 : f32 to vector<2x128xf32>
    %111 = arith.select %109, %98, %110 : vector<2x128xi1>, vector<2x128xf32>
    %112 = arith.truncf %111 : vector<2x128xf32> to vector<2x128xbf16>
    %113 = arith.index_cast %66 : i32 to index
    %c0_28 = arith.constant 0 : index
    %c0_29 = arith.constant 0 : index
    %114 = vector.load %arg5[%113, %c0_28, %c0_29] : memref<8x2x128xbf16, #tpu.memory_space<vmem>>, vector<1x2x128xbf16>
    %115 = vector.shape_cast %114 : vector<1x2x128xbf16> to vector<2x128xbf16>
    %116 = vector.shape_cast %112 : vector<2x128xbf16> to vector<1x2x128xbf16>
    tpu.vector_store %arg5[%113, %c0_28, %c0_29], %116 {strides = array<i32>} : memref<8x2x128xbf16, #tpu.memory_space<vmem>>, vector<1x2x128xbf16>,
    %c3_i32 = arith.constant 3 : i32
    %117 = arith.muli %arg0, %c3_i32 : i32
    %c2_i32_30 = arith.constant 2 : i32
    %118 = arith.addi %c2_i32_30, %117 : i32
    %c0_31 = arith.constant 0 : index
    %119 = arith.index_cast %118 : i32 to index
    %c0_32 = arith.constant 0 : index
    %c0_33 = arith.constant 0 : index
    %120 = vector.load %arg2[%c0_31, %119, %c0_32, %c0_33] : memref<1x8x2x512xbf16, #tpu.memory_space<vmem>>, vector<1x1x2x512xbf16>
    %121 = vector.shape_cast %120 : vector<1x1x2x512xbf16> to vector<2x512xbf16>
    %122 = arith.extf %121 : vector<2x512xbf16> to vector<2x512xf32>
    %123 = arith.truncf %104 : vector<2x128xf32> to vector<2x128xbf16>
    %cst_34 = arith.constant dense<0.000000e+00> : vector<2x512xf32>
    %124 = tpu.matmul %123, %4, %cst_34 {dimension_numbers = #tpu.dot_dimension_numbers<[1], [0], [0], [1], [0, 0, 1, 1], [], []>} : vector<2x128xbf16>, vector<128x512xbf16>, vector<2x512xf32> -> vector<2x512xf32>
    %125 = arith.addf %122, %124 : vector<2x512xf32>
    %126 = vector.extract_strided_slice %125 {offsets = [0, 0], sizes = [2, 128], strides = [1, 1]} : vector<2x512xf32> to vector<2x128xf32>
    %127 = arith.negf %126 : vector<2x128xf32>
    %128 = math.exp %127 : vector<2x128xf32>
    %cst_35 = arith.constant 1.000000e+00 : f32
    %129 = vector.broadcast %cst_35 : f32 to vector<2x128xf32>
    %130 = arith.addf %129, %128 : vector<2x128xf32>
    %131 = arith.divf %129, %130 : vector<2x128xf32>
    %132 = vector.extract_strided_slice %125 {offsets = [0, 128], sizes = [2, 128], strides = [1, 1]} : vector<2x512xf32> to vector<2x128xf32>
    %133 = arith.negf %132 : vector<2x128xf32>
    %134 = math.exp %133 : vector<2x128xf32>
    %cst_36 = arith.constant 1.000000e+00 : f32
    %135 = vector.broadcast %cst_36 : f32 to vector<2x128xf32>
    %136 = arith.addf %135, %134 : vector<2x128xf32>
    %137 = arith.divf %135, %136 : vector<2x128xf32>
    %138 = vector.extract_strided_slice %125 {offsets = [0, 256], sizes = [2, 128], strides = [1, 1]} : vector<2x512xf32> to vector<2x128xf32>
    %139 = math.tanh %138 : vector<2x128xf32>
    %140 = vector.extract_strided_slice %125 {offsets = [0, 384], sizes = [2, 128], strides = [1, 1]} : vector<2x512xf32> to vector<2x128xf32>
    %141 = arith.negf %140 : vector<2x128xf32>
    %142 = math.exp %141 : vector<2x128xf32>
    %cst_37 = arith.constant 1.000000e+00 : f32
    %143 = vector.broadcast %cst_37 : f32 to vector<2x128xf32>
    %144 = arith.addf %143, %142 : vector<2x128xf32>
    %145 = arith.divf %143, %144 : vector<2x128xf32>
    %146 = arith.mulf %137, %107 : vector<2x128xf32>
    %147 = arith.mulf %131, %139 : vector<2x128xf32>
    %148 = arith.addf %146, %147 : vector<2x128xf32>
    %149 = math.tanh %148 : vector<2x128xf32>
    %150 = arith.mulf %145, %149 : vector<2x128xf32>
    %151 = arith.addi %10, %118 : i32
    %152 = vector.broadcast %151 : i32 to vector<2x1xi32>
    %153 = arith.cmpi slt, %152, %5 : vector<2x1xi32>
    %154 = vector.shape_cast %153 : vector<2x1xi1> to vector<2x1xi1>
    %155 = vector.broadcast %154 : vector<2x1xi1> to vector<2x128xi1>
    %156 = arith.select %155, %150, %104 : vector<2x128xi1>, vector<2x128xf32>
    %157 = vector.shape_cast %153 : vector<2x1xi1> to vector<2x1xi1>
    %158 = vector.broadcast %157 : vector<2x1xi1> to vector<2x128xi1>
    %159 = arith.select %158, %148, %107 : vector<2x128xi1>, vector<2x128xf32>
    %cst_38 = arith.constant 0.000000e+00 : f32
    %160 = vector.shape_cast %153 : vector<2x1xi1> to vector<2x1xi1>
    %161 = vector.broadcast %160 : vector<2x1xi1> to vector<2x128xi1>
    %162 = vector.broadcast %cst_38 : f32 to vector<2x128xf32>
    %163 = arith.select %161, %150, %162 : vector<2x128xi1>, vector<2x128xf32>
    %164 = arith.truncf %163 : vector<2x128xf32> to vector<2x128xbf16>
    %165 = arith.index_cast %118 : i32 to index
    %c0_39 = arith.constant 0 : index
    %c0_40 = arith.constant 0 : index
    %166 = vector.load %arg5[%165, %c0_39, %c0_40] : memref<8x2x128xbf16, #tpu.memory_space<vmem>>, vector<1x2x128xbf16>
    %167 = vector.shape_cast %166 : vector<1x2x128xbf16> to vector<2x128xbf16>
    %168 = vector.shape_cast %164 : vector<2x128xbf16> to vector<1x2x128xbf16>
    tpu.vector_store %arg5[%165, %c0_39, %c0_40], %168 {strides = array<i32>} : memref<8x2x128xbf16, #tpu.memory_space<vmem>>, vector<1x2x128xbf16>,
    %c1_i32_41 = arith.constant 1 : i32
    %169 = arith.muli %arg0, %c1_i32_41 : i32
    %c3_i32_42 = arith.constant 3 : i32
    %170 = arith.addi %c3_i32_42, %169 : i32
    %c0_43 = arith.constant 0 : index
    %171 = arith.index_cast %170 : i32 to index
    %c0_44 = arith.constant 0 : index
    %c0_45 = arith.constant 0 : index
    %172 = vector.load %arg2[%c0_43, %171, %c0_44, %c0_45] : memref<1x8x2x512xbf16, #tpu.memory_space<vmem>>, vector<1x1x2x512xbf16>
    %173 = vector.shape_cast %172 : vector<1x1x2x512xbf16> to vector<2x512xbf16>
    %174 = arith.extf %173 : vector<2x512xbf16> to vector<2x512xf32>
    %175 = arith.truncf %156 : vector<2x128xf32> to vector<2x128xbf16>
    %cst_46 = arith.constant dense<0.000000e+00> : vector<2x512xf32>
    %176 = tpu.matmul %175, %4, %cst_46 {dimension_numbers = #tpu.dot_dimension_numbers<[1], [0], [0], [1], [0, 0, 1, 1], [], []>} : vector<2x128xbf16>, vector<128x512xbf16>, vector<2x512xf32> -> vector<2x512xf32>
    %177 = arith.addf %174, %176 : vector<2x512xf32>
    %178 = vector.extract_strided_slice %177 {offsets = [0, 0], sizes = [2, 128], strides = [1, 1]} : vector<2x512xf32> to vector<2x128xf32>
    %179 = arith.negf %178 : vector<2x128xf32>
    %180 = math.exp %179 : vector<2x128xf32>
    %cst_47 = arith.constant 1.000000e+00 : f32
    %181 = vector.broadcast %cst_47 : f32 to vector<2x128xf32>
    %182 = arith.addf %181, %180 : vector<2x128xf32>
    %183 = arith.divf %181, %182 : vector<2x128xf32>
    %184 = vector.extract_strided_slice %177 {offsets = [0, 128], sizes = [2, 128], strides = [1, 1]} : vector<2x512xf32> to vector<2x128xf32>
    %185 = arith.negf %184 : vector<2x128xf32>
    %186 = math.exp %185 : vector<2x128xf32>
    %cst_48 = arith.constant 1.000000e+00 : f32
    %187 = vector.broadcast %cst_48 : f32 to vector<2x128xf32>
    %188 = arith.addf %187, %186 : vector<2x128xf32>
    %189 = arith.divf %187, %188 : vector<2x128xf32>
    %190 = vector.extract_strided_slice %177 {offsets = [0, 256], sizes = [2, 128], strides = [1, 1]} : vector<2x512xf32> to vector<2x128xf32>
    %191 = math.tanh %190 : vector<2x128xf32>
    %192 = vector.extract_strided_slice %177 {offsets = [0, 384], sizes = [2, 128], strides = [1, 1]} : vector<2x512xf32> to vector<2x128xf32>
    %193 = arith.negf %192 : vector<2x128xf32>
    %194 = math.exp %193 : vector<2x128xf32>
    %cst_49 = arith.constant 1.000000e+00 : f32
    %195 = vector.broadcast %cst_49 : f32 to vector<2x128xf32>
    %196 = arith.addf %195, %194 : vector<2x128xf32>
    %197 = arith.divf %195, %196 : vector<2x128xf32>
    %198 = arith.mulf %189, %159 : vector<2x128xf32>
    %199 = arith.mulf %183, %191 : vector<2x128xf32>
    %200 = arith.addf %198, %199 : vector<2x128xf32>
    %201 = math.tanh %200 : vector<2x128xf32>
    %202 = arith.mulf %197, %201 : vector<2x128xf32>
    %203 = arith.addi %10, %170 : i32
    %204 = vector.broadcast %203 : i32 to vector<2x1xi32>
    %205 = arith.cmpi slt, %204, %5 : vector<2x1xi32>
    %206 = vector.shape_cast %205 : vector<2x1xi1> to vector<2x1xi1>
    %207 = vector.broadcast %206 : vector<2x1xi1> to vector<2x128xi1>
    %208 = arith.select %207, %202, %156 : vector<2x128xi1>, vector<2x128xf32>
    %209 = vector.shape_cast %205 : vector<2x1xi1> to vector<2x1xi1>
    %210 = vector.broadcast %209 : vector<2x1xi1> to vector<2x128xi1>
    %211 = arith.select %210, %200, %159 : vector<2x128xi1>, vector<2x128xf32>
    %cst_50 = arith.constant 0.000000e+00 : f32
    %212 = vector.shape_cast %205 : vector<2x1xi1> to vector<2x1xi1>
    %213 = vector.broadcast %212 : vector<2x1xi1> to vector<2x128xi1>
    %214 = vector.broadcast %cst_50 : f32 to vector<2x128xf32>
    %215 = arith.select %213, %202, %214 : vector<2x128xi1>, vector<2x128xf32>
    %216 = arith.truncf %215 : vector<2x128xf32> to vector<2x128xbf16>
    %217 = arith.index_cast %170 : i32 to index
    %c0_51 = arith.constant 0 : index
    %c0_52 = arith.constant 0 : index
    %218 = vector.load %arg5[%217, %c0_51, %c0_52] : memref<8x2x128xbf16, #tpu.memory_space<vmem>>, vector<1x2x128xbf16>
    %219 = vector.shape_cast %218 : vector<1x2x128xbf16> to vector<2x128xbf16>
    %220 = vector.shape_cast %216 : vector<2x128xbf16> to vector<1x2x128xbf16>
    tpu.vector_store %arg5[%217, %c0_51, %c0_52], %220 {strides = array<i32>} : memref<8x2x128xbf16, #tpu.memory_space<vmem>>, vector<1x2x128xbf16>,
    %c-1_i32 = arith.constant -1 : i32
    %221 = arith.muli %arg0, %c-1_i32 : i32
    %c4_i32 = arith.constant 4 : i32
    %222 = arith.addi %c4_i32, %221 : i32
    %c0_53 = arith.constant 0 : index
    %223 = arith.index_cast %222 : i32 to index
    %c0_54 = arith.constant 0 : index
    %c0_55 = arith.constant 0 : index
    %224 = vector.load %arg2[%c0_53, %223, %c0_54, %c0_55] : memref<1x8x2x512xbf16, #tpu.memory_space<vmem>>, vector<1x1x2x512xbf16>
    %225 = vector.shape_cast %224 : vector<1x1x2x512xbf16> to vector<2x512xbf16>
    %226 = arith.extf %225 : vector<2x512xbf16> to vector<2x512xf32>
    %227 = arith.truncf %208 : vector<2x128xf32> to vector<2x128xbf16>
    %cst_56 = arith.constant dense<0.000000e+00> : vector<2x512xf32>
    %228 = tpu.matmul %227, %4, %cst_56 {dimension_numbers = #tpu.dot_dimension_numbers<[1], [0], [0], [1], [0, 0, 1, 1], [], []>} : vector<2x128xbf16>, vector<128x512xbf16>, vector<2x512xf32> -> vector<2x512xf32>
    %229 = arith.addf %226, %228 : vector<2x512xf32>
    %230 = vector.extract_strided_slice %229 {offsets = [0, 0], sizes = [2, 128], strides = [1, 1]} : vector<2x512xf32> to vector<2x128xf32>
    %231 = arith.negf %230 : vector<2x128xf32>
    %232 = math.exp %231 : vector<2x128xf32>
    %cst_57 = arith.constant 1.000000e+00 : f32
    %233 = vector.broadcast %cst_57 : f32 to vector<2x128xf32>
    %234 = arith.addf %233, %232 : vector<2x128xf32>
    %235 = arith.divf %233, %234 : vector<2x128xf32>
    %236 = vector.extract_strided_slice %229 {offsets = [0, 128], sizes = [2, 128], strides = [1, 1]} : vector<2x512xf32> to vector<2x128xf32>
    %237 = arith.negf %236 : vector<2x128xf32>
    %238 = math.exp %237 : vector<2x128xf32>
    %cst_58 = arith.constant 1.000000e+00 : f32
    %239 = vector.broadcast %cst_58 : f32 to vector<2x128xf32>
    %240 = arith.addf %239, %238 : vector<2x128xf32>
    %241 = arith.divf %239, %240 : vector<2x128xf32>
    %242 = vector.extract_strided_slice %229 {offsets = [0, 256], sizes = [2, 128], strides = [1, 1]} : vector<2x512xf32> to vector<2x128xf32>
    %243 = math.tanh %242 : vector<2x128xf32>
    %244 = vector.extract_strided_slice %229 {offsets = [0, 384], sizes = [2, 128], strides = [1, 1]} : vector<2x512xf32> to vector<2x128xf32>
    %245 = arith.negf %244 : vector<2x128xf32>
    %246 = math.exp %245 : vector<2x128xf32>
    %cst_59 = arith.constant 1.000000e+00 : f32
    %247 = vector.broadcast %cst_59 : f32 to vector<2x128xf32>
    %248 = arith.addf %247, %246 : vector<2x128xf32>
    %249 = arith.divf %247, %248 : vector<2x128xf32>
    %250 = arith.mulf %241, %211 : vector<2x128xf32>
    %251 = arith.mulf %235, %243 : vector<2x128xf32>
    %252 = arith.addf %250, %251 : vector<2x128xf32>
    %253 = math.tanh %252 : vector<2x128xf32>
    %254 = arith.mulf %249, %253 : vector<2x128xf32>
    %255 = arith.addi %10, %222 : i32
    %256 = vector.broadcast %255 : i32 to vector<2x1xi32>
    %257 = arith.cmpi slt, %256, %5 : vector<2x1xi32>
    %258 = vector.shape_cast %257 : vector<2x1xi1> to vector<2x1xi1>
    %259 = vector.broadcast %258 : vector<2x1xi1> to vector<2x128xi1>
    %260 = arith.select %259, %254, %208 : vector<2x128xi1>, vector<2x128xf32>
    %261 = vector.shape_cast %257 : vector<2x1xi1> to vector<2x1xi1>
    %262 = vector.broadcast %261 : vector<2x1xi1> to vector<2x128xi1>
    %263 = arith.select %262, %252, %211 : vector<2x128xi1>, vector<2x128xf32>
    %cst_60 = arith.constant 0.000000e+00 : f32
    %264 = vector.shape_cast %257 : vector<2x1xi1> to vector<2x1xi1>
    %265 = vector.broadcast %264 : vector<2x1xi1> to vector<2x128xi1>
    %266 = vector.broadcast %cst_60 : f32 to vector<2x128xf32>
    %267 = arith.select %265, %254, %266 : vector<2x128xi1>, vector<2x128xf32>
    %268 = arith.truncf %267 : vector<2x128xf32> to vector<2x128xbf16>
    %269 = arith.index_cast %222 : i32 to index
    %c0_61 = arith.constant 0 : index
    %c0_62 = arith.constant 0 : index
    %270 = vector.load %arg5[%269, %c0_61, %c0_62] : memref<8x2x128xbf16, #tpu.memory_space<vmem>>, vector<1x2x128xbf16>
    %271 = vector.shape_cast %270 : vector<1x2x128xbf16> to vector<2x128xbf16>
    %272 = vector.shape_cast %268 : vector<2x128xbf16> to vector<1x2x128xbf16>
    tpu.vector_store %arg5[%269, %c0_61, %c0_62], %272 {strides = array<i32>} : memref<8x2x128xbf16, #tpu.memory_space<vmem>>, vector<1x2x128xbf16>,
    %c-3_i32 = arith.constant -3 : i32
    %273 = arith.muli %arg0, %c-3_i32 : i32
    %c5_i32_63 = arith.constant 5 : i32
    %274 = arith.addi %c5_i32_63, %273 : i32
    %c0_64 = arith.constant 0 : index
    %275 = arith.index_cast %274 : i32 to index
    %c0_65 = arith.constant 0 : index
    %c0_66 = arith.constant 0 : index
    %276 = vector.load %arg2[%c0_64, %275, %c0_65, %c0_66] : memref<1x8x2x512xbf16, #tpu.memory_space<vmem>>, vector<1x1x2x512xbf16>
    %277 = vector.shape_cast %276 : vector<1x1x2x512xbf16> to vector<2x512xbf16>
    %278 = arith.extf %277 : vector<2x512xbf16> to vector<2x512xf32>
    %279 = arith.truncf %260 : vector<2x128xf32> to vector<2x128xbf16>
    %cst_67 = arith.constant dense<0.000000e+00> : vector<2x512xf32>
    %280 = tpu.matmul %279, %4, %cst_67 {dimension_numbers = #tpu.dot_dimension_numbers<[1], [0], [0], [1], [0, 0, 1, 1], [], []>} : vector<2x128xbf16>, vector<128x512xbf16>, vector<2x512xf32> -> vector<2x512xf32>
    %281 = arith.addf %278, %280 : vector<2x512xf32>
    %282 = vector.extract_strided_slice %281 {offsets = [0, 0], sizes = [2, 128], strides = [1, 1]} : vector<2x512xf32> to vector<2x128xf32>
    %283 = arith.negf %282 : vector<2x128xf32>
    %284 = math.exp %283 : vector<2x128xf32>
    %cst_68 = arith.constant 1.000000e+00 : f32
    %285 = vector.broadcast %cst_68 : f32 to vector<2x128xf32>
    %286 = arith.addf %285, %284 : vector<2x128xf32>
    %287 = arith.divf %285, %286 : vector<2x128xf32>
    %288 = vector.extract_strided_slice %281 {offsets = [0, 128], sizes = [2, 128], strides = [1, 1]} : vector<2x512xf32> to vector<2x128xf32>
    %289 = arith.negf %288 : vector<2x128xf32>
    %290 = math.exp %289 : vector<2x128xf32>
    %cst_69 = arith.constant 1.000000e+00 : f32
    %291 = vector.broadcast %cst_69 : f32 to vector<2x128xf32>
    %292 = arith.addf %291, %290 : vector<2x128xf32>
    %293 = arith.divf %291, %292 : vector<2x128xf32>
    %294 = vector.extract_strided_slice %281 {offsets = [0, 256], sizes = [2, 128], strides = [1, 1]} : vector<2x512xf32> to vector<2x128xf32>
    %295 = math.tanh %294 : vector<2x128xf32>
    %296 = vector.extract_strided_slice %281 {offsets = [0, 384], sizes = [2, 128], strides = [1, 1]} : vector<2x512xf32> to vector<2x128xf32>
    %297 = arith.negf %296 : vector<2x128xf32>
    %298 = math.exp %297 : vector<2x128xf32>
    %cst_70 = arith.constant 1.000000e+00 : f32
    %299 = vector.broadcast %cst_70 : f32 to vector<2x128xf32>
    %300 = arith.addf %299, %298 : vector<2x128xf32>
    %301 = arith.divf %299, %300 : vector<2x128xf32>
    %302 = arith.mulf %293, %263 : vector<2x128xf32>
    %303 = arith.mulf %287, %295 : vector<2x128xf32>
    %304 = arith.addf %302, %303 : vector<2x128xf32>
    %305 = math.tanh %304 : vector<2x128xf32>
    %306 = arith.mulf %301, %305 : vector<2x128xf32>
    %307 = arith.addi %10, %274 : i32
    %308 = vector.broadcast %307 : i32 to vector<2x1xi32>
    %309 = arith.cmpi slt, %308, %5 : vector<2x1xi32>
    %310 = vector.shape_cast %309 : vector<2x1xi1> to vector<2x1xi1>
    %311 = vector.broadcast %310 : vector<2x1xi1> to vector<2x128xi1>
    %312 = arith.select %311, %306, %260 : vector<2x128xi1>, vector<2x128xf32>
    %313 = vector.shape_cast %309 : vector<2x1xi1> to vector<2x1xi1>
    %314 = vector.broadcast %313 : vector<2x1xi1> to vector<2x128xi1>
    %315 = arith.select %314, %304, %263 : vector<2x128xi1>, vector<2x128xf32>
    %cst_71 = arith.constant 0.000000e+00 : f32
    %316 = vector.shape_cast %309 : vector<2x1xi1> to vector<2x1xi1>
    %317 = vector.broadcast %316 : vector<2x1xi1> to vector<2x128xi1>
    %318 = vector.broadcast %cst_71 : f32 to vector<2x128xf32>
    %319 = arith.select %317, %306, %318 : vector<2x128xi1>, vector<2x128xf32>
    %320 = arith.truncf %319 : vector<2x128xf32> to vector<2x128xbf16>
    %321 = arith.index_cast %274 : i32 to index
    %c0_72 = arith.constant 0 : index
    %c0_73 = arith.constant 0 : index
    %322 = vector.load %arg5[%321, %c0_72, %c0_73] : memref<8x2x128xbf16, #tpu.memory_space<vmem>>, vector<1x2x128xbf16>
    %323 = vector.shape_cast %322 : vector<1x2x128xbf16> to vector<2x128xbf16>
    %324 = vector.shape_cast %320 : vector<2x128xbf16> to vector<1x2x128xbf16>
    tpu.vector_store %arg5[%321, %c0_72, %c0_73], %324 {strides = array<i32>} : memref<8x2x128xbf16, #tpu.memory_space<vmem>>, vector<1x2x128xbf16>,
    %c-5_i32 = arith.constant -5 : i32
    %325 = arith.muli %arg0, %c-5_i32 : i32
    %c6_i32 = arith.constant 6 : i32
    %326 = arith.addi %c6_i32, %325 : i32
    %c0_74 = arith.constant 0 : index
    %327 = arith.index_cast %326 : i32 to index
    %c0_75 = arith.constant 0 : index
    %c0_76 = arith.constant 0 : index
    %328 = vector.load %arg2[%c0_74, %327, %c0_75, %c0_76] : memref<1x8x2x512xbf16, #tpu.memory_space<vmem>>, vector<1x1x2x512xbf16>
    %329 = vector.shape_cast %328 : vector<1x1x2x512xbf16> to vector<2x512xbf16>
    %330 = arith.extf %329 : vector<2x512xbf16> to vector<2x512xf32>
    %331 = arith.truncf %312 : vector<2x128xf32> to vector<2x128xbf16>
    %cst_77 = arith.constant dense<0.000000e+00> : vector<2x512xf32>
    %332 = tpu.matmul %331, %4, %cst_77 {dimension_numbers = #tpu.dot_dimension_numbers<[1], [0], [0], [1], [0, 0, 1, 1], [], []>} : vector<2x128xbf16>, vector<128x512xbf16>, vector<2x512xf32> -> vector<2x512xf32>
    %333 = arith.addf %330, %332 : vector<2x512xf32>
    %334 = vector.extract_strided_slice %333 {offsets = [0, 0], sizes = [2, 128], strides = [1, 1]} : vector<2x512xf32> to vector<2x128xf32>
    %335 = arith.negf %334 : vector<2x128xf32>
    %336 = math.exp %335 : vector<2x128xf32>
    %cst_78 = arith.constant 1.000000e+00 : f32
    %337 = vector.broadcast %cst_78 : f32 to vector<2x128xf32>
    %338 = arith.addf %337, %336 : vector<2x128xf32>
    %339 = arith.divf %337, %338 : vector<2x128xf32>
    %340 = vector.extract_strided_slice %333 {offsets = [0, 128], sizes = [2, 128], strides = [1, 1]} : vector<2x512xf32> to vector<2x128xf32>
    %341 = arith.negf %340 : vector<2x128xf32>
    %342 = math.exp %341 : vector<2x128xf32>
    %cst_79 = arith.constant 1.000000e+00 : f32
    %343 = vector.broadcast %cst_79 : f32 to vector<2x128xf32>
    %344 = arith.addf %343, %342 : vector<2x128xf32>
    %345 = arith.divf %343, %344 : vector<2x128xf32>
    %346 = vector.extract_strided_slice %333 {offsets = [0, 256], sizes = [2, 128], strides = [1, 1]} : vector<2x512xf32> to vector<2x128xf32>
    %347 = math.tanh %346 : vector<2x128xf32>
    %348 = vector.extract_strided_slice %333 {offsets = [0, 384], sizes = [2, 128], strides = [1, 1]} : vector<2x512xf32> to vector<2x128xf32>
    %349 = arith.negf %348 : vector<2x128xf32>
    %350 = math.exp %349 : vector<2x128xf32>
    %cst_80 = arith.constant 1.000000e+00 : f32
    %351 = vector.broadcast %cst_80 : f32 to vector<2x128xf32>
    %352 = arith.addf %351, %350 : vector<2x128xf32>
    %353 = arith.divf %351, %352 : vector<2x128xf32>
    %354 = arith.mulf %345, %315 : vector<2x128xf32>
    %355 = arith.mulf %339, %347 : vector<2x128xf32>
    %356 = arith.addf %354, %355 : vector<2x128xf32>
    %357 = math.tanh %356 : vector<2x128xf32>
    %358 = arith.mulf %353, %357 : vector<2x128xf32>
    %359 = arith.addi %10, %326 : i32
    %360 = vector.broadcast %359 : i32 to vector<2x1xi32>
    %361 = arith.cmpi slt, %360, %5 : vector<2x1xi32>
    %362 = vector.shape_cast %361 : vector<2x1xi1> to vector<2x1xi1>
    %363 = vector.broadcast %362 : vector<2x1xi1> to vector<2x128xi1>
    %364 = arith.select %363, %358, %312 : vector<2x128xi1>, vector<2x128xf32>
    %365 = vector.shape_cast %361 : vector<2x1xi1> to vector<2x1xi1>
    %366 = vector.broadcast %365 : vector<2x1xi1> to vector<2x128xi1>
    %367 = arith.select %366, %356, %315 : vector<2x128xi1>, vector<2x128xf32>
    %cst_81 = arith.constant 0.000000e+00 : f32
    %368 = vector.shape_cast %361 : vector<2x1xi1> to vector<2x1xi1>
    %369 = vector.broadcast %368 : vector<2x1xi1> to vector<2x128xi1>
    %370 = vector.broadcast %cst_81 : f32 to vector<2x128xf32>
    %371 = arith.select %369, %358, %370 : vector<2x128xi1>, vector<2x128xf32>
    %372 = arith.truncf %371 : vector<2x128xf32> to vector<2x128xbf16>
    %373 = arith.index_cast %326 : i32 to index
    %c0_82 = arith.constant 0 : index
    %c0_83 = arith.constant 0 : index
    %374 = vector.load %arg5[%373, %c0_82, %c0_83] : memref<8x2x128xbf16, #tpu.memory_space<vmem>>, vector<1x2x128xbf16>
    %375 = vector.shape_cast %374 : vector<1x2x128xbf16> to vector<2x128xbf16>
    %376 = vector.shape_cast %372 : vector<2x128xbf16> to vector<1x2x128xbf16>
    tpu.vector_store %arg5[%373, %c0_82, %c0_83], %376 {strides = array<i32>} : memref<8x2x128xbf16, #tpu.memory_space<vmem>>, vector<1x2x128xbf16>,
    %c-7_i32 = arith.constant -7 : i32
    %377 = arith.muli %arg0, %c-7_i32 : i32
    %c7_i32_84 = arith.constant 7 : i32
    %378 = arith.addi %c7_i32_84, %377 : i32
    %c0_85 = arith.constant 0 : index
    %379 = arith.index_cast %378 : i32 to index
    %c0_86 = arith.constant 0 : index
    %c0_87 = arith.constant 0 : index
    %380 = vector.load %arg2[%c0_85, %379, %c0_86, %c0_87] : memref<1x8x2x512xbf16, #tpu.memory_space<vmem>>, vector<1x1x2x512xbf16>
    %381 = vector.shape_cast %380 : vector<1x1x2x512xbf16> to vector<2x512xbf16>
    %382 = arith.extf %381 : vector<2x512xbf16> to vector<2x512xf32>
    %383 = arith.truncf %364 : vector<2x128xf32> to vector<2x128xbf16>
    %cst_88 = arith.constant dense<0.000000e+00> : vector<2x512xf32>
    %384 = tpu.matmul %383, %4, %cst_88 {dimension_numbers = #tpu.dot_dimension_numbers<[1], [0], [0], [1], [0, 0, 1, 1], [], []>} : vector<2x128xbf16>, vector<128x512xbf16>, vector<2x512xf32> -> vector<2x512xf32>
    %385 = arith.addf %382, %384 : vector<2x512xf32>
    %386 = vector.extract_strided_slice %385 {offsets = [0, 0], sizes = [2, 128], strides = [1, 1]} : vector<2x512xf32> to vector<2x128xf32>
    %387 = arith.negf %386 : vector<2x128xf32>
    %388 = math.exp %387 : vector<2x128xf32>
    %cst_89 = arith.constant 1.000000e+00 : f32
    %389 = vector.broadcast %cst_89 : f32 to vector<2x128xf32>
    %390 = arith.addf %389, %388 : vector<2x128xf32>
    %391 = arith.divf %389, %390 : vector<2x128xf32>
    %392 = vector.extract_strided_slice %385 {offsets = [0, 128], sizes = [2, 128], strides = [1, 1]} : vector<2x512xf32> to vector<2x128xf32>
    %393 = arith.negf %392 : vector<2x128xf32>
    %394 = math.exp %393 : vector<2x128xf32>
    %cst_90 = arith.constant 1.000000e+00 : f32
    %395 = vector.broadcast %cst_90 : f32 to vector<2x128xf32>
    %396 = arith.addf %395, %394 : vector<2x128xf32>
    %397 = arith.divf %395, %396 : vector<2x128xf32>
    %398 = vector.extract_strided_slice %385 {offsets = [0, 256], sizes = [2, 128], strides = [1, 1]} : vector<2x512xf32> to vector<2x128xf32>
    %399 = math.tanh %398 : vector<2x128xf32>
    %400 = vector.extract_strided_slice %385 {offsets = [0, 384], sizes = [2, 128], strides = [1, 1]} : vector<2x512xf32> to vector<2x128xf32>
    %401 = arith.negf %400 : vector<2x128xf32>
    %402 = math.exp %401 : vector<2x128xf32>
    %cst_91 = arith.constant 1.000000e+00 : f32
    %403 = vector.broadcast %cst_91 : f32 to vector<2x128xf32>
    %404 = arith.addf %403, %402 : vector<2x128xf32>
    %405 = arith.divf %403, %404 : vector<2x128xf32>
    %406 = arith.mulf %397, %367 : vector<2x128xf32>
    %407 = arith.mulf %391, %399 : vector<2x128xf32>
    %408 = arith.addf %406, %407 : vector<2x128xf32>
    %409 = math.tanh %408 : vector<2x128xf32>
    %410 = arith.mulf %405, %409 : vector<2x128xf32>
    %411 = arith.addi %10, %378 : i32
    %412 = vector.broadcast %411 : i32 to vector<2x1xi32>
    %413 = arith.cmpi slt, %412, %5 : vector<2x1xi32>
    %414 = vector.shape_cast %413 : vector<2x1xi1> to vector<2x1xi1>
    %415 = vector.broadcast %414 : vector<2x1xi1> to vector<2x128xi1>
    %416 = arith.select %415, %410, %364 : vector<2x128xi1>, vector<2x128xf32>
    %417 = vector.shape_cast %413 : vector<2x1xi1> to vector<2x1xi1>
    %418 = vector.broadcast %417 : vector<2x1xi1> to vector<2x128xi1>
    %419 = arith.select %418, %408, %367 : vector<2x128xi1>, vector<2x128xf32>
    %cst_92 = arith.constant 0.000000e+00 : f32
    %420 = vector.shape_cast %413 : vector<2x1xi1> to vector<2x1xi1>
    %421 = vector.broadcast %420 : vector<2x1xi1> to vector<2x128xi1>
    %422 = vector.broadcast %cst_92 : f32 to vector<2x128xf32>
    %423 = arith.select %421, %410, %422 : vector<2x128xi1>, vector<2x128xf32>
    %424 = arith.truncf %423 : vector<2x128xf32> to vector<2x128xbf16>
    %425 = arith.index_cast %378 : i32 to index
    %c0_93 = arith.constant 0 : index
    %c0_94 = arith.constant 0 : index
    %426 = vector.load %arg5[%425, %c0_93, %c0_94] : memref<8x2x128xbf16, #tpu.memory_space<vmem>>, vector<1x2x128xbf16>
    %427 = vector.shape_cast %426 : vector<1x2x128xbf16> to vector<2x128xbf16>
    %428 = vector.shape_cast %424 : vector<2x128xbf16> to vector<1x2x128xbf16>
    tpu.vector_store %arg5[%425, %c0_93, %c0_94], %428 {strides = array<i32>} : memref<8x2x128xbf16, #tpu.memory_space<vmem>>, vector<1x2x128xbf16>,
    %c0_95 = arith.constant 0 : index
    %c0_96 = arith.constant 0 : index
    %429 = vector.load %arg6[%c0_95, %c0_96] : memref<2x128xf32, #tpu.memory_space<vmem>>, vector<2x128xf32>
    tpu.vector_store %arg6[%c0_95, %c0_96], %416 {strides = array<i32>} : memref<2x128xf32, #tpu.memory_space<vmem>>, vector<2x128xf32>,
    %c0_97 = arith.constant 0 : index
    %c0_98 = arith.constant 0 : index
    %430 = vector.load %arg7[%c0_97, %c0_98] : memref<2x128xf32, #tpu.memory_space<vmem>>, vector<2x128xf32>
    tpu.vector_store %arg7[%c0_97, %c0_98], %419 {strides = array<i32>} : memref<2x128xf32, #tpu.memory_space<vmem>>, vector<2x128xf32>,
    return
  }
  func.func @transform_0(%arg0: i32, %arg1: i32) -> (i32, i32, i32, i32) {
    %c2_i32 = arith.constant 2 : i32
    %0 = arith.muli %c2_i32, %arg1 : i32
    %c0_i32 = arith.constant 0 : i32
    %1 = arith.subi %c0_i32, %0 : i32
    %2 = arith.muli %arg0, %1 : i32
    %3 = arith.addi %arg1, %2 : i32
    %c0_i32_0 = arith.constant 0 : i32
    %c0_i32_1 = arith.constant 0 : i32
    %c0_i32_2 = arith.constant 0 : i32
    return %arg0, %3, %c0_i32_0, %c0_i32_1 : i32, i32, i32, i32
  }
  func.func @transform_1(%arg0: i32, %arg1: i32) -> (i32, i32) {
    %c0_i32 = arith.constant 0 : i32
    %c0_i32_0 = arith.constant 0 : i32
    %c0_i32_1 = arith.constant 0 : i32
    return %c0_i32, %c0_i32_0 : i32, i32
  }
  func.func @transform_2(%arg0: i32, %arg1: i32) -> (i32, i32, i32) {
    %c0_i32 = arith.constant 0 : i32
    %c0_i32_0 = arith.constant 0 : i32
    %c0_i32_1 = arith.constant 0 : i32
    return %arg0, %c0_i32, %c0_i32_0 : i32, i32, i32
  }
  func.func @transform_3(%arg0: i32, %arg1: i32) -> (i32, i32, i32) {
    %c2_i32 = arith.constant 2 : i32
    %0 = arith.muli %c2_i32, %arg1 : i32
    %c0_i32 = arith.constant 0 : i32
    %1 = arith.subi %c0_i32, %0 : i32
    %2 = arith.muli %arg0, %1 : i32
    %3 = arith.addi %arg1, %2 : i32
    %c0_i32_0 = arith.constant 0 : i32
    %c0_i32_1 = arith.constant 0 : i32
    return %3, %c0_i32_0, %arg0 : i32, i32, i32
  }
}

module attributes {stable_mosaic.version = 11 : i64} {
  func.func @_gate_proj_kernel(%arg0: i32, %arg1: i32, %arg2: memref<16x512xbf16, #tpu.memory_space<vmem>>, %arg3: memref<2x512x512xbf16, #tpu.memory_space<vmem>>, %arg4: memref<2x1x512xf32, #tpu.memory_space<vmem>>, %arg5: memref<2x16x512xbf16, #tpu.memory_space<vmem>>) attributes {dimension_semantics = [#tpu.dimension_semantics<parallel>, #tpu.dimension_semantics<parallel>], iteration_bounds = array<i64: 1, 1>, scalar_prefetch = 0 : i64, scratch_operands = 0 : i64, tpu.core_type = #tpu.core_type<tc>, window_params = [{transform_indices = @transform_0, window_bounds = array<i64: 16, 512>}, {transform_indices = @transform_1, window_bounds = array<i64: 2, 512, 512>}, {transform_indices = @transform_2, window_bounds = array<i64: 2, 1, 512>}, {transform_indices = @transform_3, window_bounds = array<i64: 2, 16, 512>}]} {
    %c0 = arith.constant 0 : index
    %c0_0 = arith.constant 0 : index
    %0 = vector.load %arg2[%c0, %c0_0] : memref<16x512xbf16, #tpu.memory_space<vmem>>, vector<16x512xbf16>
    %c0_1 = arith.constant 0 : index
    %c0_2 = arith.constant 0 : index
    %c0_3 = arith.constant 0 : index
    %1 = vector.load %arg3[%c0_1, %c0_2, %c0_3] : memref<2x512x512xbf16, #tpu.memory_space<vmem>>, vector<1x512x512xbf16>
    %2 = vector.shape_cast %1 : vector<1x512x512xbf16> to vector<512x512xbf16>
    %cst = arith.constant dense<0.000000e+00> : vector<16x512xf32>
    %3 = tpu.matmul %0, %2, %cst {dimension_numbers = #tpu.dot_dimension_numbers<[1], [0], [0], [1], [0, 0, 1, 1], [], []>} : vector<16x512xbf16>, vector<512x512xbf16>, vector<16x512xf32> -> vector<16x512xf32>
    %c0_4 = arith.constant 0 : index
    %c0_5 = arith.constant 0 : index
    %c0_6 = arith.constant 0 : index
    %4 = vector.load %arg4[%c0_4, %c0_5, %c0_6] : memref<2x1x512xf32, #tpu.memory_space<vmem>>, vector<1x1x512xf32>
    %5 = vector.shape_cast %4 : vector<1x1x512xf32> to vector<1x512xf32>
    %6 = vector.broadcast %5 : vector<1x512xf32> to vector<16x512xf32>
    %7 = arith.addf %3, %6 : vector<16x512xf32>
    %8 = arith.truncf %7 : vector<16x512xf32> to vector<16x512xbf16>
    %c0_7 = arith.constant 0 : index
    %c0_8 = arith.constant 0 : index
    %c0_9 = arith.constant 0 : index
    %9 = vector.load %arg5[%c0_7, %c0_8, %c0_9] : memref<2x16x512xbf16, #tpu.memory_space<vmem>>, vector<1x16x512xbf16>
    %10 = vector.shape_cast %9 : vector<1x16x512xbf16> to vector<16x512xbf16>
    %11 = vector.shape_cast %8 : vector<16x512xbf16> to vector<1x16x512xbf16>
    tpu.vector_store %arg5[%c0_7, %c0_8, %c0_9], %11 {strides = array<i32>} : memref<2x16x512xbf16, #tpu.memory_space<vmem>>, vector<1x16x512xbf16>,
    %c1 = arith.constant 1 : index
    %c0_10 = arith.constant 0 : index
    %c0_11 = arith.constant 0 : index
    %12 = vector.load %arg3[%c1, %c0_10, %c0_11] : memref<2x512x512xbf16, #tpu.memory_space<vmem>>, vector<1x512x512xbf16>
    %13 = vector.shape_cast %12 : vector<1x512x512xbf16> to vector<512x512xbf16>
    %cst_12 = arith.constant dense<0.000000e+00> : vector<16x512xf32>
    %14 = tpu.matmul %0, %13, %cst_12 {dimension_numbers = #tpu.dot_dimension_numbers<[1], [0], [0], [1], [0, 0, 1, 1], [], []>} : vector<16x512xbf16>, vector<512x512xbf16>, vector<16x512xf32> -> vector<16x512xf32>
    %c1_13 = arith.constant 1 : index
    %c0_14 = arith.constant 0 : index
    %c0_15 = arith.constant 0 : index
    %15 = vector.load %arg4[%c1_13, %c0_14, %c0_15] : memref<2x1x512xf32, #tpu.memory_space<vmem>>, vector<1x1x512xf32>
    %16 = vector.shape_cast %15 : vector<1x1x512xf32> to vector<1x512xf32>
    %17 = vector.broadcast %16 : vector<1x512xf32> to vector<16x512xf32>
    %18 = arith.addf %14, %17 : vector<16x512xf32>
    %19 = arith.truncf %18 : vector<16x512xf32> to vector<16x512xbf16>
    %c1_16 = arith.constant 1 : index
    %c0_17 = arith.constant 0 : index
    %c0_18 = arith.constant 0 : index
    %20 = vector.load %arg5[%c1_16, %c0_17, %c0_18] : memref<2x16x512xbf16, #tpu.memory_space<vmem>>, vector<1x16x512xbf16>
    %21 = vector.shape_cast %20 : vector<1x16x512xbf16> to vector<16x512xbf16>
    %22 = vector.shape_cast %19 : vector<16x512xbf16> to vector<1x16x512xbf16>
    tpu.vector_store %arg5[%c1_16, %c0_17, %c0_18], %22 {strides = array<i32>} : memref<2x16x512xbf16, #tpu.memory_space<vmem>>, vector<1x16x512xbf16>,
    return
  }
  func.func @transform_0(%arg0: i32, %arg1: i32) -> (i32, i32) {
    %c0_i32 = arith.constant 0 : i32
    %c0_i32_0 = arith.constant 0 : i32
    return %arg1, %c0_i32 : i32, i32
  }
  func.func @transform_1(%arg0: i32, %arg1: i32) -> (i32, i32, i32) {
    %c0_i32 = arith.constant 0 : i32
    %c0_i32_0 = arith.constant 0 : i32
    %c0_i32_1 = arith.constant 0 : i32
    return %c0_i32, %c0_i32_0, %arg0 : i32, i32, i32
  }
  func.func @transform_2(%arg0: i32, %arg1: i32) -> (i32, i32, i32) {
    %c0_i32 = arith.constant 0 : i32
    %c0_i32_0 = arith.constant 0 : i32
    %c0_i32_1 = arith.constant 0 : i32
    return %c0_i32, %c0_i32_0, %arg0 : i32, i32, i32
  }
  func.func @transform_3(%arg0: i32, %arg1: i32) -> (i32, i32, i32) {
    %c0_i32 = arith.constant 0 : i32
    %c0_i32_0 = arith.constant 0 : i32
    return %c0_i32, %arg1, %arg0 : i32, i32, i32
  }
}

module attributes {stable_mosaic.version = 11 : i64} {
  func.func @_proj_ctc_kernel(%arg0: i32, %arg1: memref<8x256xbf16, #tpu.memory_space<vmem>>, %arg2: memref<256x128xbf16, #tpu.memory_space<vmem>>, %arg3: memref<1x128xf32, #tpu.memory_space<vmem>>, %arg4: memref<128x128xbf16, #tpu.memory_space<vmem>>, %arg5: memref<1x128xf32, #tpu.memory_space<vmem>>, %arg6: memref<8x128xf32, #tpu.memory_space<vmem>>, %arg7: memref<8x128xf32, #tpu.memory_space<vmem>>) attributes {dimension_semantics = [#tpu.dimension_semantics<parallel>], iteration_bounds = array<i64: 1>, scalar_prefetch = 0 : i64, scratch_operands = 0 : i64, tpu.core_type = #tpu.core_type<tc>, window_params = [{transform_indices = @transform_0, window_bounds = array<i64: 8, 256>}, {pipeline_mode = #tpu.pipeline_mode<synchronous>, transform_indices = @transform_1, window_bounds = array<i64: 256, 128>}, {pipeline_mode = #tpu.pipeline_mode<synchronous>, transform_indices = @transform_2, window_bounds = array<i64: 1, 128>}, {pipeline_mode = #tpu.pipeline_mode<synchronous>, transform_indices = @transform_3, window_bounds = array<i64: 128, 128>}, {pipeline_mode = #tpu.pipeline_mode<synchronous>, transform_indices = @transform_4, window_bounds = array<i64: 1, 128>}, {transform_indices = @transform_5, window_bounds = array<i64: 8, 128>}, {transform_indices = @transform_6, window_bounds = array<i64: 8, 128>}]} {
    %c0 = arith.constant 0 : index
    %c0_0 = arith.constant 0 : index
    %0 = vector.load %arg1[%c0, %c0_0] : memref<8x256xbf16, #tpu.memory_space<vmem>>, vector<8x256xbf16>
    %c0_1 = arith.constant 0 : index
    %c0_2 = arith.constant 0 : index
    %1 = vector.load %arg2[%c0_1, %c0_2] : memref<256x128xbf16, #tpu.memory_space<vmem>>, vector<256x128xbf16>
    %cst = arith.constant dense<0.000000e+00> : vector<8x128xf32>
    %2 = tpu.matmul %0, %1, %cst {dimension_numbers = #tpu.dot_dimension_numbers<[1], [0], [0], [1], [0, 0, 1, 1], [], []>} : vector<8x256xbf16>, vector<256x128xbf16>, vector<8x128xf32> -> vector<8x128xf32>
    %c0_3 = arith.constant 0 : index
    %c0_4 = arith.constant 0 : index
    %3 = vector.load %arg3[%c0_3, %c0_4] : memref<1x128xf32, #tpu.memory_space<vmem>>, vector<1x128xf32>
    %4 = vector.broadcast %3 : vector<1x128xf32> to vector<8x128xf32>
    %5 = arith.addf %2, %4 : vector<8x128xf32>
    %c0_5 = arith.constant 0 : index
    %c0_6 = arith.constant 0 : index
    %6 = vector.load %arg6[%c0_5, %c0_6] : memref<8x128xf32, #tpu.memory_space<vmem>>, vector<8x128xf32>
    tpu.vector_store %arg6[%c0_5, %c0_6], %5 {strides = array<i32>} : memref<8x128xf32, #tpu.memory_space<vmem>>, vector<8x128xf32>,
    %7 = arith.truncf %5 : vector<8x128xf32> to vector<8x128xbf16>
    %c0_7 = arith.constant 0 : index
    %c0_8 = arith.constant 0 : index
    %8 = vector.load %arg4[%c0_7, %c0_8] : memref<128x128xbf16, #tpu.memory_space<vmem>>, vector<128x128xbf16>
    %cst_9 = arith.constant dense<0.000000e+00> : vector<8x128xf32>
    %9 = tpu.matmul %7, %8, %cst_9 {dimension_numbers = #tpu.dot_dimension_numbers<[1], [0], [0], [1], [0, 0, 1, 1], [], []>} : vector<8x128xbf16>, vector<128x128xbf16>, vector<8x128xf32> -> vector<8x128xf32>
    %c0_10 = arith.constant 0 : index
    %c0_11 = arith.constant 0 : index
    %10 = vector.load %arg5[%c0_10, %c0_11] : memref<1x128xf32, #tpu.memory_space<vmem>>, vector<1x128xf32>
    %11 = vector.broadcast %10 : vector<1x128xf32> to vector<8x128xf32>
    %12 = arith.addf %9, %11 : vector<8x128xf32>
    %c0_12 = arith.constant 0 : index
    %c0_13 = arith.constant 0 : index
    %13 = vector.load %arg7[%c0_12, %c0_13] : memref<8x128xf32, #tpu.memory_space<vmem>>, vector<8x128xf32>
    tpu.vector_store %arg7[%c0_12, %c0_13], %12 {strides = array<i32>} : memref<8x128xf32, #tpu.memory_space<vmem>>, vector<8x128xf32>,
    return
  }
  func.func @transform_0(%arg0: i32) -> (i32, i32) {
    %c0_i32 = arith.constant 0 : i32
    %c0_i32_0 = arith.constant 0 : i32
    return %arg0, %c0_i32 : i32, i32
  }
  func.func @transform_1(%arg0: i32) -> (i32, i32) {
    %c0_i32 = arith.constant 0 : i32
    %c0_i32_0 = arith.constant 0 : i32
    %c0_i32_1 = arith.constant 0 : i32
    return %c0_i32, %c0_i32_0 : i32, i32
  }
  func.func @transform_2(%arg0: i32) -> (i32, i32) {
    %c0_i32 = arith.constant 0 : i32
    %c0_i32_0 = arith.constant 0 : i32
    %c0_i32_1 = arith.constant 0 : i32
    return %c0_i32, %c0_i32_0 : i32, i32
  }
  func.func @transform_3(%arg0: i32) -> (i32, i32) {
    %c0_i32 = arith.constant 0 : i32
    %c0_i32_0 = arith.constant 0 : i32
    %c0_i32_1 = arith.constant 0 : i32
    return %c0_i32, %c0_i32_0 : i32, i32
  }
  func.func @transform_4(%arg0: i32) -> (i32, i32) {
    %c0_i32 = arith.constant 0 : i32
    %c0_i32_0 = arith.constant 0 : i32
    %c0_i32_1 = arith.constant 0 : i32
    return %c0_i32, %c0_i32_0 : i32, i32
  }
  func.func @transform_5(%arg0: i32) -> (i32, i32) {
    %c0_i32 = arith.constant 0 : i32
    %c0_i32_0 = arith.constant 0 : i32
    return %arg0, %c0_i32 : i32, i32
  }
  func.func @transform_6(%arg0: i32) -> (i32, i32) {
    %c0_i32 = arith.constant 0 : i32
    %c0_i32_0 = arith.constant 0 : i32
    return %arg0, %c0_i32 : i32, i32
  }
}

</mosaic_0001>

<bundles_post_ra>
// kernel: listener_forward.7
= control target key start
LH: loop header
LB: loop body
LE: loop exit
PB: predicated region body
PF: predicated region fallthrough
CT: control target
= control target key end

     0   :  { %v525_v1 = vmov 0   ;;  %vm67_vm0 = vcmask 130048   ;;  %v27_v15 = vlaneseq  ;;  %s650_s1 = inlined_call_operand.vmem [shape: bf16[2,16,512], index: 1, kind: input, shape index: {}]   ;;  %s651_s0 = inlined_call_operand.vmem [shape: f32[32,16], index: 0, kind: input, shape index: {}]   ;;  %s652_s2 = inlined_call_operand.vmem [shape: f32[2,1,512], index: 2, kind: input, shape index: {}]   ;;  %s653_s3 = inlined_call_operand.vmem [shape: bf16[2,32,512], index: 3, kind: output, shape index: {}]  }
   0x1   :  { %v513_v0 = vld [vmem:[%s650_s1 + $0x4] ss:$16 sps:$4 sm:$0xff]   ;;  %106 = vmatprep.mubr.bf16.mxu0 %v525_v1  ;;  %159 = vmatprep.mubr.bf16.mxu1 %v525_v1  ;;  %v515_v2 = vld [vmem:[%s650_s1 + $0xc] ss:$16 sps:$4 sm:$0xff]   ;;  %v517_v3 = vld [vmem:[%s650_s1] ss:$16 sps:$4 sm:$0xff]  }
   0x2   :  { %74 = vmatprep.subr.bf16.mxu0 %v513_v0  ;;  %v518_v4 = vld [vmem:[%s650_s1 + $0x8] ss:$16 sps:$4 sm:$0xff]   ;;  %v15_v5 = vld [vmem:[%s651_s0] sm:$0xff]  ;;  %127 = vmatprep.subr.bf16.mxu1 %v515_v2  ;;  %v524_v11 = vld [vmem:[%s650_s1 + $0x2c] ss:$16 sps:$4 sm:$0xff]   ;;  %v590_v16 = vshrl.u32 %v27_v15, 7 }
   0x3   :  { %v16_v6 = vld [vmem:[%s651_s0 + $0x8] sm:$0xff]  ;;  %75 = vmatpush1.bf16.msra.mxu0 %v517_v3  ;;  %128 = vmatpush1.bf16.msra.mxu1 %v518_v4  ;;  %v519_v8 = vld [vmem:[%s650_s1 + $0x20] ss:$16 sps:$4 sm:$0xff]   ;;  %v521_v9 = vld [vmem:[%s650_s1 + $0x24] ss:$16 sps:$4 sm:$0xff]  }
   0x4   :  { %v19_v7 = vpack.c.bf16 %v16_v6, %v15_v5  ;;  %v522_v10 = vld [vmem:[%s650_s1 + $0x28] ss:$16 sps:$4 sm:$0xff]   ;;  %284 = vmatprep.subr.bf16.mxu0 %v521_v9  ;;  %337 = vmatprep.subr.bf16.mxu1 %v524_v11  ;;  %v17_v12 = vld [vmem:[%s651_s0 + $0x10] sm:$0xff]  ;;  %v29_v17 = vsub.s32 0, %v590_v16  ;;  %v37_v18 = vsub.s32 2, %v590_v16  ;;  %v33_v20 = vsub.s32 1, %v590_v16 }
   0x5   :  { %v18_v13 = vld [vmem:[%s651_s0 + $0x18] sm:$0xff]  ;;  %v25_v19 = vld [vmem:[%s652_s2] sm:$0xf]  ;;  %v41_v21 = vsub.s32 3, %v590_v16  ;;  %v471_v56 = vld [vmem:[%s652_s2 + $0x4] sm:$0xf] }
   0x6   :  { %455 = vmatmul.mubr.msk.bf16.vlgmr.msra.gmra.mrb[0].mxu0 %vm67_vm0, %v19_v7  ;;  %457 = vmatmul.mubr.msk.bf16.vlgmr.msra.gmra.mrb[0].mxu1 %vm67_vm0, %v19_v7  ;;  %v20_v14 = vpack.c.bf16 %v18_v13, %v17_v12  ;;  %v30_v22 = vrot.slane %v25_v19, %v29_v17  ;;  %v38_v23 = vrot.slane %v25_v19, %v37_v18 }
   0x7   :  { %285 = vmatpush1.bf16.msra.mxu0 %v519_v8  ;;  %338 = vmatpush1.bf16.msra.mxu1 %v522_v10  ;;  %v34_v24 = vrot.slane %v25_v19, %v33_v20  ;;  %v42_v25 = vrot.slane %v25_v19, %v41_v21  ;;  %v255_v2 = vrot.slane %v471_v56, %v37_v18 }
   0x8   :  { %116 = vmatprep.mubr.bf16.mxu0 %v525_v1  ;;  %169 = vmatprep.mubr.bf16.mxu1 %v525_v1  ;;  %v251_v5 = vrot.slane %v471_v56, %v33_v20  ;;  %v259_v6 = vrot.slane %v471_v56, %v41_v21 }
   0xe   :  { %456 = vmatmul.mubr.msk.bf16.gmra.mrb[4].mxu0 %vm67_vm0, %v20_v14  ;;  %458 = vmatmul.mubr.msk.bf16.gmra.mrb[4].mxu1 %vm67_vm0, %v20_v14 }
   0xf   :  { %316 = vmatprep.mubr.bf16.mxu0 %v525_v1  ;;  %369 = vmatprep.mubr.bf16.mxu1 %v525_v1 }
  0x16   :  { %476 = vmatmul.mubr.msk.bf16.vlgmr.msra.gmra.mrb[8].mxu0 %vm67_vm0, %v19_v7  ;;  %478 = vmatmul.mubr.msk.bf16.vlgmr.msra.gmra.mrb[8].mxu1 %vm67_vm0, %v19_v7 }
  0x17   :  { %326 = vmatprep.mubr.bf16.mxu0 %v525_v1  ;;  %379 = vmatprep.mubr.bf16.mxu1 %v525_v1  ;;  %v247_v1 = vrot.slane %v471_v56, %v29_v17 }
  0x1e   :  { %477 = vmatmul.mubr.msk.bf16.gmra.mrb[12].mxu0 %vm67_vm0, %v20_v14  ;;  %479 = vmatmul.mubr.msk.bf16.gmra.mrb[12].mxu1 %vm67_vm0, %v20_v14 }
  0xd9   :  { %v108_v26 = vpop.f32.mrb[0].mxu0  ;;  %v161_v27 = vpop.f32.mrb[0].mxu1 }
  0xda   :  { %v109_v28 = vadd.f32 %v108_v26, %v30_v22  ;;  %v162_v29 = vadd.f32 %v161_v27, %v38_v23  ;;  %v110_v30 = vpop.f32.mrb[1].mxu0  ;;  %v163_v31 = vpop.f32.mrb[1].mxu1 }
  0xdb   :  { %v111_v32 = vadd.f32 %v110_v30, %v34_v24  ;;  %v164_v33 = vadd.f32 %v163_v31, %v42_v25  ;;  %v112_v34 = vpop.f32.mrb[2].mxu0  ;;  %v165_v35 = vpop.f32.mrb[2].mxu1 }
  0xdc   :  { %v113_v36 = vadd.f32 %v112_v34, %v30_v22  ;;  %v166_v37 = vadd.f32 %v165_v35, %v38_v23  ;;  %v114_v38 = vpop.f32.mrb[3].mxu0  ;;  %v167_v39 = vpop.f32.mrb[3].mxu1 }
  0xdd   :  { %v496_v40 = vpack.c.bf16 %v111_v32, %v109_v28  ;;  %v497_v41 = vpack.c.bf16 %v164_v33, %v162_v29  ;;  %v115_v42 = vadd.f32 %v114_v38, %v34_v24  ;;  %v168_v43 = vadd.f32 %v167_v39, %v42_v25 }
  0xdf   :  { %228 = vst [vmem:[%s653_s3] sm:$0xff] %v496_v40  ;;  %229 = vst [vmem:[%s653_s3 + $0x8] sm:$0xff] %v497_v41  ;;  %v498_v44 = vpack.c.bf16 %v115_v42, %v113_v36  ;;  %v499_v45 = vpack.c.bf16 %v168_v43, %v166_v37 }
  0xe1   :  { %230 = vst [vmem:[%s653_s3 + $0x10] sm:$0xff] %v498_v44  ;;  %231 = vst [vmem:[%s653_s3 + $0x18] sm:$0xff] %v499_v45  ;;  %v118_v46 = vpop.f32.mrb[4].mxu0  ;;  %v171_v47 = vpop.f32.mrb[4].mxu1 }
  0xe2   :  { %v119_v48 = vadd.f32 %v118_v46, %v30_v22  ;;  %v172_v49 = vadd.f32 %v171_v47, %v38_v23  ;;  %v120_v50 = vpop.f32.mrb[5].mxu0  ;;  %v173_v51 = vpop.f32.mrb[5].mxu1 }
  0xe3   :  { %v121_v52 = vadd.f32 %v120_v50, %v34_v24  ;;  %v174_v53 = vadd.f32 %v173_v51, %v42_v25  ;;  %v122_v54 = vpop.f32.mrb[6].mxu0  ;;  %v175_v55 = vpop.f32.mrb[6].mxu1 }
  0xe4   :  { %v123_v57 = vadd.f32 %v122_v54, %v30_v22  ;;  %v176_v58 = vadd.f32 %v175_v55, %v38_v23  ;;  %v124_v59 = vpop.f32.mrb[7].mxu0  ;;  %v177_v60 = vpop.f32.mrb[7].mxu1 }
  0xe5   :  { %v500_v61 = vpack.c.bf16 %v121_v52, %v119_v48  ;;  %v501_v62 = vpack.c.bf16 %v174_v53, %v172_v49  ;;  %v125_v63 = vadd.f32 %v124_v59, %v34_v24  ;;  %v178_v0 = vadd.f32 %v177_v60, %v42_v25 }
  0xe7   :  { %232 = vst [vmem:[%s653_s3 + $0x20] sm:$0xff] %v500_v61  ;;  %233 = vst [vmem:[%s653_s3 + $0x28] sm:$0xff] %v501_v62  ;;  %v502_v3 = vpack.c.bf16 %v125_v63, %v123_v57  ;;  %v503_v4 = vpack.c.bf16 %v178_v0, %v176_v58 }
  0xe9   :  { %234 = vst [vmem:[%s653_s3 + $0x30] sm:$0xff] %v502_v3  ;;  %235 = vst [vmem:[%s653_s3 + $0x38] sm:$0xff] %v503_v4  ;;  %v318_v7 = vpop.f32.mrb[8].mxu0  ;;  %v371_v8 = vpop.f32.mrb[8].mxu1 }
  0xea   :  { %v319_v9 = vadd.f32 %v318_v7, %v247_v1  ;;  %v372_v10 = vadd.f32 %v371_v8, %v255_v2  ;;  %v320_v11 = vpop.f32.mrb[9].mxu0  ;;  %v373_v12 = vpop.f32.mrb[9].mxu1 }
  0xeb   :  { %v321_v13 = vadd.f32 %v320_v11, %v251_v5  ;;  %v374_v14 = vadd.f32 %v373_v12, %v259_v6  ;;  %v322_v15 = vpop.f32.mrb[10].mxu0  ;;  %v375_v16 = vpop.f32.mrb[10].mxu1 }
  0xec   :  { %v323_v17 = vadd.f32 %v322_v15, %v247_v1  ;;  %v376_v18 = vadd.f32 %v375_v16, %v255_v2  ;;  %v324_v19 = vpop.f32.mrb[11].mxu0  ;;  %v377_v20 = vpop.f32.mrb[11].mxu1 }
  0xed   :  { %v504_v21 = vpack.c.bf16 %v321_v13, %v319_v9  ;;  %v505_v22 = vpack.c.bf16 %v374_v14, %v372_v10  ;;  %v325_v23 = vadd.f32 %v324_v19, %v251_v5  ;;  %v378_v24 = vadd.f32 %v377_v20, %v259_v6 }
  0xef   :  { %488 = vst [vmem:[%s653_s3 + $0x40] sm:$0xff] %v504_v21  ;;  %489 = vst [vmem:[%s653_s3 + $0x48] sm:$0xff] %v505_v22  ;;  %v506_v25 = vpack.c.bf16 %v325_v23, %v323_v17  ;;  %v507_v26 = vpack.c.bf16 %v378_v24, %v376_v18 }
  0xf1   :  { %490 = vst [vmem:[%s653_s3 + $0x50] sm:$0xff] %v506_v25  ;;  %491 = vst [vmem:[%s653_s3 + $0x58] sm:$0xff] %v507_v26  ;;  %v328_v27 = vpop.f32.mrb[12].mxu0  ;;  %v381_v28 = vpop.f32.mrb[12].mxu1 }
  0xf2   :  { %v329_v29 = vadd.f32 %v328_v27, %v247_v1  ;;  %v382_v30 = vadd.f32 %v381_v28, %v255_v2  ;;  %v330_v31 = vpop.f32.mrb[13].mxu0  ;;  %v383_v32 = vpop.f32.mrb[13].mxu1 }
  0xf3   :  { %v331_v33 = vadd.f32 %v330_v31, %v251_v5  ;;  %v384_v34 = vadd.f32 %v383_v32, %v259_v6  ;;  %v332_v35 = vpop.f32.mrb[14].mxu0  ;;  %v385_v36 = vpop.f32.mrb[14].mxu1 }
  0xf4   :  { %v333_v37 = vadd.f32 %v332_v35, %v247_v1  ;;  %v386_v38 = vadd.f32 %v385_v36, %v255_v2  ;;  %v334_v39 = vpop.f32.mrb[15].mxu0  ;;  %v387_v40 = vpop.f32.mrb[15].mxu1 }
  0xf5   :  { %v508_v41 = vpack.c.bf16 %v331_v33, %v329_v29  ;;  %v509_v42 = vpack.c.bf16 %v384_v34, %v382_v30  ;;  %v335_v43 = vadd.f32 %v334_v39, %v251_v5  ;;  %v388_v44 = vadd.f32 %v387_v40, %v259_v6 }
  0xf7   :  { %492 = vst [vmem:[%s653_s3 + $0x60] sm:$0xff] %v508_v41  ;;  %493 = vst [vmem:[%s653_s3 + $0x68] sm:$0xff] %v509_v42  ;;  %v510_v45 = vpack.c.bf16 %v335_v43, %v333_v37  ;;  %v511_v46 = vpack.c.bf16 %v388_v44, %v386_v38 }
  0xf9   :  { %494 = vst [vmem:[%s653_s3 + $0x70] sm:$0xff] %v510_v45  ;;  %495 = vst [vmem:[%s653_s3 + $0x78] sm:$0xff] %v511_v46 }

// kernel: listener_forward.8
= control target key start
LH: loop header
LB: loop body
LE: loop exit
PB: predicated region body
PF: predicated region fallthrough
CT: control target
= control target key end

     0   :  { %s2380_s12 = smov 0   ;;  %s2382_s13 = smov 0   ;;  %s3138_s0 = inlined_call_operand.vmem [shape: bf16[2,16,2,512], index: 0, kind: input, shape index: {}]   ;;  %s3139_s1 = inlined_call_operand.vmem [shape: s32[2,1], index: 1, kind: input, shape index: {}]   ;;  %s3140_s2 = inlined_call_operand.vmem [shape: bf16[2,128,512], index: 2, kind: input, shape index: {}]   ;;  %s3141_s3 = inlined_call_operand.vmem [shape: bf16[16,2,256], index: 3, kind: output, shape index: {}]  }
   0x1   :  { %s2384_s14 = smov 0   ;;  %s2386_s15 = smov 0  }
   0x2   :  { %s2388_s16 = smov 0   ;;  %s2390_s17 = smov 0  }
   0x3   :  { %s2392_s18 = smov 0  }
   0x4 LB: > { %s22_s19 = sadd.s32 1, %s2347_s16  ;;  %s25_s20 = sadd.s32 1, %s2351_s17  ;;  %s2355_s18 = sphi %s2392_s18, %s13_s18   ;;  %s2351_s17 = sphi %s2390_s17, %s3148_s17   ;;  %s2347_s16 = sphi %s2388_s16, %s3147_s16   ;;  %s2343_s15 = sphi %s2386_s15, %s3146_s15   ;;  %s2339_s14 = sphi %s2384_s14, %s3145_s14   ;;  %s2335_s13 = sphi %s2382_s13, %s3144_s13   ;;  %s2331_s12 = sphi %s2380_s12, %s3143_s12  }
   0x5   : > { %p23_p0 = scmp.ge.s32.totalorder %s22_s19, 2  ;;  %s1929_s21 = sadd.s32 4294967295, %s2355_s18  }
   0x6   : > { %s1933_s22 = sshll.u32 %s2347_s16, 1  ;;  %p135_p2 = scmp.ne.s32.totalorder %s2335_s13, %s2331_s12 }
   0x7   : > { %s3150_s19 = smov (%p23_p0, %s22_s19), 0  ;;  %s3152_s20 = smov (!%p23_p0, %s25_s20), %s2351_s17 }
   0x8   : > { %s113_s23 = ssub.s32 1, %s1933_s22  ;;  %s1934_s24 = sshll.u32 %s3150_s19, 1 }
   0x9   : > { %p27_p1 = scmp.ge.s32.totalorder %s3152_s20, 2  ;;  %s114_s25 = smul.u32 %s2351_s17, %s113_s23 }
   0xa   : > { %s117_s26 = ssub.s32 1, %s1934_s24  ;;  %p136_p3 = scmp.eq.s32.totalorder %s1929_s21, 3 }
   0xb   : > { %s3154_s20 = smov (%p27_p1, %s3152_s20), 0  ;;  %s115_s27 = sadd.s32 %s2347_s16, %s114_s25 }
   0xc   : > { %s118_s28 = smul.u32 %s117_s26, %s3154_s20  ;;  %s121_s29 = ssub.s32 %s2351_s17, %s3154_s20 }
   0xd   : > { %p2432_p4 = por %p136_p3, %p135_p2  ;;  %p1937_p5 = scmp.ge.s32.totalorder %s2355_s18, 1 }
   0xe   : > { %s119_s4 = sadd.s32 %s118_s28, %s3150_s19  ;;  %p192_p6 = scmp.lt.s32.totalorder %s2355_s18, 5 }
   0xf   : > { %s120_s5 = ssub.s32 %s115_s27, %s119_s4  ;;  %s125_s6 = sadd.s32 1, %s2335_s13 }
  0x10   : > { %s122_s7 = sor.u32 %s121_s29, %s120_s5  ;;  %p193_p7 = pnand %p1937_p5, %p192_p6 }
  0x11   : > { %p123_p8 = scmp.eq.s32.totalorder %s122_s7, 0  ;;  %s225_s9 = sand.u32 (!%p193_p7), 1, %s2331_s12  }
  0x12   : > { %196 = sbr.rel (%p193_p7) target bundleno = 2234 (0x8ba), region = 32  ;;  %s1939_s10 = sshll.u32 (!%p193_p7), %s2339_s14, 1 }
  0x13   : > { %s2441_s8 = scalar_select %p123_p8, %s2335_s13, %s125_s6  }
  0x14   : > { %s1938_s11 = sshll.u32 (!%p193_p7), %s225_s9, 3  ;;  %s229_s21 = ssub.s32 (!%p193_p7), 1, %s1939_s10 }
  0x15   : > { %s230_s22 = smul.u32 (!%p193_p7), %s2343_s15, %s229_s21  ;;  %p233_p9 = scmp.lt.s32.totalorder (!%p193_p7), %s2343_s15, 1 }
  0x16   : > { %s2466_s21 = scalar_lea.vmem (!%p193_p7), [#allocation4], %s1938_s11  ;;  %p1945_p11 = scmp.ne.s32.totalorder (!%p193_p7), %s2339_s14, 0 }
  0x17   : > { %s2448_s23 = sadd.s32 (!%p193_p7), %s2339_s14, %s230_s22 }
  0x18   : > { %s2451_s24 = sshll.u32 (!%p193_p7), %s2448_s23, 3 }
  0x19   : > { %s234_s25 = scalar_select %p233_p9, %s2343_s15, 1 }
  0x1a   : > { %p235_p10 = scmp.lt.s32.totalorder %s2451_s24, 15  ;;  %260 = sbr.rel (%p1945_p11) target bundleno = 33 (0x21), region = 36  ;;  %v2357_v0 = vmov (!%p1945_p11), 0.0  }
  0x1b   : > { %s1942_s26 = sshll.u32 %s234_s25, 6  ;;  %s2030_s27 = sshll.u32 %s234_s25, 8  ;;  %261 = vst [vmem:[#allocation2] sm:$0x3] (!%p1945_p11), %v2357_v0  ;;  %262 = vst [vmem:[#allocation3] sm:$0x3] (!%p1945_p11), %v2357_v0 }
  0x1c   : > { %s236_s28 = scalar_select %p235_p10, %s2451_s24, 15 }
  0x1d   : > { %s2459_s12 = scalar_lea.vmem %s3140_s2, %s2030_s27 }
  0x1e   : > { %s1941_s5 = sshll.u32 %s236_s28, 2 }
  0x1f   : > { %s239_s6 = sadd.s32 %s1942_s26, %s1941_s5 }
  0x20   : > { %s2464_s10 = scalar_lea.vmem %s3138_s0, %s239_s6 }
  0x21 PF: > { %v2470_v1 = vld [vmem:[%s2459_s12 + $0x4] ss:$16 sps:$4 sm:$0xff]   ;;  %v2473_v2 = vld [vmem:[%s2459_s12 + $0xc] ss:$16 sps:$4 sm:$0xff]   ;;  %v2358_v3 = vmov 0   ;;  %s619_s14 = smul.u32 5, %s2343_s15  ;;  %v560_v47 = vlaneseq }
  0x22   : > { %501 = vmatprep.mubr.bf16.mxu0 %v2358_v3  ;;  %542 = vmatprep.mubr.bf16.mxu1 %v2358_v3  ;;  %v2479_v4 = vld [vmem:[%s2459_s12] ss:$16 sps:$4 sm:$0xff]   ;;  %v2482_v5 = vld [vmem:[%s2459_s12 + $0x8] ss:$16 sps:$4 sm:$0xff]   ;;  %v2487_v6 = vld [vmem:[%s2459_s12 + $0x24] ss:$16 sps:$4 sm:$0xff]  }
  0x23   : > { %469 = vmatprep.subr.bf16.mxu0 %v2470_v1  ;;  %2091 = vset.pattern.permute.xlu0 %v2358_v3  ;;  %v2493_v7 = vld [vmem:[%s2459_s12 + $0x2c] ss:$16 sps:$4 sm:$0xff]   ;;  %v2496_v8 = vld [vmem:[%s2459_s12 + $0x20] ss:$16 sps:$4 sm:$0xff]   ;;  %v2500_v9 = vld [vmem:[%s2459_s12 + $0x28] ss:$16 sps:$4 sm:$0xff]  }
  0x24   : > { %510 = vmatprep.subr.bf16.mxu1 %v2473_v2  ;;  %2092 = vset.pattern.permute.xlu1 %v2358_v3  ;;  %v2504_v10 = vld [vmem:[%s2459_s12 + $0x44] ss:$16 sps:$4 sm:$0xff]   ;;  %v2507_v11 = vld [vmem:[%s2459_s12 + $0x4c] ss:$16 sps:$4 sm:$0xff]   ;;  %v2510_v12 = vld [vmem:[%s2459_s12 + $0x40] ss:$16 sps:$4 sm:$0xff]  }
  0x25   : > { %470 = vmatpush1.bf16.msra.mxu0 %v2479_v4  ;;  %511 = vmatpush1.bf16.msra.mxu1 %v2482_v5  ;;  %v2513_v13 = vld [vmem:[%s2459_s12 + $0x48] ss:$16 sps:$4 sm:$0xff]   ;;  %v2518_v14 = vld [vmem:[%s2459_s12 + $0x64] ss:$16 sps:$4 sm:$0xff]   ;;  %v2523_v15 = vld [vmem:[%s2459_s12 + $0x6c] ss:$16 sps:$4 sm:$0xff]  }
  0x26   : > { %471 = vmatprep.subr.bf16.mxu0 %v2487_v6  ;;  %512 = vmatprep.subr.bf16.mxu1 %v2493_v7  ;;  %v2526_v16 = vld [vmem:[%s2459_s12 + $0x60] ss:$16 sps:$4 sm:$0xff]   ;;  %v2532_v17 = vld [vmem:[%s2459_s12 + $0x68] ss:$16 sps:$4 sm:$0xff]   ;;  %v2535_v18 = vld [vmem:[%s2459_s12 + $0x84] ss:$16 sps:$4 sm:$0xff]  }
  0x27   : > { %s303_s11 = smul.u32 7, %s2343_s15  ;;  %v2541_v19 = vld [vmem:[%s2459_s12 + $0x8c] ss:$16 sps:$4 sm:$0xff]   ;;  %v2544_v20 = vld [vmem:[%s2459_s12 + $0x80] ss:$16 sps:$4 sm:$0xff]   ;;  %s620_s22 = sadd.s32 1, %s619_s14 }
  0x28   : > { %v2547_v21 = vld [vmem:[%s2459_s12 + $0x88] ss:$16 sps:$4 sm:$0xff]   ;;  %v2554_v22 = vld [vmem:[%s2459_s12 + $0xa4] ss:$16 sps:$4 sm:$0xff]   ;;  %v2562_v23 = vld [vmem:[%s2459_s12 + $0xac] ss:$16 sps:$4 sm:$0xff]   ;;  %s762_s26 = sadd.s32 %s2451_s24, %s620_s22 }
  0x29   : > { %472 = vmatpush1.bf16.msra.mxu0 %v2496_v8  ;;  %513 = vmatpush1.bf16.msra.mxu1 %v2500_v9  ;;  %s605_s25 = sadd.s32 %s2451_s24, %s303_s11  ;;  %s2566_s27 = ssub.s32 4, %s2343_s15  ;;  %v2572_v25 = vld [vmem:[%s2459_s12 + $0xa0] ss:$16 sps:$4 sm:$0xff]   ;;  %v2575_v26 = vld [vmem:[%s2459_s12 + $0xa8] ss:$16 sps:$4 sm:$0xff]   ;;  %v763_v30 = vstv %s762_s26  ;;  %v561_v49 = vshrl.u32 %v560_v47, 7 }
  0x2a   : > { %473 = vmatprep.subr.bf16.mxu0 %v2504_v10  ;;  %514 = vmatprep.subr.bf16.mxu1 %v2507_v11  ;;  %v606_v24 = vstv %s605_s25  ;;  %s1402_s28 = smul.u32 4294967291, %s2343_s15  ;;  %v2580_v27 = vld [vmem:[%s2459_s12 + $0xc4] ss:$16 sps:$4 sm:$0xff]   ;;  %v2583_v28 = vld [vmem:[%s2459_s12 + $0xcc] ss:$16 sps:$4 sm:$0xff]   ;;  %s1231_s5 = sadd.s32 %s2451_s24, %s2566_s27 }
  0x2b   : > { %v2588_v29 = vld [vmem:[%s3139_s1] sm:$0x3]  ;;  %v2602_v33 = vld [vmem:[%s2459_s12 + $0xc8] ss:$16 sps:$4 sm:$0xff]   ;;  %v2608_v34 = vld [vmem:[%s2459_s12 + $0xe4] ss:$16 sps:$4 sm:$0xff]   ;;  %v1232_v36 = vstv %s1231_s5  ;;  %s617_s25 = scalar_lea.vmem %s2466_s21, %s303_s11 [#allocation4] }
  0x2c   : > { %vm607_vm0 = vcmp.lt.s32.totalorder %v606_v24, %v2588_v29  ;;  %s1403_s6 = sadd.s32 6, %s1402_s28  ;;  %v2599_v32 = vld [vmem:[%s2459_s12 + $0xc0] ss:$16 sps:$4 sm:$0xff]   ;;  %vm764_vm1 = vcmp.lt.s32.totalorder %v763_v30, %v2588_v29  ;;  %v2611_v35 = vld [vmem:[%s2459_s12 + $0xec] ss:$16 sps:$4 sm:$0xff]   ;;  %vm1233_vm2 = vcmp.lt.s32.totalorder %v1232_v36, %v2588_v29  ;;  %s1948_s9 = smul.u32 28, %s2343_s15 }
  0x2d   : > { %474 = vmatpush1.bf16.msra.mxu0 %v2510_v12  ;;  %515 = vmatpush1.bf16.msra.mxu1 %v2513_v13  ;;  %v608_v31 = vsel %vm607_vm0, 1, %v2358_v3  ;;  %s1545_s7 = sadd.s32 %s2451_s24, %s1403_s6  ;;  %v765_v37 = vsel %vm764_vm1, 1, %v2358_v3  ;;  %v2618_v38 = vld [vmem:[%s2459_s12 + $0xe0] ss:$16 sps:$4 sm:$0xff]   ;;  %v2621_v39 = vld [vmem:[%s2459_s12 + $0xe8] ss:$16 sps:$4 sm:$0xff]  }
  0x2e   : > { %475 = vmatprep.subr.bf16.mxu0 %v2518_v14  ;;  %516 = vmatprep.subr.bf16.mxu1 %v2523_v15  ;;  %v2623_v40 = vld [vmem:[#allocation2] sm:$0x3]  ;;  %v1546_v41 = vstv %s1545_s7  ;;  %v1234_v43 = vsel %vm1233_vm2, 1, %v2358_v3  ;;  %v2359_v45 = vmov 1983009808   ;;  %s305_s22 = scalar_lea.vmem %s2464_s10, %s1948_s9  ;;  %s776_s11 = smul.u32 3, %s2343_s15 }
  0x2f   : > { %610 = vperm.xlu0 %2091, %v608_v31   ;;  %v308_v42 = vpack.c.bf16 %v2623_v40, %v2623_v40  ;;  %vm1547_vm3 = vcmp.lt.s32.totalorder %v1546_v41, %v2588_v29  ;;  %v558_v46 = vunpack.c.l.s4 %v2359_v45  ;;  %v306_v54 = vld [vmem:[%s305_s22] sm:$0xf]  ;;  %s933_s26 = sadd.s32 3, %s2343_s15  ;;  %s1245_s4 = smul.u32 4294967293, %s2343_s15 }
  0x30   : > { %v1548_v44 = vsel %vm1547_vm3, 1, %v2358_v3  ;;  %v307_v63 = vunpack.c.l.bf16 %v306_v54  ;;  %s1075_s29 = sadd.s32 %s2451_s24, %s933_s26  ;;  %s777_s5 = sadd.s32 2, %s776_s11 }
  0x31   : > { %476 = vmatpush1.bf16.msra.mxu0 %v2526_v16  ;;  %517 = vmatpush1.bf16.msra.mxu1 %v2532_v17  ;;  %v559_v48 = vunpack.c.0.s8 %v558_v46  ;;  %s919_s6 = sadd.s32 %s2451_s24, %s777_s5  ;;  %s1246_s7 = sadd.s32 5, %s1245_s4 }
  0x32   : > { %477 = vmatprep.subr.bf16.mxu0 %v2535_v18  ;;  %518 = vmatprep.subr.bf16.mxu1 %v2541_v19  ;;  %s1388_s9 = sadd.s32 %s2451_s24, %s1246_s7  ;;  %s1559_s22 = smul.u32 4294967289, %s2343_s15 }
  0x33   : > { %767 = vperm.xlu0 %2091, %v765_v37   ;;  %v2673_v52 = vsub.s32 %v559_v48, %v561_v49  ;;  %s1848_s7 = scalar_lea.vmem %s2466_s21, %s776_s11 [#allocation4]  ;;  %s1996_s11 = sshll.u32 %s2343_s15, 2 }
  0x35   : > { %478 = vmatpush1.bf16.msra.mxu0 %v2544_v20  ;;  %519 = vmatpush1.bf16.msra.mxu1 %v2547_v21 }
  0x36   : > { %479 = vmatprep.subr.bf16.mxu0 %v2554_v22  ;;  %520 = vmatprep.subr.bf16.mxu1 %v2562_v23 }
  0x37   : > { %1236 = vperm.xlu0 %2091, %v1234_v43  }
  0x39   : > { %480 = vmatpush1.bf16.msra.mxu0 %v2572_v25  ;;  %521 = vmatpush1.bf16.msra.mxu1 %v2575_v26 }
  0x3a   : > { %481 = vmatprep.subr.bf16.mxu0 %v2580_v27  ;;  %522 = vmatprep.subr.bf16.mxu1 %v2583_v28 }
  0x3b   : > { %1550 = vperm.xlu0 %2091, %v1548_v44  }
  0x3d   : > { %482 = vmatpush1.bf16.msra.mxu0 %v2599_v32  ;;  %523 = vmatpush1.bf16.msra.mxu1 %v2602_v33 }
  0x3e   : > { %483 = vmatprep.subr.bf16.mxu0 %v2608_v34  ;;  %524 = vmatprep.subr.bf16.mxu1 %v2611_v35 }
  0x41   : > { %484 = vmatpush1.bf16.msra.mxu0 %v2618_v38  ;;  %525 = vmatpush1.bf16.msra.mxu1 %v2621_v39 }
  0x42   : > { %626 = vmatprep.subr.bf16.mxu0 %v2470_v1  ;;  %667 = vmatprep.subr.bf16.mxu1 %v2473_v2 }
  0x44   : > { %502 = vmatmul.mubr.bf16.vlgmr.msra.gmra.mrb[0].mxu0 %v308_v42  ;;  %543 = vmatmul.mubr.bf16.vlgmr.msra.gmra.mrb[0].mxu1 %v308_v42 }
  0x45   : > { %627 = vmatpush1.bf16.msra.mxu0 %v2479_v4  ;;  %668 = vmatpush1.bf16.msra.mxu1 %v2482_v5 }
  0x46   : > { %628 = vmatprep.subr.bf16.mxu0 %v2487_v6  ;;  %669 = vmatprep.subr.bf16.mxu1 %v2493_v7 }
  0x47   : > { %658 = vmatprep.mubr.bf16.mxu0 %v2358_v3  ;;  %699 = vmatprep.mubr.bf16.mxu1 %v2358_v3 }
  0x49   : > { %629 = vmatpush1.bf16.msra.mxu0 %v2496_v8  ;;  %670 = vmatpush1.bf16.msra.mxu1 %v2500_v9 }
  0x4a   : > { %630 = vmatprep.subr.bf16.mxu0 %v2504_v10  ;;  %671 = vmatprep.subr.bf16.mxu1 %v2507_v11 }
  0x4d   : > { %631 = vmatpush1.bf16.msra.mxu0 %v2510_v12  ;;  %672 = vmatpush1.bf16.msra.mxu1 %v2513_v13 }
  0x4e   : > { %632 = vmatprep.subr.bf16.mxu0 %v2518_v14  ;;  %673 = vmatprep.subr.bf16.mxu1 %v2523_v15 }
  0x51   : > { %633 = vmatpush1.bf16.msra.mxu0 %v2526_v16  ;;  %674 = vmatpush1.bf16.msra.mxu1 %v2532_v17 }
  0x52   : > { %634 = vmatprep.subr.bf16.mxu0 %v2535_v18  ;;  %675 = vmatprep.subr.bf16.mxu1 %v2541_v19 }
  0x55   : > { %635 = vmatpush1.bf16.msra.mxu0 %v2544_v20  ;;  %676 = vmatpush1.bf16.msra.mxu1 %v2547_v21 }
  0x56   : > { %636 = vmatprep.subr.bf16.mxu0 %v2554_v22  ;;  %677 = vmatprep.subr.bf16.mxu1 %v2562_v23 }
  0x59   : > { %637 = vmatpush1.bf16.msra.mxu0 %v2572_v25  ;;  %678 = vmatpush1.bf16.msra.mxu1 %v2575_v26 }
  0x5a   : > { %638 = vmatprep.subr.bf16.mxu0 %v2580_v27  ;;  %679 = vmatprep.subr.bf16.mxu1 %v2583_v28 }
  0x5d   : > { %639 = vmatpush1.bf16.msra.mxu0 %v2599_v32  ;;  %680 = vmatpush1.bf16.msra.mxu1 %v2602_v33 }
  0x5e   : > { %640 = vmatprep.subr.bf16.mxu0 %v2608_v34  ;;  %681 = vmatprep.subr.bf16.mxu1 %v2611_v35 }
  0x61   : > { %641 = vmatpush1.bf16.msra.mxu0 %v2618_v38  ;;  %682 = vmatpush1.bf16.msra.mxu1 %v2621_v39 }
  0x62   : > { %783 = vmatprep.subr.bf16.mxu0 %v2470_v1  ;;  %824 = vmatprep.subr.bf16.mxu1 %v2473_v2 }
 0x117   : > { %v503_v50 = vpop.f32.mrb[0].mxu0  ;;  %v544_v51 = vpop.f32.mrb[0].mxu1 }
 0x118   : > { %v505_v53 = vpop.f32.mrb[1].mxu0  ;;  %v546_v55 = vpop.f32.mrb[1].mxu1 }
 0x119   : > { %v555_v56 = vcombine.low %v503_v50, %v505_v53  ;;  %v556_v57 = vcombine.low %v544_v51, %v546_v55  ;;  %v507_v58 = vpop.f32.mrb[2].mxu0  ;;  %v548_v59 = vpop.f32.mrb[2].mxu1  ;;  %v302_v50 = vld [vmem:[#allocation3] sm:$0x3] }
 0x11a   : > { %v508_v60 = vpop.f32.mrb[3].mxu0  ;;  %v549_v61 = vpop.f32.mrb[3].mxu1 }
 0x11b   : > { %v563_v62 = vrot.slane %v555_v56, %v2673_v52  ;;  %v570_v0 = vrot.slane %v556_v57, %v2673_v52  ;;  %v611_v53 = vpop.permute.xlu0 %610 }
 0x11c   : > { %vm612_vm4 = vcmp.eq.s32.totalorder %v611_v53, 1 }
 0x11d   : > { %v571_v24 = vcombine.low %v563_v62, %v570_v0 }
 0x11f   : > { %v573_v30 = vadd.f32 %v571_v24, %v307_v63 }
 0x121   : > { %v1981_v31 = vmul.f32 -1.442695, %v573_v30  ;;  %v581_v36 = vrot.slane %v573_v30, 2  ;;  %v592_v41 = vrot.slane %v573_v30, 6  ;;  %v589_v44 = vrot.slane %v573_v30, 4 }
 0x123   : > { %2141 = vpow2.f32 %v1981_v31  ;;  %v1982_v37 = vmul.f32 -1.442695, %v581_v36  ;;  %v1983_v42 = vmul.f32 -1.442695, %v592_v41  ;;  %v920_v31 = vstv %s919_s6 }
 0x124   : > { %vm921_vm5 = vcmp.lt.s32.totalorder %v920_v31, %v2588_v29 }
 0x125   : > { %2143 = vpow2.f32 %v1982_v37  ;;  %v922_v36 = vsel %vm921_vm5, 1, %v2358_v3  ;;  %v1389_v37 = vstv %s1388_s9  ;;  %s1851_s9 = scalar_lea.vmem %s2464_s10, %s1996_s11 }
 0x126   : > { %2145 = vpow2.f32 %v1983_v42  ;;  %924 = vperm.xlu1 %2092, %v922_v36   ;;  %vm1390_vm7 = vcmp.lt.s32.totalorder %v1389_v37, %v2588_v29 }
 0x12d   : > { %v2142_v43 = vpop.eup %2141 }
 0x12e   : > { %v577_v45 = vadd.f32 1.0, %v2142_v43  ;;  %v1391_v43 = vsel %vm1390_vm7, 1, %v2358_v3 }
 0x12f   : > { %v2144_v46 = vpop.eup %2143 }
 0x130   : > { %2147 = vrcp.f32 %v577_v45  ;;  %v586_v47 = vadd.f32 1.0, %v2144_v46  ;;  %v2146_v48 = vpop.eup %2145 }
 0x131   : > { %2149 = vtanh.f32 %v589_v44  ;;  %v597_v55 = vadd.f32 1.0, %v2146_v48 }
 0x132   : > { %2151 = vrcp.f32 %v586_v47 }
 0x133   : > { %2153 = vrcp.f32 %v597_v55 }
 0x13a   : > { %v2148_v49 = vpop.eup %2147 }
 0x13b   : > { %v2150_v51 = vpop.eup %2149 }
 0x13c   : > { %v2152_v54 = vpop.eup %2151  ;;  %v601_v57 = vmul.f32 %v2150_v51, %v2148_v49 }
 0x13d   : > { %v600_v56 = vmul.f32 %v2152_v54, %v302_v50  ;;  %v2154_v60 = vpop.eup %2153 }
 0x13f   : > { %v602_v58 = vadd.f32 %v601_v57, %v600_v56 }
 0x141   : > { %2155 = vtanh.f32 %v602_v58  ;;  %v2677_v59 = vsel %vm612_vm4, %v602_v58, %v302_v50 }
 0x14b   : > { %v2156_v61 = vpop.eup %2155 }
 0x14c   : > { %v604_v62 = vmul.f32 %v2156_v61, %v2154_v60 }
 0x14e   : > { %v2683_v63 = vsel %vm612_vm4, %v604_v62, %v2623_v40  ;;  %v615_v0 = vsel %vm612_vm4, %v604_v62, 0.0  ;;  %v1076_v40 = vstv %s1075_s29  ;;  %s1984_s29 = smul.u32 20, %s2343_s15 }
 0x14f   : > { %v616_v24 = vpack.c.bf16 %v615_v0, %v615_v0  ;;  %v625_v30 = vpack.c.bf16 %v2683_v63, %v2683_v63  ;;  %vm1077_vm6 = vcmp.lt.s32.totalorder %v1076_v40, %v2588_v29 }
 0x150   : > { %v1078_v41 = vsel %vm1077_vm6, 1, %v2358_v3  ;;  %s1838_s5 = scalar_lea.vmem %s2464_s10, %s1984_s29 }
 0x151   : > { %618 = vst [vmem:[%s617_s25] sm:$0x1] %v616_v24  ;;  %659 = vmatmul.mubr.bf16.vlgmr.msra.gmra.mrb[4].mxu0 %v625_v30  ;;  %700 = vmatmul.mubr.bf16.vlgmr.msra.gmra.mrb[4].mxu1 %v625_v30  ;;  %s1560_s25 = sadd.s32 7, %s1559_s22  ;;  %v1985_v48 = vld [vmem:[%s1838_s5 + $0x4] sm:$0xf]  ;;  %s1243_s5 = scalar_lea.vmem %s2466_s21, %s2566_s27 [#allocation4] }
 0x152   : > { %784 = vmatpush1.bf16.msra.mxu0 %v2479_v4  ;;  %825 = vmatpush1.bf16.msra.mxu1 %v2482_v5  ;;  %s1702_s26 = sadd.s32 %s2451_s24, %s1560_s25  ;;  %s1841_s24 = scalar_lea.vmem %s2466_s21, %s619_s14 [#allocation4] }
 0x153   : > { %785 = vmatprep.subr.bf16.mxu0 %v2487_v6  ;;  %826 = vmatprep.subr.bf16.mxu1 %v2493_v7  ;;  %v1703_v42 = vstv %s1702_s26  ;;  %s1990_s14 = smul.u32 12, %s2343_s15  ;;  %s1853_s25 = scalar_lea.vmem %s2466_s21, %s2343_s15 [#allocation4] }
 0x154   : > { %815 = vmatprep.mubr.bf16.mxu0 %v2358_v3  ;;  %856 = vmatprep.mubr.bf16.mxu1 %v2358_v3  ;;  %vm1704_vm8 = vcmp.lt.s32.totalorder %v1703_v42, %v2588_v29  ;;  %v624_v29 = vunpack.c.l.bf16 %v1985_v48  ;;  %s2002_s26 = sshll.u32 %s2566_s27, 2  ;;  %s2006_s27 = smul.u32 4294967284, %s2343_s15 }
 0x155   : > { %1080 = vperm.xlu1 %2092, %v1078_v41   ;;  %v1705_v44 = vsel %vm1704_vm8, 1, %v2358_v3  ;;  %s1845_s6 = scalar_lea.vmem %s2464_s10, %s1990_s14  ;;  %s1091_s29 = scalar_lea.vmem %s2464_s10, %s2002_s26 }
 0x156   : > { %786 = vmatpush1.bf16.msra.mxu0 %v2496_v8  ;;  %827 = vmatpush1.bf16.msra.mxu1 %v2500_v9 }
 0x157   : > { %787 = vmatprep.subr.bf16.mxu0 %v2504_v10  ;;  %828 = vmatprep.subr.bf16.mxu1 %v2507_v11 }
 0x159   : > { %1393 = vperm.xlu1 %2092, %v1391_v43  }
 0x15a   : > { %788 = vmatpush1.bf16.msra.mxu0 %v2510_v12  ;;  %829 = vmatpush1.bf16.msra.mxu1 %v2513_v13 }
 0x15b   : > { %789 = vmatprep.subr.bf16.mxu0 %v2518_v14  ;;  %830 = vmatprep.subr.bf16.mxu1 %v2523_v15 }
 0x15d   : > { %1707 = vperm.xlu1 %2092, %v1705_v44  }
 0x15e   : > { %790 = vmatpush1.bf16.msra.mxu0 %v2526_v16  ;;  %831 = vmatpush1.bf16.msra.mxu1 %v2532_v17 }
 0x15f   : > { %791 = vmatprep.subr.bf16.mxu0 %v2535_v18  ;;  %832 = vmatprep.subr.bf16.mxu1 %v2541_v19 }
 0x162   : > { %792 = vmatpush1.bf16.msra.mxu0 %v2544_v20  ;;  %833 = vmatpush1.bf16.msra.mxu1 %v2547_v21 }
 0x163   : > { %793 = vmatprep.subr.bf16.mxu0 %v2554_v22  ;;  %834 = vmatprep.subr.bf16.mxu1 %v2562_v23 }
 0x166   : > { %794 = vmatpush1.bf16.msra.mxu0 %v2572_v25  ;;  %835 = vmatpush1.bf16.msra.mxu1 %v2575_v26 }
 0x167   : > { %795 = vmatprep.subr.bf16.mxu0 %v2580_v27  ;;  %836 = vmatprep.subr.bf16.mxu1 %v2583_v28 }
 0x16a   : > { %796 = vmatpush1.bf16.msra.mxu0 %v2599_v32  ;;  %837 = vmatpush1.bf16.msra.mxu1 %v2602_v33 }
 0x16b   : > { %797 = vmatprep.subr.bf16.mxu0 %v2608_v34  ;;  %838 = vmatprep.subr.bf16.mxu1 %v2611_v35 }
 0x16e   : > { %798 = vmatpush1.bf16.msra.mxu0 %v2618_v38  ;;  %839 = vmatpush1.bf16.msra.mxu1 %v2621_v39 }
 0x16f   : > { %939 = vmatprep.subr.bf16.mxu0 %v2470_v1  ;;  %980 = vmatprep.subr.bf16.mxu1 %v2473_v2 }
 0x224   : > { %v660_v45 = vpop.f32.mrb[4].mxu0  ;;  %v701_v46 = vpop.f32.mrb[4].mxu1 }
 0x225   : > { %v662_v47 = vpop.f32.mrb[5].mxu0  ;;  %v703_v49 = vpop.f32.mrb[5].mxu1 }
 0x226   : > { %v712_v50 = vcombine.low %v660_v45, %v662_v47  ;;  %v713_v51 = vcombine.low %v701_v46, %v703_v49  ;;  %v664_v53 = vpop.f32.mrb[6].mxu0  ;;  %v705_v54 = vpop.f32.mrb[6].mxu1 }
 0x227   : > { %v665_v55 = vpop.f32.mrb[7].mxu0  ;;  %v706_v56 = vpop.f32.mrb[7].mxu1 }
 0x228   : > { %v720_v57 = vrot.slane %v712_v50, %v2673_v52  ;;  %v727_v58 = vrot.slane %v713_v51, %v2673_v52  ;;  %v768_v50 = vpop.permute.xlu0 %767 }
 0x229   : > { %vm769_vm9 = vcmp.eq.s32.totalorder %v768_v50, 1 }
 0x22a   : > { %v728_v60 = vcombine.low %v720_v57, %v727_v58 }
 0x22c   : > { %v730_v61 = vadd.f32 %v728_v60, %v624_v29 }
 0x22e   : > { %v1986_v62 = vmul.f32 -1.442695, %v730_v61  ;;  %v738_v0 = vrot.slane %v730_v61, 2  ;;  %v749_v30 = vrot.slane %v730_v61, 6  ;;  %v746_v36 = vrot.slane %v730_v61, 4 }
 0x230   : > { %2157 = vpow2.f32 %v1986_v62  ;;  %v1987_v24 = vmul.f32 -1.442695, %v738_v0  ;;  %v1988_v40 = vmul.f32 -1.442695, %v749_v30  ;;  %v1991_v62 = vld [vmem:[%s1845_s6 + $0x8] sm:$0xf]  ;;  %s1870_s6 = scalar_lea.vmem %s2466_s21, %s1402_s28 [#allocation4] }
 0x231   : > { %s2031_s28 = sshll.u32 (%p2432_p4), %s2448_s23, 4 }
 0x232   : > { %2159 = vpow2.f32 %v1987_v24 }
 0x233   : > { %2161 = vpow2.f32 %v1988_v40 }
 0x23a   : > { %v2158_v31 = vpop.eup %2157 }
 0x23b   : > { %v734_v37 = vadd.f32 1.0, %v2158_v31 }
 0x23c   : > { %v2160_v41 = vpop.eup %2159 }
 0x23d   : > { %2163 = vrcp.f32 %v734_v37  ;;  %v743_v42 = vadd.f32 1.0, %v2160_v41  ;;  %v2162_v43 = vpop.eup %2161 }
 0x23e   : > { %2165 = vtanh.f32 %v746_v36  ;;  %v754_v47 = vadd.f32 1.0, %v2162_v43 }
 0x23f   : > { %2167 = vrcp.f32 %v743_v42  ;;  %v781_v42 = vunpack.c.l.bf16 %v1991_v62 }
 0x240   : > { %2169 = vrcp.f32 %v754_v47 }
 0x247   : > { %v2164_v44 = vpop.eup %2163 }
 0x248   : > { %v2166_v45 = vpop.eup %2165 }
 0x249   : > { %v2168_v46 = vpop.eup %2167  ;;  %v758_v48 = vmul.f32 %v2166_v45, %v2164_v44 }
 0x24a   : > { %v757_v49 = vmul.f32 %v2168_v46, %v2677_v59  ;;  %v2170_v54 = vpop.eup %2169 }
 0x24c   : > { %v759_v51 = vadd.f32 %v758_v48, %v757_v49 }
 0x24e   : > { %2171 = vtanh.f32 %v759_v51  ;;  %v2749_v53 = vsel %vm769_vm9, %v759_v51, %v2677_v59 }
 0x258   : > { %v2172_v55 = vpop.eup %2171 }
 0x259   : > { %v761_v56 = vmul.f32 %v2172_v55, %v2170_v54 }
 0x25b   : > { %v2755_v57 = vsel %vm769_vm9, %v761_v56, %v2683_v63  ;;  %v772_v29 = vsel %vm769_vm9, %v761_v56, 0.0 }
 0x25c   : > { %v773_v58 = vpack.c.bf16 %v772_v29, %v772_v29  ;;  %v782_v60 = vpack.c.bf16 %v2755_v57, %v2755_v57 }
 0x25e   : > { %1989 = vst [vmem:[%s1841_s24 + $0x1] sm:$0x1] %v773_v58  ;;  %816 = vmatmul.mubr.bf16.vlgmr.msra.gmra.mrb[8].mxu0 %v782_v60  ;;  %857 = vmatmul.mubr.bf16.vlgmr.msra.gmra.mrb[8].mxu1 %v782_v60  ;;  %s1860_s24 = scalar_lea.vmem %s2464_s10, %s2006_s27 }
 0x25f   : > { %940 = vmatpush1.bf16.msra.mxu0 %v2479_v4  ;;  %981 = vmatpush1.bf16.msra.mxu1 %v2482_v5 }
 0x260   : > { %941 = vmatprep.subr.bf16.mxu0 %v2487_v6  ;;  %982 = vmatprep.subr.bf16.mxu1 %v2493_v7 }
 0x261   : > { %971 = vmatprep.mubr.bf16.mxu0 %v2358_v3  ;;  %1012 = vmatprep.mubr.bf16.mxu1 %v2358_v3 }
 0x263   : > { %942 = vmatpush1.bf16.msra.mxu0 %v2496_v8  ;;  %983 = vmatpush1.bf16.msra.mxu1 %v2500_v9 }
 0x264   : > { %943 = vmatprep.subr.bf16.mxu0 %v2504_v10  ;;  %984 = vmatprep.subr.bf16.mxu1 %v2507_v11 }
 0x267   : > { %944 = vmatpush1.bf16.msra.mxu0 %v2510_v12  ;;  %985 = vmatpush1.bf16.msra.mxu1 %v2513_v13 }
 0x268   : > { %945 = vmatprep.subr.bf16.mxu0 %v2518_v14  ;;  %986 = vmatprep.subr.bf16.mxu1 %v2523_v15 }
 0x26b   : > { %946 = vmatpush1.bf16.msra.mxu0 %v2526_v16  ;;  %987 = vmatpush1.bf16.msra.mxu1 %v2532_v17 }
 0x26c   : > { %947 = vmatprep.subr.bf16.mxu0 %v2535_v18  ;;  %988 = vmatprep.subr.bf16.mxu1 %v2541_v19 }
 0x26f   : > { %948 = vmatpush1.bf16.msra.mxu0 %v2544_v20  ;;  %989 = vmatpush1.bf16.msra.mxu1 %v2547_v21 }
 0x270   : > { %949 = vmatprep.subr.bf16.mxu0 %v2554_v22  ;;  %990 = vmatprep.subr.bf16.mxu1 %v2562_v23 }
 0x273   : > { %950 = vmatpush1.bf16.msra.mxu0 %v2572_v25  ;;  %991 = vmatpush1.bf16.msra.mxu1 %v2575_v26 }
 0x274   : > { %951 = vmatprep.subr.bf16.mxu0 %v2580_v27  ;;  %992 = vmatprep.subr.bf16.mxu1 %v2583_v28 }
 0x277   : > { %952 = vmatpush1.bf16.msra.mxu0 %v2599_v32  ;;  %993 = vmatpush1.bf16.msra.mxu1 %v2602_v33 }
 0x278   : > { %953 = vmatprep.subr.bf16.mxu0 %v2608_v34  ;;  %994 = vmatprep.subr.bf16.mxu1 %v2611_v35 }
 0x27b   : > { %954 = vmatpush1.bf16.msra.mxu0 %v2618_v38  ;;  %995 = vmatpush1.bf16.msra.mxu1 %v2621_v39 }
 0x27c   : > { %1095 = vmatprep.subr.bf16.mxu0 %v2470_v1  ;;  %1136 = vmatprep.subr.bf16.mxu1 %v2473_v2 }
 0x331   : > { %v817_v59 = vpop.f32.mrb[8].mxu0  ;;  %v858_v63 = vpop.f32.mrb[8].mxu1 }
 0x332   : > { %v819_v61 = vpop.f32.mrb[9].mxu0  ;;  %v860_v0 = vpop.f32.mrb[9].mxu1 }
 0x333   : > { %v869_v24 = vcombine.low %v817_v59, %v819_v61  ;;  %v870_v30 = vcombine.low %v858_v63, %v860_v0  ;;  %v821_v40 = vpop.f32.mrb[10].mxu0  ;;  %v862_v31 = vpop.f32.mrb[10].mxu1 }
 0x334   : > { %v822_v36 = vpop.f32.mrb[11].mxu0  ;;  %v863_v37 = vpop.f32.mrb[11].mxu1 }
 0x335   : > { %v877_v41 = vrot.slane %v869_v24, %v2673_v52  ;;  %v884_v43 = vrot.slane %v870_v30, %v2673_v52  ;;  %v925_v63 = vpop.permute.xlu1 %924 }
 0x336   : > { %vm926_vm10 = vcmp.eq.s32.totalorder %v925_v63, 1 }
 0x337   : > { %v885_v44 = vcombine.low %v877_v41, %v884_v43 }
 0x339   : > { %v887_v45 = vadd.f32 %v885_v44, %v781_v42 }
 0x33b   : > { %v1992_v46 = vmul.f32 -1.442695, %v887_v45  ;;  %v895_v47 = vrot.slane %v887_v45, 2  ;;  %v906_v49 = vrot.slane %v887_v45, 6  ;;  %v903_v54 = vrot.slane %v887_v45, 4 }
 0x33d   : > { %2173 = vpow2.f32 %v1992_v46  ;;  %v1993_v48 = vmul.f32 -1.442695, %v895_v47  ;;  %v1994_v50 = vmul.f32 -1.442695, %v906_v49 }
 0x33f   : > { %2175 = vpow2.f32 %v1993_v48 }
 0x340   : > { %2177 = vpow2.f32 %v1994_v50 }
 0x347   : > { %v2174_v51 = vpop.eup %2173 }
 0x348   : > { %v891_v55 = vadd.f32 1.0, %v2174_v51 }
 0x349   : > { %v2176_v56 = vpop.eup %2175 }
 0x34a   : > { %2179 = vrcp.f32 %v891_v55  ;;  %v900_v29 = vadd.f32 1.0, %v2176_v56  ;;  %v2178_v58 = vpop.eup %2177 }
 0x34b   : > { %2181 = vtanh.f32 %v903_v54  ;;  %v911_v62 = vadd.f32 1.0, %v2178_v58 }
 0x34c   : > { %2183 = vrcp.f32 %v900_v29 }
 0x34d   : > { %2185 = vrcp.f32 %v911_v62 }
 0x354   : > { %v2180_v60 = vpop.eup %2179 }
 0x355   : > { %v2182_v59 = vpop.eup %2181 }
 0x356   : > { %v2184_v61 = vpop.eup %2183  ;;  %v915_v24 = vmul.f32 %v2182_v59, %v2180_v60 }
 0x357   : > { %v914_v0 = vmul.f32 %v2184_v61, %v2749_v53  ;;  %v2186_v31 = vpop.eup %2185 }
 0x359   : > { %v916_v30 = vadd.f32 %v915_v24, %v914_v0 }
 0x35b   : > { %2187 = vtanh.f32 %v916_v30  ;;  %v2799_v40 = vsel %vm926_vm10, %v916_v30, %v2749_v53  ;;  %v1081_v30 = vpop.permute.xlu1 %1080 }
 0x35c   : > { %vm1082_vm11 = vcmp.eq.s32.totalorder %v1081_v30, 1 }
 0x365   : > { %v2188_v36 = vpop.eup %2187 }
 0x366   : > { %v918_v37 = vmul.f32 %v2188_v36, %v2186_v31 }
 0x368   : > { %v2805_v41 = vsel %vm926_vm10, %v918_v37, %v2755_v57  ;;  %v929_v42 = vsel %vm926_vm10, %v918_v37, 0.0 }
 0x369   : > { %v930_v43 = vpack.c.bf16 %v929_v42, %v929_v42  ;;  %v938_v44 = vpack.c.bf16 %v2805_v41, %v2805_v41 }
 0x36b   : > { %1995 = vst [vmem:[%s1848_s7 + $0x2] sm:$0x1] %v930_v43  ;;  %972 = vmatmul.mubr.bf16.vlgmr.msra.gmra.mrb[12].mxu0 %v938_v44  ;;  %1013 = vmatmul.mubr.bf16.vlgmr.msra.gmra.mrb[12].mxu1 %v938_v44  ;;  %s2018_s7 = smul.u32 4294967268, %s2343_s15 }
 0x36c   : > { %1096 = vmatpush1.bf16.msra.mxu0 %v2479_v4  ;;  %1137 = vmatpush1.bf16.msra.mxu1 %v2482_v5 }
 0x36d   : > { %1097 = vmatprep.subr.bf16.mxu0 %v2487_v6  ;;  %1138 = vmatprep.subr.bf16.mxu1 %v2493_v7  ;;  %v1997_v7 = vld [vmem:[%s1851_s9 + $0xc] sm:$0xf]  ;;  %s1874_s11 = scalar_lea.vmem %s2464_s10, %s2018_s7 }
 0x36e   : > { %1127 = vmatprep.mubr.bf16.mxu0 %v2358_v3  ;;  %1168 = vmatprep.mubr.bf16.mxu1 %v2358_v3  ;;  %v937_v45 = vunpack.c.l.bf16 %v1997_v7  ;;  %v2863_v7 = vld [vmem:[%s2459_s12 + $0x8] ss:$16 sps:$4 sm:$0xff]  }
 0x370   : > { %1098 = vmatpush1.bf16.msra.mxu0 %v2496_v8  ;;  %1139 = vmatpush1.bf16.msra.mxu1 %v2500_v9 }
 0x371   : > { %1099 = vmatprep.subr.bf16.mxu0 %v2504_v10  ;;  %1140 = vmatprep.subr.bf16.mxu1 %v2507_v11 }
 0x374   : > { %1100 = vmatpush1.bf16.msra.mxu0 %v2510_v12  ;;  %1141 = vmatpush1.bf16.msra.mxu1 %v2513_v13 }
 0x375   : > { %1101 = vmatprep.subr.bf16.mxu0 %v2518_v14  ;;  %1142 = vmatprep.subr.bf16.mxu1 %v2523_v15 }
 0x378   : > { %1102 = vmatpush1.bf16.msra.mxu0 %v2526_v16  ;;  %1143 = vmatpush1.bf16.msra.mxu1 %v2532_v17 }
 0x379   : > { %1103 = vmatprep.subr.bf16.mxu0 %v2535_v18  ;;  %1144 = vmatprep.subr.bf16.mxu1 %v2541_v19 }
 0x37c   : > { %1104 = vmatpush1.bf16.msra.mxu0 %v2544_v20  ;;  %1145 = vmatpush1.bf16.msra.mxu1 %v2547_v21 }
 0x37d   : > { %1105 = vmatprep.subr.bf16.mxu0 %v2554_v22  ;;  %1146 = vmatprep.subr.bf16.mxu1 %v2562_v23 }
 0x380   : > { %1106 = vmatpush1.bf16.msra.mxu0 %v2572_v25  ;;  %1147 = vmatpush1.bf16.msra.mxu1 %v2575_v26 }
 0x381   : > { %1107 = vmatprep.subr.bf16.mxu0 %v2580_v27  ;;  %1148 = vmatprep.subr.bf16.mxu1 %v2583_v28 }
 0x384   : > { %1108 = vmatpush1.bf16.msra.mxu0 %v2599_v32  ;;  %1149 = vmatpush1.bf16.msra.mxu1 %v2602_v33 }
 0x385   : > { %1109 = vmatprep.subr.bf16.mxu0 %v2608_v34  ;;  %1150 = vmatprep.subr.bf16.mxu1 %v2611_v35 }
 0x388   : > { %1110 = vmatpush1.bf16.msra.mxu0 %v2618_v38  ;;  %1151 = vmatpush1.bf16.msra.mxu1 %v2621_v39 }
 0x389   : > { %1252 = vmatprep.subr.bf16.mxu0 %v2470_v1  ;;  %1293 = vmatprep.subr.bf16.mxu1 %v2473_v2 }
 0x43e   : > { %v973_v4 = vpop.f32.mrb[12].mxu0  ;;  %v1014_v5 = vpop.f32.mrb[12].mxu1 }
 0x43f   : > { %v975_v6 = vpop.f32.mrb[13].mxu0  ;;  %v1016_v8 = vpop.f32.mrb[13].mxu1 }
 0x440   : > { %v1025_v9 = vcombine.low %v973_v4, %v975_v6  ;;  %v1026_v10 = vcombine.low %v1014_v5, %v1016_v8  ;;  %v977_v11 = vpop.f32.mrb[14].mxu0  ;;  %v1018_v12 = vpop.f32.mrb[14].mxu1  ;;  %v2871_v8 = vld [vmem:[%s2459_s12 + $0x2c] ss:$16 sps:$4 sm:$0xff]  }
 0x441   : > { %v978_v13 = vpop.f32.mrb[15].mxu0  ;;  %v1019_v53 = vpop.f32.mrb[15].mxu1  ;;  %v2885_v11 = vld [vmem:[%s2459_s12 + $0x44] ss:$16 sps:$4 sm:$0xff]   ;;  %v2889_v12 = vld [vmem:[%s2459_s12 + $0x4c] ss:$16 sps:$4 sm:$0xff]  }
 0x442   : > { %v1033_v57 = vrot.slane %v1025_v9, %v2673_v52  ;;  %v1040_v1 = vrot.slane %v1026_v10, %v2673_v52  ;;  %v2877_v9 = vld [vmem:[%s2459_s12 + $0x20] ss:$16 sps:$4 sm:$0xff]   ;;  %v2881_v10 = vld [vmem:[%s2459_s12 + $0x28] ss:$16 sps:$4 sm:$0xff]  }
 0x443   : > { %v2893_v13 = vld [vmem:[%s2459_s12 + $0x40] ss:$16 sps:$4 sm:$0xff]   ;;  %v2897_v53 = vld [vmem:[%s2459_s12 + $0x48] ss:$16 sps:$4 sm:$0xff]  }
 0x444   : > { %v1041_v46 = vcombine.low %v1033_v57, %v1040_v1 }
 0x446   : > { %v1043_v2 = vadd.f32 %v1041_v46, %v937_v45 }
 0x448   : > { %v1998_v47 = vmul.f32 -1.442695, %v1043_v2  ;;  %v1051_v48 = vrot.slane %v1043_v2, 2  ;;  %v1062_v50 = vrot.slane %v1043_v2, 6  ;;  %v1059_v55 = vrot.slane %v1043_v2, 4 }
 0x44a   : > { %2189 = vpow2.f32 %v1998_v47  ;;  %v1999_v49 = vmul.f32 -1.442695, %v1051_v48  ;;  %v2000_v51 = vmul.f32 -1.442695, %v1062_v50 }
 0x44c   : > { %2191 = vpow2.f32 %v1999_v49 }
 0x44d   : > { %2193 = vpow2.f32 %v2000_v51 }
 0x454   : > { %v2190_v54 = vpop.eup %2189 }
 0x455   : > { %v1047_v56 = vadd.f32 1.0, %v2190_v54 }
 0x456   : > { %v2192_v29 = vpop.eup %2191 }
 0x457   : > { %2195 = vrcp.f32 %v1047_v56  ;;  %v1056_v58 = vadd.f32 1.0, %v2192_v29  ;;  %v2194_v60 = vpop.eup %2193 }
 0x458   : > { %2197 = vtanh.f32 %v1059_v55  ;;  %v1067_v62 = vadd.f32 1.0, %v2194_v60  ;;  %v1237_v60 = vpop.permute.xlu0 %1236 }
 0x459   : > { %2199 = vrcp.f32 %v1056_v58  ;;  %vm1238_vm12 = vcmp.eq.s32.totalorder %v1237_v60, 1 }
 0x45a   : > { %2201 = vrcp.f32 %v1067_v62 }
 0x461   : > { %v2196_v59 = vpop.eup %2195 }
 0x462   : > { %v2198_v63 = vpop.eup %2197 }
 0x463   : > { %v2200_v61 = vpop.eup %2199  ;;  %v1071_v0 = vmul.f32 %v2198_v63, %v2196_v59 }
 0x464   : > { %v1070_v24 = vmul.f32 %v2200_v61, %v2799_v40  ;;  %v2202_v37 = vpop.eup %2201 }
 0x466   : > { %v1072_v31 = vadd.f32 %v1071_v0, %v1070_v24 }
 0x468   : > { %2203 = vtanh.f32 %v1072_v31  ;;  %v2849_v36 = vsel %vm1082_vm11, %v1072_v31, %v2799_v40  ;;  %v2859_v40 = vld [vmem:[%s2459_s12] ss:$16 sps:$4 sm:$0xff]  }
 0x472   : > { %v2204_v42 = vpop.eup %2203 }
 0x473   : > { %v1074_v43 = vmul.f32 %v2204_v42, %v2202_v37  ;;  %v2960_v42 = vld [vmem:[%s2459_s12 + $0x6c] ss:$16 sps:$4 sm:$0xff]  }
 0x475   : > { %v2852_v44 = vsel %vm1082_vm11, %v1074_v43, %v2805_v41  ;;  %v1085_v4 = vsel %vm1082_vm11, %v1074_v43, 0.0  ;;  %v2867_v41 = vld [vmem:[%s2459_s12 + $0x24] ss:$16 sps:$4 sm:$0xff]   ;;  %v2964_v43 = vld [vmem:[%s2459_s12 + $0x60] ss:$16 sps:$4 sm:$0xff]  }
 0x476   : > { %v1086_v5 = vpack.c.bf16 %v1085_v4, %v1085_v4  ;;  %v1094_v6 = vpack.c.bf16 %v2852_v44, %v2852_v44  ;;  %v2972_v4 = vld [vmem:[%s2459_s12 + $0x84] ss:$16 sps:$4 sm:$0xff]  }
 0x478   : > { %2001 = vst [vmem:[%s1853_s25 + $0x3] sm:$0x1] %v1086_v5  ;;  %1128 = vmatmul.mubr.bf16.vlgmr.msra.gmra.mrb[16].mxu0 %v1094_v6  ;;  %1169 = vmatmul.mubr.bf16.vlgmr.msra.gmra.mrb[16].mxu1 %v1094_v6  ;;  %v2976_v5 = vld [vmem:[%s2459_s12 + $0x8c] ss:$16 sps:$4 sm:$0xff]   ;;  %v2980_v6 = vld [vmem:[%s2459_s12 + $0x80] ss:$16 sps:$4 sm:$0xff]  }
 0x479   : > { %1253 = vmatpush1.bf16.msra.mxu0 %v2859_v40  ;;  %1294 = vmatpush1.bf16.msra.mxu1 %v2863_v7 }
 0x47a   : > { %1254 = vmatprep.subr.bf16.mxu0 %v2867_v41  ;;  %1295 = vmatprep.subr.bf16.mxu1 %v2871_v8 }
 0x47b   : > { %1284 = vmatprep.mubr.bf16.mxu0 %v2358_v3  ;;  %1325 = vmatprep.mubr.bf16.mxu1 %v2358_v3 }
 0x47d   : > { %1255 = vmatpush1.bf16.msra.mxu0 %v2877_v9  ;;  %1296 = vmatpush1.bf16.msra.mxu1 %v2881_v10 }
 0x47e   : > { %1256 = vmatprep.subr.bf16.mxu0 %v2885_v11  ;;  %1297 = vmatprep.subr.bf16.mxu1 %v2889_v12 }
 0x481   : > { %1257 = vmatpush1.bf16.msra.mxu0 %v2893_v13  ;;  %1298 = vmatpush1.bf16.msra.mxu1 %v2897_v53 }
 0x482   : > { %1258 = vmatprep.subr.bf16.mxu0 %v2518_v14  ;;  %1299 = vmatprep.subr.bf16.mxu1 %v2523_v15  ;;  %v2921_v14 = vld [vmem:[%s2459_s12 + $0x4] ss:$16 sps:$4 sm:$0xff]   ;;  %v2925_v15 = vld [vmem:[%s2459_s12 + $0xc] ss:$16 sps:$4 sm:$0xff]  }
 0x485   : > { %1259 = vmatpush1.bf16.msra.mxu0 %v2526_v16  ;;  %1300 = vmatpush1.bf16.msra.mxu1 %v2532_v17 }
 0x486   : > { %1260 = vmatprep.subr.bf16.mxu0 %v2535_v18  ;;  %1301 = vmatprep.subr.bf16.mxu1 %v2541_v19  ;;  %v1092_v19 = vld [vmem:[%s1091_s29] sm:$0xf] }
 0x489   : > { %1261 = vmatpush1.bf16.msra.mxu0 %v2544_v20  ;;  %1302 = vmatpush1.bf16.msra.mxu1 %v2547_v21 }
 0x48a   : > { %1262 = vmatprep.subr.bf16.mxu0 %v2554_v22  ;;  %1303 = vmatprep.subr.bf16.mxu1 %v2562_v23 }
 0x48d   : > { %1263 = vmatpush1.bf16.msra.mxu0 %v2572_v25  ;;  %1304 = vmatpush1.bf16.msra.mxu1 %v2575_v26 }
 0x48e   : > { %1264 = vmatprep.subr.bf16.mxu0 %v2580_v27  ;;  %1305 = vmatprep.subr.bf16.mxu1 %v2583_v28 }
 0x491   : > { %1265 = vmatpush1.bf16.msra.mxu0 %v2599_v32  ;;  %1306 = vmatpush1.bf16.msra.mxu1 %v2602_v33  ;;  %v1093_v32 = vunpack.c.l.bf16 %v1092_v19  ;;  %v2996_v19 = vld [vmem:[%s2459_s12 + $0xa0] ss:$16 sps:$4 sm:$0xff]  }
 0x492   : > { %1266 = vmatprep.subr.bf16.mxu0 %v2608_v34  ;;  %1307 = vmatprep.subr.bf16.mxu1 %v2611_v35 }
 0x495   : > { %1267 = vmatpush1.bf16.msra.mxu0 %v2618_v38  ;;  %1308 = vmatpush1.bf16.msra.mxu1 %v2621_v39 }
 0x496   : > { %1409 = vmatprep.subr.bf16.mxu0 %v2921_v14  ;;  %1450 = vmatprep.subr.bf16.mxu1 %v2925_v15 }
 0x54b   : > { %v1129_v16 = vpop.f32.mrb[16].mxu0  ;;  %v1170_v17 = vpop.f32.mrb[16].mxu1 }
 0x54c   : > { %v1131_v18 = vpop.f32.mrb[17].mxu0  ;;  %v1172_v20 = vpop.f32.mrb[17].mxu1 }
 0x54d   : > { %v1181_v21 = vcombine.low %v1129_v16, %v1131_v18  ;;  %v1182_v22 = vcombine.low %v1170_v17, %v1172_v20  ;;  %v1133_v23 = vpop.f32.mrb[18].mxu0  ;;  %v1174_v25 = vpop.f32.mrb[18].mxu1  ;;  %v2984_v16 = vld [vmem:[%s2459_s12 + $0x88] ss:$16 sps:$4 sm:$0xff]   ;;  %v2988_v17 = vld [vmem:[%s2459_s12 + $0xa4] ss:$16 sps:$4 sm:$0xff]  }
 0x54e   : > { %v1134_v26 = vpop.f32.mrb[19].mxu0  ;;  %v1175_v27 = vpop.f32.mrb[19].mxu1  ;;  %v2992_v18 = vld [vmem:[%s2459_s12 + $0xac] ss:$16 sps:$4 sm:$0xff]   ;;  %v3000_v20 = vld [vmem:[%s2459_s12 + $0xa8] ss:$16 sps:$4 sm:$0xff]  }
 0x54f   : > { %v1189_v28 = vrot.slane %v1181_v21, %v2673_v52  ;;  %v1196_v33 = vrot.slane %v1182_v22, %v2673_v52  ;;  %v3004_v21 = vld [vmem:[%s2459_s12 + $0xc4] ss:$16 sps:$4 sm:$0xff]   ;;  %v3008_v22 = vld [vmem:[%s2459_s12 + $0xcc] ss:$16 sps:$4 sm:$0xff]   ;;  %v3012_v23 = vld [vmem:[%s2459_s12 + $0xc0] ss:$16 sps:$4 sm:$0xff]  }
 0x550   : > { %v3016_v25 = vld [vmem:[%s2459_s12 + $0xc8] ss:$16 sps:$4 sm:$0xff]   ;;  %v3020_v26 = vld [vmem:[%s2459_s12 + $0xe4] ss:$16 sps:$4 sm:$0xff]   ;;  %v3024_v27 = vld [vmem:[%s2459_s12 + $0xec] ss:$16 sps:$4 sm:$0xff]  }
 0x551   : > { %v1197_v34 = vcombine.low %v1189_v28, %v1196_v33  ;;  %v3028_v28 = vld [vmem:[%s2459_s12 + $0xe0] ss:$16 sps:$4 sm:$0xff]  }
 0x553   : > { %v1199_v35 = vadd.f32 %v1197_v34, %v1093_v32  ;;  %v3032_v32 = vld [vmem:[%s2459_s12 + $0xe8] ss:$16 sps:$4 sm:$0xff]  }
 0x555   : > { %v2003_v38 = vmul.f32 -1.442695, %v1199_v35  ;;  %v1207_v39 = vrot.slane %v1199_v35, 2  ;;  %v1218_v45 = vrot.slane %v1199_v35, 6  ;;  %v1215_v2 = vrot.slane %v1199_v35, 4 }
 0x557   : > { %2205 = vpow2.f32 %v2003_v38  ;;  %v2004_v57 = vmul.f32 -1.442695, %v1207_v39  ;;  %v2005_v1 = vmul.f32 -1.442695, %v1218_v45  ;;  %v2007_v38 = vld [vmem:[%s1860_s24 + $0x14] sm:$0xf] }
 0x559   : > { %2207 = vpow2.f32 %v2004_v57 }
 0x55a   : > { %2209 = vpow2.f32 %v2005_v1 }
 0x561   : > { %v2206_v46 = vpop.eup %2205 }
 0x562   : > { %v1203_v47 = vadd.f32 1.0, %v2206_v46 }
 0x563   : > { %v2208_v48 = vpop.eup %2207 }
 0x564   : > { %2211 = vrcp.f32 %v1203_v47  ;;  %v1212_v49 = vadd.f32 1.0, %v2208_v48  ;;  %v2210_v50 = vpop.eup %2209 }
 0x565   : > { %2213 = vtanh.f32 %v1215_v2  ;;  %v1223_v56 = vadd.f32 1.0, %v2210_v50 }
 0x566   : > { %2215 = vrcp.f32 %v1212_v49  ;;  %v1250_v49 = vunpack.c.l.bf16 %v2007_v38  ;;  %v1394_v38 = vpop.permute.xlu1 %1393 }
 0x567   : > { %2217 = vrcp.f32 %v1223_v56  ;;  %vm1395_vm13 = vcmp.eq.s32.totalorder %v1394_v38, 1 }
 0x56e   : > { %v2212_v51 = vpop.eup %2211 }
 0x56f   : > { %v2214_v54 = vpop.eup %2213 }
 0x570   : > { %v2216_v55 = vpop.eup %2215  ;;  %v1227_v29 = vmul.f32 %v2214_v54, %v2212_v51 }
 0x571   : > { %v1226_v58 = vmul.f32 %v2216_v55, %v2849_v36  ;;  %v2218_v61 = vpop.eup %2217 }
 0x573   : > { %v1228_v59 = vadd.f32 %v1227_v29, %v1226_v58 }
 0x575   : > { %2219 = vtanh.f32 %v1228_v59  ;;  %v2934_v63 = vsel %vm1238_vm12, %v1228_v59, %v2849_v36  ;;  %v2956_v36 = vld [vmem:[%s2459_s12 + $0x64] ss:$16 sps:$4 sm:$0xff]  }
 0x57f   : > { %v2220_v62 = vpop.eup %2219 }
 0x580   : > { %v1230_v0 = vmul.f32 %v2220_v62, %v2218_v61 }
 0x582   : > { %v2939_v24 = vsel %vm1238_vm12, %v1230_v0, %v2852_v44  ;;  %v1241_v30 = vsel %vm1238_vm12, %v1230_v0, 0.0  ;;  %v2968_v44 = vld [vmem:[%s2459_s12 + $0x68] ss:$16 sps:$4 sm:$0xff]   ;;  %s1863_s12 = scalar_lea.vmem %s2466_s21, %s1245_s4 [#allocation4]  ;;  %s2012_s4 = smul.u32 4294967276, %s2343_s15 }
 0x583   : > { %v1242_v31 = vpack.c.bf16 %v1241_v30, %v1241_v30  ;;  %v1251_v37 = vpack.c.bf16 %v2939_v24, %v2939_v24 }
 0x584   : > { %s1867_s14 = scalar_lea.vmem %s2464_s10, %s2012_s4  ;;  %s1877_s10 = scalar_lea.vmem %s2466_s21, %s1559_s22 [#allocation4] }
 0x585   : > { %1244 = vst [vmem:[%s1243_s5] sm:$0x1] %v1242_v31  ;;  %1285 = vmatmul.mubr.bf16.vlgmr.msra.gmra.mrb[20].mxu0 %v1251_v37  ;;  %1326 = vmatmul.mubr.bf16.vlgmr.msra.gmra.mrb[20].mxu1 %v1251_v37  ;;  %s1731_s22 = sadd.s32 (%p2432_p4), %s2343_s15, %s2031_s28 }
 0x586   : > { %1410 = vmatpush1.bf16.msra.mxu0 %v2859_v40  ;;  %1451 = vmatpush1.bf16.msra.mxu1 %v2863_v7  ;;  %s1732_s25 = scalar_lea.vmem (%p2432_p4), %s3141_s3, %s1731_s22 }
 0x587   : > { %1411 = vmatprep.subr.bf16.mxu0 %v2867_v41  ;;  %1452 = vmatprep.subr.bf16.mxu1 %v2871_v8 }
 0x588   : > { %1441 = vmatprep.mubr.bf16.mxu0 %v2358_v3  ;;  %1482 = vmatprep.mubr.bf16.mxu1 %v2358_v3 }
 0x58a   : > { %1412 = vmatpush1.bf16.msra.mxu0 %v2877_v9  ;;  %1453 = vmatpush1.bf16.msra.mxu1 %v2881_v10 }
 0x58b   : > { %1413 = vmatprep.subr.bf16.mxu0 %v2885_v11  ;;  %1454 = vmatprep.subr.bf16.mxu1 %v2889_v12 }
 0x58e   : > { %1414 = vmatpush1.bf16.msra.mxu0 %v2893_v13  ;;  %1455 = vmatpush1.bf16.msra.mxu1 %v2897_v53 }
 0x58f   : > { %1415 = vmatprep.subr.bf16.mxu0 %v2956_v36  ;;  %1456 = vmatprep.subr.bf16.mxu1 %v2960_v42 }
 0x592   : > { %1416 = vmatpush1.bf16.msra.mxu0 %v2964_v43  ;;  %1457 = vmatpush1.bf16.msra.mxu1 %v2968_v44 }
 0x593   : > { %1417 = vmatprep.subr.bf16.mxu0 %v2972_v4  ;;  %1458 = vmatprep.subr.bf16.mxu1 %v2976_v5 }
 0x596   : > { %1418 = vmatpush1.bf16.msra.mxu0 %v2980_v6  ;;  %1459 = vmatpush1.bf16.msra.mxu1 %v2984_v16 }
 0x597   : > { %1419 = vmatprep.subr.bf16.mxu0 %v2988_v17  ;;  %1460 = vmatprep.subr.bf16.mxu1 %v2992_v18 }
 0x59a   : > { %1420 = vmatpush1.bf16.msra.mxu0 %v2996_v19  ;;  %1461 = vmatpush1.bf16.msra.mxu1 %v3000_v20 }
 0x59b   : > { %1421 = vmatprep.subr.bf16.mxu0 %v3004_v21  ;;  %1462 = vmatprep.subr.bf16.mxu1 %v3008_v22 }
 0x59e   : > { %1422 = vmatpush1.bf16.msra.mxu0 %v3012_v23  ;;  %1463 = vmatpush1.bf16.msra.mxu1 %v3016_v25 }
 0x59f   : > { %1423 = vmatprep.subr.bf16.mxu0 %v3020_v26  ;;  %1464 = vmatprep.subr.bf16.mxu1 %v3024_v27 }
 0x5a2   : > { %1424 = vmatpush1.bf16.msra.mxu0 %v3028_v28  ;;  %1465 = vmatpush1.bf16.msra.mxu1 %v3032_v32 }
 0x5a3   : > { %1566 = vmatprep.subr.bf16.mxu0 %v2921_v14  ;;  %1607 = vmatprep.subr.bf16.mxu1 %v2925_v15 }
 0x658   : > { %v1286_v33 = vpop.f32.mrb[20].mxu0  ;;  %v1327_v34 = vpop.f32.mrb[20].mxu1 }
 0x659   : > { %v1288_v35 = vpop.f32.mrb[21].mxu0  ;;  %v1329_v39 = vpop.f32.mrb[21].mxu1 }
 0x65a   : > { %v1338_v57 = vcombine.low %v1286_v33, %v1288_v35  ;;  %v1339_v45 = vcombine.low %v1327_v34, %v1329_v39  ;;  %v1290_v1 = vpop.f32.mrb[22].mxu0  ;;  %v1331_v46 = vpop.f32.mrb[22].mxu1 }
 0x65b   : > { %v1291_v2 = vpop.f32.mrb[23].mxu0  ;;  %v1332_v47 = vpop.f32.mrb[23].mxu1 }
 0x65c   : > { %v1346_v48 = vrot.slane %v1338_v57, %v2673_v52  ;;  %v1353_v14 = vrot.slane %v1339_v45, %v2673_v52 }
 0x65e   : > { %v1354_v50 = vcombine.low %v1346_v48, %v1353_v14 }
 0x660   : > { %v1356_v15 = vadd.f32 %v1354_v50, %v1250_v49 }
 0x662   : > { %v2008_v51 = vmul.f32 -1.442695, %v1356_v15  ;;  %v1364_v54 = vrot.slane %v1356_v15, 2  ;;  %v1375_v56 = vrot.slane %v1356_v15, 6  ;;  %v1372_v60 = vrot.slane %v1356_v15, 4 }
 0x664   : > { %2221 = vpow2.f32 %v2008_v51  ;;  %v2009_v55 = vmul.f32 -1.442695, %v1364_v54  ;;  %v2010_v29 = vmul.f32 -1.442695, %v1375_v56 }
 0x666   : > { %2223 = vpow2.f32 %v2009_v55 }
 0x667   : > { %2225 = vpow2.f32 %v2010_v29 }
 0x66e   : > { %v2222_v58 = vpop.eup %2221 }
 0x66f   : > { %v1360_v59 = vadd.f32 1.0, %v2222_v58 }
 0x670   : > { %v2224_v61 = vpop.eup %2223 }
 0x671   : > { %2227 = vrcp.f32 %v1360_v59  ;;  %v1369_v62 = vadd.f32 1.0, %v2224_v61  ;;  %v2226_v0 = vpop.eup %2225 }
 0x672   : > { %2229 = vtanh.f32 %v1372_v60  ;;  %v1380_v33 = vadd.f32 1.0, %v2226_v0  ;;  %v2019_v0 = vld [vmem:[%s1874_s11 + $0x1c] sm:$0xf] }
 0x673   : > { %2231 = vrcp.f32 %v1369_v62 }
 0x674   : > { %2233 = vrcp.f32 %v1380_v33 }
 0x67b   : > { %v2228_v30 = vpop.eup %2227 }
 0x67c   : > { %v2230_v31 = vpop.eup %2229 }
 0x67d   : > { %v2232_v37 = vpop.eup %2231  ;;  %v1384_v34 = vmul.f32 %v2230_v31, %v2228_v30 }
 0x67e   : > { %v1383_v35 = vmul.f32 %v2232_v37, %v2934_v63  ;;  %v2234_v45 = vpop.eup %2233 }
 0x680   : > { %v1385_v39 = vadd.f32 %v1384_v34, %v1383_v35 }
 0x682   : > { %2235 = vtanh.f32 %v1385_v39  ;;  %v3043_v57 = vsel %vm1395_vm13, %v1385_v39, %v2934_v63 }
 0x68c   : > { %v2236_v1 = vpop.eup %2235 }
 0x68d   : > { %v1387_v46 = vmul.f32 %v2236_v1, %v2234_v45 }
 0x68f   : > { %v3049_v2 = vsel %vm1395_vm13, %v1387_v46, %v2939_v24  ;;  %v1398_v47 = vsel %vm1395_vm13, %v1387_v46, 0.0 }
 0x690   : > { %v1399_v48 = vpack.c.bf16 %v1398_v47, %v1398_v47  ;;  %v1408_v49 = vpack.c.bf16 %v3049_v2, %v3049_v2 }
 0x692   : > { %2011 = vst [vmem:[%s1863_s12 + $0x5] sm:$0x1] %v1399_v48  ;;  %1442 = vmatmul.mubr.bf16.vlgmr.msra.gmra.mrb[24].mxu0 %v1408_v49  ;;  %1483 = vmatmul.mubr.bf16.vlgmr.msra.gmra.mrb[24].mxu1 %v1408_v49 }
 0x693   : > { %1567 = vmatpush1.bf16.msra.mxu0 %v2859_v40  ;;  %1608 = vmatpush1.bf16.msra.mxu1 %v2863_v7 }
 0x694   : > { %1568 = vmatprep.subr.bf16.mxu0 %v2867_v41  ;;  %1609 = vmatprep.subr.bf16.mxu1 %v2871_v8  ;;  %v2013_v41 = vld [vmem:[%s1867_s14 + $0x18] sm:$0xf] }
 0x695   : > { %1598 = vmatprep.mubr.bf16.mxu0 %v2358_v3  ;;  %1639 = vmatprep.mubr.bf16.mxu1 %v2358_v3  ;;  %v1407_v24 = vunpack.c.l.bf16 %v2013_v41 }
 0x697   : > { %1569 = vmatpush1.bf16.msra.mxu0 %v2877_v9  ;;  %1610 = vmatpush1.bf16.msra.mxu1 %v2881_v10 }
 0x698   : > { %1570 = vmatprep.subr.bf16.mxu0 %v2885_v11  ;;  %1611 = vmatprep.subr.bf16.mxu1 %v2889_v12 }
 0x69b   : > { %1571 = vmatpush1.bf16.msra.mxu0 %v2893_v13  ;;  %1612 = vmatpush1.bf16.msra.mxu1 %v2897_v53 }
 0x69c   : > { %1572 = vmatprep.subr.bf16.mxu0 %v2956_v36  ;;  %1613 = vmatprep.subr.bf16.mxu1 %v2960_v42 }
 0x69f   : > { %1573 = vmatpush1.bf16.msra.mxu0 %v2964_v43  ;;  %1614 = vmatpush1.bf16.msra.mxu1 %v2968_v44 }
 0x6a0   : > { %1574 = vmatprep.subr.bf16.mxu0 %v2972_v4  ;;  %1615 = vmatprep.subr.bf16.mxu1 %v2976_v5 }
 0x6a3   : > { %1575 = vmatpush1.bf16.msra.mxu0 %v2980_v6  ;;  %1616 = vmatpush1.bf16.msra.mxu1 %v2984_v16 }
 0x6a4   : > { %1576 = vmatprep.subr.bf16.mxu0 %v2988_v17  ;;  %1617 = vmatprep.subr.bf16.mxu1 %v2992_v18 }
 0x6a7   : > { %1577 = vmatpush1.bf16.msra.mxu0 %v2996_v19  ;;  %1618 = vmatpush1.bf16.msra.mxu1 %v3000_v20 }
 0x6a8   : > { %1578 = vmatprep.subr.bf16.mxu0 %v3004_v21  ;;  %1619 = vmatprep.subr.bf16.mxu1 %v3008_v22 }
 0x6ab   : > { %1579 = vmatpush1.bf16.msra.mxu0 %v3012_v23  ;;  %1620 = vmatpush1.bf16.msra.mxu1 %v3016_v25 }
 0x6ac   : > { %1580 = vmatprep.subr.bf16.mxu0 %v3020_v26  ;;  %1621 = vmatprep.subr.bf16.mxu1 %v3024_v27 }
 0x6af   : > { %1581 = vmatpush1.bf16.msra.mxu0 %v3028_v28  ;;  %1622 = vmatpush1.bf16.msra.mxu1 %v3032_v32  ;;  %v1551_v28 = vpop.permute.xlu0 %1550 }
 0x6b0   : > { %vm1552_vm14 = vcmp.eq.s32.totalorder %v1551_v28, 1 }
 0x765   : > { %v1443_v3 = vpop.f32.mrb[24].mxu0  ;;  %v1484_v40 = vpop.f32.mrb[24].mxu1 }
 0x766   : > { %v1445_v7 = vpop.f32.mrb[25].mxu0  ;;  %v1486_v8 = vpop.f32.mrb[25].mxu1 }
 0x767   : > { %v1495_v9 = vcombine.low %v1443_v3, %v1445_v7  ;;  %v1496_v10 = vcombine.low %v1484_v40, %v1486_v8  ;;  %v1447_v11 = vpop.f32.mrb[26].mxu0  ;;  %v1488_v12 = vpop.f32.mrb[26].mxu1 }
 0x768   : > { %v1448_v13 = vpop.f32.mrb[27].mxu0  ;;  %v1489_v53 = vpop.f32.mrb[27].mxu1 }
 0x769   : > { %v1503_v63 = vrot.slane %v1495_v9, %v2673_v52  ;;  %v1510_v36 = vrot.slane %v1496_v10, %v2673_v52  ;;  %v1708_v53 = vpop.permute.xlu1 %1707 }
 0x76a   : > { %vm1709_vm15 = vcmp.eq.s32.totalorder %v1708_v53, 1 }
 0x76b   : > { %v1511_v42 = vcombine.low %v1503_v63, %v1510_v36 }
 0x76d   : > { %v1513_v43 = vadd.f32 %v1511_v42, %v1407_v24 }
 0x76f   : > { %v2014_v44 = vmul.f32 -1.442695, %v1513_v43  ;;  %v1521_v4 = vrot.slane %v1513_v43, 2  ;;  %v1532_v6 = vrot.slane %v1513_v43, 6  ;;  %v1529_v18 = vrot.slane %v1513_v43, 4 }
 0x771   : > { %2237 = vpow2.f32 %v2014_v44  ;;  %v2015_v5 = vmul.f32 -1.442695, %v1521_v4  ;;  %v2016_v16 = vmul.f32 -1.442695, %v1532_v6 }
 0x773   : > { %2239 = vpow2.f32 %v2015_v5 }
 0x774   : > { %2241 = vpow2.f32 %v2016_v16 }
 0x77b   : > { %v2238_v17 = vpop.eup %2237 }
 0x77c   : > { %v1517_v19 = vadd.f32 1.0, %v2238_v17 }
 0x77d   : > { %v2240_v20 = vpop.eup %2239 }
 0x77e   : > { %2243 = vrcp.f32 %v1517_v19  ;;  %v1526_v21 = vadd.f32 1.0, %v2240_v20  ;;  %v2242_v22 = vpop.eup %2241 }
 0x77f   : > { %2245 = vtanh.f32 %v1529_v18  ;;  %v1537_v27 = vadd.f32 1.0, %v2242_v22 }
 0x780   : > { %2247 = vrcp.f32 %v1526_v21 }
 0x781   : > { %2249 = vrcp.f32 %v1537_v27 }
 0x788   : > { %v2244_v23 = vpop.eup %2243 }
 0x789   : > { %v2246_v25 = vpop.eup %2245 }
 0x78a   : > { %v2248_v26 = vpop.eup %2247  ;;  %v1541_v32 = vmul.f32 %v2246_v25, %v2244_v23 }
 0x78b   : > { %v1540_v14 = vmul.f32 %v2248_v26, %v3043_v57  ;;  %v2250_v51 = vpop.eup %2249 }
 0x78d   : > { %v1542_v50 = vadd.f32 %v1541_v32, %v1540_v14 }
 0x78f   : > { %2251 = vtanh.f32 %v1542_v50  ;;  %v1554_v15 = vsel %vm1552_vm14, %v1542_v50, %v3043_v57  ;;  %v1564_v57 = vunpack.c.l.bf16 %v2019_v0 }
 0x799   : > { %v2252_v54 = vpop.eup %2251 }
 0x79a   : > { %v1544_v55 = vmul.f32 %v2252_v54, %v2250_v51 }
 0x79c   : > { %v1553_v56 = vsel %vm1552_vm14, %v1544_v55, %v3049_v2  ;;  %v1555_v29 = vsel %vm1552_vm14, %v1544_v55, 0.0 }
 0x79d   : > { %v1556_v58 = vpack.c.bf16 %v1555_v29, %v1555_v29  ;;  %v1565_v60 = vpack.c.bf16 %v1553_v56, %v1553_v56 }
 0x79f   : > { %2017 = vst [vmem:[%s1870_s6 + $0x6] sm:$0x1] %v1556_v58  ;;  %1599 = vmatmul.mubr.bf16.vlgmr.msra.gmra.mrb[28].mxu0 %v1565_v60  ;;  %1640 = vmatmul.mubr.bf16.vlgmr.msra.gmra.mrb[28].mxu1 %v1565_v60 }
 0x872   : > { %v1600_v59 = vpop.f32.mrb[28].mxu0  ;;  %v1641_v61 = vpop.f32.mrb[28].mxu1 }
 0x873   : > { %v1602_v62 = vpop.f32.mrb[29].mxu0  ;;  %v1643_v30 = vpop.f32.mrb[29].mxu1 }
 0x874   : > { %v1652_v31 = vcombine.low %v1600_v59, %v1602_v62  ;;  %v1653_v37 = vcombine.low %v1641_v61, %v1643_v30  ;;  %v1604_v33 = vpop.f32.mrb[30].mxu0  ;;  %v1645_v34 = vpop.f32.mrb[30].mxu1 }
 0x875   : > { %v1605_v35 = vpop.f32.mrb[31].mxu0  ;;  %v1646_v38 = vpop.f32.mrb[31].mxu1 }
 0x876   : > { %v1660_v39 = vrot.slane %v1652_v31, %v2673_v52  ;;  %v1667_v45 = vrot.slane %v1653_v37, %v2673_v52 }
 0x878   : > { %v1668_v1 = vcombine.low %v1660_v39, %v1667_v45 }
 0x87a   : > { %v1670_v46 = vadd.f32 %v1668_v1, %v1564_v57 }
 0x87c   : > { %v2020_v2 = vmul.f32 -1.442695, %v1670_v46  ;;  %v1678_v47 = vrot.slane %v1670_v46, 2  ;;  %v1689_v49 = vrot.slane %v1670_v46, 6  ;;  %v1686_v7 = vrot.slane %v1670_v46, 4 }
 0x87e   : > { %2253 = vpow2.f32 %v2020_v2  ;;  %v2021_v48 = vmul.f32 -1.442695, %v1678_v47  ;;  %v2022_v3 = vmul.f32 -1.442695, %v1689_v49 }
 0x880   : > { %2255 = vpow2.f32 %v2021_v48 }
 0x881   : > { %2257 = vpow2.f32 %v2022_v3 }
 0x888   : > { %v2254_v40 = vpop.eup %2253 }
 0x889   : > { %v1674_v41 = vadd.f32 1.0, %v2254_v40 }
 0x88a   : > { %v2256_v8 = vpop.eup %2255 }
 0x88b   : > { %2259 = vrcp.f32 %v1674_v41  ;;  %v1683_v9 = vadd.f32 1.0, %v2256_v8  ;;  %v2258_v10 = vpop.eup %2257 }
 0x88c   : > { %2261 = vtanh.f32 %v1686_v7  ;;  %v1694_v13 = vadd.f32 1.0, %v2258_v10 }
 0x88d   : > { %2263 = vrcp.f32 %v1683_v9 }
 0x88e   : > { %2265 = vrcp.f32 %v1694_v13 }
 0x895   : > { %v2260_v52 = vpop.eup %2259 }
 0x896   : > { %v2262_v11 = vpop.eup %2261 }
 0x897   : > { %v2264_v12 = vpop.eup %2263  ;;  %v1698_v24 = vmul.f32 %v2262_v11, %v2260_v52 }
 0x898   : > { %v1697_v63 = vmul.f32 %v2264_v12, %v1554_v15  ;;  %v2266_v43 = vpop.eup %2265 }
 0x89a   : > { %v1699_v36 = vadd.f32 %v1698_v24, %v1697_v63 }
 0x89c   : > { %2267 = vtanh.f32 %v1699_v36  ;;  %v1711_v42 = vsel %vm1709_vm15, %v1699_v36, %v1554_v15 }
 0x89d   : > { %1717 = vst [vmem:[#allocation3] sm:$0x3] %v1711_v42 }
 0x8a6   : > { %v2268_v44 = vpop.eup %2267  ;;  %1724 = sbr.rel (!%p2432_p4) target bundleno = 2234 (0x8ba), region = 40 }
 0x8a7   : > { %v1701_v4 = vmul.f32 %v2268_v44, %v2266_v43 }
 0x8a9   : > { %v1710_v5 = vsel %vm1709_vm15, %v1701_v4, %v1553_v56  ;;  %v1712_v6 = vsel %vm1709_vm15, %v1701_v4, 0.0 }
 0x8aa   : > { %v1713_v16 = vpack.c.bf16 %v1712_v6, %v1712_v6  ;;  %1716 = vst [vmem:[#allocation2] sm:$0x3] %v1710_v5 }
 0x8ac   : > { %2023 = vst [vmem:[%s1877_s10 + $0x7] sm:$0x1] %v1713_v16 }
 0x8b3   : > { %v1748_v17 = vld [vmem:[%s2466_s21] sm:$0x1]  ;;  %v1750_v18 = vld [vmem:[%s2466_s21 + $0x1] sm:$0x1]  ;;  %v1752_v19 = vld [vmem:[%s2466_s21 + $0x2] sm:$0x1] }
 0x8b4   : > { %v1754_v20 = vld [vmem:[%s2466_s21 + $0x3] sm:$0x1]  ;;  %v1756_v21 = vld [vmem:[%s2466_s21 + $0x4] sm:$0x1]  ;;  %v1758_v22 = vld [vmem:[%s2466_s21 + $0x5] sm:$0x1] }
 0x8b5   : > { %v1760_v23 = vld [vmem:[%s2466_s21 + $0x6] sm:$0x1]  ;;  %v1762_v25 = vld [vmem:[%s2466_s21 + $0x7] sm:$0x1]  ;;  %1749 = vst [vmem:[%s1732_s25] sm:$0x1] %v1748_v17 }
 0x8b6   : > { %1751 = vst [vmem:[%s1732_s25 + $0x2] sm:$0x1] %v1750_v18  ;;  %1753 = vst [vmem:[%s1732_s25 + $0x4] sm:$0x1] %v1752_v19 }
 0x8b7   : > { %1755 = vst [vmem:[%s1732_s25 + $0x6] sm:$0x1] %v1754_v20  ;;  %1757 = vst [vmem:[%s1732_s25 + $0x8] sm:$0x1] %v1756_v21 }
 0x8b8   : > { %1759 = vst [vmem:[%s1732_s25 + $0xa] sm:$0x1] %v1758_v22  ;;  %1761 = vst [vmem:[%s1732_s25 + $0xc] sm:$0x1] %v1760_v23 }
 0x8b9   : > { %1763 = vst [vmem:[%s1732_s25 + $0xe] sm:$0x1] %v1762_v25 }
 0x8ba PF: > { %s13_s18 = sadd.s32 1, %s2355_s18   ;;  %s3143_s12 = smov %s2335_s13 }
 0x8bb   : > { %p10_p12 = scmp.ge.s32.totalorder %s13_s18, 6   ;;  %s3144_s13 = smov %s2441_s8 }
 0x8bc   : > { %s3145_s14 = smov %s2347_s16  ;;  %s3146_s15 = smov %s2351_s17 }
 0x8bd   : > { %s3147_s16 = smov %s3150_s19  ;;  %s3148_s17 = smov %s3154_s20 }
 0x8be   :  { %12 = sbr.rel (!%p10_p12) target bundleno = 4 (0x4), region = 126 }

// kernel: listener_forward.9
= control target key start
LH: loop header
LB: loop body
LE: loop exit
PB: predicated region body
PF: predicated region fallthrough
CT: control target
= control target key end

     0   :  { %8 = vsyncpa [#allocation3], 0  ;;  %s2770_s12 = smov [#allocation2]   ;;  %s2871_s0 = inlined_call_operand.vmem [shape: bf16[16,512], index: 0, kind: input, shape index: {}]   ;;  %s2872_s1 = inlined_call_operand.hbm [shape: bf16[2,512,512], index: 1, kind: input, shape index: {}]   ;;  %s2873_s2 = inlined_call_operand.vmem [shape: f32[2,1,512], index: 2, kind: input, shape index: {}]   ;;  %s2874_s3 = inlined_call_operand.vmem [shape: bf16[2,16,512], index: 3, kind: output, shape index: {}]  }
   0x1   :  { %s16_s13 = sshll.u32 %s2770_s12, 4  ;;  %s2746_s16 = scalar_lea.hbm %s2872_s1, 32768  ;;  %s17_s13 = int_to_ptr.vmem [resolvable:$true] %s16_s13 }
   0x2   :  { %p2747_p0 = scmp.ne.s32.totalorder %s2872_s1, %s2746_s16  ;;  %p2750_p1 = scmp.lt.u32.totalorder %s2746_s16, %s2872_s1 }
   0x4   :  { %p2752_p2 = pnand %p2750_p1, %p2747_p0 }
   0x6   :  { %2755 = shalt.err (!%p2752_p2)
}
   0x7   :  { %s2756_s21 = scalar_lea.vmem %s17_s13, 32768  ;;  %p2761_p4 = scmp.lt.s32.totalorder %s17_s13, %s17_s13 }
   0x8   :  { %p2757_p3 = scmp.ne.s32.totalorder %s17_s13, %s2756_s21  ;;  %p2762_p5 = scmp.lt.s32.totalorder %s2756_s21, %s2756_s21 }
   0xa   :  { %p2763_p6 = por %p2762_p5, %p2761_p4 }
   0xc   :  { %p2764_p7 = pnand %p2763_p6, %p2757_p3 }
   0xe   :  { %2767 = shalt.err (!%p2764_p7)
}
   0xf   :  { %s2771_s22 = smov 256   ;;  %s2772_s23 = smov 16  }
  0x10   :  { %22 = dma.hbm_to_vmem [thread:$0]  %s2872_s1, 32768, %s17_s13, [#allocation3], %s2771_s22, %s2771_s22, %s2772_s23  }
  0x11   :  { %2768 = dma.done.wait [#allocation3], 32768  }
  0x12   :  { %2769 = vsyncadd [#allocation3], 4294934528  ;;  %v2356_v0 = vld [vmem:[#allocation2 + $0x4] ss:$16 sps:$4 sm:$0xff]   ;;  %v2358_v1 = vld [vmem:[#allocation2 + $0xc] ss:$16 sps:$4 sm:$0xff]  }
  0x13   :  { %842 = vmatprep.subr.bf16.mxu0 %v2356_v0  ;;  %v2360_v2 = vld [vmem:[#allocation2] ss:$16 sps:$4 sm:$0xff]   ;;  %v2361_v3 = vld [vmem:[#allocation2 + $0x8] ss:$16 sps:$4 sm:$0xff]   ;;  %928 = vmatprep.subr.bf16.mxu1 %v2358_v1  ;;  %v2362_v4 = vld [vmem:[#allocation2 + $0x24] ss:$16 sps:$4 sm:$0xff]  }
  0x14   :  { %843 = vmatpush1.bf16.msra.mxu0 %v2360_v2  ;;  %929 = vmatpush1.bf16.msra.mxu1 %v2361_v3  ;;  %v2364_v5 = vld [vmem:[#allocation2 + $0x2c] ss:$16 sps:$4 sm:$0xff]   ;;  %v2366_v6 = vld [vmem:[#allocation2 + $0x20] ss:$16 sps:$4 sm:$0xff]   ;;  %v2367_v7 = vld [vmem:[#allocation2 + $0x28] ss:$16 sps:$4 sm:$0xff]  }
  0x15   :  { %844 = vmatprep.subr.bf16.mxu0 %v2362_v4  ;;  %930 = vmatprep.subr.bf16.mxu1 %v2364_v5  ;;  %v2368_v8 = vld [vmem:[#allocation2 + $0x44] ss:$16 sps:$4 sm:$0xff]   ;;  %v2370_v9 = vld [vmem:[#allocation2 + $0x4c] ss:$16 sps:$4 sm:$0xff]   ;;  %v2372_v10 = vld [vmem:[#allocation2 + $0x40] ss:$16 sps:$4 sm:$0xff]  }
  0x16   :  { %v2373_v11 = vld [vmem:[#allocation2 + $0x48] ss:$16 sps:$4 sm:$0xff]   ;;  %v2374_v12 = vld [vmem:[#allocation2 + $0x64] ss:$16 sps:$4 sm:$0xff]   ;;  %v2376_v13 = vld [vmem:[#allocation2 + $0x6c] ss:$16 sps:$4 sm:$0xff]  }
  0x17   :  { %v2378_v14 = vld [vmem:[#allocation2 + $0x60] ss:$16 sps:$4 sm:$0xff]   ;;  %v2379_v15 = vld [vmem:[#allocation2 + $0x68] ss:$16 sps:$4 sm:$0xff]   ;;  %v2380_v16 = vld [vmem:[#allocation2 + $0x84] ss:$16 sps:$4 sm:$0xff]  }
  0x18   :  { %845 = vmatpush1.bf16.msra.mxu0 %v2366_v6  ;;  %931 = vmatpush1.bf16.msra.mxu1 %v2367_v7  ;;  %v2382_v17 = vld [vmem:[#allocation2 + $0x8c] ss:$16 sps:$4 sm:$0xff]   ;;  %v2384_v18 = vld [vmem:[#allocation2 + $0x80] ss:$16 sps:$4 sm:$0xff]   ;;  %v2385_v19 = vld [vmem:[#allocation2 + $0x88] ss:$16 sps:$4 sm:$0xff]  }
  0x19   :  { %846 = vmatprep.subr.bf16.mxu0 %v2368_v8  ;;  %932 = vmatprep.subr.bf16.mxu1 %v2370_v9  ;;  %v2386_v20 = vld [vmem:[#allocation2 + $0xa4] ss:$16 sps:$4 sm:$0xff]   ;;  %v2388_v21 = vld [vmem:[#allocation2 + $0xac] ss:$16 sps:$4 sm:$0xff]   ;;  %v2390_v22 = vld [vmem:[#allocation2 + $0xa0] ss:$16 sps:$4 sm:$0xff]  }
  0x1a   :  { %v2391_v23 = vld [vmem:[#allocation2 + $0xa8] ss:$16 sps:$4 sm:$0xff]   ;;  %v2392_v24 = vld [vmem:[#allocation2 + $0xc4] ss:$16 sps:$4 sm:$0xff]   ;;  %v2394_v25 = vld [vmem:[#allocation2 + $0xcc] ss:$16 sps:$4 sm:$0xff]  }
  0x1b   :  { %v2396_v26 = vld [vmem:[#allocation2 + $0xc0] ss:$16 sps:$4 sm:$0xff]   ;;  %v2397_v27 = vld [vmem:[#allocation2 + $0xc8] ss:$16 sps:$4 sm:$0xff]   ;;  %v2398_v28 = vld [vmem:[#allocation2 + $0xe4] ss:$16 sps:$4 sm:$0xff]  }
  0x1c   :  { %847 = vmatpush1.bf16.msra.mxu0 %v2372_v10  ;;  %933 = vmatpush1.bf16.msra.mxu1 %v2373_v11  ;;  %v2400_v29 = vld [vmem:[#allocation2 + $0xec] ss:$16 sps:$4 sm:$0xff]   ;;  %v2402_v30 = vld [vmem:[#allocation2 + $0xe0] ss:$16 sps:$4 sm:$0xff]   ;;  %v2403_v31 = vld [vmem:[#allocation2 + $0xe8] ss:$16 sps:$4 sm:$0xff]  }
  0x1d   :  { %848 = vmatprep.subr.bf16.mxu0 %v2374_v12  ;;  %934 = vmatprep.subr.bf16.mxu1 %v2376_v13  ;;  %v2404_v32 = vld [vmem:[#allocation2 + $0x104] ss:$16 sps:$4 sm:$0xff]   ;;  %v2406_v33 = vld [vmem:[#allocation2 + $0x10c] ss:$16 sps:$4 sm:$0xff]   ;;  %v2408_v34 = vld [vmem:[#allocation2 + $0x100] ss:$16 sps:$4 sm:$0xff]  }
  0x1e   :  { %v2409_v35 = vld [vmem:[#allocation2 + $0x108] ss:$16 sps:$4 sm:$0xff]   ;;  %v2410_v36 = vld [vmem:[#allocation2 + $0x124] ss:$16 sps:$4 sm:$0xff]   ;;  %v2412_v37 = vld [vmem:[#allocation2 + $0x12c] ss:$16 sps:$4 sm:$0xff]  }
  0x1f   :  { %v2414_v38 = vld [vmem:[#allocation2 + $0x120] ss:$16 sps:$4 sm:$0xff]   ;;  %v2415_v39 = vld [vmem:[#allocation2 + $0x128] ss:$16 sps:$4 sm:$0xff]   ;;  %v2416_v40 = vld [vmem:[#allocation2 + $0x144] ss:$16 sps:$4 sm:$0xff]  }
  0x20   :  { %849 = vmatpush1.bf16.msra.mxu0 %v2378_v14  ;;  %935 = vmatpush1.bf16.msra.mxu1 %v2379_v15  ;;  %v2418_v41 = vld [vmem:[#allocation2 + $0x14c] ss:$16 sps:$4 sm:$0xff]   ;;  %v2420_v42 = vld [vmem:[#allocation2 + $0x140] ss:$16 sps:$4 sm:$0xff]   ;;  %v2421_v43 = vld [vmem:[#allocation2 + $0x148] ss:$16 sps:$4 sm:$0xff]  }
  0x21   :  { %850 = vmatprep.subr.bf16.mxu0 %v2380_v16  ;;  %936 = vmatprep.subr.bf16.mxu1 %v2382_v17  ;;  %v2422_v44 = vld [vmem:[#allocation2 + $0x164] ss:$16 sps:$4 sm:$0xff]   ;;  %v2424_v45 = vld [vmem:[#allocation2 + $0x16c] ss:$16 sps:$4 sm:$0xff]   ;;  %v2426_v46 = vld [vmem:[#allocation2 + $0x160] ss:$16 sps:$4 sm:$0xff]  }
  0x22   :  { %v2808_v47 = vld [vmem:[%s2871_s0 + $0x4] ss:$16 sps:$4 sm:$0xff]   ;;  %v2427_v48 = vld [vmem:[#allocation2 + $0x168] ss:$16 sps:$4 sm:$0xff]   ;;  %v2430_v50 = vld [vmem:[#allocation2 + $0x18c] ss:$16 sps:$4 sm:$0xff]  }
  0x23   :  { %v2428_v49 = vld [vmem:[#allocation2 + $0x184] ss:$16 sps:$4 sm:$0xff]   ;;  %874 = vmatprep.mubr.bf16.mxu0 %v2808_v47  ;;  %960 = vmatprep.mubr.bf16.mxu1 %v2808_v47  ;;  %v2432_v51 = vld [vmem:[#allocation2 + $0x180] ss:$16 sps:$4 sm:$0xff]   ;;  %v2433_v52 = vld [vmem:[#allocation2 + $0x188] ss:$16 sps:$4 sm:$0xff]  }
  0x24   :  { %851 = vmatpush1.bf16.msra.mxu0 %v2384_v18  ;;  %937 = vmatpush1.bf16.msra.mxu1 %v2385_v19  ;;  %v2434_v53 = vld [vmem:[#allocation2 + $0x1a4] ss:$16 sps:$4 sm:$0xff]   ;;  %v2436_v54 = vld [vmem:[#allocation2 + $0x1ac] ss:$16 sps:$4 sm:$0xff]   ;;  %v2438_v55 = vld [vmem:[#allocation2 + $0x1a0] ss:$16 sps:$4 sm:$0xff]  }
  0x25   :  { %852 = vmatprep.subr.bf16.mxu0 %v2386_v20  ;;  %938 = vmatprep.subr.bf16.mxu1 %v2388_v21  ;;  %v2439_v56 = vld [vmem:[#allocation2 + $0x1a8] ss:$16 sps:$4 sm:$0xff]   ;;  %v2440_v57 = vld [vmem:[#allocation2 + $0x1c4] ss:$16 sps:$4 sm:$0xff]   ;;  %v2442_v58 = vld [vmem:[#allocation2 + $0x1cc] ss:$16 sps:$4 sm:$0xff]  }
  0x26   :  { %v2444_v59 = vld [vmem:[#allocation2 + $0x1c0] ss:$16 sps:$4 sm:$0xff]   ;;  %v2445_v60 = vld [vmem:[#allocation2 + $0x1c8] ss:$16 sps:$4 sm:$0xff]   ;;  %v2446_v61 = vld [vmem:[#allocation2 + $0x1e4] ss:$16 sps:$4 sm:$0xff]  }
  0x27   :  { %v2448_v62 = vld [vmem:[#allocation2 + $0x1ec] ss:$16 sps:$4 sm:$0xff]   ;;  %v2450_v63 = vld [vmem:[#allocation2 + $0x1e0] ss:$16 sps:$4 sm:$0xff]   ;;  %v2451_v0 = vld [vmem:[#allocation2 + $0x1e8] ss:$16 sps:$4 sm:$0xff]  }
  0x28   :  { %853 = vmatpush1.bf16.msra.mxu0 %v2390_v22  ;;  %939 = vmatpush1.bf16.msra.mxu1 %v2391_v23  ;;  %v2456_v1 = vld [vmem:[#allocation2 + $0x204] ss:$16 sps:$4 sm:$0xff]   ;;  %v2459_v2 = vld [vmem:[#allocation2 + $0x20c] ss:$16 sps:$4 sm:$0xff]   ;;  %v2454_v3 = vld [vmem:[#allocation2 + $0x200] ss:$16 sps:$4 sm:$0xff]  }
  0x29   :  { %854 = vmatprep.subr.bf16.mxu0 %v2392_v24  ;;  %940 = vmatprep.subr.bf16.mxu1 %v2394_v25  ;;  %v2457_v4 = vld [vmem:[#allocation2 + $0x208] ss:$16 sps:$4 sm:$0xff]   ;;  %v2815_v5 = vld [vmem:[%s2871_s0] ss:$16 sps:$4 sm:$0xff]   ;;  %v2463_v6 = vld [vmem:[#allocation2 + $0x224] ss:$16 sps:$4 sm:$0xff]  }
  0x2a   :  { %v2466_v7 = vld [vmem:[#allocation2 + $0x22c] ss:$16 sps:$4 sm:$0xff]   ;;  %v2461_v8 = vld [vmem:[#allocation2 + $0x220] ss:$16 sps:$4 sm:$0xff]   ;;  %v2464_v9 = vld [vmem:[#allocation2 + $0x228] ss:$16 sps:$4 sm:$0xff]  }
  0x2b   :  { %v2469_v10 = vld [vmem:[#allocation2 + $0x244] ss:$16 sps:$4 sm:$0xff]   ;;  %v2472_v11 = vld [vmem:[#allocation2 + $0x24c] ss:$16 sps:$4 sm:$0xff]   ;;  %v2467_v12 = vld [vmem:[#allocation2 + $0x240] ss:$16 sps:$4 sm:$0xff]  }
  0x2c   :  { %855 = vmatpush1.bf16.msra.mxu0 %v2396_v26  ;;  %941 = vmatpush1.bf16.msra.mxu1 %v2397_v27  ;;  %v2470_v13 = vld [vmem:[#allocation2 + $0x248] ss:$16 sps:$4 sm:$0xff]   ;;  %v2475_v14 = vld [vmem:[#allocation2 + $0x264] ss:$16 sps:$4 sm:$0xff]   ;;  %v2478_v15 = vld [vmem:[#allocation2 + $0x26c] ss:$16 sps:$4 sm:$0xff]  }
  0x2d   :  { %856 = vmatprep.subr.bf16.mxu0 %v2398_v28  ;;  %942 = vmatprep.subr.bf16.mxu1 %v2400_v29  ;;  %v2473_v16 = vld [vmem:[#allocation2 + $0x260] ss:$16 sps:$4 sm:$0xff]   ;;  %v2476_v17 = vld [vmem:[#allocation2 + $0x268] ss:$16 sps:$4 sm:$0xff]   ;;  %v2481_v18 = vld [vmem:[#allocation2 + $0x284] ss:$16 sps:$4 sm:$0xff]  }
  0x2e   :  { %v2484_v19 = vld [vmem:[#allocation2 + $0x28c] ss:$16 sps:$4 sm:$0xff]   ;;  %v2479_v20 = vld [vmem:[#allocation2 + $0x280] ss:$16 sps:$4 sm:$0xff]   ;;  %v2482_v21 = vld [vmem:[#allocation2 + $0x288] ss:$16 sps:$4 sm:$0xff]  }
  0x2f   :  { %v2487_v22 = vld [vmem:[#allocation2 + $0x2a4] ss:$16 sps:$4 sm:$0xff]   ;;  %v2490_v23 = vld [vmem:[#allocation2 + $0x2ac] ss:$16 sps:$4 sm:$0xff]   ;;  %v2485_v24 = vld [vmem:[#allocation2 + $0x2a0] ss:$16 sps:$4 sm:$0xff]  }
  0x30   :  { %857 = vmatpush1.bf16.msra.mxu0 %v2402_v30  ;;  %943 = vmatpush1.bf16.msra.mxu1 %v2403_v31  ;;  %v2488_v25 = vld [vmem:[#allocation2 + $0x2a8] ss:$16 sps:$4 sm:$0xff]   ;;  %v2493_v26 = vld [vmem:[#allocation2 + $0x2c4] ss:$16 sps:$4 sm:$0xff]   ;;  %v2496_v27 = vld [vmem:[#allocation2 + $0x2cc] ss:$16 sps:$4 sm:$0xff]  }
  0x31   :  { %858 = vmatprep.subr.bf16.mxu0 %v2404_v32  ;;  %944 = vmatprep.subr.bf16.mxu1 %v2406_v33  ;;  %v2491_v28 = vld [vmem:[#allocation2 + $0x2c0] ss:$16 sps:$4 sm:$0xff]   ;;  %v2494_v29 = vld [vmem:[#allocation2 + $0x2c8] ss:$16 sps:$4 sm:$0xff]   ;;  %v2822_v30 = vld [vmem:[%s2871_s0 + $0xc] ss:$16 sps:$4 sm:$0xff]  }
  0x32   :  { %v2499_v31 = vld [vmem:[#allocation2 + $0x2e4] ss:$16 sps:$4 sm:$0xff]   ;;  %v2502_v32 = vld [vmem:[#allocation2 + $0x2ec] ss:$16 sps:$4 sm:$0xff]   ;;  %v2497_v33 = vld [vmem:[#allocation2 + $0x2e0] ss:$16 sps:$4 sm:$0xff]  }
  0x34   :  { %859 = vmatpush1.bf16.msra.mxu0 %v2408_v34  ;;  %945 = vmatpush1.bf16.msra.mxu1 %v2409_v35  ;;  %v2500_v34 = vld [vmem:[#allocation2 + $0x2e8] ss:$16 sps:$4 sm:$0xff]   ;;  %v2505_v35 = vld [vmem:[#allocation2 + $0x304] ss:$16 sps:$4 sm:$0xff]  }
  0x35   :  { %860 = vmatprep.subr.bf16.mxu0 %v2410_v36  ;;  %946 = vmatprep.subr.bf16.mxu1 %v2412_v37  ;;  %v2508_v36 = vld [vmem:[#allocation2 + $0x30c] ss:$16 sps:$4 sm:$0xff]   ;;  %v2503_v37 = vld [vmem:[#allocation2 + $0x300] ss:$16 sps:$4 sm:$0xff]  }
  0x38   :  { %861 = vmatpush1.bf16.msra.mxu0 %v2414_v38  ;;  %947 = vmatpush1.bf16.msra.mxu1 %v2415_v39  ;;  %v2506_v38 = vld [vmem:[#allocation2 + $0x308] ss:$16 sps:$4 sm:$0xff]   ;;  %v2511_v39 = vld [vmem:[#allocation2 + $0x324] ss:$16 sps:$4 sm:$0xff]  }
  0x39   :  { %862 = vmatprep.subr.bf16.mxu0 %v2416_v40  ;;  %948 = vmatprep.subr.bf16.mxu1 %v2418_v41  ;;  %v2514_v40 = vld [vmem:[#allocation2 + $0x32c] ss:$16 sps:$4 sm:$0xff]   ;;  %v2509_v41 = vld [vmem:[#allocation2 + $0x320] ss:$16 sps:$4 sm:$0xff]  }
  0x3c   :  { %863 = vmatpush1.bf16.msra.mxu0 %v2420_v42  ;;  %949 = vmatpush1.bf16.msra.mxu1 %v2421_v43  ;;  %v2512_v42 = vld [vmem:[#allocation2 + $0x328] ss:$16 sps:$4 sm:$0xff]   ;;  %v2517_v43 = vld [vmem:[#allocation2 + $0x344] ss:$16 sps:$4 sm:$0xff]  }
  0x3d   :  { %864 = vmatprep.subr.bf16.mxu0 %v2422_v44  ;;  %950 = vmatprep.subr.bf16.mxu1 %v2424_v45  ;;  %v2520_v44 = vld [vmem:[#allocation2 + $0x34c] ss:$16 sps:$4 sm:$0xff]   ;;  %v2515_v45 = vld [vmem:[#allocation2 + $0x340] ss:$16 sps:$4 sm:$0xff]  }
  0x40   :  { %865 = vmatpush1.bf16.msra.mxu0 %v2426_v46  ;;  %951 = vmatpush1.bf16.msra.mxu1 %v2427_v48  ;;  %v2518_v46 = vld [vmem:[#allocation2 + $0x348] ss:$16 sps:$4 sm:$0xff]   ;;  %v2523_v48 = vld [vmem:[#allocation2 + $0x364] ss:$16 sps:$4 sm:$0xff]  }
  0x41   :  { %866 = vmatprep.subr.bf16.mxu0 %v2428_v49  ;;  %952 = vmatprep.subr.bf16.mxu1 %v2430_v50  ;;  %v2526_v49 = vld [vmem:[#allocation2 + $0x36c] ss:$16 sps:$4 sm:$0xff]   ;;  %v2521_v50 = vld [vmem:[#allocation2 + $0x360] ss:$16 sps:$4 sm:$0xff]  }
  0x44   :  { %867 = vmatpush1.bf16.msra.mxu0 %v2432_v51  ;;  %953 = vmatpush1.bf16.msra.mxu1 %v2433_v52  ;;  %v2524_v51 = vld [vmem:[#allocation2 + $0x368] ss:$16 sps:$4 sm:$0xff]   ;;  %v2529_v52 = vld [vmem:[#allocation2 + $0x384] ss:$16 sps:$4 sm:$0xff]  }
  0x45   :  { %868 = vmatprep.subr.bf16.mxu0 %v2434_v53  ;;  %954 = vmatprep.subr.bf16.mxu1 %v2436_v54  ;;  %v2532_v53 = vld [vmem:[#allocation2 + $0x38c] ss:$16 sps:$4 sm:$0xff]   ;;  %v2527_v54 = vld [vmem:[#allocation2 + $0x380] ss:$16 sps:$4 sm:$0xff]  }
  0x48   :  { %869 = vmatpush1.bf16.msra.mxu0 %v2438_v55  ;;  %955 = vmatpush1.bf16.msra.mxu1 %v2439_v56  ;;  %v2530_v55 = vld [vmem:[#allocation2 + $0x388] ss:$16 sps:$4 sm:$0xff]   ;;  %v2535_v56 = vld [vmem:[#allocation2 + $0x3a4] ss:$16 sps:$4 sm:$0xff]  }
  0x49   :  { %870 = vmatprep.subr.bf16.mxu0 %v2440_v57  ;;  %956 = vmatprep.subr.bf16.mxu1 %v2442_v58  ;;  %v2538_v57 = vld [vmem:[#allocation2 + $0x3ac] ss:$16 sps:$4 sm:$0xff]   ;;  %v2533_v58 = vld [vmem:[#allocation2 + $0x3a0] ss:$16 sps:$4 sm:$0xff]  }
  0x4c   :  { %871 = vmatpush1.bf16.msra.mxu0 %v2444_v59  ;;  %957 = vmatpush1.bf16.msra.mxu1 %v2445_v60  ;;  %v2536_v59 = vld [vmem:[#allocation2 + $0x3a8] ss:$16 sps:$4 sm:$0xff]   ;;  %v2541_v60 = vld [vmem:[#allocation2 + $0x3c4] ss:$16 sps:$4 sm:$0xff]  }
  0x4d   :  { %872 = vmatprep.subr.bf16.mxu0 %v2446_v61  ;;  %958 = vmatprep.subr.bf16.mxu1 %v2448_v62  ;;  %v2544_v61 = vld [vmem:[#allocation2 + $0x3cc] ss:$16 sps:$4 sm:$0xff]   ;;  %v2539_v62 = vld [vmem:[#allocation2 + $0x3c0] ss:$16 sps:$4 sm:$0xff]  }
  0x50   :  { %873 = vmatpush1.bf16.msra.mxu0 %v2450_v63  ;;  %959 = vmatpush1.bf16.msra.mxu1 %v2451_v0  ;;  %v2542_v63 = vld [vmem:[#allocation2 + $0x3c8] ss:$16 sps:$4 sm:$0xff]   ;;  %v2547_v0 = vld [vmem:[#allocation2 + $0x3e4] ss:$16 sps:$4 sm:$0xff]  }
  0x51   :  { %885 = vmatprep.subr.bf16.mxu0 %v2456_v1  ;;  %971 = vmatprep.subr.bf16.mxu1 %v2459_v2  ;;  %v2550_v1 = vld [vmem:[#allocation2 + $0x3ec] ss:$16 sps:$4 sm:$0xff]   ;;  %v2545_v2 = vld [vmem:[#allocation2 + $0x3e0] ss:$16 sps:$4 sm:$0xff]  }
  0x53   :  { %875 = vmatmul.mubr.bf16.vlgmr.msra.gmra.mrb[0].mxu0 %v2815_v5  ;;  %961 = vmatmul.mubr.bf16.vlgmr.msra.gmra.mrb[0].mxu1 %v2815_v5 }
  0x54   :  { %886 = vmatpush1.bf16.msra.mxu0 %v2454_v3  ;;  %972 = vmatpush1.bf16.msra.mxu1 %v2457_v4  ;;  %v2548_v3 = vld [vmem:[#allocation2 + $0x3e8] ss:$16 sps:$4 sm:$0xff]   ;;  %v2556_v4 = vld [vmem:[#allocation2 + $0x404] ss:$16 sps:$4 sm:$0xff]  }
  0x55   :  { %887 = vmatprep.subr.bf16.mxu0 %v2463_v6  ;;  %973 = vmatprep.subr.bf16.mxu1 %v2466_v7  ;;  %v2559_v6 = vld [vmem:[#allocation2 + $0x40c] ss:$16 sps:$4 sm:$0xff]   ;;  %v2829_v7 = vld [vmem:[%s2871_s0 + $0x8] ss:$16 sps:$4 sm:$0xff]  }
  0x56   :  { %917 = vmatprep.mubr.bf16.mxu0 %v2822_v30  ;;  %1003 = vmatprep.mubr.bf16.mxu1 %v2822_v30 }
  0x58   :  { %888 = vmatpush1.bf16.msra.mxu0 %v2461_v8  ;;  %974 = vmatpush1.bf16.msra.mxu1 %v2464_v9  ;;  %v2554_v8 = vld [vmem:[#allocation2 + $0x400] ss:$16 sps:$4 sm:$0xff]   ;;  %v2557_v9 = vld [vmem:[#allocation2 + $0x408] ss:$16 sps:$4 sm:$0xff]  }
  0x59   :  { %889 = vmatprep.subr.bf16.mxu0 %v2469_v10  ;;  %975 = vmatprep.subr.bf16.mxu1 %v2472_v11  ;;  %v2562_v10 = vld [vmem:[#allocation2 + $0x424] ss:$16 sps:$4 sm:$0xff]   ;;  %v2565_v11 = vld [vmem:[#allocation2 + $0x42c] ss:$16 sps:$4 sm:$0xff]  }
  0x5c   :  { %890 = vmatpush1.bf16.msra.mxu0 %v2467_v12  ;;  %976 = vmatpush1.bf16.msra.mxu1 %v2470_v13  ;;  %v2560_v12 = vld [vmem:[#allocation2 + $0x420] ss:$16 sps:$4 sm:$0xff]   ;;  %v2563_v13 = vld [vmem:[#allocation2 + $0x428] ss:$16 sps:$4 sm:$0xff]  }
  0x5d   :  { %891 = vmatprep.subr.bf16.mxu0 %v2475_v14  ;;  %977 = vmatprep.subr.bf16.mxu1 %v2478_v15  ;;  %v2568_v14 = vld [vmem:[#allocation2 + $0x444] ss:$16 sps:$4 sm:$0xff]   ;;  %v2571_v15 = vld [vmem:[#allocation2 + $0x44c] ss:$16 sps:$4 sm:$0xff]  }
  0x60   :  { %892 = vmatpush1.bf16.msra.mxu0 %v2473_v16  ;;  %978 = vmatpush1.bf16.msra.mxu1 %v2476_v17  ;;  %v2566_v16 = vld [vmem:[#allocation2 + $0x440] ss:$16 sps:$4 sm:$0xff]   ;;  %v2569_v17 = vld [vmem:[#allocation2 + $0x448] ss:$16 sps:$4 sm:$0xff]  }
  0x61   :  { %893 = vmatprep.subr.bf16.mxu0 %v2481_v18  ;;  %979 = vmatprep.subr.bf16.mxu1 %v2484_v19  ;;  %v2574_v18 = vld [vmem:[#allocation2 + $0x464] ss:$16 sps:$4 sm:$0xff]   ;;  %v2577_v19 = vld [vmem:[#allocation2 + $0x46c] ss:$16 sps:$4 sm:$0xff]  }
  0x64   :  { %894 = vmatpush1.bf16.msra.mxu0 %v2479_v20  ;;  %980 = vmatpush1.bf16.msra.mxu1 %v2482_v21  ;;  %v2572_v20 = vld [vmem:[#allocation2 + $0x460] ss:$16 sps:$4 sm:$0xff]   ;;  %v2575_v21 = vld [vmem:[#allocation2 + $0x468] ss:$16 sps:$4 sm:$0xff]  }
  0x65   :  { %895 = vmatprep.subr.bf16.mxu0 %v2487_v22  ;;  %981 = vmatprep.subr.bf16.mxu1 %v2490_v23  ;;  %v2580_v22 = vld [vmem:[#allocation2 + $0x484] ss:$16 sps:$4 sm:$0xff]   ;;  %v2583_v23 = vld [vmem:[#allocation2 + $0x48c] ss:$16 sps:$4 sm:$0xff]  }
  0x68   :  { %896 = vmatpush1.bf16.msra.mxu0 %v2485_v24  ;;  %982 = vmatpush1.bf16.msra.mxu1 %v2488_v25  ;;  %v2578_v24 = vld [vmem:[#allocation2 + $0x480] ss:$16 sps:$4 sm:$0xff]   ;;  %v2581_v25 = vld [vmem:[#allocation2 + $0x488] ss:$16 sps:$4 sm:$0xff]  }
  0x69   :  { %897 = vmatprep.subr.bf16.mxu0 %v2493_v26  ;;  %983 = vmatprep.subr.bf16.mxu1 %v2496_v27  ;;  %v2589_v26 = vld [vmem:[#allocation2 + $0x4ac] ss:$16 sps:$4 sm:$0xff]   ;;  %v2584_v27 = vld [vmem:[#allocation2 + $0x4a0] ss:$16 sps:$4 sm:$0xff]  }
  0x6c   :  { %898 = vmatpush1.bf16.msra.mxu0 %v2491_v28  ;;  %984 = vmatpush1.bf16.msra.mxu1 %v2494_v29  ;;  %v2587_v28 = vld [vmem:[#allocation2 + $0x4a8] ss:$16 sps:$4 sm:$0xff]   ;;  %v2592_v29 = vld [vmem:[#allocation2 + $0x4c4] ss:$16 sps:$4 sm:$0xff]  }
  0x6d   :  { %899 = vmatprep.subr.bf16.mxu0 %v2499_v31  ;;  %985 = vmatprep.subr.bf16.mxu1 %v2502_v32  ;;  %v2595_v31 = vld [vmem:[#allocation2 + $0x4cc] ss:$16 sps:$4 sm:$0xff]   ;;  %v2590_v32 = vld [vmem:[#allocation2 + $0x4c0] ss:$16 sps:$4 sm:$0xff]  }
  0x70   :  { %900 = vmatpush1.bf16.msra.mxu0 %v2497_v33  ;;  %986 = vmatpush1.bf16.msra.mxu1 %v2500_v34  ;;  %v2593_v33 = vld [vmem:[#allocation2 + $0x4c8] ss:$16 sps:$4 sm:$0xff]   ;;  %v2598_v34 = vld [vmem:[#allocation2 + $0x4e4] ss:$16 sps:$4 sm:$0xff]  }
  0x71   :  { %901 = vmatprep.subr.bf16.mxu0 %v2505_v35  ;;  %987 = vmatprep.subr.bf16.mxu1 %v2508_v36  ;;  %v2601_v35 = vld [vmem:[#allocation2 + $0x4ec] ss:$16 sps:$4 sm:$0xff]   ;;  %v2596_v36 = vld [vmem:[#allocation2 + $0x4e0] ss:$16 sps:$4 sm:$0xff]  }
  0x74   :  { %902 = vmatpush1.bf16.msra.mxu0 %v2503_v37  ;;  %988 = vmatpush1.bf16.msra.mxu1 %v2506_v38  ;;  %v2599_v37 = vld [vmem:[#allocation2 + $0x4e8] ss:$16 sps:$4 sm:$0xff]   ;;  %v2604_v38 = vld [vmem:[#allocation2 + $0x504] ss:$16 sps:$4 sm:$0xff]  }
  0x75   :  { %903 = vmatprep.subr.bf16.mxu0 %v2511_v39  ;;  %989 = vmatprep.subr.bf16.mxu1 %v2514_v40  ;;  %v2607_v39 = vld [vmem:[#allocation2 + $0x50c] ss:$16 sps:$4 sm:$0xff]   ;;  %v2602_v40 = vld [vmem:[#allocation2 + $0x500] ss:$16 sps:$4 sm:$0xff]  }
  0x78   :  { %904 = vmatpush1.bf16.msra.mxu0 %v2509_v41  ;;  %990 = vmatpush1.bf16.msra.mxu1 %v2512_v42  ;;  %v2605_v41 = vld [vmem:[#allocation2 + $0x508] ss:$16 sps:$4 sm:$0xff]   ;;  %v2610_v42 = vld [vmem:[#allocation2 + $0x524] ss:$16 sps:$4 sm:$0xff]  }
  0x79   :  { %905 = vmatprep.subr.bf16.mxu0 %v2517_v43  ;;  %991 = vmatprep.subr.bf16.mxu1 %v2520_v44  ;;  %v2613_v43 = vld [vmem:[#allocation2 + $0x52c] ss:$16 sps:$4 sm:$0xff]   ;;  %v2608_v44 = vld [vmem:[#allocation2 + $0x520] ss:$16 sps:$4 sm:$0xff]  }
  0x7c   :  { %906 = vmatpush1.bf16.msra.mxu0 %v2515_v45  ;;  %992 = vmatpush1.bf16.msra.mxu1 %v2518_v46  ;;  %v2611_v45 = vld [vmem:[#allocation2 + $0x528] ss:$16 sps:$4 sm:$0xff]   ;;  %v2616_v46 = vld [vmem:[#allocation2 + $0x544] ss:$16 sps:$4 sm:$0xff]  }
  0x7d   :  { %907 = vmatprep.subr.bf16.mxu0 %v2523_v48  ;;  %993 = vmatprep.subr.bf16.mxu1 %v2526_v49  ;;  %v2619_v48 = vld [vmem:[#allocation2 + $0x54c] ss:$16 sps:$4 sm:$0xff]   ;;  %v2614_v49 = vld [vmem:[#allocation2 + $0x540] ss:$16 sps:$4 sm:$0xff]  }
  0x80   :  { %908 = vmatpush1.bf16.msra.mxu0 %v2521_v50  ;;  %994 = vmatpush1.bf16.msra.mxu1 %v2524_v51  ;;  %v2617_v50 = vld [vmem:[#allocation2 + $0x548] ss:$16 sps:$4 sm:$0xff]   ;;  %v2622_v51 = vld [vmem:[#allocation2 + $0x564] ss:$16 sps:$4 sm:$0xff]  }
  0x81   :  { %909 = vmatprep.subr.bf16.mxu0 %v2529_v52  ;;  %995 = vmatprep.subr.bf16.mxu1 %v2532_v53  ;;  %v2625_v52 = vld [vmem:[#allocation2 + $0x56c] ss:$16 sps:$4 sm:$0xff]   ;;  %v2620_v53 = vld [vmem:[#allocation2 + $0x560] ss:$16 sps:$4 sm:$0xff]  }
  0x84   :  { %910 = vmatpush1.bf16.msra.mxu0 %v2527_v54  ;;  %996 = vmatpush1.bf16.msra.mxu1 %v2530_v55  ;;  %v2623_v54 = vld [vmem:[#allocation2 + $0x568] ss:$16 sps:$4 sm:$0xff]   ;;  %v2628_v55 = vld [vmem:[#allocation2 + $0x584] ss:$16 sps:$4 sm:$0xff]  }
  0x85   :  { %911 = vmatprep.subr.bf16.mxu0 %v2535_v56  ;;  %997 = vmatprep.subr.bf16.mxu1 %v2538_v57  ;;  %v2631_v56 = vld [vmem:[#allocation2 + $0x58c] ss:$16 sps:$4 sm:$0xff]   ;;  %v2626_v57 = vld [vmem:[#allocation2 + $0x580] ss:$16 sps:$4 sm:$0xff]  }
  0x88   :  { %912 = vmatpush1.bf16.msra.mxu0 %v2533_v58  ;;  %998 = vmatpush1.bf16.msra.mxu1 %v2536_v59  ;;  %v2629_v58 = vld [vmem:[#allocation2 + $0x588] ss:$16 sps:$4 sm:$0xff]   ;;  %v2634_v59 = vld [vmem:[#allocation2 + $0x5a4] ss:$16 sps:$4 sm:$0xff]  }
  0x89   :  { %913 = vmatprep.subr.bf16.mxu0 %v2541_v60  ;;  %999 = vmatprep.subr.bf16.mxu1 %v2544_v61  ;;  %v2637_v60 = vld [vmem:[#allocation2 + $0x5ac] ss:$16 sps:$4 sm:$0xff]   ;;  %v2632_v61 = vld [vmem:[#allocation2 + $0x5a0] ss:$16 sps:$4 sm:$0xff]  }
  0x8c   :  { %914 = vmatpush1.bf16.msra.mxu0 %v2539_v62  ;;  %1000 = vmatpush1.bf16.msra.mxu1 %v2542_v63  ;;  %v2635_v62 = vld [vmem:[#allocation2 + $0x5a8] ss:$16 sps:$4 sm:$0xff]   ;;  %v2640_v63 = vld [vmem:[#allocation2 + $0x5c4] ss:$16 sps:$4 sm:$0xff]  }
  0x8d   :  { %915 = vmatprep.subr.bf16.mxu0 %v2547_v0  ;;  %1001 = vmatprep.subr.bf16.mxu1 %v2550_v1  ;;  %v2643_v0 = vld [vmem:[#allocation2 + $0x5cc] ss:$16 sps:$4 sm:$0xff]   ;;  %v2638_v1 = vld [vmem:[#allocation2 + $0x5c0] ss:$16 sps:$4 sm:$0xff]  }
  0x90   :  { %916 = vmatpush1.bf16.msra.mxu0 %v2545_v2  ;;  %1002 = vmatpush1.bf16.msra.mxu1 %v2548_v3  ;;  %v2641_v2 = vld [vmem:[#allocation2 + $0x5c8] ss:$16 sps:$4 sm:$0xff]   ;;  %v2646_v3 = vld [vmem:[#allocation2 + $0x5e4] ss:$16 sps:$4 sm:$0xff]  }
  0x91   :  { %1834 = vmatprep.subr.bf16.mxu0 %v2556_v4  ;;  %1920 = vmatprep.subr.bf16.mxu1 %v2559_v6  ;;  %v2649_v4 = vld [vmem:[#allocation2 + $0x5ec] ss:$16 sps:$4 sm:$0xff]   ;;  %v2644_v6 = vld [vmem:[#allocation2 + $0x5e0] ss:$16 sps:$4 sm:$0xff]  }
  0x93   :  { %918 = vmatmul.mubr.bf16.vlgmr.msra.gmra.mrb[0].mxu0 %v2829_v7  ;;  %1004 = vmatmul.mubr.bf16.vlgmr.msra.gmra.mrb[0].mxu1 %v2829_v7 }
  0x94   :  { %1835 = vmatpush1.bf16.msra.mxu0 %v2554_v8  ;;  %1921 = vmatpush1.bf16.msra.mxu1 %v2557_v9  ;;  %v2647_v8 = vld [vmem:[#allocation2 + $0x5e8] ss:$16 sps:$4 sm:$0xff]   ;;  %v2652_v9 = vld [vmem:[#allocation2 + $0x604] ss:$16 sps:$4 sm:$0xff]  }
  0x95   :  { %1836 = vmatprep.subr.bf16.mxu0 %v2562_v10  ;;  %1922 = vmatprep.subr.bf16.mxu1 %v2565_v11  ;;  %v2655_v10 = vld [vmem:[#allocation2 + $0x60c] ss:$16 sps:$4 sm:$0xff]   ;;  %v2650_v11 = vld [vmem:[#allocation2 + $0x600] ss:$16 sps:$4 sm:$0xff]  }
  0x96   :  { %1866 = vmatprep.mubr.bf16.mxu0 %v2808_v47  ;;  %1952 = vmatprep.mubr.bf16.mxu1 %v2808_v47  ;;  %v2586_v47 = vld [vmem:[#allocation2 + $0x4a4] ss:$16 sps:$4 sm:$0xff]  }
  0x98   :  { %1837 = vmatpush1.bf16.msra.mxu0 %v2560_v12  ;;  %1923 = vmatpush1.bf16.msra.mxu1 %v2563_v13  ;;  %v2653_v12 = vld [vmem:[#allocation2 + $0x608] ss:$16 sps:$4 sm:$0xff]   ;;  %v2658_v13 = vld [vmem:[#allocation2 + $0x624] ss:$16 sps:$4 sm:$0xff]  }
  0x99   :  { %1838 = vmatprep.subr.bf16.mxu0 %v2568_v14  ;;  %1924 = vmatprep.subr.bf16.mxu1 %v2571_v15  ;;  %v2661_v14 = vld [vmem:[#allocation2 + $0x62c] ss:$16 sps:$4 sm:$0xff]   ;;  %v2656_v15 = vld [vmem:[#allocation2 + $0x620] ss:$16 sps:$4 sm:$0xff]  }
  0x9c   :  { %1839 = vmatpush1.bf16.msra.mxu0 %v2566_v16  ;;  %1925 = vmatpush1.bf16.msra.mxu1 %v2569_v17  ;;  %v2659_v16 = vld [vmem:[#allocation2 + $0x628] ss:$16 sps:$4 sm:$0xff]   ;;  %v2664_v17 = vld [vmem:[#allocation2 + $0x644] ss:$16 sps:$4 sm:$0xff]  }
  0x9d   :  { %1840 = vmatprep.subr.bf16.mxu0 %v2574_v18  ;;  %1926 = vmatprep.subr.bf16.mxu1 %v2577_v19  ;;  %v2667_v18 = vld [vmem:[#allocation2 + $0x64c] ss:$16 sps:$4 sm:$0xff]   ;;  %v2662_v19 = vld [vmem:[#allocation2 + $0x640] ss:$16 sps:$4 sm:$0xff]  }
  0xa0   :  { %1841 = vmatpush1.bf16.msra.mxu0 %v2572_v20  ;;  %1927 = vmatpush1.bf16.msra.mxu1 %v2575_v21  ;;  %v2665_v20 = vld [vmem:[#allocation2 + $0x648] ss:$16 sps:$4 sm:$0xff]   ;;  %v2670_v21 = vld [vmem:[#allocation2 + $0x664] ss:$16 sps:$4 sm:$0xff]  }
  0xa1   :  { %1842 = vmatprep.subr.bf16.mxu0 %v2580_v22  ;;  %1928 = vmatprep.subr.bf16.mxu1 %v2583_v23  ;;  %v2668_v22 = vld [vmem:[#allocation2 + $0x660] ss:$16 sps:$4 sm:$0xff]   ;;  %v2671_v23 = vld [vmem:[#allocation2 + $0x668] ss:$16 sps:$4 sm:$0xff]  }
  0xa4   :  { %1843 = vmatpush1.bf16.msra.mxu0 %v2578_v24  ;;  %1929 = vmatpush1.bf16.msra.mxu1 %v2581_v25  ;;  %v2676_v24 = vld [vmem:[#allocation2 + $0x684] ss:$16 sps:$4 sm:$0xff]   ;;  %v2679_v25 = vld [vmem:[#allocation2 + $0x68c] ss:$16 sps:$4 sm:$0xff]  }
  0xa5   :  { %1844 = vmatprep.subr.bf16.mxu0 %v2586_v47  ;;  %1930 = vmatprep.subr.bf16.mxu1 %v2589_v26  ;;  %v2674_v47 = vld [vmem:[#allocation2 + $0x680] ss:$16 sps:$4 sm:$0xff]   ;;  %v2682_v26 = vld [vmem:[#allocation2 + $0x6a4] ss:$16 sps:$4 sm:$0xff]  }
  0xa8   :  { %1845 = vmatpush1.bf16.msra.mxu0 %v2584_v27  ;;  %1931 = vmatpush1.bf16.msra.mxu1 %v2587_v28  ;;  %v2685_v27 = vld [vmem:[#allocation2 + $0x6ac] ss:$16 sps:$4 sm:$0xff]   ;;  %v2680_v28 = vld [vmem:[#allocation2 + $0x6a0] ss:$16 sps:$4 sm:$0xff]  }
  0xa9   :  { %1846 = vmatprep.subr.bf16.mxu0 %v2592_v29  ;;  %1932 = vmatprep.subr.bf16.mxu1 %v2595_v31  ;;  %v2683_v29 = vld [vmem:[#allocation2 + $0x6a8] ss:$16 sps:$4 sm:$0xff]   ;;  %v2688_v31 = vld [vmem:[#allocation2 + $0x6c4] ss:$16 sps:$4 sm:$0xff]  }
  0xac   :  { %1847 = vmatpush1.bf16.msra.mxu0 %v2590_v32  ;;  %1933 = vmatpush1.bf16.msra.mxu1 %v2593_v33  ;;  %v2691_v32 = vld [vmem:[#allocation2 + $0x6cc] ss:$16 sps:$4 sm:$0xff]   ;;  %v2686_v33 = vld [vmem:[#allocation2 + $0x6c0] ss:$16 sps:$4 sm:$0xff]  }
  0xad   :  { %1848 = vmatprep.subr.bf16.mxu0 %v2598_v34  ;;  %1934 = vmatprep.subr.bf16.mxu1 %v2601_v35  ;;  %v2689_v34 = vld [vmem:[#allocation2 + $0x6c8] ss:$16 sps:$4 sm:$0xff]   ;;  %v2694_v35 = vld [vmem:[#allocation2 + $0x6e4] ss:$16 sps:$4 sm:$0xff]  }
  0xb0   :  { %1849 = vmatpush1.bf16.msra.mxu0 %v2596_v36  ;;  %1935 = vmatpush1.bf16.msra.mxu1 %v2599_v37  ;;  %v2697_v36 = vld [vmem:[#allocation2 + $0x6ec] ss:$16 sps:$4 sm:$0xff]   ;;  %v2692_v37 = vld [vmem:[#allocation2 + $0x6e0] ss:$16 sps:$4 sm:$0xff]  }
  0xb1   :  { %1850 = vmatprep.subr.bf16.mxu0 %v2604_v38  ;;  %1936 = vmatprep.subr.bf16.mxu1 %v2607_v39  ;;  %v2695_v38 = vld [vmem:[#allocation2 + $0x6e8] ss:$16 sps:$4 sm:$0xff]   ;;  %v2700_v39 = vld [vmem:[#allocation2 + $0x704] ss:$16 sps:$4 sm:$0xff]  }
  0xb4   :  { %1851 = vmatpush1.bf16.msra.mxu0 %v2602_v40  ;;  %1937 = vmatpush1.bf16.msra.mxu1 %v2605_v41  ;;  %v2703_v40 = vld [vmem:[#allocation2 + $0x70c] ss:$16 sps:$4 sm:$0xff]   ;;  %v2698_v41 = vld [vmem:[#allocation2 + $0x700] ss:$16 sps:$4 sm:$0xff]  }
  0xb5   :  { %1852 = vmatprep.subr.bf16.mxu0 %v2610_v42  ;;  %1938 = vmatprep.subr.bf16.mxu1 %v2613_v43  ;;  %v2701_v42 = vld [vmem:[#allocation2 + $0x708] ss:$16 sps:$4 sm:$0xff]   ;;  %v2706_v43 = vld [vmem:[#allocation2 + $0x724] ss:$16 sps:$4 sm:$0xff]  }
  0xb8   :  { %1853 = vmatpush1.bf16.msra.mxu0 %v2608_v44  ;;  %1939 = vmatpush1.bf16.msra.mxu1 %v2611_v45  ;;  %v2709_v44 = vld [vmem:[#allocation2 + $0x72c] ss:$16 sps:$4 sm:$0xff]   ;;  %v2704_v45 = vld [vmem:[#allocation2 + $0x720] ss:$16 sps:$4 sm:$0xff]  }
  0xb9   :  { %1854 = vmatprep.subr.bf16.mxu0 %v2616_v46  ;;  %1940 = vmatprep.subr.bf16.mxu1 %v2619_v48  ;;  %v2707_v46 = vld [vmem:[#allocation2 + $0x728] ss:$16 sps:$4 sm:$0xff]   ;;  %v2712_v48 = vld [vmem:[#allocation2 + $0x744] ss:$16 sps:$4 sm:$0xff]  }
  0xbc   :  { %1855 = vmatpush1.bf16.msra.mxu0 %v2614_v49  ;;  %1941 = vmatpush1.bf16.msra.mxu1 %v2617_v50  ;;  %v2715_v49 = vld [vmem:[#allocation2 + $0x74c] ss:$16 sps:$4 sm:$0xff]   ;;  %v2710_v50 = vld [vmem:[#allocation2 + $0x740] ss:$16 sps:$4 sm:$0xff]  }
  0xbd   :  { %1856 = vmatprep.subr.bf16.mxu0 %v2622_v51  ;;  %1942 = vmatprep.subr.bf16.mxu1 %v2625_v52  ;;  %v2713_v51 = vld [vmem:[#allocation2 + $0x748] ss:$16 sps:$4 sm:$0xff]   ;;  %v2718_v52 = vld [vmem:[#allocation2 + $0x764] ss:$16 sps:$4 sm:$0xff]  }
  0xc0   :  { %1857 = vmatpush1.bf16.msra.mxu0 %v2620_v53  ;;  %1943 = vmatpush1.bf16.msra.mxu1 %v2623_v54  ;;  %v2721_v53 = vld [vmem:[#allocation2 + $0x76c] ss:$16 sps:$4 sm:$0xff]   ;;  %v2716_v54 = vld [vmem:[#allocation2 + $0x760] ss:$16 sps:$4 sm:$0xff]  }
  0xc1   :  { %1858 = vmatprep.subr.bf16.mxu0 %v2628_v55  ;;  %1944 = vmatprep.subr.bf16.mxu1 %v2631_v56  ;;  %v2719_v55 = vld [vmem:[#allocation2 + $0x768] ss:$16 sps:$4 sm:$0xff]   ;;  %v2724_v56 = vld [vmem:[#allocation2 + $0x784] ss:$16 sps:$4 sm:$0xff]  }
  0xc4   :  { %1859 = vmatpush1.bf16.msra.mxu0 %v2626_v57  ;;  %1945 = vmatpush1.bf16.msra.mxu1 %v2629_v58  ;;  %v2727_v57 = vld [vmem:[#allocation2 + $0x78c] ss:$16 sps:$4 sm:$0xff]   ;;  %v2722_v58 = vld [vmem:[#allocation2 + $0x780] ss:$16 sps:$4 sm:$0xff]  }
  0xc5   :  { %1860 = vmatprep.subr.bf16.mxu0 %v2634_v59  ;;  %1946 = vmatprep.subr.bf16.mxu1 %v2637_v60  ;;  %v2725_v59 = vld [vmem:[#allocation2 + $0x788] ss:$16 sps:$4 sm:$0xff]   ;;  %v2730_v60 = vld [vmem:[#allocation2 + $0x7a4] ss:$16 sps:$4 sm:$0xff]  }
  0xc8   :  { %1861 = vmatpush1.bf16.msra.mxu0 %v2632_v61  ;;  %1947 = vmatpush1.bf16.msra.mxu1 %v2635_v62  ;;  %v2733_v61 = vld [vmem:[#allocation2 + $0x7ac] ss:$16 sps:$4 sm:$0xff]   ;;  %v2728_v62 = vld [vmem:[#allocation2 + $0x7a0] ss:$16 sps:$4 sm:$0xff]  }
  0xc9   :  { %1862 = vmatprep.subr.bf16.mxu0 %v2640_v63  ;;  %1948 = vmatprep.subr.bf16.mxu1 %v2643_v0  ;;  %v2731_v63 = vld [vmem:[#allocation2 + $0x7a8] ss:$16 sps:$4 sm:$0xff]   ;;  %v2736_v0 = vld [vmem:[#allocation2 + $0x7c4] ss:$16 sps:$4 sm:$0xff]  }
  0xcc   :  { %1863 = vmatpush1.bf16.msra.mxu0 %v2638_v1  ;;  %1949 = vmatpush1.bf16.msra.mxu1 %v2641_v2  ;;  %v2739_v1 = vld [vmem:[#allocation2 + $0x7cc] ss:$16 sps:$4 sm:$0xff]   ;;  %v2734_v2 = vld [vmem:[#allocation2 + $0x7c0] ss:$16 sps:$4 sm:$0xff]  }
  0xcd   :  { %1864 = vmatprep.subr.bf16.mxu0 %v2646_v3  ;;  %1950 = vmatprep.subr.bf16.mxu1 %v2649_v4  ;;  %v2737_v3 = vld [vmem:[#allocation2 + $0x7c8] ss:$16 sps:$4 sm:$0xff]   ;;  %v2742_v4 = vld [vmem:[#allocation2 + $0x7e4] ss:$16 sps:$4 sm:$0xff]  }
  0xd0   :  { %1865 = vmatpush1.bf16.msra.mxu0 %v2644_v6  ;;  %1951 = vmatpush1.bf16.msra.mxu1 %v2647_v8  ;;  %v2745_v6 = vld [vmem:[#allocation2 + $0x7ec] ss:$16 sps:$4 sm:$0xff]   ;;  %v2740_v8 = vld [vmem:[#allocation2 + $0x7e0] ss:$16 sps:$4 sm:$0xff]  }
  0xd1   :  { %1877 = vmatprep.subr.bf16.mxu0 %v2652_v9  ;;  %1963 = vmatprep.subr.bf16.mxu1 %v2655_v10  ;;  %v2743_v9 = vld [vmem:[#allocation2 + $0x7e8] ss:$16 sps:$4 sm:$0xff]   ;;  %v162_v10 = vlaneseq }
  0xd3   :  { %1867 = vmatmul.mubr.bf16.vlgmr.msra.gmra.mrb[4].mxu0 %v2815_v5  ;;  %1953 = vmatmul.mubr.bf16.vlgmr.msra.gmra.mrb[4].mxu1 %v2815_v5  ;;  %v2673_v5 = vld [vmem:[#allocation2 + $0x66c] ss:$16 sps:$4 sm:$0xff]  }
  0xd4   :  { %1878 = vmatpush1.bf16.msra.mxu0 %v2650_v11  ;;  %1964 = vmatpush1.bf16.msra.mxu1 %v2653_v12  ;;  %v163_v11 = vshrl.u32 %v162_v10, 7 }
  0xd5   :  { %1879 = vmatprep.subr.bf16.mxu0 %v2658_v13  ;;  %1965 = vmatprep.subr.bf16.mxu1 %v2661_v14  ;;  %v160_v14 = vld [vmem:[%s2873_s2] sm:$0xf] }
  0xd6   :  { %1909 = vmatprep.mubr.bf16.mxu0 %v2822_v30  ;;  %1995 = vmatprep.mubr.bf16.mxu1 %v2822_v30  ;;  %v2677_v30 = vld [vmem:[#allocation2 + $0x688] ss:$16 sps:$4 sm:$0xff]   ;;  %v164_v12 = vsub.s32 0, %v163_v11  ;;  %v172_v13 = vsub.s32 2, %v163_v11 }
  0xd8   :  { %1880 = vmatpush1.bf16.msra.mxu0 %v2656_v15  ;;  %1966 = vmatpush1.bf16.msra.mxu1 %v2659_v16  ;;  %v168_v15 = vsub.s32 1, %v163_v11  ;;  %v176_v16 = vsub.s32 3, %v163_v11 }
  0xd9   :  { %1881 = vmatprep.subr.bf16.mxu0 %v2664_v17  ;;  %1967 = vmatprep.subr.bf16.mxu1 %v2667_v18  ;;  %v165_v17 = vrot.slane %v160_v14, %v164_v12  ;;  %v173_v18 = vrot.slane %v160_v14, %v172_v13 }
  0xdc   :  { %1882 = vmatpush1.bf16.msra.mxu0 %v2662_v19  ;;  %1968 = vmatpush1.bf16.msra.mxu1 %v2665_v20  ;;  %v169_v19 = vrot.slane %v160_v14, %v168_v15  ;;  %v177_v20 = vrot.slane %v160_v14, %v176_v16 }
  0xdd   :  { %1883 = vmatprep.subr.bf16.mxu0 %v2670_v21  ;;  %1969 = vmatprep.subr.bf16.mxu1 %v2673_v5 }
  0xe0   :  { %1884 = vmatpush1.bf16.msra.mxu0 %v2668_v22  ;;  %1970 = vmatpush1.bf16.msra.mxu1 %v2671_v23 }
  0xe1   :  { %1885 = vmatprep.subr.bf16.mxu0 %v2676_v24  ;;  %1971 = vmatprep.subr.bf16.mxu1 %v2679_v25 }
  0xe4   :  { %1886 = vmatpush1.bf16.msra.mxu0 %v2674_v47  ;;  %1972 = vmatpush1.bf16.msra.mxu1 %v2677_v30 }
  0xe5   :  { %1887 = vmatprep.subr.bf16.mxu0 %v2682_v26  ;;  %1973 = vmatprep.subr.bf16.mxu1 %v2685_v27 }
  0xe8   :  { %1888 = vmatpush1.bf16.msra.mxu0 %v2680_v28  ;;  %1974 = vmatpush1.bf16.msra.mxu1 %v2683_v29 }
  0xe9   :  { %1889 = vmatprep.subr.bf16.mxu0 %v2688_v31  ;;  %1975 = vmatprep.subr.bf16.mxu1 %v2691_v32 }
  0xec   :  { %1890 = vmatpush1.bf16.msra.mxu0 %v2686_v33  ;;  %1976 = vmatpush1.bf16.msra.mxu1 %v2689_v34 }
  0xed   :  { %1891 = vmatprep.subr.bf16.mxu0 %v2694_v35  ;;  %1977 = vmatprep.subr.bf16.mxu1 %v2697_v36 }
  0xf0   :  { %1892 = vmatpush1.bf16.msra.mxu0 %v2692_v37  ;;  %1978 = vmatpush1.bf16.msra.mxu1 %v2695_v38  ;;  %v2176_v38 = vld [vmem:[%s2873_s2 + $0x4] sm:$0xf] }
  0xf1   :  { %1893 = vmatprep.subr.bf16.mxu0 %v2700_v39  ;;  %1979 = vmatprep.subr.bf16.mxu1 %v2703_v40  ;;  %v1177_v39 = vrot.slane %v2176_v38, %v164_v12  ;;  %v1185_v40 = vrot.slane %v2176_v38, %v172_v13 }
  0xf4   :  { %1894 = vmatpush1.bf16.msra.mxu0 %v2698_v41  ;;  %1980 = vmatpush1.bf16.msra.mxu1 %v2701_v42  ;;  %v1181_v41 = vrot.slane %v2176_v38, %v168_v15  ;;  %v1189_v42 = vrot.slane %v2176_v38, %v176_v16 }
  0xf5   :  { %1895 = vmatprep.subr.bf16.mxu0 %v2706_v43  ;;  %1981 = vmatprep.subr.bf16.mxu1 %v2709_v44 }
  0xf8   :  { %1896 = vmatpush1.bf16.msra.mxu0 %v2704_v45  ;;  %1982 = vmatpush1.bf16.msra.mxu1 %v2707_v46 }
  0xf9   :  { %1897 = vmatprep.subr.bf16.mxu0 %v2712_v48  ;;  %1983 = vmatprep.subr.bf16.mxu1 %v2715_v49 }
  0xfc   :  { %1898 = vmatpush1.bf16.msra.mxu0 %v2710_v50  ;;  %1984 = vmatpush1.bf16.msra.mxu1 %v2713_v51 }
  0xfd   :  { %1899 = vmatprep.subr.bf16.mxu0 %v2718_v52  ;;  %1985 = vmatprep.subr.bf16.mxu1 %v2721_v53 }
 0x100   :  { %1900 = vmatpush1.bf16.msra.mxu0 %v2716_v54  ;;  %1986 = vmatpush1.bf16.msra.mxu1 %v2719_v55 }
 0x101   :  { %1901 = vmatprep.subr.bf16.mxu0 %v2724_v56  ;;  %1987 = vmatprep.subr.bf16.mxu1 %v2727_v57 }
 0x104   :  { %1902 = vmatpush1.bf16.msra.mxu0 %v2722_v58  ;;  %1988 = vmatpush1.bf16.msra.mxu1 %v2725_v59 }
 0x105   :  { %1903 = vmatprep.subr.bf16.mxu0 %v2730_v60  ;;  %1989 = vmatprep.subr.bf16.mxu1 %v2733_v61 }
 0x108   :  { %1904 = vmatpush1.bf16.msra.mxu0 %v2728_v62  ;;  %1990 = vmatpush1.bf16.msra.mxu1 %v2731_v63 }
 0x109   :  { %1905 = vmatprep.subr.bf16.mxu0 %v2736_v0  ;;  %1991 = vmatprep.subr.bf16.mxu1 %v2739_v1 }
 0x10c   :  { %1906 = vmatpush1.bf16.msra.mxu0 %v2734_v2  ;;  %1992 = vmatpush1.bf16.msra.mxu1 %v2737_v3 }
 0x10d   :  { %1907 = vmatprep.subr.bf16.mxu0 %v2742_v4  ;;  %1993 = vmatprep.subr.bf16.mxu1 %v2745_v6 }
 0x110   :  { %1908 = vmatpush1.bf16.msra.mxu0 %v2740_v8  ;;  %1994 = vmatpush1.bf16.msra.mxu1 %v2743_v9 }
 0x113   :  { %1910 = vmatmul.mubr.bf16.vlgmr.msra.gmra.mrb[4].mxu0 %v2829_v7  ;;  %1996 = vmatmul.mubr.bf16.vlgmr.msra.gmra.mrb[4].mxu1 %v2829_v7 }
 0x166   :  { %v919_v21 = vpop.f32.mrb[0].mxu0  ;;  %v1005_v5 = vpop.f32.mrb[0].mxu1 }
 0x167   :  { %v2321_v22 = vadd.f32 %v919_v21, %v165_v17  ;;  %v2325_v23 = vadd.f32 %v1005_v5, %v173_v18  ;;  %v921_v24 = vpop.f32.mrb[1].mxu0  ;;  %v1007_v7 = vpop.f32.mrb[1].mxu1 }
 0x168   :  { %v2322_v25 = vadd.f32 %v921_v24, %v169_v19  ;;  %v2326_v47 = vadd.f32 %v1007_v7, %v177_v20  ;;  %v923_v30 = vpop.f32.mrb[2].mxu0  ;;  %v1009_v26 = vpop.f32.mrb[2].mxu1 }
 0x169   :  { %v2323_v27 = vadd.f32 %v923_v30, %v165_v17  ;;  %v2327_v28 = vadd.f32 %v1009_v26, %v173_v18  ;;  %v925_v29 = vpop.f32.mrb[3].mxu0  ;;  %v1011_v31 = vpop.f32.mrb[3].mxu1 }
 0x16a   :  { %v2313_v32 = vpack.c.bf16 %v2322_v25, %v2321_v22  ;;  %v2314_v33 = vpack.c.bf16 %v2326_v47, %v2325_v23  ;;  %v2324_v34 = vadd.f32 %v925_v29, %v169_v19  ;;  %v2328_v35 = vadd.f32 %v1011_v31, %v177_v20 }
 0x16c   :  { %1038 = vst [vmem:[%s2874_s3] sm:$0xff] %v2313_v32  ;;  %1039 = vst [vmem:[%s2874_s3 + $0x8] sm:$0xff] %v2314_v33  ;;  %v2315_v36 = vpack.c.bf16 %v2324_v34, %v2323_v27  ;;  %v2316_v37 = vpack.c.bf16 %v2328_v35, %v2327_v28 }
 0x16e   :  { %1040 = vst [vmem:[%s2874_s3 + $0x10] sm:$0xff] %v2315_v36  ;;  %1041 = vst [vmem:[%s2874_s3 + $0x18] sm:$0xff] %v2316_v37 }
 0x1e6   :  { %v1911_v43 = vpop.f32.mrb[4].mxu0  ;;  %v1997_v44 = vpop.f32.mrb[4].mxu1 }
 0x1e7   :  { %v2329_v45 = vadd.f32 %v1911_v43, %v1177_v39  ;;  %v2333_v46 = vadd.f32 %v1997_v44, %v1185_v40  ;;  %v1913_v48 = vpop.f32.mrb[5].mxu0  ;;  %v1999_v49 = vpop.f32.mrb[5].mxu1 }
 0x1e8   :  { %v2330_v50 = vadd.f32 %v1913_v48, %v1181_v41  ;;  %v2334_v51 = vadd.f32 %v1999_v49, %v1189_v42  ;;  %v1915_v52 = vpop.f32.mrb[6].mxu0  ;;  %v2001_v53 = vpop.f32.mrb[6].mxu1 }
 0x1e9   :  { %v2331_v54 = vadd.f32 %v1915_v52, %v1177_v39  ;;  %v2335_v55 = vadd.f32 %v2001_v53, %v1185_v40  ;;  %v1917_v56 = vpop.f32.mrb[7].mxu0  ;;  %v2003_v57 = vpop.f32.mrb[7].mxu1 }
 0x1ea   :  { %v2317_v58 = vpack.c.bf16 %v2330_v50, %v2329_v45  ;;  %v2318_v59 = vpack.c.bf16 %v2334_v51, %v2333_v46  ;;  %v2332_v60 = vadd.f32 %v1917_v56, %v1181_v41  ;;  %v2336_v61 = vadd.f32 %v2003_v57, %v1189_v42 }
 0x1ec   :  { %2309 = vst [vmem:[%s2874_s3 + $0x20] sm:$0xff] %v2317_v58  ;;  %2310 = vst [vmem:[%s2874_s3 + $0x28] sm:$0xff] %v2318_v59  ;;  %v2319_v62 = vpack.c.bf16 %v2332_v60, %v2331_v54  ;;  %v2320_v63 = vpack.c.bf16 %v2336_v61, %v2335_v55 }
 0x1ee   :  { %2311 = vst [vmem:[%s2874_s3 + $0x30] sm:$0xff] %v2319_v62  ;;  %2312 = vst [vmem:[%s2874_s3 + $0x38] sm:$0xff] %v2320_v63 }
 0x1ef   :  { %2039 = vsyncpa [#allocation3], 1 }

// kernel: listener_forward.10
= control target key start
LH: loop header
LB: loop body
LE: loop exit
PB: predicated region body
PF: predicated region fallthrough
CT: control target
= control target key end

     0   :  { %s2331_s12 = smov 0   ;;  %s2333_s13 = smov 0   ;;  %s3047_s0 = inlined_call_operand.vmem [shape: bf16[2,8,2,512], index: 0, kind: input, shape index: {}]   ;;  %s3048_s1 = inlined_call_operand.vmem [shape: s32[2,1], index: 1, kind: input, shape index: {}]   ;;  %s3049_s2 = inlined_call_operand.vmem [shape: bf16[2,128,512], index: 2, kind: input, shape index: {}]   ;;  %s3050_s3 = inlined_call_operand.vmem [shape: bf16[8,2,256], index: 3, kind: output, shape index: {}]  }
   0x1   :  { %s2335_s14 = smov 0   ;;  %s2337_s15 = smov 0  }
   0x2   :  { %s2339_s16 = smov 0  }
   0x3 LB: > { %s1926_s17 = sadd.s32 4294967295, %s2306_s16   ;;  %s25_s18 = sadd.s32 1, %s2302_s15  ;;  %s2306_s16 = sphi %s2339_s16, %s13_s16   ;;  %s2302_s15 = sphi %s2337_s15, %s3055_s15   ;;  %s2298_s14 = sphi %s2335_s14, %s3054_s14   ;;  %s2294_s13 = sphi %s2333_s13, %s3053_s13   ;;  %s2290_s12 = sphi %s2331_s12, %s3052_s12  }
   0x4   : > { %p27_p0 = scmp.ge.s32.totalorder %s25_s18, 2  ;;  %s125_s19 = sadd.s32 1, %s2294_s13 }
   0x5   : > { %p135_p1 = scmp.ne.s32.totalorder %s2294_s13, %s2290_s12  ;;  %p136_p2 = scmp.eq.s32.totalorder %s1926_s17, 1 }
   0x6   : > { %s3057_s18 = smov (%p27_p0, %s25_s18), 0  ;;  %p1930_p4 = scmp.ge.s32.totalorder %s2306_s16, 1 }
   0x7   : > { %p2363_p3 = por %p136_p2, %p135_p1  ;;  %s121_s21 = ssub.s32 %s2302_s15, %s3057_s18 }
   0x8   : > { %p192_p5 = scmp.lt.s32.totalorder %s2306_s16, 3  ;;  %p123_p6 = scmp.eq.s32.totalorder %s121_s21, 0 }
   0xa   : > { %p193_p7 = pnand %p1930_p4, %p192_p5 }
   0xb   : > { %s2372_s22 = scalar_select %p123_p6, %s2294_s13, %s125_s19  }
   0xc   : > { %196 = sbr.rel (%p193_p7) target bundleno = 2221 (0x8ad), region = 32  ;;  %p233_p8 = scmp.lt.s32.totalorder (!%p193_p7), %s2298_s14, 1  ;;  %v2378_v0 = vld [vmem:[%s3048_s1] sm:$0x3] (!%p193_p7)  ;;  %v2308_v1 = vmov (!%p193_p7), 0   ;;  %v2309_v2 = vmov (!%p193_p7), 0.0   ;;  %v560_v47 = vlaneseq (!%p193_p7) }
   0xd   : > { %s303_s25 = smul.u32 (!%p193_p7), 7, %s2298_s14  ;;  %501 = vmatprep.mubr.bf16.mxu0 (!%p193_p7), %v2308_v1  ;;  %542 = vmatprep.mubr.bf16.mxu1 (!%p193_p7), %v2308_v1  ;;  %261 = vst [vmem:[#allocation2] sm:$0x3] (!%p193_p7), %v2309_v2  ;;  %262 = vst [vmem:[#allocation3] sm:$0x3] (!%p193_p7), %v2309_v2  ;;  %s2407_s6 = ssub.s32 (!%p193_p7), 4, %s2298_s14 }
   0xe   : > { %s619_s26 = smul.u32 (!%p193_p7), 5, %s2298_s14  ;;  %2058 = vset.pattern.permute.xlu0 (!%p193_p7), %v2308_v1  ;;  %2059 = vset.pattern.permute.xlu1 (!%p193_p7), %v2308_v1  ;;  %v1232_v9 = vstv (!%p193_p7), %s2407_s6  ;;  %v2310_v45 = vmov (!%p193_p7), 1983009808   ;;  %v561_v49 = vshrl.u32 (!%p193_p7), %v560_v47, 7  ;;  %s225_s23 = sand.u32 (!%p193_p7), 1, %s2290_s12  }
   0xf   : > { %v606_v3 = vstv (!%p193_p7), %s303_s25  ;;  %vm1233_vm2 = vcmp.lt.s32.totalorder (!%p193_p7), %v1232_v9, %v2378_v0  ;;  %s1402_s7 = smul.u32 (!%p193_p7), 4294967291, %s2298_s14  ;;  %v558_v46 = vunpack.c.l.s4 (!%p193_p7), %v2310_v45  ;;  %s1931_s24 = sshll.u32 (!%p193_p7), %s225_s23, 3 }
  0x10   : > { %vm607_vm0 = vcmp.lt.s32.totalorder (!%p193_p7), %v606_v3, %v2378_v0  ;;  %s620_s28 = sadd.s32 (!%p193_p7), 1, %s619_s26  ;;  %v1234_v13 = vsel (!%p193_p7), %vm1233_vm2, 1, %v2308_v1  ;;  %s1935_s10 = smul.u32 (!%p193_p7), 28, %s2298_s14 }
  0x11   : > { %v608_v4 = vsel (!%p193_p7), %vm607_vm0, 1, %v2308_v1  ;;  %v763_v5 = vstv (!%p193_p7), %s620_s28  ;;  %s1403_s8 = sadd.s32 (!%p193_p7), 6, %s1402_s7  ;;  %v559_v48 = vunpack.c.0.s8 (!%p193_p7), %v558_v46  ;;  %s776_s12 = smul.u32 (!%p193_p7), 3, %s2298_s14 }
  0x12   : > { %610 = vperm.xlu0 (!%p193_p7), %2058, %v608_v4   ;;  %vm764_vm1 = vcmp.lt.s32.totalorder (!%p193_p7), %v763_v5, %v2378_v0  ;;  %v1546_v17 = vstv (!%p193_p7), %s1403_s8  ;;  %s1559_s8 = smul.u32 (!%p193_p7), 4294967289, %s2298_s14 }
  0x13   : > { %s2385_s27 = scalar_select %p233_p8, %s2298_s14, 1  ;;  %v765_v7 = vsel %vm764_vm1, 1, %v2308_v1  ;;  %vm1547_vm3 = vcmp.lt.s32.totalorder %v1546_v17, %v2378_v0  ;;  %v2590_v52 = vsub.s32 %v559_v48, %v561_v49 }
  0x14   : > { %v1548_v23 = vsel %vm1547_vm3, 1, %v2308_v1  ;;  %v2538_v43 = vld [vmem:[#allocation2] sm:$0x3]  ;;  %s777_s30 = sadd.s32 2, %s776_s12 }
  0x15   : > { %s2014_s29 = sshll.u32 %s2385_s27, 8  ;;  %v308_v44 = vpack.c.bf16 %v2538_v43, %v2538_v43  ;;  %s1932_s9 = sshll.u32 %s2385_s27, 5 }
  0x16   : > { %s2399_s5 = scalar_lea.vmem %s3049_s2, %s2014_s29  ;;  %767 = vperm.xlu0 %2058, %v765_v7   ;;  %s2587_s19 = scalar_lea.vmem %s3047_s0, %s1932_s9 }
  0x17   : > { %v2403_v6 = vld [vmem:[%s2399_s5 + $0x4] ss:$16 sps:$4 sm:$0xff]   ;;  %v2410_v8 = vld [vmem:[%s2399_s5 + $0xc] ss:$16 sps:$4 sm:$0xff]   ;;  %v2415_v10 = vld [vmem:[%s2399_s5] ss:$16 sps:$4 sm:$0xff]   ;;  %s305_s21 = scalar_lea.vmem %s2587_s19, %s1935_s10 }
  0x18   : > { %469 = vmatprep.subr.bf16.mxu0 %v2403_v6  ;;  %v2418_v11 = vld [vmem:[%s2399_s5 + $0x8] ss:$16 sps:$4 sm:$0xff]   ;;  %510 = vmatprep.subr.bf16.mxu1 %v2410_v8  ;;  %v2424_v12 = vld [vmem:[%s2399_s5 + $0x24] ss:$16 sps:$4 sm:$0xff]   ;;  %v2430_v14 = vld [vmem:[%s2399_s5 + $0x2c] ss:$16 sps:$4 sm:$0xff]  }
  0x19   : > { %470 = vmatpush1.bf16.msra.mxu0 %v2415_v10  ;;  %511 = vmatpush1.bf16.msra.mxu1 %v2418_v11  ;;  %v2433_v15 = vld [vmem:[%s2399_s5 + $0x20] ss:$16 sps:$4 sm:$0xff]   ;;  %v2439_v16 = vld [vmem:[%s2399_s5 + $0x28] ss:$16 sps:$4 sm:$0xff]   ;;  %v2443_v18 = vld [vmem:[%s2399_s5 + $0x44] ss:$16 sps:$4 sm:$0xff]  }
  0x1a   : > { %471 = vmatprep.subr.bf16.mxu0 %v2424_v12  ;;  %512 = vmatprep.subr.bf16.mxu1 %v2430_v14  ;;  %v2447_v19 = vld [vmem:[%s2399_s5 + $0x4c] ss:$16 sps:$4 sm:$0xff]   ;;  %v2450_v20 = vld [vmem:[%s2399_s5 + $0x40] ss:$16 sps:$4 sm:$0xff]   ;;  %v2453_v21 = vld [vmem:[%s2399_s5 + $0x48] ss:$16 sps:$4 sm:$0xff]  }
  0x1b   : > { %1236 = vperm.xlu0 %2058, %v1234_v13   ;;  %v2458_v22 = vld [vmem:[%s2399_s5 + $0x64] ss:$16 sps:$4 sm:$0xff]   ;;  %v2464_v24 = vld [vmem:[%s2399_s5 + $0x6c] ss:$16 sps:$4 sm:$0xff]   ;;  %v2467_v25 = vld [vmem:[%s2399_s5 + $0x60] ss:$16 sps:$4 sm:$0xff]  }
  0x1c   : > { %v2472_v26 = vld [vmem:[%s2399_s5 + $0x68] ss:$16 sps:$4 sm:$0xff]   ;;  %v2475_v27 = vld [vmem:[%s2399_s5 + $0x84] ss:$16 sps:$4 sm:$0xff]   ;;  %v2480_v28 = vld [vmem:[%s2399_s5 + $0x8c] ss:$16 sps:$4 sm:$0xff]  }
  0x1d   : > { %472 = vmatpush1.bf16.msra.mxu0 %v2433_v15  ;;  %513 = vmatpush1.bf16.msra.mxu1 %v2439_v16  ;;  %v2483_v29 = vld [vmem:[%s2399_s5 + $0x80] ss:$16 sps:$4 sm:$0xff]   ;;  %v2486_v30 = vld [vmem:[%s2399_s5 + $0x88] ss:$16 sps:$4 sm:$0xff]   ;;  %v2491_v31 = vld [vmem:[%s2399_s5 + $0xa4] ss:$16 sps:$4 sm:$0xff]  }
  0x1e   : > { %473 = vmatprep.subr.bf16.mxu0 %v2443_v18  ;;  %514 = vmatprep.subr.bf16.mxu1 %v2447_v19  ;;  %v2496_v32 = vld [vmem:[%s2399_s5 + $0xac] ss:$16 sps:$4 sm:$0xff]   ;;  %v2501_v33 = vld [vmem:[%s2399_s5 + $0xa0] ss:$16 sps:$4 sm:$0xff]   ;;  %v2504_v34 = vld [vmem:[%s2399_s5 + $0xa8] ss:$16 sps:$4 sm:$0xff]  }
  0x1f   : > { %1550 = vperm.xlu0 %2058, %v1548_v23   ;;  %v2509_v35 = vld [vmem:[%s2399_s5 + $0xc4] ss:$16 sps:$4 sm:$0xff]   ;;  %v2512_v36 = vld [vmem:[%s2399_s5 + $0xcc] ss:$16 sps:$4 sm:$0xff]   ;;  %v2517_v37 = vld [vmem:[%s2399_s5 + $0xc0] ss:$16 sps:$4 sm:$0xff]  }
  0x20   : > { %v2520_v38 = vld [vmem:[%s2399_s5 + $0xc8] ss:$16 sps:$4 sm:$0xff]   ;;  %v2525_v39 = vld [vmem:[%s2399_s5 + $0xe4] ss:$16 sps:$4 sm:$0xff]   ;;  %v2528_v40 = vld [vmem:[%s2399_s5 + $0xec] ss:$16 sps:$4 sm:$0xff]  }
  0x21   : > { %474 = vmatpush1.bf16.msra.mxu0 %v2450_v20  ;;  %515 = vmatpush1.bf16.msra.mxu1 %v2453_v21  ;;  %v2533_v41 = vld [vmem:[%s2399_s5 + $0xe0] ss:$16 sps:$4 sm:$0xff]   ;;  %v2536_v42 = vld [vmem:[%s2399_s5 + $0xe8] ss:$16 sps:$4 sm:$0xff]   ;;  %s2600_s27 = scalar_lea.vmem [#allocation4], %s1931_s24  ;;  %s1245_s29 = smul.u32 4294967293, %s2298_s14 }
  0x22   : > { %475 = vmatprep.subr.bf16.mxu0 %v2458_v22  ;;  %516 = vmatprep.subr.bf16.mxu1 %v2464_v24  ;;  %v306_v54 = vld [vmem:[%s305_s21] sm:$0xf]  ;;  %s617_s28 = scalar_lea.vmem %s2600_s27, %s303_s25 [#allocation4]  ;;  %s933_s25 = sadd.s32 3, %s2298_s14 }
  0x23   : > { %v307_v63 = vunpack.c.l.bf16 %v306_v54  ;;  %s1246_s4 = sadd.s32 5, %s1245_s29  ;;  %s1560_s9 = sadd.s32 7, %s1559_s8 }
  0x24   : > { %s1971_s10 = smul.u32 20, %s2298_s14  ;;  %s1841_s17 = scalar_lea.vmem %s2600_s27, %s619_s26 [#allocation4] }
  0x25   : > { %476 = vmatpush1.bf16.msra.mxu0 %v2467_v25  ;;  %517 = vmatpush1.bf16.msra.mxu1 %v2472_v26  ;;  %s1977_s26 = smul.u32 12, %s2298_s14  ;;  %s1848_s23 = scalar_lea.vmem %s2600_s27, %s776_s12 [#allocation4] }
  0x26   : > { %477 = vmatprep.subr.bf16.mxu0 %v2475_v27  ;;  %518 = vmatprep.subr.bf16.mxu1 %v2480_v28  ;;  %s1838_s11 = scalar_lea.vmem %s2587_s19, %s1971_s10  ;;  %s1983_s24 = sshll.u32 %s2298_s14, 2 }
  0x27   : > { %s1845_s21 = scalar_lea.vmem %s2587_s19, %s1977_s26  ;;  %s1853_s12 = scalar_lea.vmem %s2600_s27, %s2298_s14 [#allocation4] }
  0x29   : > { %478 = vmatpush1.bf16.msra.mxu0 %v2483_v29  ;;  %519 = vmatpush1.bf16.msra.mxu1 %v2486_v30 }
  0x2a   : > { %479 = vmatprep.subr.bf16.mxu0 %v2491_v31  ;;  %520 = vmatprep.subr.bf16.mxu1 %v2496_v32 }
  0x2d   : > { %480 = vmatpush1.bf16.msra.mxu0 %v2501_v33  ;;  %521 = vmatpush1.bf16.msra.mxu1 %v2504_v34 }
  0x2e   : > { %481 = vmatprep.subr.bf16.mxu0 %v2509_v35  ;;  %522 = vmatprep.subr.bf16.mxu1 %v2512_v36 }
  0x31   : > { %482 = vmatpush1.bf16.msra.mxu0 %v2517_v37  ;;  %523 = vmatpush1.bf16.msra.mxu1 %v2520_v38 }
  0x32   : > { %483 = vmatprep.subr.bf16.mxu0 %v2525_v39  ;;  %524 = vmatprep.subr.bf16.mxu1 %v2528_v40 }
  0x35   : > { %484 = vmatpush1.bf16.msra.mxu0 %v2533_v41  ;;  %525 = vmatpush1.bf16.msra.mxu1 %v2536_v42 }
  0x36   : > { %626 = vmatprep.subr.bf16.mxu0 %v2403_v6  ;;  %667 = vmatprep.subr.bf16.mxu1 %v2410_v8 }
  0x38   : > { %502 = vmatmul.mubr.bf16.vlgmr.msra.gmra.mrb[0].mxu0 %v308_v44  ;;  %543 = vmatmul.mubr.bf16.vlgmr.msra.gmra.mrb[0].mxu1 %v308_v44 }
  0x39   : > { %627 = vmatpush1.bf16.msra.mxu0 %v2415_v10  ;;  %668 = vmatpush1.bf16.msra.mxu1 %v2418_v11 }
  0x3a   : > { %628 = vmatprep.subr.bf16.mxu0 %v2424_v12  ;;  %669 = vmatprep.subr.bf16.mxu1 %v2430_v14 }
  0x3b   : > { %658 = vmatprep.mubr.bf16.mxu0 %v2308_v1  ;;  %699 = vmatprep.mubr.bf16.mxu1 %v2308_v1 }
  0x3d   : > { %629 = vmatpush1.bf16.msra.mxu0 %v2433_v15  ;;  %670 = vmatpush1.bf16.msra.mxu1 %v2439_v16 }
  0x3e   : > { %630 = vmatprep.subr.bf16.mxu0 %v2443_v18  ;;  %671 = vmatprep.subr.bf16.mxu1 %v2447_v19 }
  0x41   : > { %631 = vmatpush1.bf16.msra.mxu0 %v2450_v20  ;;  %672 = vmatpush1.bf16.msra.mxu1 %v2453_v21 }
  0x42   : > { %632 = vmatprep.subr.bf16.mxu0 %v2458_v22  ;;  %673 = vmatprep.subr.bf16.mxu1 %v2464_v24 }
  0x45   : > { %633 = vmatpush1.bf16.msra.mxu0 %v2467_v25  ;;  %674 = vmatpush1.bf16.msra.mxu1 %v2472_v26 }
  0x46   : > { %634 = vmatprep.subr.bf16.mxu0 %v2475_v27  ;;  %675 = vmatprep.subr.bf16.mxu1 %v2480_v28 }
  0x49   : > { %635 = vmatpush1.bf16.msra.mxu0 %v2483_v29  ;;  %676 = vmatpush1.bf16.msra.mxu1 %v2486_v30 }
  0x4a   : > { %636 = vmatprep.subr.bf16.mxu0 %v2491_v31  ;;  %677 = vmatprep.subr.bf16.mxu1 %v2496_v32 }
  0x4d   : > { %637 = vmatpush1.bf16.msra.mxu0 %v2501_v33  ;;  %678 = vmatpush1.bf16.msra.mxu1 %v2504_v34 }
  0x4e   : > { %638 = vmatprep.subr.bf16.mxu0 %v2509_v35  ;;  %679 = vmatprep.subr.bf16.mxu1 %v2512_v36 }
  0x51   : > { %639 = vmatpush1.bf16.msra.mxu0 %v2517_v37  ;;  %680 = vmatpush1.bf16.msra.mxu1 %v2520_v38 }
  0x52   : > { %640 = vmatprep.subr.bf16.mxu0 %v2525_v39  ;;  %681 = vmatprep.subr.bf16.mxu1 %v2528_v40 }
  0x55   : > { %641 = vmatpush1.bf16.msra.mxu0 %v2533_v41  ;;  %682 = vmatpush1.bf16.msra.mxu1 %v2536_v42 }
  0x56   : > { %783 = vmatprep.subr.bf16.mxu0 %v2403_v6  ;;  %824 = vmatprep.subr.bf16.mxu1 %v2410_v8 }
 0x10b   : > { %v503_v50 = vpop.f32.mrb[0].mxu0  ;;  %v544_v51 = vpop.f32.mrb[0].mxu1 }
 0x10c   : > { %v505_v53 = vpop.f32.mrb[1].mxu0  ;;  %v546_v55 = vpop.f32.mrb[1].mxu1 }
 0x10d   : > { %v555_v56 = vcombine.low %v503_v50, %v505_v53  ;;  %v556_v57 = vcombine.low %v544_v51, %v546_v55  ;;  %v507_v58 = vpop.f32.mrb[2].mxu0  ;;  %v548_v59 = vpop.f32.mrb[2].mxu1  ;;  %v302_v50 = vld [vmem:[#allocation3] sm:$0x3] }
 0x10e   : > { %v508_v60 = vpop.f32.mrb[3].mxu0  ;;  %v549_v61 = vpop.f32.mrb[3].mxu1 }
 0x10f   : > { %v563_v62 = vrot.slane %v555_v56, %v2590_v52  ;;  %v570_v2 = vrot.slane %v556_v57, %v2590_v52  ;;  %v611_v53 = vpop.permute.xlu0 %610 }
 0x110   : > { %vm612_vm4 = vcmp.eq.s32.totalorder %v611_v53, 1 }
 0x111   : > { %v571_v3 = vcombine.low %v563_v62, %v570_v2 }
 0x113   : > { %v573_v4 = vadd.f32 %v571_v3, %v307_v63 }
 0x115   : > { %v1968_v5 = vmul.f32 -1.442695, %v573_v4  ;;  %v581_v7 = vrot.slane %v573_v4, 2  ;;  %v592_v13 = vrot.slane %v573_v4, 6  ;;  %v589_v44 = vrot.slane %v573_v4, 4 }
 0x117   : > { %2108 = vpow2.f32 %v1968_v5  ;;  %v1969_v9 = vmul.f32 -1.442695, %v581_v7  ;;  %v1970_v17 = vmul.f32 -1.442695, %v592_v13  ;;  %v920_v5 = vstv %s777_s30 }
 0x118   : > { %vm921_vm5 = vcmp.lt.s32.totalorder %v920_v5, %v2378_v0 }
 0x119   : > { %2110 = vpow2.f32 %v1969_v9  ;;  %v922_v7 = vsel %vm921_vm5, 1, %v2308_v1  ;;  %v1389_v9 = vstv %s1246_s4  ;;  %s1243_s4 = scalar_lea.vmem %s2600_s27, %s2407_s6 [#allocation4] }
 0x11a   : > { %2112 = vpow2.f32 %v1970_v17  ;;  %924 = vperm.xlu1 %2059, %v922_v7   ;;  %vm1390_vm7 = vcmp.lt.s32.totalorder %v1389_v9, %v2378_v0  ;;  %v1703_v17 = vstv %s1560_s9 }
 0x11b   : > { %vm1704_vm8 = vcmp.lt.s32.totalorder %v1703_v17, %v2378_v0 }
 0x121   : > { %v2109_v23 = vpop.eup %2108 }
 0x122   : > { %v577_v45 = vadd.f32 1.0, %v2109_v23  ;;  %v1391_v23 = vsel %vm1390_vm7, 1, %v2308_v1 }
 0x123   : > { %v2111_v46 = vpop.eup %2110 }
 0x124   : > { %2114 = vrcp.f32 %v577_v45  ;;  %v586_v47 = vadd.f32 1.0, %v2111_v46  ;;  %v2113_v48 = vpop.eup %2112 }
 0x125   : > { %2116 = vtanh.f32 %v589_v44  ;;  %v597_v55 = vadd.f32 1.0, %v2113_v48  ;;  %v1705_v44 = vsel %vm1704_vm8, 1, %v2308_v1  ;;  %v1972_v48 = vld [vmem:[%s1838_s11 + $0x4] sm:$0xf]  ;;  %s1870_s11 = scalar_lea.vmem %s2600_s27, %s1402_s7 [#allocation4]  ;;  %s1877_s7 = scalar_lea.vmem %s2600_s27, %s1559_s8 [#allocation4] }
 0x126   : > { %2118 = vrcp.f32 %v586_v47  ;;  %s1732_s8 = scalar_lea.vmem (%p2363_p3), %s3050_s3, %s2298_s14 }
 0x127   : > { %2120 = vrcp.f32 %v597_v55 }
 0x12e   : > { %v2115_v49 = vpop.eup %2114 }
 0x12f   : > { %v2117_v51 = vpop.eup %2116 }
 0x130   : > { %v2119_v54 = vpop.eup %2118  ;;  %v601_v57 = vmul.f32 %v2117_v51, %v2115_v49 }
 0x131   : > { %v600_v56 = vmul.f32 %v2119_v54, %v302_v50  ;;  %v2121_v60 = vpop.eup %2120 }
 0x133   : > { %v602_v58 = vadd.f32 %v601_v57, %v600_v56 }
 0x135   : > { %2122 = vtanh.f32 %v602_v58  ;;  %v2594_v59 = vsel %vm612_vm4, %v602_v58, %v302_v50 }
 0x13f   : > { %v2123_v61 = vpop.eup %2122 }
 0x140   : > { %v604_v62 = vmul.f32 %v2123_v61, %v2121_v60 }
 0x142   : > { %v2598_v63 = vsel %vm612_vm4, %v604_v62, %v2538_v43  ;;  %v615_v2 = vsel %vm612_vm4, %v604_v62, 0.0  ;;  %v1076_v43 = vstv %s933_s25  ;;  %s1989_s25 = sshll.u32 %s2407_s6, 2  ;;  %s1993_s6 = smul.u32 4294967284, %s2298_s14 }
 0x143   : > { %v616_v3 = vpack.c.bf16 %v615_v2, %v615_v2  ;;  %v625_v4 = vpack.c.bf16 %v2598_v63, %v2598_v63  ;;  %vm1077_vm6 = vcmp.lt.s32.totalorder %v1076_v43, %v2378_v0  ;;  %v624_v0 = vunpack.c.l.bf16 %v1972_v48  ;;  %s1091_s30 = scalar_lea.vmem %s2587_s19, %s1989_s25 }
 0x144   : > { %v1078_v13 = vsel %vm1077_vm6, 1, %v2308_v1  ;;  %s1860_s9 = scalar_lea.vmem %s2587_s19, %s1993_s6 }
 0x145   : > { %618 = vst [vmem:[%s617_s28] sm:$0x1] %v616_v3  ;;  %659 = vmatmul.mubr.bf16.vlgmr.msra.gmra.mrb[4].mxu0 %v625_v4  ;;  %700 = vmatmul.mubr.bf16.vlgmr.msra.gmra.mrb[4].mxu1 %v625_v4  ;;  %s1851_s28 = scalar_lea.vmem %s2587_s19, %s1983_s24 }
 0x146   : > { %784 = vmatpush1.bf16.msra.mxu0 %v2415_v10  ;;  %825 = vmatpush1.bf16.msra.mxu1 %v2418_v11 }
 0x147   : > { %785 = vmatprep.subr.bf16.mxu0 %v2424_v12  ;;  %826 = vmatprep.subr.bf16.mxu1 %v2430_v14 }
 0x148   : > { %815 = vmatprep.mubr.bf16.mxu0 %v2308_v1  ;;  %856 = vmatprep.mubr.bf16.mxu1 %v2308_v1 }
 0x149   : > { %1080 = vperm.xlu1 %2059, %v1078_v13  }
 0x14a   : > { %786 = vmatpush1.bf16.msra.mxu0 %v2433_v15  ;;  %827 = vmatpush1.bf16.msra.mxu1 %v2439_v16 }
 0x14b   : > { %787 = vmatprep.subr.bf16.mxu0 %v2443_v18  ;;  %828 = vmatprep.subr.bf16.mxu1 %v2447_v19 }
 0x14d   : > { %1393 = vperm.xlu1 %2059, %v1391_v23  }
 0x14e   : > { %788 = vmatpush1.bf16.msra.mxu0 %v2450_v20  ;;  %829 = vmatpush1.bf16.msra.mxu1 %v2453_v21 }
 0x14f   : > { %789 = vmatprep.subr.bf16.mxu0 %v2458_v22  ;;  %830 = vmatprep.subr.bf16.mxu1 %v2464_v24 }
 0x151   : > { %1707 = vperm.xlu1 %2059, %v1705_v44  }
 0x152   : > { %790 = vmatpush1.bf16.msra.mxu0 %v2467_v25  ;;  %831 = vmatpush1.bf16.msra.mxu1 %v2472_v26 }
 0x153   : > { %791 = vmatprep.subr.bf16.mxu0 %v2475_v27  ;;  %832 = vmatprep.subr.bf16.mxu1 %v2480_v28 }
 0x156   : > { %792 = vmatpush1.bf16.msra.mxu0 %v2483_v29  ;;  %833 = vmatpush1.bf16.msra.mxu1 %v2486_v30 }
 0x157   : > { %793 = vmatprep.subr.bf16.mxu0 %v2491_v31  ;;  %834 = vmatprep.subr.bf16.mxu1 %v2496_v32 }
 0x15a   : > { %794 = vmatpush1.bf16.msra.mxu0 %v2501_v33  ;;  %835 = vmatpush1.bf16.msra.mxu1 %v2504_v34 }
 0x15b   : > { %795 = vmatprep.subr.bf16.mxu0 %v2509_v35  ;;  %836 = vmatprep.subr.bf16.mxu1 %v2512_v36 }
 0x15e   : > { %796 = vmatpush1.bf16.msra.mxu0 %v2517_v37  ;;  %837 = vmatpush1.bf16.msra.mxu1 %v2520_v38 }
 0x15f   : > { %797 = vmatprep.subr.bf16.mxu0 %v2525_v39  ;;  %838 = vmatprep.subr.bf16.mxu1 %v2528_v40 }
 0x162   : > { %798 = vmatpush1.bf16.msra.mxu0 %v2533_v41  ;;  %839 = vmatpush1.bf16.msra.mxu1 %v2536_v42 }
 0x163   : > { %939 = vmatprep.subr.bf16.mxu0 %v2403_v6  ;;  %980 = vmatprep.subr.bf16.mxu1 %v2410_v8 }
 0x218   : > { %v660_v45 = vpop.f32.mrb[4].mxu0  ;;  %v701_v46 = vpop.f32.mrb[4].mxu1 }
 0x219   : > { %v662_v47 = vpop.f32.mrb[5].mxu0  ;;  %v703_v49 = vpop.f32.mrb[5].mxu1 }
 0x21a   : > { %v712_v50 = vcombine.low %v660_v45, %v662_v47  ;;  %v713_v51 = vcombine.low %v701_v46, %v703_v49  ;;  %v664_v53 = vpop.f32.mrb[6].mxu0  ;;  %v705_v54 = vpop.f32.mrb[6].mxu1 }
 0x21b   : > { %v665_v55 = vpop.f32.mrb[7].mxu0  ;;  %v706_v56 = vpop.f32.mrb[7].mxu1 }
 0x21c   : > { %v720_v57 = vrot.slane %v712_v50, %v2590_v52  ;;  %v727_v58 = vrot.slane %v713_v51, %v2590_v52  ;;  %v768_v50 = vpop.permute.xlu0 %767 }
 0x21d   : > { %vm769_vm9 = vcmp.eq.s32.totalorder %v768_v50, 1 }
 0x21e   : > { %v728_v60 = vcombine.low %v720_v57, %v727_v58 }
 0x220   : > { %v730_v61 = vadd.f32 %v728_v60, %v624_v0 }
 0x222   : > { %v1973_v62 = vmul.f32 -1.442695, %v730_v61  ;;  %v738_v2 = vrot.slane %v730_v61, 2  ;;  %v749_v4 = vrot.slane %v730_v61, 6  ;;  %v746_v7 = vrot.slane %v730_v61, 4 }
 0x224   : > { %2124 = vpow2.f32 %v1973_v62  ;;  %v1974_v3 = vmul.f32 -1.442695, %v738_v2  ;;  %v1975_v43 = vmul.f32 -1.442695, %v749_v4  ;;  %v1978_v62 = vld [vmem:[%s1845_s21 + $0x8] sm:$0xf] }
 0x226   : > { %2126 = vpow2.f32 %v1974_v3 }
 0x227   : > { %2128 = vpow2.f32 %v1975_v43 }
 0x22e   : > { %v2125_v5 = vpop.eup %2124 }
 0x22f   : > { %v734_v9 = vadd.f32 1.0, %v2125_v5 }
 0x230   : > { %v2127_v13 = vpop.eup %2126 }
 0x231   : > { %2130 = vrcp.f32 %v734_v9  ;;  %v743_v17 = vadd.f32 1.0, %v2127_v13  ;;  %v2129_v23 = vpop.eup %2128 }
 0x232   : > { %2132 = vtanh.f32 %v746_v7  ;;  %v754_v47 = vadd.f32 1.0, %v2129_v23 }
 0x233   : > { %2134 = vrcp.f32 %v743_v17  ;;  %v781_v17 = vunpack.c.l.bf16 %v1978_v62 }
 0x234   : > { %2136 = vrcp.f32 %v754_v47 }
 0x23b   : > { %v2131_v44 = vpop.eup %2130 }
 0x23c   : > { %v2133_v45 = vpop.eup %2132 }
 0x23d   : > { %v2135_v46 = vpop.eup %2134  ;;  %v758_v48 = vmul.f32 %v2133_v45, %v2131_v44 }
 0x23e   : > { %v757_v49 = vmul.f32 %v2135_v46, %v2594_v59  ;;  %v2137_v54 = vpop.eup %2136 }
 0x240   : > { %v759_v51 = vadd.f32 %v758_v48, %v757_v49 }
 0x242   : > { %2138 = vtanh.f32 %v759_v51  ;;  %v2665_v53 = vsel %vm769_vm9, %v759_v51, %v2594_v59 }
 0x24c   : > { %v2139_v55 = vpop.eup %2138 }
 0x24d   : > { %v761_v56 = vmul.f32 %v2139_v55, %v2137_v54 }
 0x24f   : > { %v2671_v57 = vsel %vm769_vm9, %v761_v56, %v2598_v63  ;;  %v772_v0 = vsel %vm769_vm9, %v761_v56, 0.0 }
 0x250   : > { %v773_v58 = vpack.c.bf16 %v772_v0, %v772_v0  ;;  %v782_v60 = vpack.c.bf16 %v2671_v57, %v2671_v57 }
 0x252   : > { %1976 = vst [vmem:[%s1841_s17 + $0x1] sm:$0x1] %v773_v58  ;;  %816 = vmatmul.mubr.bf16.vlgmr.msra.gmra.mrb[8].mxu0 %v782_v60  ;;  %857 = vmatmul.mubr.bf16.vlgmr.msra.gmra.mrb[8].mxu1 %v782_v60  ;;  %s2005_s17 = smul.u32 4294967268, %s2298_s14 }
 0x253   : > { %940 = vmatpush1.bf16.msra.mxu0 %v2415_v10  ;;  %981 = vmatpush1.bf16.msra.mxu1 %v2418_v11 }
 0x254   : > { %941 = vmatprep.subr.bf16.mxu0 %v2424_v12  ;;  %982 = vmatprep.subr.bf16.mxu1 %v2430_v14  ;;  %s1874_s26 = scalar_lea.vmem %s2587_s19, %s2005_s17 }
 0x255   : > { %971 = vmatprep.mubr.bf16.mxu0 %v2308_v1  ;;  %1012 = vmatprep.mubr.bf16.mxu1 %v2308_v1 }
 0x257   : > { %942 = vmatpush1.bf16.msra.mxu0 %v2433_v15  ;;  %983 = vmatpush1.bf16.msra.mxu1 %v2439_v16 }
 0x258   : > { %943 = vmatprep.subr.bf16.mxu0 %v2443_v18  ;;  %984 = vmatprep.subr.bf16.mxu1 %v2447_v19 }
 0x25b   : > { %944 = vmatpush1.bf16.msra.mxu0 %v2450_v20  ;;  %985 = vmatpush1.bf16.msra.mxu1 %v2453_v21 }
 0x25c   : > { %945 = vmatprep.subr.bf16.mxu0 %v2458_v22  ;;  %986 = vmatprep.subr.bf16.mxu1 %v2464_v24 }
 0x25f   : > { %946 = vmatpush1.bf16.msra.mxu0 %v2467_v25  ;;  %987 = vmatpush1.bf16.msra.mxu1 %v2472_v26 }
 0x260   : > { %947 = vmatprep.subr.bf16.mxu0 %v2475_v27  ;;  %988 = vmatprep.subr.bf16.mxu1 %v2480_v28 }
 0x263   : > { %948 = vmatpush1.bf16.msra.mxu0 %v2483_v29  ;;  %989 = vmatpush1.bf16.msra.mxu1 %v2486_v30 }
 0x264   : > { %949 = vmatprep.subr.bf16.mxu0 %v2491_v31  ;;  %990 = vmatprep.subr.bf16.mxu1 %v2496_v32 }
 0x267   : > { %950 = vmatpush1.bf16.msra.mxu0 %v2501_v33  ;;  %991 = vmatpush1.bf16.msra.mxu1 %v2504_v34 }
 0x268   : > { %951 = vmatprep.subr.bf16.mxu0 %v2509_v35  ;;  %992 = vmatprep.subr.bf16.mxu1 %v2512_v36 }
 0x26b   : > { %952 = vmatpush1.bf16.msra.mxu0 %v2517_v37  ;;  %993 = vmatpush1.bf16.msra.mxu1 %v2520_v38 }
 0x26c   : > { %953 = vmatprep.subr.bf16.mxu0 %v2525_v39  ;;  %994 = vmatprep.subr.bf16.mxu1 %v2528_v40 }
 0x26f   : > { %954 = vmatpush1.bf16.msra.mxu0 %v2533_v41  ;;  %995 = vmatpush1.bf16.msra.mxu1 %v2536_v42 }
 0x270   : > { %1095 = vmatprep.subr.bf16.mxu0 %v2403_v6  ;;  %1136 = vmatprep.subr.bf16.mxu1 %v2410_v8 }
 0x325   : > { %v817_v59 = vpop.f32.mrb[8].mxu0  ;;  %v858_v63 = vpop.f32.mrb[8].mxu1 }
 0x326   : > { %v819_v61 = vpop.f32.mrb[9].mxu0  ;;  %v860_v2 = vpop.f32.mrb[9].mxu1 }
 0x327   : > { %v869_v3 = vcombine.low %v817_v59, %v819_v61  ;;  %v870_v4 = vcombine.low %v858_v63, %v860_v2  ;;  %v821_v43 = vpop.f32.mrb[10].mxu0  ;;  %v862_v5 = vpop.f32.mrb[10].mxu1 }
 0x328   : > { %v822_v7 = vpop.f32.mrb[11].mxu0  ;;  %v863_v9 = vpop.f32.mrb[11].mxu1 }
 0x329   : > { %v877_v13 = vrot.slane %v869_v3, %v2590_v52  ;;  %v884_v23 = vrot.slane %v870_v4, %v2590_v52  ;;  %v925_v63 = vpop.permute.xlu1 %924 }
 0x32a   : > { %vm926_vm10 = vcmp.eq.s32.totalorder %v925_v63, 1 }
 0x32b   : > { %v885_v44 = vcombine.low %v877_v13, %v884_v23 }
 0x32d   : > { %v887_v45 = vadd.f32 %v885_v44, %v781_v17 }
 0x32f   : > { %v1979_v46 = vmul.f32 -1.442695, %v887_v45  ;;  %v895_v47 = vrot.slane %v887_v45, 2  ;;  %v906_v49 = vrot.slane %v887_v45, 6  ;;  %v903_v54 = vrot.slane %v887_v45, 4 }
 0x331   : > { %2140 = vpow2.f32 %v1979_v46  ;;  %v1980_v48 = vmul.f32 -1.442695, %v895_v47  ;;  %v1981_v50 = vmul.f32 -1.442695, %v906_v49  ;;  %v1984_v46 = vld [vmem:[%s1851_s28 + $0xc] sm:$0xf] }
 0x333   : > { %2142 = vpow2.f32 %v1980_v48 }
 0x334   : > { %2144 = vpow2.f32 %v1981_v50 }
 0x33b   : > { %v2141_v51 = vpop.eup %2140 }
 0x33c   : > { %v891_v55 = vadd.f32 1.0, %v2141_v51 }
 0x33d   : > { %v2143_v56 = vpop.eup %2142 }
 0x33e   : > { %2146 = vrcp.f32 %v891_v55  ;;  %v900_v0 = vadd.f32 1.0, %v2143_v56  ;;  %v2145_v58 = vpop.eup %2144 }
 0x33f   : > { %2148 = vtanh.f32 %v903_v54  ;;  %v911_v62 = vadd.f32 1.0, %v2145_v58 }
 0x340   : > { %2150 = vrcp.f32 %v900_v0  ;;  %v937_v0 = vunpack.c.l.bf16 %v1984_v46  ;;  %v1081_v46 = vpop.permute.xlu1 %1080 }
 0x341   : > { %2152 = vrcp.f32 %v911_v62  ;;  %vm1082_vm11 = vcmp.eq.s32.totalorder %v1081_v46, 1  ;;  %v2860_v46 = vld [vmem:[%s2399_s5 + $0x4c] ss:$16 sps:$4 sm:$0xff]  }
 0x348   : > { %v2147_v60 = vpop.eup %2146 }
 0x349   : > { %v2149_v59 = vpop.eup %2148 }
 0x34a   : > { %v2151_v61 = vpop.eup %2150  ;;  %v915_v3 = vmul.f32 %v2149_v59, %v2147_v60 }
 0x34b   : > { %v914_v2 = vmul.f32 %v2151_v61, %v2665_v53  ;;  %v2153_v5 = vpop.eup %2152 }
 0x34d   : > { %v916_v4 = vadd.f32 %v915_v3, %v914_v2 }
 0x34f   : > { %2154 = vtanh.f32 %v916_v4  ;;  %v2715_v43 = vsel %vm926_vm10, %v916_v4, %v2665_v53 }
 0x359   : > { %v2155_v7 = vpop.eup %2154 }
 0x35a   : > { %v918_v9 = vmul.f32 %v2155_v7, %v2153_v5 }
 0x35c   : > { %v2721_v13 = vsel %vm926_vm10, %v918_v9, %v2671_v57  ;;  %v929_v17 = vsel %vm926_vm10, %v918_v9, 0.0 }
 0x35d   : > { %v930_v23 = vpack.c.bf16 %v929_v17, %v929_v17  ;;  %v938_v44 = vpack.c.bf16 %v2721_v13, %v2721_v13 }
 0x35f   : > { %1982 = vst [vmem:[%s1848_s23 + $0x2] sm:$0x1] %v930_v23  ;;  %972 = vmatmul.mubr.bf16.vlgmr.msra.gmra.mrb[12].mxu0 %v938_v44  ;;  %1013 = vmatmul.mubr.bf16.vlgmr.msra.gmra.mrb[12].mxu1 %v938_v44 }
 0x360   : > { %1096 = vmatpush1.bf16.msra.mxu0 %v2415_v10  ;;  %1137 = vmatpush1.bf16.msra.mxu1 %v2418_v11 }
 0x361   : > { %1097 = vmatprep.subr.bf16.mxu0 %v2424_v12  ;;  %1138 = vmatprep.subr.bf16.mxu1 %v2430_v14 }
 0x362   : > { %1127 = vmatprep.mubr.bf16.mxu0 %v2308_v1  ;;  %1168 = vmatprep.mubr.bf16.mxu1 %v2308_v1 }
 0x364   : > { %1098 = vmatpush1.bf16.msra.mxu0 %v2433_v15  ;;  %1139 = vmatpush1.bf16.msra.mxu1 %v2439_v16 }
 0x365   : > { %1099 = vmatprep.subr.bf16.mxu0 %v2443_v18  ;;  %1140 = vmatprep.subr.bf16.mxu1 %v2447_v19 }
 0x368   : > { %1100 = vmatpush1.bf16.msra.mxu0 %v2450_v20  ;;  %1141 = vmatpush1.bf16.msra.mxu1 %v2453_v21 }
 0x369   : > { %1101 = vmatprep.subr.bf16.mxu0 %v2458_v22  ;;  %1142 = vmatprep.subr.bf16.mxu1 %v2464_v24 }
 0x36c   : > { %1102 = vmatpush1.bf16.msra.mxu0 %v2467_v25  ;;  %1143 = vmatpush1.bf16.msra.mxu1 %v2472_v26 }
 0x36d   : > { %1103 = vmatprep.subr.bf16.mxu0 %v2475_v27  ;;  %1144 = vmatprep.subr.bf16.mxu1 %v2480_v28 }
 0x370   : > { %1104 = vmatpush1.bf16.msra.mxu0 %v2483_v29  ;;  %1145 = vmatpush1.bf16.msra.mxu1 %v2486_v30 }
 0x371   : > { %1105 = vmatprep.subr.bf16.mxu0 %v2491_v31  ;;  %1146 = vmatprep.subr.bf16.mxu1 %v2496_v32 }
 0x374   : > { %1106 = vmatpush1.bf16.msra.mxu0 %v2501_v33  ;;  %1147 = vmatpush1.bf16.msra.mxu1 %v2504_v34 }
 0x375   : > { %1107 = vmatprep.subr.bf16.mxu0 %v2509_v35  ;;  %1148 = vmatprep.subr.bf16.mxu1 %v2512_v36 }
 0x378   : > { %1108 = vmatpush1.bf16.msra.mxu0 %v2517_v37  ;;  %1149 = vmatpush1.bf16.msra.mxu1 %v2520_v38 }
 0x379   : > { %1109 = vmatprep.subr.bf16.mxu0 %v2525_v39  ;;  %1150 = vmatprep.subr.bf16.mxu1 %v2528_v40 }
 0x37c   : > { %1110 = vmatpush1.bf16.msra.mxu0 %v2533_v41  ;;  %1151 = vmatpush1.bf16.msra.mxu1 %v2536_v42 }
 0x37d   : > { %1252 = vmatprep.subr.bf16.mxu0 %v2403_v6  ;;  %1293 = vmatprep.subr.bf16.mxu1 %v2410_v8 }
 0x432   : > { %v973_v53 = vpop.f32.mrb[12].mxu0  ;;  %v1014_v57 = vpop.f32.mrb[12].mxu1 }
 0x433   : > { %v975_v45 = vpop.f32.mrb[13].mxu0  ;;  %v1016_v47 = vpop.f32.mrb[13].mxu1 }
 0x434   : > { %v1025_v48 = vcombine.low %v973_v53, %v975_v45  ;;  %v1026_v49 = vcombine.low %v1014_v57, %v1016_v47  ;;  %v977_v50 = vpop.f32.mrb[14].mxu0  ;;  %v1018_v51 = vpop.f32.mrb[14].mxu1 }
 0x435   : > { %v978_v54 = vpop.f32.mrb[15].mxu0  ;;  %v1019_v55 = vpop.f32.mrb[15].mxu1 }
 0x436   : > { %v1033_v56 = vrot.slane %v1025_v48, %v2590_v52  ;;  %v1040_v6 = vrot.slane %v1026_v49, %v2590_v52 }
 0x438   : > { %v1041_v58 = vcombine.low %v1033_v56, %v1040_v6 }
 0x43a   : > { %v1043_v8 = vadd.f32 %v1041_v58, %v937_v0 }
 0x43c   : > { %v1985_v60 = vmul.f32 -1.442695, %v1043_v8  ;;  %v1051_v59 = vrot.slane %v1043_v8, 2  ;;  %v1062_v61 = vrot.slane %v1043_v8, 6  ;;  %v1059_v3 = vrot.slane %v1043_v8, 4 }
 0x43e   : > { %2156 = vpow2.f32 %v1985_v60  ;;  %v1986_v63 = vmul.f32 -1.442695, %v1051_v59  ;;  %v1987_v62 = vmul.f32 -1.442695, %v1062_v61  ;;  %v1237_v60 = vpop.permute.xlu0 %1236 }
 0x43f   : > { %vm1238_vm12 = vcmp.eq.s32.totalorder %v1237_v60, 1 }
 0x440   : > { %2158 = vpow2.f32 %v1986_v63 }
 0x441   : > { %2160 = vpow2.f32 %v1987_v62 }
 0x448   : > { %v2157_v2 = vpop.eup %2156 }
 0x449   : > { %v1047_v4 = vadd.f32 1.0, %v2157_v2 }
 0x44a   : > { %v2159_v5 = vpop.eup %2158 }
 0x44b   : > { %2162 = vrcp.f32 %v1047_v4  ;;  %v1056_v7 = vadd.f32 1.0, %v2159_v5  ;;  %v2161_v9 = vpop.eup %2160 }
 0x44c   : > { %2164 = vtanh.f32 %v1059_v3  ;;  %v1067_v53 = vadd.f32 1.0, %v2161_v9  ;;  %v2830_v9 = vld [vmem:[%s2399_s5] ss:$16 sps:$4 sm:$0xff]  }
 0x44d   : > { %2166 = vrcp.f32 %v1056_v7 }
 0x44e   : > { %2168 = vrcp.f32 %v1067_v53  ;;  %v2848_v53 = vld [vmem:[%s2399_s5 + $0x20] ss:$16 sps:$4 sm:$0xff]  }
 0x455   : > { %v2163_v17 = vpop.eup %2162 }
 0x456   : > { %v2165_v23 = vpop.eup %2164 }
 0x457   : > { %v2167_v44 = vpop.eup %2166  ;;  %v1071_v57 = vmul.f32 %v2165_v23, %v2163_v17  ;;  %v2834_v17 = vld [vmem:[%s2399_s5 + $0x8] ss:$16 sps:$4 sm:$0xff]   ;;  %v2838_v23 = vld [vmem:[%s2399_s5 + $0x24] ss:$16 sps:$4 sm:$0xff]  }
 0x458   : > { %v1070_v45 = vmul.f32 %v2167_v44, %v2715_v43  ;;  %v2169_v49 = vpop.eup %2168  ;;  %v2842_v44 = vld [vmem:[%s2399_s5 + $0x2c] ss:$16 sps:$4 sm:$0xff]  }
 0x45a   : > { %v1072_v47 = vadd.f32 %v1071_v57, %v1070_v45  ;;  %v2852_v57 = vld [vmem:[%s2399_s5 + $0x28] ss:$16 sps:$4 sm:$0xff]   ;;  %v2856_v45 = vld [vmem:[%s2399_s5 + $0x44] ss:$16 sps:$4 sm:$0xff]  }
 0x45c   : > { %2170 = vtanh.f32 %v1072_v47  ;;  %v2765_v48 = vsel %vm1082_vm11, %v1072_v47, %v2715_v43  ;;  %v2864_v47 = vld [vmem:[%s2399_s5 + $0x40] ss:$16 sps:$4 sm:$0xff]  }
 0x466   : > { %v2171_v50 = vpop.eup %2170 }
 0x467   : > { %v1074_v51 = vmul.f32 %v2171_v50, %v2169_v49  ;;  %v2872_v49 = vld [vmem:[%s2399_s5 + $0x64] ss:$16 sps:$4 sm:$0xff]   ;;  %v2876_v50 = vld [vmem:[%s2399_s5 + $0x6c] ss:$16 sps:$4 sm:$0xff]  }
 0x469   : > { %v2768_v54 = vsel %vm1082_vm11, %v1074_v51, %v2721_v13  ;;  %v1085_v55 = vsel %vm1082_vm11, %v1074_v51, 0.0  ;;  %v2880_v51 = vld [vmem:[%s2399_s5 + $0x60] ss:$16 sps:$4 sm:$0xff]  }
 0x46a   : > { %v1086_v56 = vpack.c.bf16 %v1085_v55, %v1085_v55  ;;  %v1094_v0 = vpack.c.bf16 %v2768_v54, %v2768_v54  ;;  %v2888_v55 = vld [vmem:[%s2399_s5 + $0x84] ss:$16 sps:$4 sm:$0xff]  }
 0x46c   : > { %1988 = vst [vmem:[%s1853_s12 + $0x3] sm:$0x1] %v1086_v56  ;;  %1128 = vmatmul.mubr.bf16.vlgmr.msra.gmra.mrb[16].mxu0 %v1094_v0  ;;  %1169 = vmatmul.mubr.bf16.vlgmr.msra.gmra.mrb[16].mxu1 %v1094_v0  ;;  %v2892_v56 = vld [vmem:[%s2399_s5 + $0x8c] ss:$16 sps:$4 sm:$0xff]   ;;  %v2896_v0 = vld [vmem:[%s2399_s5 + $0x80] ss:$16 sps:$4 sm:$0xff]  }
 0x46d   : > { %1253 = vmatpush1.bf16.msra.mxu0 %v2415_v10  ;;  %1294 = vmatpush1.bf16.msra.mxu1 %v2418_v11  ;;  %v2807_v10 = vld [vmem:[%s2399_s5 + $0x4] ss:$16 sps:$4 sm:$0xff]   ;;  %v2811_v11 = vld [vmem:[%s2399_s5 + $0xc] ss:$16 sps:$4 sm:$0xff]  }
 0x46e   : > { %1254 = vmatprep.subr.bf16.mxu0 %v2424_v12  ;;  %1295 = vmatprep.subr.bf16.mxu1 %v2430_v14 }
 0x46f   : > { %1284 = vmatprep.mubr.bf16.mxu0 %v2308_v1  ;;  %1325 = vmatprep.mubr.bf16.mxu1 %v2308_v1 }
 0x471   : > { %1255 = vmatpush1.bf16.msra.mxu0 %v2433_v15  ;;  %1296 = vmatpush1.bf16.msra.mxu1 %v2439_v16  ;;  %v1092_v16 = vld [vmem:[%s1091_s30] sm:$0xf] }
 0x472   : > { %1256 = vmatprep.subr.bf16.mxu0 %v2443_v18  ;;  %1297 = vmatprep.subr.bf16.mxu1 %v2447_v19 }
 0x475   : > { %1257 = vmatpush1.bf16.msra.mxu0 %v2450_v20  ;;  %1298 = vmatpush1.bf16.msra.mxu1 %v2453_v21 }
 0x476   : > { %1258 = vmatprep.subr.bf16.mxu0 %v2458_v22  ;;  %1299 = vmatprep.subr.bf16.mxu1 %v2464_v24 }
 0x479   : > { %1259 = vmatpush1.bf16.msra.mxu0 %v2467_v25  ;;  %1300 = vmatpush1.bf16.msra.mxu1 %v2472_v26 }
 0x47a   : > { %1260 = vmatprep.subr.bf16.mxu0 %v2475_v27  ;;  %1301 = vmatprep.subr.bf16.mxu1 %v2480_v28  ;;  %v1093_v27 = vunpack.c.l.bf16 %v1092_v16  ;;  %v2912_v16 = vld [vmem:[%s2399_s5 + $0xa0] ss:$16 sps:$4 sm:$0xff]  }
 0x47d   : > { %1261 = vmatpush1.bf16.msra.mxu0 %v2483_v29  ;;  %1302 = vmatpush1.bf16.msra.mxu1 %v2486_v30 }
 0x47e   : > { %1262 = vmatprep.subr.bf16.mxu0 %v2491_v31  ;;  %1303 = vmatprep.subr.bf16.mxu1 %v2496_v32 }
 0x481   : > { %1263 = vmatpush1.bf16.msra.mxu0 %v2501_v33  ;;  %1304 = vmatpush1.bf16.msra.mxu1 %v2504_v34 }
 0x482   : > { %1264 = vmatprep.subr.bf16.mxu0 %v2509_v35  ;;  %1305 = vmatprep.subr.bf16.mxu1 %v2512_v36 }
 0x485   : > { %1265 = vmatpush1.bf16.msra.mxu0 %v2517_v37  ;;  %1306 = vmatpush1.bf16.msra.mxu1 %v2520_v38 }
 0x486   : > { %1266 = vmatprep.subr.bf16.mxu0 %v2525_v39  ;;  %1307 = vmatprep.subr.bf16.mxu1 %v2528_v40 }
 0x489   : > { %1267 = vmatpush1.bf16.msra.mxu0 %v2533_v41  ;;  %1308 = vmatpush1.bf16.msra.mxu1 %v2536_v42 }
 0x48a   : > { %1409 = vmatprep.subr.bf16.mxu0 %v2807_v10  ;;  %1450 = vmatprep.subr.bf16.mxu1 %v2811_v11 }
 0x53f   : > { %v1129_v12 = vpop.f32.mrb[16].mxu0  ;;  %v1170_v14 = vpop.f32.mrb[16].mxu1 }
 0x540   : > { %v1131_v15 = vpop.f32.mrb[17].mxu0  ;;  %v1172_v18 = vpop.f32.mrb[17].mxu1 }
 0x541   : > { %v1181_v19 = vcombine.low %v1129_v12, %v1131_v15  ;;  %v1182_v20 = vcombine.low %v1170_v14, %v1172_v18  ;;  %v1133_v21 = vpop.f32.mrb[18].mxu0  ;;  %v1174_v22 = vpop.f32.mrb[18].mxu1  ;;  %v2900_v12 = vld [vmem:[%s2399_s5 + $0x88] ss:$16 sps:$4 sm:$0xff]   ;;  %v2904_v14 = vld [vmem:[%s2399_s5 + $0xa4] ss:$16 sps:$4 sm:$0xff]  }
 0x542   : > { %v1134_v24 = vpop.f32.mrb[19].mxu0  ;;  %v1175_v25 = vpop.f32.mrb[19].mxu1  ;;  %v2908_v15 = vld [vmem:[%s2399_s5 + $0xac] ss:$16 sps:$4 sm:$0xff]   ;;  %v2916_v18 = vld [vmem:[%s2399_s5 + $0xa8] ss:$16 sps:$4 sm:$0xff]  }
 0x543   : > { %v1189_v26 = vrot.slane %v1181_v19, %v2590_v52  ;;  %v1196_v28 = vrot.slane %v1182_v20, %v2590_v52  ;;  %v2920_v19 = vld [vmem:[%s2399_s5 + $0xc4] ss:$16 sps:$4 sm:$0xff]   ;;  %v2924_v20 = vld [vmem:[%s2399_s5 + $0xcc] ss:$16 sps:$4 sm:$0xff]   ;;  %v2928_v21 = vld [vmem:[%s2399_s5 + $0xc0] ss:$16 sps:$4 sm:$0xff]  }
 0x544   : > { %v2932_v22 = vld [vmem:[%s2399_s5 + $0xc8] ss:$16 sps:$4 sm:$0xff]   ;;  %v2936_v24 = vld [vmem:[%s2399_s5 + $0xe4] ss:$16 sps:$4 sm:$0xff]   ;;  %v2940_v25 = vld [vmem:[%s2399_s5 + $0xec] ss:$16 sps:$4 sm:$0xff]  }
 0x545   : > { %v1197_v29 = vcombine.low %v1189_v26, %v1196_v28  ;;  %v2944_v26 = vld [vmem:[%s2399_s5 + $0xe0] ss:$16 sps:$4 sm:$0xff]  }
 0x547   : > { %v1199_v30 = vadd.f32 %v1197_v29, %v1093_v27  ;;  %v2948_v27 = vld [vmem:[%s2399_s5 + $0xe8] ss:$16 sps:$4 sm:$0xff]  }
 0x549   : > { %v1990_v31 = vmul.f32 -1.442695, %v1199_v30  ;;  %v1207_v32 = vrot.slane %v1199_v30, 2  ;;  %v1218_v34 = vrot.slane %v1199_v30, 6  ;;  %v1215_v37 = vrot.slane %v1199_v30, 4 }
 0x54b   : > { %2172 = vpow2.f32 %v1990_v31  ;;  %v1991_v33 = vmul.f32 -1.442695, %v1207_v32  ;;  %v1992_v35 = vmul.f32 -1.442695, %v1218_v34  ;;  %v1994_v31 = vld [vmem:[%s1860_s9 + $0x14] sm:$0xf] }
 0x54d   : > { %2174 = vpow2.f32 %v1991_v33 }
 0x54e   : > { %2176 = vpow2.f32 %v1992_v35 }
 0x555   : > { %v2173_v36 = vpop.eup %2172 }
 0x556   : > { %v1203_v38 = vadd.f32 1.0, %v2173_v36 }
 0x557   : > { %v2175_v39 = vpop.eup %2174 }
 0x558   : > { %2178 = vrcp.f32 %v1203_v38  ;;  %v1212_v40 = vadd.f32 1.0, %v2175_v39  ;;  %v2177_v41 = vpop.eup %2176 }
 0x559   : > { %2180 = vtanh.f32 %v1215_v37  ;;  %v1223_v6 = vadd.f32 1.0, %v2177_v41 }
 0x55a   : > { %2182 = vrcp.f32 %v1212_v40  ;;  %v1250_v40 = vunpack.c.l.bf16 %v1994_v31  ;;  %v1394_v31 = vpop.permute.xlu1 %1393 }
 0x55b   : > { %2184 = vrcp.f32 %v1223_v6  ;;  %vm1395_vm13 = vcmp.eq.s32.totalorder %v1394_v31, 1 }
 0x562   : > { %v2179_v42 = vpop.eup %2178 }
 0x563   : > { %v2181_v43 = vpop.eup %2180 }
 0x564   : > { %v2183_v13 = vpop.eup %2182  ;;  %v1227_v58 = vmul.f32 %v2181_v43, %v2179_v42 }
 0x565   : > { %v1226_v8 = vmul.f32 %v2183_v13, %v2765_v48  ;;  %v2185_v61 = vpop.eup %2184 }
 0x567   : > { %v1228_v59 = vadd.f32 %v1227_v58, %v1226_v8 }
 0x569   : > { %2186 = vtanh.f32 %v1228_v59  ;;  %v2820_v63 = vsel %vm1238_vm12, %v1228_v59, %v2765_v48  ;;  %v2868_v48 = vld [vmem:[%s2399_s5 + $0x48] ss:$16 sps:$4 sm:$0xff]  }
 0x573   : > { %v2187_v62 = vpop.eup %2186 }
 0x574   : > { %v1230_v2 = vmul.f32 %v2187_v62, %v2185_v61 }
 0x576   : > { %v2825_v3 = vsel %vm1238_vm12, %v1230_v2, %v2768_v54  ;;  %v1241_v4 = vsel %vm1238_vm12, %v1230_v2, 0.0  ;;  %v2884_v54 = vld [vmem:[%s2399_s5 + $0x68] ss:$16 sps:$4 sm:$0xff]   ;;  %s1863_s5 = scalar_lea.vmem %s2600_s27, %s1245_s29 [#allocation4]  ;;  %s1999_s29 = smul.u32 4294967276, %s2298_s14 }
 0x577   : > { %v1242_v5 = vpack.c.bf16 %v1241_v4, %v1241_v4  ;;  %v1251_v7 = vpack.c.bf16 %v2825_v3, %v2825_v3 }
 0x578   : > { %s1867_s10 = scalar_lea.vmem %s2587_s19, %s1999_s29 }
 0x579   : > { %1244 = vst [vmem:[%s1243_s4] sm:$0x1] %v1242_v5  ;;  %1285 = vmatmul.mubr.bf16.vlgmr.msra.gmra.mrb[20].mxu0 %v1251_v7  ;;  %1326 = vmatmul.mubr.bf16.vlgmr.msra.gmra.mrb[20].mxu1 %v1251_v7 }
 0x57a   : > { %1410 = vmatpush1.bf16.msra.mxu0 %v2830_v9  ;;  %1451 = vmatpush1.bf16.msra.mxu1 %v2834_v17 }
 0x57b   : > { %1411 = vmatprep.subr.bf16.mxu0 %v2838_v23  ;;  %1452 = vmatprep.subr.bf16.mxu1 %v2842_v44 }
 0x57c   : > { %1441 = vmatprep.mubr.bf16.mxu0 %v2308_v1  ;;  %1482 = vmatprep.mubr.bf16.mxu1 %v2308_v1 }
 0x57e   : > { %1412 = vmatpush1.bf16.msra.mxu0 %v2848_v53  ;;  %1453 = vmatpush1.bf16.msra.mxu1 %v2852_v57 }
 0x57f   : > { %1413 = vmatprep.subr.bf16.mxu0 %v2856_v45  ;;  %1454 = vmatprep.subr.bf16.mxu1 %v2860_v46 }
 0x582   : > { %1414 = vmatpush1.bf16.msra.mxu0 %v2864_v47  ;;  %1455 = vmatpush1.bf16.msra.mxu1 %v2868_v48 }
 0x583   : > { %1415 = vmatprep.subr.bf16.mxu0 %v2872_v49  ;;  %1456 = vmatprep.subr.bf16.mxu1 %v2876_v50 }
 0x586   : > { %1416 = vmatpush1.bf16.msra.mxu0 %v2880_v51  ;;  %1457 = vmatpush1.bf16.msra.mxu1 %v2884_v54 }
 0x587   : > { %1417 = vmatprep.subr.bf16.mxu0 %v2888_v55  ;;  %1458 = vmatprep.subr.bf16.mxu1 %v2892_v56 }
 0x58a   : > { %1418 = vmatpush1.bf16.msra.mxu0 %v2896_v0  ;;  %1459 = vmatpush1.bf16.msra.mxu1 %v2900_v12 }
 0x58b   : > { %1419 = vmatprep.subr.bf16.mxu0 %v2904_v14  ;;  %1460 = vmatprep.subr.bf16.mxu1 %v2908_v15 }
 0x58e   : > { %1420 = vmatpush1.bf16.msra.mxu0 %v2912_v16  ;;  %1461 = vmatpush1.bf16.msra.mxu1 %v2916_v18 }
 0x58f   : > { %1421 = vmatprep.subr.bf16.mxu0 %v2920_v19  ;;  %1462 = vmatprep.subr.bf16.mxu1 %v2924_v20 }
 0x592   : > { %1422 = vmatpush1.bf16.msra.mxu0 %v2928_v21  ;;  %1463 = vmatpush1.bf16.msra.mxu1 %v2932_v22 }
 0x593   : > { %1423 = vmatprep.subr.bf16.mxu0 %v2936_v24  ;;  %1464 = vmatprep.subr.bf16.mxu1 %v2940_v25 }
 0x596   : > { %1424 = vmatpush1.bf16.msra.mxu0 %v2944_v26  ;;  %1465 = vmatpush1.bf16.msra.mxu1 %v2948_v27 }
 0x597   : > { %1566 = vmatprep.subr.bf16.mxu0 %v2807_v10  ;;  %1607 = vmatprep.subr.bf16.mxu1 %v2811_v11 }
 0x64c   : > { %v1286_v28 = vpop.f32.mrb[20].mxu0  ;;  %v1327_v29 = vpop.f32.mrb[20].mxu1 }
 0x64d   : > { %v1288_v30 = vpop.f32.mrb[21].mxu0  ;;  %v1329_v32 = vpop.f32.mrb[21].mxu1 }
 0x64e   : > { %v1338_v33 = vcombine.low %v1286_v28, %v1288_v30  ;;  %v1339_v34 = vcombine.low %v1327_v29, %v1329_v32  ;;  %v1290_v35 = vpop.f32.mrb[22].mxu0  ;;  %v1331_v36 = vpop.f32.mrb[22].mxu1 }
 0x64f   : > { %v1291_v37 = vpop.f32.mrb[23].mxu0  ;;  %v1332_v38 = vpop.f32.mrb[23].mxu1 }
 0x650   : > { %v1346_v39 = vrot.slane %v1338_v33, %v2590_v52  ;;  %v1353_v10 = vrot.slane %v1339_v34, %v2590_v52 }
 0x652   : > { %v1354_v41 = vcombine.low %v1346_v39, %v1353_v10 }
 0x654   : > { %v1356_v11 = vadd.f32 %v1354_v41, %v1250_v40 }
 0x656   : > { %v1995_v42 = vmul.f32 -1.442695, %v1356_v11  ;;  %v1364_v43 = vrot.slane %v1356_v11, 2  ;;  %v1375_v6 = vrot.slane %v1356_v11, 6  ;;  %v1372_v60 = vrot.slane %v1356_v11, 4 }
 0x658   : > { %2188 = vpow2.f32 %v1995_v42  ;;  %v1996_v13 = vmul.f32 -1.442695, %v1364_v43  ;;  %v1997_v58 = vmul.f32 -1.442695, %v1375_v6 }
 0x65a   : > { %2190 = vpow2.f32 %v1996_v13 }
 0x65b   : > { %2192 = vpow2.f32 %v1997_v58 }
 0x662   : > { %v2189_v8 = vpop.eup %2188 }
 0x663   : > { %v1360_v59 = vadd.f32 1.0, %v2189_v8 }
 0x664   : > { %v2191_v61 = vpop.eup %2190 }
 0x665   : > { %2194 = vrcp.f32 %v1360_v59  ;;  %v1369_v62 = vadd.f32 1.0, %v2191_v61  ;;  %v2193_v2 = vpop.eup %2192 }
 0x666   : > { %2196 = vtanh.f32 %v1372_v60  ;;  %v1380_v28 = vadd.f32 1.0, %v2193_v2  ;;  %v2006_v2 = vld [vmem:[%s1874_s26 + $0x1c] sm:$0xf] }
 0x667   : > { %2198 = vrcp.f32 %v1369_v62 }
 0x668   : > { %2200 = vrcp.f32 %v1380_v28 }
 0x66f   : > { %v2195_v4 = vpop.eup %2194 }
 0x670   : > { %v2197_v5 = vpop.eup %2196 }
 0x671   : > { %v2199_v7 = vpop.eup %2198  ;;  %v1384_v29 = vmul.f32 %v2197_v5, %v2195_v4 }
 0x672   : > { %v1383_v30 = vmul.f32 %v2199_v7, %v2820_v63  ;;  %v2201_v34 = vpop.eup %2200 }
 0x674   : > { %v1385_v32 = vadd.f32 %v1384_v29, %v1383_v30 }
 0x676   : > { %2202 = vtanh.f32 %v1385_v32  ;;  %v2959_v33 = vsel %vm1395_vm13, %v1385_v32, %v2820_v63 }
 0x680   : > { %v2203_v35 = vpop.eup %2202 }
 0x681   : > { %v1387_v36 = vmul.f32 %v2203_v35, %v2201_v34 }
 0x683   : > { %v2965_v37 = vsel %vm1395_vm13, %v1387_v36, %v2825_v3  ;;  %v1398_v38 = vsel %vm1395_vm13, %v1387_v36, 0.0 }
 0x684   : > { %v1399_v39 = vpack.c.bf16 %v1398_v38, %v1398_v38  ;;  %v1408_v40 = vpack.c.bf16 %v2965_v37, %v2965_v37 }
 0x686   : > { %1998 = vst [vmem:[%s1863_s5 + $0x5] sm:$0x1] %v1399_v39  ;;  %1442 = vmatmul.mubr.bf16.vlgmr.msra.gmra.mrb[24].mxu0 %v1408_v40  ;;  %1483 = vmatmul.mubr.bf16.vlgmr.msra.gmra.mrb[24].mxu1 %v1408_v40 }
 0x687   : > { %1567 = vmatpush1.bf16.msra.mxu0 %v2830_v9  ;;  %1608 = vmatpush1.bf16.msra.mxu1 %v2834_v17  ;;  %v2000_v9 = vld [vmem:[%s1867_s10 + $0x18] sm:$0xf] }
 0x688   : > { %1568 = vmatprep.subr.bf16.mxu0 %v2838_v23  ;;  %1609 = vmatprep.subr.bf16.mxu1 %v2842_v44 }
 0x689   : > { %1598 = vmatprep.mubr.bf16.mxu0 %v2308_v1  ;;  %1639 = vmatprep.mubr.bf16.mxu1 %v2308_v1 }
 0x68b   : > { %1569 = vmatpush1.bf16.msra.mxu0 %v2848_v53  ;;  %1610 = vmatpush1.bf16.msra.mxu1 %v2852_v57 }
 0x68c   : > { %1570 = vmatprep.subr.bf16.mxu0 %v2856_v45  ;;  %1611 = vmatprep.subr.bf16.mxu1 %v2860_v46 }
 0x68f   : > { %1571 = vmatpush1.bf16.msra.mxu0 %v2864_v47  ;;  %1612 = vmatpush1.bf16.msra.mxu1 %v2868_v48  ;;  %v1407_v48 = vunpack.c.l.bf16 %v2000_v9 }
 0x690   : > { %1572 = vmatprep.subr.bf16.mxu0 %v2872_v49  ;;  %1613 = vmatprep.subr.bf16.mxu1 %v2876_v50 }
 0x693   : > { %1573 = vmatpush1.bf16.msra.mxu0 %v2880_v51  ;;  %1614 = vmatpush1.bf16.msra.mxu1 %v2884_v54 }
 0x694   : > { %1574 = vmatprep.subr.bf16.mxu0 %v2888_v55  ;;  %1615 = vmatprep.subr.bf16.mxu1 %v2892_v56 }
 0x697   : > { %1575 = vmatpush1.bf16.msra.mxu0 %v2896_v0  ;;  %1616 = vmatpush1.bf16.msra.mxu1 %v2900_v12 }
 0x698   : > { %1576 = vmatprep.subr.bf16.mxu0 %v2904_v14  ;;  %1617 = vmatprep.subr.bf16.mxu1 %v2908_v15 }
 0x69b   : > { %1577 = vmatpush1.bf16.msra.mxu0 %v2912_v16  ;;  %1618 = vmatpush1.bf16.msra.mxu1 %v2916_v18 }
 0x69c   : > { %1578 = vmatprep.subr.bf16.mxu0 %v2920_v19  ;;  %1619 = vmatprep.subr.bf16.mxu1 %v2924_v20 }
 0x69f   : > { %1579 = vmatpush1.bf16.msra.mxu0 %v2928_v21  ;;  %1620 = vmatpush1.bf16.msra.mxu1 %v2932_v22 }
 0x6a0   : > { %1580 = vmatprep.subr.bf16.mxu0 %v2936_v24  ;;  %1621 = vmatprep.subr.bf16.mxu1 %v2940_v25 }
 0x6a3   : > { %1581 = vmatpush1.bf16.msra.mxu0 %v2944_v26  ;;  %1622 = vmatpush1.bf16.msra.mxu1 %v2948_v27  ;;  %v1551_v26 = vpop.permute.xlu0 %1550 }
 0x6a4   : > { %vm1552_vm14 = vcmp.eq.s32.totalorder %v1551_v26, 1 }
 0x759   : > { %v1443_v1 = vpop.f32.mrb[24].mxu0  ;;  %v1484_v63 = vpop.f32.mrb[24].mxu1 }
 0x75a   : > { %v1445_v3 = vpop.f32.mrb[25].mxu0  ;;  %v1486_v17 = vpop.f32.mrb[25].mxu1 }
 0x75b   : > { %v1495_v23 = vcombine.low %v1443_v1, %v1445_v3  ;;  %v1496_v44 = vcombine.low %v1484_v63, %v1486_v17  ;;  %v1447_v53 = vpop.f32.mrb[26].mxu0  ;;  %v1488_v57 = vpop.f32.mrb[26].mxu1 }
 0x75c   : > { %v1448_v45 = vpop.f32.mrb[27].mxu0  ;;  %v1489_v46 = vpop.f32.mrb[27].mxu1 }
 0x75d   : > { %v1503_v47 = vrot.slane %v1495_v23, %v2590_v52  ;;  %v1510_v49 = vrot.slane %v1496_v44, %v2590_v52  ;;  %v1708_v46 = vpop.permute.xlu1 %1707 }
 0x75e   : > { %vm1709_vm15 = vcmp.eq.s32.totalorder %v1708_v46, 1 }
 0x75f   : > { %v1511_v50 = vcombine.low %v1503_v47, %v1510_v49 }
 0x761   : > { %v1513_v51 = vadd.f32 %v1511_v50, %v1407_v48 }
 0x763   : > { %v2001_v54 = vmul.f32 -1.442695, %v1513_v51  ;;  %v1521_v55 = vrot.slane %v1513_v51, 2  ;;  %v1532_v0 = vrot.slane %v1513_v51, 6  ;;  %v1529_v15 = vrot.slane %v1513_v51, 4 }
 0x765   : > { %2204 = vpow2.f32 %v2001_v54  ;;  %v2002_v56 = vmul.f32 -1.442695, %v1521_v55  ;;  %v2003_v12 = vmul.f32 -1.442695, %v1532_v0 }
 0x767   : > { %2206 = vpow2.f32 %v2002_v56 }
 0x768   : > { %2208 = vpow2.f32 %v2003_v12 }
 0x76f   : > { %v2205_v14 = vpop.eup %2204 }
 0x770   : > { %v1517_v16 = vadd.f32 1.0, %v2205_v14 }
 0x771   : > { %v2207_v18 = vpop.eup %2206 }
 0x772   : > { %2210 = vrcp.f32 %v1517_v16  ;;  %v1526_v19 = vadd.f32 1.0, %v2207_v18  ;;  %v2209_v20 = vpop.eup %2208 }
 0x773   : > { %2212 = vtanh.f32 %v1529_v15  ;;  %v1537_v25 = vadd.f32 1.0, %v2209_v20 }
 0x774   : > { %2214 = vrcp.f32 %v1526_v19 }
 0x775   : > { %2216 = vrcp.f32 %v1537_v25 }
 0x77c   : > { %v2211_v21 = vpop.eup %2210 }
 0x77d   : > { %v2213_v22 = vpop.eup %2212 }
 0x77e   : > { %v2215_v24 = vpop.eup %2214  ;;  %v1541_v27 = vmul.f32 %v2213_v22, %v2211_v21 }
 0x77f   : > { %v1540_v10 = vmul.f32 %v2215_v24, %v2959_v33  ;;  %v2217_v42 = vpop.eup %2216 }
 0x781   : > { %v1542_v41 = vadd.f32 %v1541_v27, %v1540_v10 }
 0x783   : > { %2218 = vtanh.f32 %v1542_v41  ;;  %v1554_v11 = vsel %vm1552_vm14, %v1542_v41, %v2959_v33  ;;  %v1564_v33 = vunpack.c.l.bf16 %v2006_v2 }
 0x78d   : > { %v2219_v43 = vpop.eup %2218 }
 0x78e   : > { %v1544_v13 = vmul.f32 %v2219_v43, %v2217_v42 }
 0x790   : > { %v1553_v6 = vsel %vm1552_vm14, %v1544_v13, %v2965_v37  ;;  %v1555_v58 = vsel %vm1552_vm14, %v1544_v13, 0.0 }
 0x791   : > { %v1556_v8 = vpack.c.bf16 %v1555_v58, %v1555_v58  ;;  %v1565_v60 = vpack.c.bf16 %v1553_v6, %v1553_v6 }
 0x793   : > { %2004 = vst [vmem:[%s1870_s11 + $0x6] sm:$0x1] %v1556_v8  ;;  %1599 = vmatmul.mubr.bf16.vlgmr.msra.gmra.mrb[28].mxu0 %v1565_v60  ;;  %1640 = vmatmul.mubr.bf16.vlgmr.msra.gmra.mrb[28].mxu1 %v1565_v60 }
 0x866   : > { %v1600_v59 = vpop.f32.mrb[28].mxu0  ;;  %v1641_v61 = vpop.f32.mrb[28].mxu1 }
 0x867   : > { %v1602_v62 = vpop.f32.mrb[29].mxu0  ;;  %v1643_v4 = vpop.f32.mrb[29].mxu1 }
 0x868   : > { %v1652_v5 = vcombine.low %v1600_v59, %v1602_v62  ;;  %v1653_v7 = vcombine.low %v1641_v61, %v1643_v4  ;;  %v1604_v28 = vpop.f32.mrb[30].mxu0  ;;  %v1645_v29 = vpop.f32.mrb[30].mxu1 }
 0x869   : > { %v1605_v30 = vpop.f32.mrb[31].mxu0  ;;  %v1646_v31 = vpop.f32.mrb[31].mxu1 }
 0x86a   : > { %v1660_v32 = vrot.slane %v1652_v5, %v2590_v52  ;;  %v1667_v34 = vrot.slane %v1653_v7, %v2590_v52 }
 0x86c   : > { %v1668_v35 = vcombine.low %v1660_v32, %v1667_v34 }
 0x86e   : > { %v1670_v36 = vadd.f32 %v1668_v35, %v1564_v33 }
 0x870   : > { %v2007_v37 = vmul.f32 -1.442695, %v1670_v36  ;;  %v1678_v38 = vrot.slane %v1670_v36, 2  ;;  %v1689_v40 = vrot.slane %v1670_v36, 6  ;;  %v1686_v3 = vrot.slane %v1670_v36, 4 }
 0x872   : > { %2220 = vpow2.f32 %v2007_v37  ;;  %v2008_v39 = vmul.f32 -1.442695, %v1678_v38  ;;  %v2009_v1 = vmul.f32 -1.442695, %v1689_v40 }
 0x874   : > { %2222 = vpow2.f32 %v2008_v39 }
 0x875   : > { %2224 = vpow2.f32 %v2009_v1 }
 0x87c   : > { %v2221_v63 = vpop.eup %2220 }
 0x87d   : > { %v1674_v9 = vadd.f32 1.0, %v2221_v63 }
 0x87e   : > { %v2223_v17 = vpop.eup %2222 }
 0x87f   : > { %2226 = vrcp.f32 %v1674_v9  ;;  %v1683_v23 = vadd.f32 1.0, %v2223_v17  ;;  %v2225_v44 = vpop.eup %2224 }
 0x880   : > { %2228 = vtanh.f32 %v1686_v3  ;;  %v1694_v45 = vadd.f32 1.0, %v2225_v44 }
 0x881   : > { %2230 = vrcp.f32 %v1683_v23 }
 0x882   : > { %2232 = vrcp.f32 %v1694_v45 }
 0x889   : > { %v2227_v52 = vpop.eup %2226 }
 0x88a   : > { %v2229_v53 = vpop.eup %2228 }
 0x88b   : > { %v2231_v57 = vpop.eup %2230  ;;  %v1698_v48 = vmul.f32 %v2229_v53, %v2227_v52 }
 0x88c   : > { %v1697_v47 = vmul.f32 %v2231_v57, %v1554_v11  ;;  %v2233_v51 = vpop.eup %2232 }
 0x88e   : > { %v1699_v49 = vadd.f32 %v1698_v48, %v1697_v47 }
 0x890   : > { %2234 = vtanh.f32 %v1699_v49  ;;  %v1711_v50 = vsel %vm1709_vm15, %v1699_v49, %v1554_v11 }
 0x891   : > { %1717 = vst [vmem:[#allocation3] sm:$0x3] %v1711_v50 }
 0x89a   : > { %v2235_v54 = vpop.eup %2234  ;;  %1724 = sbr.rel (!%p2363_p3) target bundleno = 2221 (0x8ad), region = 40 }
 0x89b   : > { %v1701_v55 = vmul.f32 %v2235_v54, %v2233_v51 }
 0x89d   : > { %v1710_v56 = vsel %vm1709_vm15, %v1701_v55, %v1553_v6  ;;  %v1712_v0 = vsel %vm1709_vm15, %v1701_v55, 0.0 }
 0x89e   : > { %v1713_v12 = vpack.c.bf16 %v1712_v0, %v1712_v0  ;;  %1716 = vst [vmem:[#allocation2] sm:$0x3] %v1710_v56 }
 0x8a0   : > { %2010 = vst [vmem:[%s1877_s7 + $0x7] sm:$0x1] %v1713_v12 }
 0x8a7   : > { %v1748_v14 = vld [vmem:[%s2600_s27] sm:$0x1]  ;;  %v1750_v15 = vld [vmem:[%s2600_s27 + $0x1] sm:$0x1]  ;;  %v1752_v16 = vld [vmem:[%s2600_s27 + $0x2] sm:$0x1] }
 0x8a8   : > { %1749 = vst [vmem:[%s1732_s8] sm:$0x1] %v1748_v14  ;;  %1751 = vst [vmem:[%s1732_s8 + $0x2] sm:$0x1] %v1750_v15  ;;  %v1754_v18 = vld [vmem:[%s2600_s27 + $0x3] sm:$0x1] }
 0x8a9   : > { %1753 = vst [vmem:[%s1732_s8 + $0x4] sm:$0x1] %v1752_v16  ;;  %v1756_v19 = vld [vmem:[%s2600_s27 + $0x4] sm:$0x1]  ;;  %v1758_v20 = vld [vmem:[%s2600_s27 + $0x5] sm:$0x1] }
 0x8aa   : > { %1755 = vst [vmem:[%s1732_s8 + $0x6] sm:$0x1] %v1754_v18  ;;  %1757 = vst [vmem:[%s1732_s8 + $0x8] sm:$0x1] %v1756_v19  ;;  %v1760_v21 = vld [vmem:[%s2600_s27 + $0x6] sm:$0x1] }
 0x8ab   : > { %1759 = vst [vmem:[%s1732_s8 + $0xa] sm:$0x1] %v1758_v20  ;;  %v1762_v22 = vld [vmem:[%s2600_s27 + $0x7] sm:$0x1]  ;;  %1761 = vst [vmem:[%s1732_s8 + $0xc] sm:$0x1] %v1760_v21 }
 0x8ac   : > { %1763 = vst [vmem:[%s1732_s8 + $0xe] sm:$0x1] %v1762_v22 }
 0x8ad PF: > { %s13_s16 = sadd.s32 1, %s2306_s16   ;;  %s3052_s12 = smov %s2294_s13 }
 0x8ae   : > { %p10_p9 = scmp.ge.s32.totalorder %s13_s16, 4   ;;  %s3053_s13 = smov %s2372_s22 }
 0x8af   : > { %s3054_s14 = smov %s2302_s15  ;;  %s3055_s15 = smov %s3057_s18 }
 0x8b0   :  { %12 = sbr.rel (!%p10_p9) target bundleno = 3 (0x3), region = 126 }

// kernel: listener_forward.11
= control target key start
LH: loop header
LB: loop body
LE: loop exit
PB: predicated region body
PF: predicated region fallthrough
CT: control target
= control target key end

     0   :  { %s3730_s1 = inlined_call_operand.vmem [shape: bf16[2,512,512], index: 1, kind: input, shape index: {}]   ;;  %s3731_s0 = inlined_call_operand.vmem [shape: bf16[16,512], index: 0, kind: input, shape index: {}]   ;;  %s3732_s2 = inlined_call_operand.vmem [shape: f32[2,1,512], index: 2, kind: input, shape index: {}]   ;;  %s3733_s3 = inlined_call_operand.vmem [shape: bf16[2,16,512], index: 3, kind: output, shape index: {}]  }
   0x1   :  { %v2466_v0 = vld [vmem:[%s3730_s1 + $0x4] ss:$16 sps:$4 sm:$0xff]   ;;  %v2468_v1 = vld [vmem:[%s3730_s1 + $0xc] ss:$16 sps:$4 sm:$0xff]   ;;  %v2470_v2 = vld [vmem:[%s3730_s1] ss:$16 sps:$4 sm:$0xff]  }
   0x2   :  { %828 = vmatprep.subr.bf16.mxu0 %v2466_v0  ;;  %v2471_v3 = vld [vmem:[%s3730_s1 + $0x8] ss:$16 sps:$4 sm:$0xff]   ;;  %914 = vmatprep.subr.bf16.mxu1 %v2468_v1  ;;  %v2472_v4 = vld [vmem:[%s3730_s1 + $0x24] ss:$16 sps:$4 sm:$0xff]   ;;  %v2474_v5 = vld [vmem:[%s3730_s1 + $0x2c] ss:$16 sps:$4 sm:$0xff]  }
   0x3   :  { %829 = vmatpush1.bf16.msra.mxu0 %v2470_v2  ;;  %915 = vmatpush1.bf16.msra.mxu1 %v2471_v3  ;;  %v2476_v6 = vld [vmem:[%s3730_s1 + $0x20] ss:$16 sps:$4 sm:$0xff]   ;;  %v2477_v7 = vld [vmem:[%s3730_s1 + $0x28] ss:$16 sps:$4 sm:$0xff]   ;;  %v2478_v8 = vld [vmem:[%s3730_s1 + $0x44] ss:$16 sps:$4 sm:$0xff]  }
   0x4   :  { %830 = vmatprep.subr.bf16.mxu0 %v2472_v4  ;;  %916 = vmatprep.subr.bf16.mxu1 %v2474_v5  ;;  %v2480_v9 = vld [vmem:[%s3730_s1 + $0x4c] ss:$16 sps:$4 sm:$0xff]   ;;  %v2482_v10 = vld [vmem:[%s3730_s1 + $0x40] ss:$16 sps:$4 sm:$0xff]   ;;  %v2483_v11 = vld [vmem:[%s3730_s1 + $0x48] ss:$16 sps:$4 sm:$0xff]  }
   0x5   :  { %v2484_v12 = vld [vmem:[%s3730_s1 + $0x64] ss:$16 sps:$4 sm:$0xff]   ;;  %v2486_v13 = vld [vmem:[%s3730_s1 + $0x6c] ss:$16 sps:$4 sm:$0xff]   ;;  %v2488_v14 = vld [vmem:[%s3730_s1 + $0x60] ss:$16 sps:$4 sm:$0xff]  }
   0x6   :  { %v2489_v15 = vld [vmem:[%s3730_s1 + $0x68] ss:$16 sps:$4 sm:$0xff]   ;;  %v2490_v16 = vld [vmem:[%s3730_s1 + $0x84] ss:$16 sps:$4 sm:$0xff]   ;;  %v2492_v17 = vld [vmem:[%s3730_s1 + $0x8c] ss:$16 sps:$4 sm:$0xff]  }
   0x7   :  { %831 = vmatpush1.bf16.msra.mxu0 %v2476_v6  ;;  %917 = vmatpush1.bf16.msra.mxu1 %v2477_v7  ;;  %v2494_v18 = vld [vmem:[%s3730_s1 + $0x80] ss:$16 sps:$4 sm:$0xff]   ;;  %v2495_v19 = vld [vmem:[%s3730_s1 + $0x88] ss:$16 sps:$4 sm:$0xff]   ;;  %v2496_v20 = vld [vmem:[%s3730_s1 + $0xa4] ss:$16 sps:$4 sm:$0xff]  }
   0x8   :  { %832 = vmatprep.subr.bf16.mxu0 %v2478_v8  ;;  %918 = vmatprep.subr.bf16.mxu1 %v2480_v9  ;;  %v2498_v21 = vld [vmem:[%s3730_s1 + $0xac] ss:$16 sps:$4 sm:$0xff]   ;;  %v2500_v22 = vld [vmem:[%s3730_s1 + $0xa0] ss:$16 sps:$4 sm:$0xff]   ;;  %v2501_v23 = vld [vmem:[%s3730_s1 + $0xa8] ss:$16 sps:$4 sm:$0xff]  }
   0x9   :  { %v2502_v24 = vld [vmem:[%s3730_s1 + $0xc4] ss:$16 sps:$4 sm:$0xff]   ;;  %v2504_v25 = vld [vmem:[%s3730_s1 + $0xcc] ss:$16 sps:$4 sm:$0xff]   ;;  %v2506_v26 = vld [vmem:[%s3730_s1 + $0xc0] ss:$16 sps:$4 sm:$0xff]  }
   0xa   :  { %v2507_v27 = vld [vmem:[%s3730_s1 + $0xc8] ss:$16 sps:$4 sm:$0xff]   ;;  %v2508_v28 = vld [vmem:[%s3730_s1 + $0xe4] ss:$16 sps:$4 sm:$0xff]   ;;  %v2510_v29 = vld [vmem:[%s3730_s1 + $0xec] ss:$16 sps:$4 sm:$0xff]  }
   0xb   :  { %833 = vmatpush1.bf16.msra.mxu0 %v2482_v10  ;;  %919 = vmatpush1.bf16.msra.mxu1 %v2483_v11  ;;  %v2512_v30 = vld [vmem:[%s3730_s1 + $0xe0] ss:$16 sps:$4 sm:$0xff]   ;;  %v2513_v31 = vld [vmem:[%s3730_s1 + $0xe8] ss:$16 sps:$4 sm:$0xff]   ;;  %v2514_v32 = vld [vmem:[%s3730_s1 + $0x104] ss:$16 sps:$4 sm:$0xff]  }
   0xc   :  { %834 = vmatprep.subr.bf16.mxu0 %v2484_v12  ;;  %920 = vmatprep.subr.bf16.mxu1 %v2486_v13  ;;  %v2516_v33 = vld [vmem:[%s3730_s1 + $0x10c] ss:$16 sps:$4 sm:$0xff]   ;;  %v2518_v34 = vld [vmem:[%s3730_s1 + $0x100] ss:$16 sps:$4 sm:$0xff]   ;;  %v2519_v35 = vld [vmem:[%s3730_s1 + $0x108] ss:$16 sps:$4 sm:$0xff]  }
   0xd   :  { %v2520_v36 = vld [vmem:[%s3730_s1 + $0x124] ss:$16 sps:$4 sm:$0xff]   ;;  %v2522_v37 = vld [vmem:[%s3730_s1 + $0x12c] ss:$16 sps:$4 sm:$0xff]   ;;  %v2524_v38 = vld [vmem:[%s3730_s1 + $0x120] ss:$16 sps:$4 sm:$0xff]  }
   0xe   :  { %v2525_v39 = vld [vmem:[%s3730_s1 + $0x128] ss:$16 sps:$4 sm:$0xff]   ;;  %v2526_v40 = vld [vmem:[%s3730_s1 + $0x144] ss:$16 sps:$4 sm:$0xff]   ;;  %v2528_v41 = vld [vmem:[%s3730_s1 + $0x14c] ss:$16 sps:$4 sm:$0xff]  }
   0xf   :  { %835 = vmatpush1.bf16.msra.mxu0 %v2488_v14  ;;  %921 = vmatpush1.bf16.msra.mxu1 %v2489_v15  ;;  %v2530_v42 = vld [vmem:[%s3730_s1 + $0x140] ss:$16 sps:$4 sm:$0xff]   ;;  %v2531_v43 = vld [vmem:[%s3730_s1 + $0x148] ss:$16 sps:$4 sm:$0xff]   ;;  %v2532_v44 = vld [vmem:[%s3730_s1 + $0x164] ss:$16 sps:$4 sm:$0xff]  }
  0x10   :  { %836 = vmatprep.subr.bf16.mxu0 %v2490_v16  ;;  %922 = vmatprep.subr.bf16.mxu1 %v2492_v17  ;;  %v2534_v45 = vld [vmem:[%s3730_s1 + $0x16c] ss:$16 sps:$4 sm:$0xff]   ;;  %v2536_v46 = vld [vmem:[%s3730_s1 + $0x160] ss:$16 sps:$4 sm:$0xff]   ;;  %v3020_v47 = vld [vmem:[%s3731_s0 + $0x4] ss:$16 sps:$4 sm:$0xff]  }
  0x11   :  { %v2537_v48 = vld [vmem:[%s3730_s1 + $0x168] ss:$16 sps:$4 sm:$0xff]   ;;  %v2538_v49 = vld [vmem:[%s3730_s1 + $0x184] ss:$16 sps:$4 sm:$0xff]   ;;  %v2540_v50 = vld [vmem:[%s3730_s1 + $0x18c] ss:$16 sps:$4 sm:$0xff]   ;;  %860 = vmatprep.mubr.bf16.mxu0 %v3020_v47  ;;  %946 = vmatprep.mubr.bf16.mxu1 %v3020_v47 }
  0x12   :  { %v2542_v51 = vld [vmem:[%s3730_s1 + $0x180] ss:$16 sps:$4 sm:$0xff]   ;;  %v2543_v52 = vld [vmem:[%s3730_s1 + $0x188] ss:$16 sps:$4 sm:$0xff]   ;;  %v2544_v53 = vld [vmem:[%s3730_s1 + $0x1a4] ss:$16 sps:$4 sm:$0xff]  }
  0x13   :  { %837 = vmatpush1.bf16.msra.mxu0 %v2494_v18  ;;  %923 = vmatpush1.bf16.msra.mxu1 %v2495_v19  ;;  %v2546_v54 = vld [vmem:[%s3730_s1 + $0x1ac] ss:$16 sps:$4 sm:$0xff]   ;;  %v2548_v55 = vld [vmem:[%s3730_s1 + $0x1a0] ss:$16 sps:$4 sm:$0xff]   ;;  %v2549_v56 = vld [vmem:[%s3730_s1 + $0x1a8] ss:$16 sps:$4 sm:$0xff]  }
  0x14   :  { %838 = vmatprep.subr.bf16.mxu0 %v2496_v20  ;;  %924 = vmatprep.subr.bf16.mxu1 %v2498_v21  ;;  %v2550_v57 = vld [vmem:[%s3730_s1 + $0x1c4] ss:$16 sps:$4 sm:$0xff]   ;;  %v2552_v58 = vld [vmem:[%s3730_s1 + $0x1cc] ss:$16 sps:$4 sm:$0xff]   ;;  %v2554_v59 = vld [vmem:[%s3730_s1 + $0x1c0] ss:$16 sps:$4 sm:$0xff]  }
  0x15   :  { %v2555_v60 = vld [vmem:[%s3730_s1 + $0x1c8] ss:$16 sps:$4 sm:$0xff]   ;;  %v2556_v61 = vld [vmem:[%s3730_s1 + $0x1e4] ss:$16 sps:$4 sm:$0xff]   ;;  %v2558_v62 = vld [vmem:[%s3730_s1 + $0x1ec] ss:$16 sps:$4 sm:$0xff]  }
  0x16   :  { %v2560_v63 = vld [vmem:[%s3730_s1 + $0x1e0] ss:$16 sps:$4 sm:$0xff]   ;;  %v2561_v0 = vld [vmem:[%s3730_s1 + $0x1e8] ss:$16 sps:$4 sm:$0xff]   ;;  %v2566_v1 = vld [vmem:[%s3730_s1 + $0x204] ss:$16 sps:$4 sm:$0xff]  }
  0x17   :  { %839 = vmatpush1.bf16.msra.mxu0 %v2500_v22  ;;  %925 = vmatpush1.bf16.msra.mxu1 %v2501_v23  ;;  %v2569_v2 = vld [vmem:[%s3730_s1 + $0x20c] ss:$16 sps:$4 sm:$0xff]   ;;  %v2564_v3 = vld [vmem:[%s3730_s1 + $0x200] ss:$16 sps:$4 sm:$0xff]   ;;  %v2567_v4 = vld [vmem:[%s3730_s1 + $0x208] ss:$16 sps:$4 sm:$0xff]  }
  0x18   :  { %840 = vmatprep.subr.bf16.mxu0 %v2502_v24  ;;  %926 = vmatprep.subr.bf16.mxu1 %v2504_v25  ;;  %v3090_v5 = vld [vmem:[%s3731_s0] ss:$16 sps:$4 sm:$0xff]   ;;  %v2573_v6 = vld [vmem:[%s3730_s1 + $0x224] ss:$16 sps:$4 sm:$0xff]   ;;  %v2576_v7 = vld [vmem:[%s3730_s1 + $0x22c] ss:$16 sps:$4 sm:$0xff]  }
  0x19   :  { %v2571_v8 = vld [vmem:[%s3730_s1 + $0x220] ss:$16 sps:$4 sm:$0xff]   ;;  %v2574_v9 = vld [vmem:[%s3730_s1 + $0x228] ss:$16 sps:$4 sm:$0xff]   ;;  %v2579_v10 = vld [vmem:[%s3730_s1 + $0x244] ss:$16 sps:$4 sm:$0xff]  }
  0x1a   :  { %v2582_v11 = vld [vmem:[%s3730_s1 + $0x24c] ss:$16 sps:$4 sm:$0xff]   ;;  %v2577_v12 = vld [vmem:[%s3730_s1 + $0x240] ss:$16 sps:$4 sm:$0xff]   ;;  %v2580_v13 = vld [vmem:[%s3730_s1 + $0x248] ss:$16 sps:$4 sm:$0xff]  }
  0x1b   :  { %841 = vmatpush1.bf16.msra.mxu0 %v2506_v26  ;;  %927 = vmatpush1.bf16.msra.mxu1 %v2507_v27  ;;  %v2585_v14 = vld [vmem:[%s3730_s1 + $0x264] ss:$16 sps:$4 sm:$0xff]   ;;  %v2588_v15 = vld [vmem:[%s3730_s1 + $0x26c] ss:$16 sps:$4 sm:$0xff]   ;;  %v2583_v16 = vld [vmem:[%s3730_s1 + $0x260] ss:$16 sps:$4 sm:$0xff]  }
  0x1c   :  { %842 = vmatprep.subr.bf16.mxu0 %v2508_v28  ;;  %928 = vmatprep.subr.bf16.mxu1 %v2510_v29  ;;  %v2586_v17 = vld [vmem:[%s3730_s1 + $0x268] ss:$16 sps:$4 sm:$0xff]   ;;  %v2591_v18 = vld [vmem:[%s3730_s1 + $0x284] ss:$16 sps:$4 sm:$0xff]   ;;  %v2594_v19 = vld [vmem:[%s3730_s1 + $0x28c] ss:$16 sps:$4 sm:$0xff]  }
  0x1d   :  { %v2589_v20 = vld [vmem:[%s3730_s1 + $0x280] ss:$16 sps:$4 sm:$0xff]   ;;  %v2592_v21 = vld [vmem:[%s3730_s1 + $0x288] ss:$16 sps:$4 sm:$0xff]   ;;  %v2597_v22 = vld [vmem:[%s3730_s1 + $0x2a4] ss:$16 sps:$4 sm:$0xff]  }
  0x1e   :  { %v2600_v23 = vld [vmem:[%s3730_s1 + $0x2ac] ss:$16 sps:$4 sm:$0xff]   ;;  %v2595_v24 = vld [vmem:[%s3730_s1 + $0x2a0] ss:$16 sps:$4 sm:$0xff]   ;;  %v2598_v25 = vld [vmem:[%s3730_s1 + $0x2a8] ss:$16 sps:$4 sm:$0xff]  }
  0x1f   :  { %843 = vmatpush1.bf16.msra.mxu0 %v2512_v30  ;;  %929 = vmatpush1.bf16.msra.mxu1 %v2513_v31  ;;  %v2603_v26 = vld [vmem:[%s3730_s1 + $0x2c4] ss:$16 sps:$4 sm:$0xff]   ;;  %v2606_v27 = vld [vmem:[%s3730_s1 + $0x2cc] ss:$16 sps:$4 sm:$0xff]   ;;  %v2601_v28 = vld [vmem:[%s3730_s1 + $0x2c0] ss:$16 sps:$4 sm:$0xff]  }
  0x20   :  { %844 = vmatprep.subr.bf16.mxu0 %v2514_v32  ;;  %930 = vmatprep.subr.bf16.mxu1 %v2516_v33  ;;  %v2604_v29 = vld [vmem:[%s3730_s1 + $0x2c8] ss:$16 sps:$4 sm:$0xff]   ;;  %v3169_v30 = vld [vmem:[%s3731_s0 + $0xc] ss:$16 sps:$4 sm:$0xff]   ;;  %v2609_v31 = vld [vmem:[%s3730_s1 + $0x2e4] ss:$16 sps:$4 sm:$0xff]  }
  0x21   :  { %v2612_v32 = vld [vmem:[%s3730_s1 + $0x2ec] ss:$16 sps:$4 sm:$0xff]   ;;  %v2607_v33 = vld [vmem:[%s3730_s1 + $0x2e0] ss:$16 sps:$4 sm:$0xff]  }
  0x23   :  { %845 = vmatpush1.bf16.msra.mxu0 %v2518_v34  ;;  %931 = vmatpush1.bf16.msra.mxu1 %v2519_v35  ;;  %v2610_v34 = vld [vmem:[%s3730_s1 + $0x2e8] ss:$16 sps:$4 sm:$0xff]   ;;  %v2615_v35 = vld [vmem:[%s3730_s1 + $0x304] ss:$16 sps:$4 sm:$0xff]  }
  0x24   :  { %846 = vmatprep.subr.bf16.mxu0 %v2520_v36  ;;  %932 = vmatprep.subr.bf16.mxu1 %v2522_v37  ;;  %v2618_v36 = vld [vmem:[%s3730_s1 + $0x30c] ss:$16 sps:$4 sm:$0xff]   ;;  %v2613_v37 = vld [vmem:[%s3730_s1 + $0x300] ss:$16 sps:$4 sm:$0xff]  }
  0x27   :  { %847 = vmatpush1.bf16.msra.mxu0 %v2524_v38  ;;  %933 = vmatpush1.bf16.msra.mxu1 %v2525_v39  ;;  %v2616_v38 = vld [vmem:[%s3730_s1 + $0x308] ss:$16 sps:$4 sm:$0xff]   ;;  %v2621_v39 = vld [vmem:[%s3730_s1 + $0x324] ss:$16 sps:$4 sm:$0xff]  }
  0x28   :  { %848 = vmatprep.subr.bf16.mxu0 %v2526_v40  ;;  %934 = vmatprep.subr.bf16.mxu1 %v2528_v41  ;;  %v2624_v40 = vld [vmem:[%s3730_s1 + $0x32c] ss:$16 sps:$4 sm:$0xff]   ;;  %v2619_v41 = vld [vmem:[%s3730_s1 + $0x320] ss:$16 sps:$4 sm:$0xff]  }
  0x2b   :  { %849 = vmatpush1.bf16.msra.mxu0 %v2530_v42  ;;  %935 = vmatpush1.bf16.msra.mxu1 %v2531_v43  ;;  %v2622_v42 = vld [vmem:[%s3730_s1 + $0x328] ss:$16 sps:$4 sm:$0xff]   ;;  %v2627_v43 = vld [vmem:[%s3730_s1 + $0x344] ss:$16 sps:$4 sm:$0xff]  }
  0x2c   :  { %850 = vmatprep.subr.bf16.mxu0 %v2532_v44  ;;  %936 = vmatprep.subr.bf16.mxu1 %v2534_v45  ;;  %v2630_v44 = vld [vmem:[%s3730_s1 + $0x34c] ss:$16 sps:$4 sm:$0xff]   ;;  %v2625_v45 = vld [vmem:[%s3730_s1 + $0x340] ss:$16 sps:$4 sm:$0xff]  }
  0x2f   :  { %851 = vmatpush1.bf16.msra.mxu0 %v2536_v46  ;;  %937 = vmatpush1.bf16.msra.mxu1 %v2537_v48  ;;  %v2628_v46 = vld [vmem:[%s3730_s1 + $0x348] ss:$16 sps:$4 sm:$0xff]   ;;  %v2633_v48 = vld [vmem:[%s3730_s1 + $0x364] ss:$16 sps:$4 sm:$0xff]  }
  0x30   :  { %852 = vmatprep.subr.bf16.mxu0 %v2538_v49  ;;  %938 = vmatprep.subr.bf16.mxu1 %v2540_v50  ;;  %v2636_v49 = vld [vmem:[%s3730_s1 + $0x36c] ss:$16 sps:$4 sm:$0xff]   ;;  %v2631_v50 = vld [vmem:[%s3730_s1 + $0x360] ss:$16 sps:$4 sm:$0xff]  }
  0x33   :  { %853 = vmatpush1.bf16.msra.mxu0 %v2542_v51  ;;  %939 = vmatpush1.bf16.msra.mxu1 %v2543_v52  ;;  %v2634_v51 = vld [vmem:[%s3730_s1 + $0x368] ss:$16 sps:$4 sm:$0xff]   ;;  %v2639_v52 = vld [vmem:[%s3730_s1 + $0x384] ss:$16 sps:$4 sm:$0xff]  }
  0x34   :  { %854 = vmatprep.subr.bf16.mxu0 %v2544_v53  ;;  %940 = vmatprep.subr.bf16.mxu1 %v2546_v54  ;;  %v2642_v53 = vld [vmem:[%s3730_s1 + $0x38c] ss:$16 sps:$4 sm:$0xff]   ;;  %v2637_v54 = vld [vmem:[%s3730_s1 + $0x380] ss:$16 sps:$4 sm:$0xff]  }
  0x37   :  { %855 = vmatpush1.bf16.msra.mxu0 %v2548_v55  ;;  %941 = vmatpush1.bf16.msra.mxu1 %v2549_v56  ;;  %v2640_v55 = vld [vmem:[%s3730_s1 + $0x388] ss:$16 sps:$4 sm:$0xff]   ;;  %v2645_v56 = vld [vmem:[%s3730_s1 + $0x3a4] ss:$16 sps:$4 sm:$0xff]  }
  0x38   :  { %856 = vmatprep.subr.bf16.mxu0 %v2550_v57  ;;  %942 = vmatprep.subr.bf16.mxu1 %v2552_v58  ;;  %v2648_v57 = vld [vmem:[%s3730_s1 + $0x3ac] ss:$16 sps:$4 sm:$0xff]   ;;  %v2643_v58 = vld [vmem:[%s3730_s1 + $0x3a0] ss:$16 sps:$4 sm:$0xff]  }
  0x3b   :  { %857 = vmatpush1.bf16.msra.mxu0 %v2554_v59  ;;  %943 = vmatpush1.bf16.msra.mxu1 %v2555_v60  ;;  %v2646_v59 = vld [vmem:[%s3730_s1 + $0x3a8] ss:$16 sps:$4 sm:$0xff]   ;;  %v2651_v60 = vld [vmem:[%s3730_s1 + $0x3c4] ss:$16 sps:$4 sm:$0xff]  }
  0x3c   :  { %858 = vmatprep.subr.bf16.mxu0 %v2556_v61  ;;  %944 = vmatprep.subr.bf16.mxu1 %v2558_v62  ;;  %v2654_v61 = vld [vmem:[%s3730_s1 + $0x3cc] ss:$16 sps:$4 sm:$0xff]   ;;  %v2649_v62 = vld [vmem:[%s3730_s1 + $0x3c0] ss:$16 sps:$4 sm:$0xff]  }
  0x3f   :  { %859 = vmatpush1.bf16.msra.mxu0 %v2560_v63  ;;  %945 = vmatpush1.bf16.msra.mxu1 %v2561_v0  ;;  %v2652_v63 = vld [vmem:[%s3730_s1 + $0x3c8] ss:$16 sps:$4 sm:$0xff]   ;;  %v2657_v0 = vld [vmem:[%s3730_s1 + $0x3e4] ss:$16 sps:$4 sm:$0xff]  }
  0x40   :  { %871 = vmatprep.subr.bf16.mxu0 %v2566_v1  ;;  %957 = vmatprep.subr.bf16.mxu1 %v2569_v2  ;;  %v2660_v1 = vld [vmem:[%s3730_s1 + $0x3ec] ss:$16 sps:$4 sm:$0xff]   ;;  %v2655_v2 = vld [vmem:[%s3730_s1 + $0x3e0] ss:$16 sps:$4 sm:$0xff]  }
  0x42   :  { %861 = vmatmul.mubr.bf16.vlgmr.msra.gmra.mrb[0].mxu0 %v3090_v5  ;;  %947 = vmatmul.mubr.bf16.vlgmr.msra.gmra.mrb[0].mxu1 %v3090_v5 }
  0x43   :  { %872 = vmatpush1.bf16.msra.mxu0 %v2564_v3  ;;  %958 = vmatpush1.bf16.msra.mxu1 %v2567_v4  ;;  %v2658_v3 = vld [vmem:[%s3730_s1 + $0x3e8] ss:$16 sps:$4 sm:$0xff]   ;;  %v2666_v4 = vld [vmem:[%s3730_s1 + $0x404] ss:$16 sps:$4 sm:$0xff]  }
  0x44   :  { %873 = vmatprep.subr.bf16.mxu0 %v2573_v6  ;;  %959 = vmatprep.subr.bf16.mxu1 %v2576_v7  ;;  %v2669_v6 = vld [vmem:[%s3730_s1 + $0x40c] ss:$16 sps:$4 sm:$0xff]   ;;  %v3290_v7 = vld [vmem:[%s3731_s0 + $0x8] ss:$16 sps:$4 sm:$0xff]  }
  0x45   :  { %903 = vmatprep.mubr.bf16.mxu0 %v3169_v30  ;;  %989 = vmatprep.mubr.bf16.mxu1 %v3169_v30 }
  0x47   :  { %874 = vmatpush1.bf16.msra.mxu0 %v2571_v8  ;;  %960 = vmatpush1.bf16.msra.mxu1 %v2574_v9  ;;  %v2664_v8 = vld [vmem:[%s3730_s1 + $0x400] ss:$16 sps:$4 sm:$0xff]   ;;  %v2667_v9 = vld [vmem:[%s3730_s1 + $0x408] ss:$16 sps:$4 sm:$0xff]  }
  0x48   :  { %875 = vmatprep.subr.bf16.mxu0 %v2579_v10  ;;  %961 = vmatprep.subr.bf16.mxu1 %v2582_v11  ;;  %v2672_v10 = vld [vmem:[%s3730_s1 + $0x424] ss:$16 sps:$4 sm:$0xff]   ;;  %v2675_v11 = vld [vmem:[%s3730_s1 + $0x42c] ss:$16 sps:$4 sm:$0xff]  }
  0x4b   :  { %876 = vmatpush1.bf16.msra.mxu0 %v2577_v12  ;;  %962 = vmatpush1.bf16.msra.mxu1 %v2580_v13  ;;  %v2670_v12 = vld [vmem:[%s3730_s1 + $0x420] ss:$16 sps:$4 sm:$0xff]   ;;  %v2673_v13 = vld [vmem:[%s3730_s1 + $0x428] ss:$16 sps:$4 sm:$0xff]  }
  0x4c   :  { %877 = vmatprep.subr.bf16.mxu0 %v2585_v14  ;;  %963 = vmatprep.subr.bf16.mxu1 %v2588_v15  ;;  %v2678_v14 = vld [vmem:[%s3730_s1 + $0x444] ss:$16 sps:$4 sm:$0xff]   ;;  %v2681_v15 = vld [vmem:[%s3730_s1 + $0x44c] ss:$16 sps:$4 sm:$0xff]  }
  0x4f   :  { %878 = vmatpush1.bf16.msra.mxu0 %v2583_v16  ;;  %964 = vmatpush1.bf16.msra.mxu1 %v2586_v17  ;;  %v2676_v16 = vld [vmem:[%s3730_s1 + $0x440] ss:$16 sps:$4 sm:$0xff]   ;;  %v2679_v17 = vld [vmem:[%s3730_s1 + $0x448] ss:$16 sps:$4 sm:$0xff]  }
  0x50   :  { %879 = vmatprep.subr.bf16.mxu0 %v2591_v18  ;;  %965 = vmatprep.subr.bf16.mxu1 %v2594_v19  ;;  %v2684_v18 = vld [vmem:[%s3730_s1 + $0x464] ss:$16 sps:$4 sm:$0xff]   ;;  %v2682_v19 = vld [vmem:[%s3730_s1 + $0x460] ss:$16 sps:$4 sm:$0xff]  }
  0x53   :  { %880 = vmatpush1.bf16.msra.mxu0 %v2589_v20  ;;  %966 = vmatpush1.bf16.msra.mxu1 %v2592_v21  ;;  %v2685_v20 = vld [vmem:[%s3730_s1 + $0x468] ss:$16 sps:$4 sm:$0xff]   ;;  %v2690_v21 = vld [vmem:[%s3730_s1 + $0x484] ss:$16 sps:$4 sm:$0xff]  }
  0x54   :  { %881 = vmatprep.subr.bf16.mxu0 %v2597_v22  ;;  %967 = vmatprep.subr.bf16.mxu1 %v2600_v23  ;;  %v2693_v22 = vld [vmem:[%s3730_s1 + $0x48c] ss:$16 sps:$4 sm:$0xff]   ;;  %v2688_v23 = vld [vmem:[%s3730_s1 + $0x480] ss:$16 sps:$4 sm:$0xff]  }
  0x57   :  { %882 = vmatpush1.bf16.msra.mxu0 %v2595_v24  ;;  %968 = vmatpush1.bf16.msra.mxu1 %v2598_v25  ;;  %v2691_v24 = vld [vmem:[%s3730_s1 + $0x488] ss:$16 sps:$4 sm:$0xff]   ;;  %v2696_v25 = vld [vmem:[%s3730_s1 + $0x4a4] ss:$16 sps:$4 sm:$0xff]  }
  0x58   :  { %883 = vmatprep.subr.bf16.mxu0 %v2603_v26  ;;  %969 = vmatprep.subr.bf16.mxu1 %v2606_v27  ;;  %v2699_v26 = vld [vmem:[%s3730_s1 + $0x4ac] ss:$16 sps:$4 sm:$0xff]   ;;  %v2694_v27 = vld [vmem:[%s3730_s1 + $0x4a0] ss:$16 sps:$4 sm:$0xff]  }
  0x5b   :  { %884 = vmatpush1.bf16.msra.mxu0 %v2601_v28  ;;  %970 = vmatpush1.bf16.msra.mxu1 %v2604_v29  ;;  %v2697_v28 = vld [vmem:[%s3730_s1 + $0x4a8] ss:$16 sps:$4 sm:$0xff]   ;;  %v2702_v29 = vld [vmem:[%s3730_s1 + $0x4c4] ss:$16 sps:$4 sm:$0xff]  }
  0x5c   :  { %885 = vmatprep.subr.bf16.mxu0 %v2609_v31  ;;  %971 = vmatprep.subr.bf16.mxu1 %v2612_v32  ;;  %v2705_v31 = vld [vmem:[%s3730_s1 + $0x4cc] ss:$16 sps:$4 sm:$0xff]   ;;  %v2700_v32 = vld [vmem:[%s3730_s1 + $0x4c0] ss:$16 sps:$4 sm:$0xff]  }
  0x5f   :  { %886 = vmatpush1.bf16.msra.mxu0 %v2607_v33  ;;  %972 = vmatpush1.bf16.msra.mxu1 %v2610_v34  ;;  %v2703_v33 = vld [vmem:[%s3730_s1 + $0x4c8] ss:$16 sps:$4 sm:$0xff]   ;;  %v2708_v34 = vld [vmem:[%s3730_s1 + $0x4e4] ss:$16 sps:$4 sm:$0xff]  }
  0x60   :  { %887 = vmatprep.subr.bf16.mxu0 %v2615_v35  ;;  %973 = vmatprep.subr.bf16.mxu1 %v2618_v36  ;;  %v2711_v35 = vld [vmem:[%s3730_s1 + $0x4ec] ss:$16 sps:$4 sm:$0xff]   ;;  %v2706_v36 = vld [vmem:[%s3730_s1 + $0x4e0] ss:$16 sps:$4 sm:$0xff]  }
  0x63   :  { %888 = vmatpush1.bf16.msra.mxu0 %v2613_v37  ;;  %974 = vmatpush1.bf16.msra.mxu1 %v2616_v38  ;;  %v2709_v37 = vld [vmem:[%s3730_s1 + $0x4e8] ss:$16 sps:$4 sm:$0xff]   ;;  %v2714_v38 = vld [vmem:[%s3730_s1 + $0x504] ss:$16 sps:$4 sm:$0xff]  }
  0x64   :  { %889 = vmatprep.subr.bf16.mxu0 %v2621_v39  ;;  %975 = vmatprep.subr.bf16.mxu1 %v2624_v40  ;;  %v2717_v39 = vld [vmem:[%s3730_s1 + $0x50c] ss:$16 sps:$4 sm:$0xff]   ;;  %v2712_v40 = vld [vmem:[%s3730_s1 + $0x500] ss:$16 sps:$4 sm:$0xff]  }
  0x67   :  { %890 = vmatpush1.bf16.msra.mxu0 %v2619_v41  ;;  %976 = vmatpush1.bf16.msra.mxu1 %v2622_v42  ;;  %v2715_v41 = vld [vmem:[%s3730_s1 + $0x508] ss:$16 sps:$4 sm:$0xff]   ;;  %v2720_v42 = vld [vmem:[%s3730_s1 + $0x524] ss:$16 sps:$4 sm:$0xff]  }
  0x68   :  { %891 = vmatprep.subr.bf16.mxu0 %v2627_v43  ;;  %977 = vmatprep.subr.bf16.mxu1 %v2630_v44  ;;  %v2723_v43 = vld [vmem:[%s3730_s1 + $0x52c] ss:$16 sps:$4 sm:$0xff]   ;;  %v2718_v44 = vld [vmem:[%s3730_s1 + $0x520] ss:$16 sps:$4 sm:$0xff]  }
  0x6b   :  { %892 = vmatpush1.bf16.msra.mxu0 %v2625_v45  ;;  %978 = vmatpush1.bf16.msra.mxu1 %v2628_v46  ;;  %v2721_v45 = vld [vmem:[%s3730_s1 + $0x528] ss:$16 sps:$4 sm:$0xff]   ;;  %v2726_v46 = vld [vmem:[%s3730_s1 + $0x544] ss:$16 sps:$4 sm:$0xff]  }
  0x6c   :  { %893 = vmatprep.subr.bf16.mxu0 %v2633_v48  ;;  %979 = vmatprep.subr.bf16.mxu1 %v2636_v49  ;;  %v2729_v48 = vld [vmem:[%s3730_s1 + $0x54c] ss:$16 sps:$4 sm:$0xff]   ;;  %v2724_v49 = vld [vmem:[%s3730_s1 + $0x540] ss:$16 sps:$4 sm:$0xff]  }
  0x6f   :  { %894 = vmatpush1.bf16.msra.mxu0 %v2631_v50  ;;  %980 = vmatpush1.bf16.msra.mxu1 %v2634_v51  ;;  %v2727_v50 = vld [vmem:[%s3730_s1 + $0x548] ss:$16 sps:$4 sm:$0xff]   ;;  %v2732_v51 = vld [vmem:[%s3730_s1 + $0x564] ss:$16 sps:$4 sm:$0xff]  }
  0x70   :  { %895 = vmatprep.subr.bf16.mxu0 %v2639_v52  ;;  %981 = vmatprep.subr.bf16.mxu1 %v2642_v53  ;;  %v2735_v52 = vld [vmem:[%s3730_s1 + $0x56c] ss:$16 sps:$4 sm:$0xff]   ;;  %v2730_v53 = vld [vmem:[%s3730_s1 + $0x560] ss:$16 sps:$4 sm:$0xff]  }
  0x73   :  { %896 = vmatpush1.bf16.msra.mxu0 %v2637_v54  ;;  %982 = vmatpush1.bf16.msra.mxu1 %v2640_v55  ;;  %v2733_v54 = vld [vmem:[%s3730_s1 + $0x568] ss:$16 sps:$4 sm:$0xff]   ;;  %v2738_v55 = vld [vmem:[%s3730_s1 + $0x584] ss:$16 sps:$4 sm:$0xff]  }
  0x74   :  { %897 = vmatprep.subr.bf16.mxu0 %v2645_v56  ;;  %983 = vmatprep.subr.bf16.mxu1 %v2648_v57  ;;  %v2741_v56 = vld [vmem:[%s3730_s1 + $0x58c] ss:$16 sps:$4 sm:$0xff]   ;;  %v2736_v57 = vld [vmem:[%s3730_s1 + $0x580] ss:$16 sps:$4 sm:$0xff]  }
  0x77   :  { %898 = vmatpush1.bf16.msra.mxu0 %v2643_v58  ;;  %984 = vmatpush1.bf16.msra.mxu1 %v2646_v59  ;;  %v2739_v58 = vld [vmem:[%s3730_s1 + $0x588] ss:$16 sps:$4 sm:$0xff]   ;;  %v2744_v59 = vld [vmem:[%s3730_s1 + $0x5a4] ss:$16 sps:$4 sm:$0xff]  }
  0x78   :  { %899 = vmatprep.subr.bf16.mxu0 %v2651_v60  ;;  %985 = vmatprep.subr.bf16.mxu1 %v2654_v61  ;;  %v2747_v60 = vld [vmem:[%s3730_s1 + $0x5ac] ss:$16 sps:$4 sm:$0xff]   ;;  %v2742_v61 = vld [vmem:[%s3730_s1 + $0x5a0] ss:$16 sps:$4 sm:$0xff]  }
  0x7b   :  { %900 = vmatpush1.bf16.msra.mxu0 %v2649_v62  ;;  %986 = vmatpush1.bf16.msra.mxu1 %v2652_v63  ;;  %v2745_v62 = vld [vmem:[%s3730_s1 + $0x5a8] ss:$16 sps:$4 sm:$0xff]   ;;  %v2750_v63 = vld [vmem:[%s3730_s1 + $0x5c4] ss:$16 sps:$4 sm:$0xff]  }
  0x7c   :  { %901 = vmatprep.subr.bf16.mxu0 %v2657_v0  ;;  %987 = vmatprep.subr.bf16.mxu1 %v2660_v1  ;;  %v2753_v0 = vld [vmem:[%s3730_s1 + $0x5cc] ss:$16 sps:$4 sm:$0xff]   ;;  %v2748_v1 = vld [vmem:[%s3730_s1 + $0x5c0] ss:$16 sps:$4 sm:$0xff]  }
  0x7f   :  { %902 = vmatpush1.bf16.msra.mxu0 %v2655_v2  ;;  %988 = vmatpush1.bf16.msra.mxu1 %v2658_v3  ;;  %v2751_v2 = vld [vmem:[%s3730_s1 + $0x5c8] ss:$16 sps:$4 sm:$0xff]   ;;  %v2756_v3 = vld [vmem:[%s3730_s1 + $0x5e4] ss:$16 sps:$4 sm:$0xff]  }
  0x80   :  { %1820 = vmatprep.subr.bf16.mxu0 %v2666_v4  ;;  %1906 = vmatprep.subr.bf16.mxu1 %v2669_v6  ;;  %v2759_v4 = vld [vmem:[%s3730_s1 + $0x5ec] ss:$16 sps:$4 sm:$0xff]   ;;  %v2754_v6 = vld [vmem:[%s3730_s1 + $0x5e0] ss:$16 sps:$4 sm:$0xff]  }
  0x82   :  { %904 = vmatmul.mubr.bf16.vlgmr.msra.gmra.mrb[0].mxu0 %v3290_v7  ;;  %990 = vmatmul.mubr.bf16.vlgmr.msra.gmra.mrb[0].mxu1 %v3290_v7 }
  0x83   :  { %1821 = vmatpush1.bf16.msra.mxu0 %v2664_v8  ;;  %1907 = vmatpush1.bf16.msra.mxu1 %v2667_v9  ;;  %v2757_v8 = vld [vmem:[%s3730_s1 + $0x5e8] ss:$16 sps:$4 sm:$0xff]   ;;  %v2762_v9 = vld [vmem:[%s3730_s1 + $0x604] ss:$16 sps:$4 sm:$0xff]  }
  0x84   :  { %1822 = vmatprep.subr.bf16.mxu0 %v2672_v10  ;;  %1908 = vmatprep.subr.bf16.mxu1 %v2675_v11  ;;  %v2765_v10 = vld [vmem:[%s3730_s1 + $0x60c] ss:$16 sps:$4 sm:$0xff]   ;;  %v2760_v11 = vld [vmem:[%s3730_s1 + $0x600] ss:$16 sps:$4 sm:$0xff]  }
  0x85   :  { %1852 = vmatprep.mubr.bf16.mxu0 %v3020_v47  ;;  %1938 = vmatprep.mubr.bf16.mxu1 %v3020_v47  ;;  %v2687_v47 = vld [vmem:[%s3730_s1 + $0x46c] ss:$16 sps:$4 sm:$0xff]  }
  0x87   :  { %1823 = vmatpush1.bf16.msra.mxu0 %v2670_v12  ;;  %1909 = vmatpush1.bf16.msra.mxu1 %v2673_v13  ;;  %v2763_v12 = vld [vmem:[%s3730_s1 + $0x608] ss:$16 sps:$4 sm:$0xff]   ;;  %v2768_v13 = vld [vmem:[%s3730_s1 + $0x624] ss:$16 sps:$4 sm:$0xff]  }
  0x88   :  { %1824 = vmatprep.subr.bf16.mxu0 %v2678_v14  ;;  %1910 = vmatprep.subr.bf16.mxu1 %v2681_v15  ;;  %v2771_v14 = vld [vmem:[%s3730_s1 + $0x62c] ss:$16 sps:$4 sm:$0xff]   ;;  %v2766_v15 = vld [vmem:[%s3730_s1 + $0x620] ss:$16 sps:$4 sm:$0xff]  }
  0x8b   :  { %1825 = vmatpush1.bf16.msra.mxu0 %v2676_v16  ;;  %1911 = vmatpush1.bf16.msra.mxu1 %v2679_v17  ;;  %v2769_v16 = vld [vmem:[%s3730_s1 + $0x628] ss:$16 sps:$4 sm:$0xff]   ;;  %v2774_v17 = vld [vmem:[%s3730_s1 + $0x644] ss:$16 sps:$4 sm:$0xff]  }
  0x8c   :  { %1826 = vmatprep.subr.bf16.mxu0 %v2684_v18  ;;  %1912 = vmatprep.subr.bf16.mxu1 %v2687_v47  ;;  %v2772_v18 = vld [vmem:[%s3730_s1 + $0x640] ss:$16 sps:$4 sm:$0xff]   ;;  %v2775_v47 = vld [vmem:[%s3730_s1 + $0x648] ss:$16 sps:$4 sm:$0xff]  }
  0x8f   :  { %1827 = vmatpush1.bf16.msra.mxu0 %v2682_v19  ;;  %1913 = vmatpush1.bf16.msra.mxu1 %v2685_v20  ;;  %v2780_v19 = vld [vmem:[%s3730_s1 + $0x664] ss:$16 sps:$4 sm:$0xff]   ;;  %v2778_v20 = vld [vmem:[%s3730_s1 + $0x660] ss:$16 sps:$4 sm:$0xff]  }
  0x90   :  { %1828 = vmatprep.subr.bf16.mxu0 %v2690_v21  ;;  %1914 = vmatprep.subr.bf16.mxu1 %v2693_v22  ;;  %v2781_v21 = vld [vmem:[%s3730_s1 + $0x668] ss:$16 sps:$4 sm:$0xff]   ;;  %v2786_v22 = vld [vmem:[%s3730_s1 + $0x684] ss:$16 sps:$4 sm:$0xff]  }
  0x93   :  { %1829 = vmatpush1.bf16.msra.mxu0 %v2688_v23  ;;  %1915 = vmatpush1.bf16.msra.mxu1 %v2691_v24  ;;  %v2789_v23 = vld [vmem:[%s3730_s1 + $0x68c] ss:$16 sps:$4 sm:$0xff]   ;;  %v2784_v24 = vld [vmem:[%s3730_s1 + $0x680] ss:$16 sps:$4 sm:$0xff]  }
  0x94   :  { %1830 = vmatprep.subr.bf16.mxu0 %v2696_v25  ;;  %1916 = vmatprep.subr.bf16.mxu1 %v2699_v26  ;;  %v2787_v25 = vld [vmem:[%s3730_s1 + $0x688] ss:$16 sps:$4 sm:$0xff]   ;;  %v2792_v26 = vld [vmem:[%s3730_s1 + $0x6a4] ss:$16 sps:$4 sm:$0xff]  }
  0x97   :  { %1831 = vmatpush1.bf16.msra.mxu0 %v2694_v27  ;;  %1917 = vmatpush1.bf16.msra.mxu1 %v2697_v28  ;;  %v2795_v27 = vld [vmem:[%s3730_s1 + $0x6ac] ss:$16 sps:$4 sm:$0xff]   ;;  %v2790_v28 = vld [vmem:[%s3730_s1 + $0x6a0] ss:$16 sps:$4 sm:$0xff]  }
  0x98   :  { %1832 = vmatprep.subr.bf16.mxu0 %v2702_v29  ;;  %1918 = vmatprep.subr.bf16.mxu1 %v2705_v31  ;;  %v2793_v29 = vld [vmem:[%s3730_s1 + $0x6a8] ss:$16 sps:$4 sm:$0xff]   ;;  %v2798_v31 = vld [vmem:[%s3730_s1 + $0x6c4] ss:$16 sps:$4 sm:$0xff]  }
  0x9b   :  { %1833 = vmatpush1.bf16.msra.mxu0 %v2700_v32  ;;  %1919 = vmatpush1.bf16.msra.mxu1 %v2703_v33  ;;  %v2801_v32 = vld [vmem:[%s3730_s1 + $0x6cc] ss:$16 sps:$4 sm:$0xff]   ;;  %v148_v33 = vlaneseq }
  0x9c   :  { %1834 = vmatprep.subr.bf16.mxu0 %v2708_v34  ;;  %1920 = vmatprep.subr.bf16.mxu1 %v2711_v35  ;;  %v2796_v34 = vld [vmem:[%s3730_s1 + $0x6c0] ss:$16 sps:$4 sm:$0xff]   ;;  %v2799_v35 = vld [vmem:[%s3730_s1 + $0x6c8] ss:$16 sps:$4 sm:$0xff]  }
  0x9f   :  { %1835 = vmatpush1.bf16.msra.mxu0 %v2706_v36  ;;  %1921 = vmatpush1.bf16.msra.mxu1 %v2709_v37  ;;  %v2804_v36 = vld [vmem:[%s3730_s1 + $0x6e4] ss:$16 sps:$4 sm:$0xff]   ;;  %v2807_v37 = vld [vmem:[%s3730_s1 + $0x6ec] ss:$16 sps:$4 sm:$0xff]  }
  0xa0   :  { %1836 = vmatprep.subr.bf16.mxu0 %v2714_v38  ;;  %1922 = vmatprep.subr.bf16.mxu1 %v2717_v39  ;;  %v3576_v38 = vshrl.u32 %v148_v33, 7  ;;  %v2802_v39 = vld [vmem:[%s3730_s1 + $0x6e0] ss:$16 sps:$4 sm:$0xff]  }
  0xa3   :  { %1837 = vmatpush1.bf16.msra.mxu0 %v2712_v40  ;;  %1923 = vmatpush1.bf16.msra.mxu1 %v2715_v41  ;;  %v2805_v40 = vld [vmem:[%s3730_s1 + $0x6e8] ss:$16 sps:$4 sm:$0xff]   ;;  %v2810_v41 = vld [vmem:[%s3730_s1 + $0x704] ss:$16 sps:$4 sm:$0xff]  }
  0xa4   :  { %1838 = vmatprep.subr.bf16.mxu0 %v2720_v42  ;;  %1924 = vmatprep.subr.bf16.mxu1 %v2723_v43  ;;  %v2813_v42 = vld [vmem:[%s3730_s1 + $0x70c] ss:$16 sps:$4 sm:$0xff]   ;;  %v150_v43 = vsub.s32 0, %v3576_v38 }
  0xa7   :  { %1839 = vmatpush1.bf16.msra.mxu0 %v2718_v44  ;;  %1925 = vmatpush1.bf16.msra.mxu1 %v2721_v45  ;;  %v3594_v44 = vld [vmem:[%s3732_s2 + $0x4] sm:$0xf] }
  0xa8   :  { %1840 = vmatprep.subr.bf16.mxu0 %v2726_v46  ;;  %1926 = vmatprep.subr.bf16.mxu1 %v2729_v48  ;;  %v3599_v45 = vrot.slane %v3594_v44, %v150_v43  ;;  %v2808_v46 = vld [vmem:[%s3730_s1 + $0x700] ss:$16 sps:$4 sm:$0xff]   ;;  %v2811_v48 = vld [vmem:[%s3730_s1 + $0x708] ss:$16 sps:$4 sm:$0xff]  }
  0xab   :  { %1841 = vmatpush1.bf16.msra.mxu0 %v2724_v49  ;;  %1927 = vmatpush1.bf16.msra.mxu1 %v2727_v50  ;;  %v2816_v49 = vld [vmem:[%s3730_s1 + $0x724] ss:$16 sps:$4 sm:$0xff]   ;;  %v2819_v50 = vld [vmem:[%s3730_s1 + $0x72c] ss:$16 sps:$4 sm:$0xff]  }
  0xac   :  { %1842 = vmatprep.subr.bf16.mxu0 %v2732_v51  ;;  %1928 = vmatprep.subr.bf16.mxu1 %v2735_v52  ;;  %v2814_v51 = vld [vmem:[%s3730_s1 + $0x720] ss:$16 sps:$4 sm:$0xff]   ;;  %v2817_v52 = vld [vmem:[%s3730_s1 + $0x728] ss:$16 sps:$4 sm:$0xff]  }
  0xaf   :  { %1843 = vmatpush1.bf16.msra.mxu0 %v2730_v53  ;;  %1929 = vmatpush1.bf16.msra.mxu1 %v2733_v54  ;;  %v2822_v53 = vld [vmem:[%s3730_s1 + $0x744] ss:$16 sps:$4 sm:$0xff]   ;;  %v2825_v54 = vld [vmem:[%s3730_s1 + $0x74c] ss:$16 sps:$4 sm:$0xff]  }
  0xb0   :  { %1844 = vmatprep.subr.bf16.mxu0 %v2738_v55  ;;  %1930 = vmatprep.subr.bf16.mxu1 %v2741_v56  ;;  %v2820_v55 = vld [vmem:[%s3730_s1 + $0x740] ss:$16 sps:$4 sm:$0xff]   ;;  %v2823_v56 = vld [vmem:[%s3730_s1 + $0x748] ss:$16 sps:$4 sm:$0xff]  }
  0xb3   :  { %1845 = vmatpush1.bf16.msra.mxu0 %v2736_v57  ;;  %1931 = vmatpush1.bf16.msra.mxu1 %v2739_v58  ;;  %v2828_v57 = vld [vmem:[%s3730_s1 + $0x764] ss:$16 sps:$4 sm:$0xff]   ;;  %v2831_v58 = vld [vmem:[%s3730_s1 + $0x76c] ss:$16 sps:$4 sm:$0xff]  }
  0xb4   :  { %1846 = vmatprep.subr.bf16.mxu0 %v2744_v59  ;;  %1932 = vmatprep.subr.bf16.mxu1 %v2747_v60  ;;  %v2826_v59 = vld [vmem:[%s3730_s1 + $0x760] ss:$16 sps:$4 sm:$0xff]   ;;  %v2829_v60 = vld [vmem:[%s3730_s1 + $0x768] ss:$16 sps:$4 sm:$0xff]  }
  0xb7   :  { %1847 = vmatpush1.bf16.msra.mxu0 %v2742_v61  ;;  %1933 = vmatpush1.bf16.msra.mxu1 %v2745_v62  ;;  %v2834_v61 = vld [vmem:[%s3730_s1 + $0x784] ss:$16 sps:$4 sm:$0xff]   ;;  %v2837_v62 = vld [vmem:[%s3730_s1 + $0x78c] ss:$16 sps:$4 sm:$0xff]  }
  0xb8   :  { %1848 = vmatprep.subr.bf16.mxu0 %v2750_v63  ;;  %1934 = vmatprep.subr.bf16.mxu1 %v2753_v0  ;;  %v2832_v63 = vld [vmem:[%s3730_s1 + $0x780] ss:$16 sps:$4 sm:$0xff]   ;;  %v2835_v0 = vld [vmem:[%s3730_s1 + $0x788] ss:$16 sps:$4 sm:$0xff]  }
  0xbb   :  { %1849 = vmatpush1.bf16.msra.mxu0 %v2748_v1  ;;  %1935 = vmatpush1.bf16.msra.mxu1 %v2751_v2  ;;  %v2840_v1 = vld [vmem:[%s3730_s1 + $0x7a4] ss:$16 sps:$4 sm:$0xff]   ;;  %v2843_v2 = vld [vmem:[%s3730_s1 + $0x7ac] ss:$16 sps:$4 sm:$0xff]  }
  0xbc   :  { %1850 = vmatprep.subr.bf16.mxu0 %v2756_v3  ;;  %1936 = vmatprep.subr.bf16.mxu1 %v2759_v4  ;;  %v2838_v3 = vld [vmem:[%s3730_s1 + $0x7a0] ss:$16 sps:$4 sm:$0xff]   ;;  %v2841_v4 = vld [vmem:[%s3730_s1 + $0x7a8] ss:$16 sps:$4 sm:$0xff]  }
  0xbf   :  { %1851 = vmatpush1.bf16.msra.mxu0 %v2754_v6  ;;  %1937 = vmatpush1.bf16.msra.mxu1 %v2757_v8  ;;  %v2846_v6 = vld [vmem:[%s3730_s1 + $0x7c4] ss:$16 sps:$4 sm:$0xff]   ;;  %v2849_v8 = vld [vmem:[%s3730_s1 + $0x7cc] ss:$16 sps:$4 sm:$0xff]  }
  0xc0   :  { %1863 = vmatprep.subr.bf16.mxu0 %v2762_v9  ;;  %1949 = vmatprep.subr.bf16.mxu1 %v2765_v10  ;;  %v2844_v9 = vld [vmem:[%s3730_s1 + $0x7c0] ss:$16 sps:$4 sm:$0xff]   ;;  %v2847_v10 = vld [vmem:[%s3730_s1 + $0x7c8] ss:$16 sps:$4 sm:$0xff]  }
  0xc2   :  { %1853 = vmatmul.mubr.bf16.vlgmr.msra.gmra.mrb[4].mxu0 %v3090_v5  ;;  %1939 = vmatmul.mubr.bf16.vlgmr.msra.gmra.mrb[4].mxu1 %v3090_v5  ;;  %v2777_v5 = vld [vmem:[%s3730_s1 + $0x64c] ss:$16 sps:$4 sm:$0xff]  }
  0xc3   :  { %1864 = vmatpush1.bf16.msra.mxu0 %v2760_v11  ;;  %1950 = vmatpush1.bf16.msra.mxu1 %v2763_v12  ;;  %v2852_v11 = vld [vmem:[%s3730_s1 + $0x7e4] ss:$16 sps:$4 sm:$0xff]   ;;  %v2855_v12 = vld [vmem:[%s3730_s1 + $0x7ec] ss:$16 sps:$4 sm:$0xff]  }
  0xc4   :  { %1865 = vmatprep.subr.bf16.mxu0 %v2768_v13  ;;  %1951 = vmatprep.subr.bf16.mxu1 %v2771_v14  ;;  %v2850_v13 = vld [vmem:[%s3730_s1 + $0x7e0] ss:$16 sps:$4 sm:$0xff]   ;;  %v2853_v14 = vld [vmem:[%s3730_s1 + $0x7e8] ss:$16 sps:$4 sm:$0xff]  }
  0xc5   :  { %1895 = vmatprep.mubr.bf16.mxu0 %v3169_v30  ;;  %1981 = vmatprep.mubr.bf16.mxu1 %v3169_v30  ;;  %v2783_v30 = vld [vmem:[%s3730_s1 + $0x66c] ss:$16 sps:$4 sm:$0xff]  }
  0xc7   :  { %1866 = vmatpush1.bf16.msra.mxu0 %v2766_v15  ;;  %1952 = vmatpush1.bf16.msra.mxu1 %v2769_v16  ;;  %v158_v15 = vsub.s32 2, %v3576_v38  ;;  %v146_v16 = vld [vmem:[%s3732_s2] sm:$0xf] }
  0xc8   :  { %1867 = vmatprep.subr.bf16.mxu0 %v2774_v17  ;;  %1953 = vmatprep.subr.bf16.mxu1 %v2777_v5  ;;  %v154_v17 = vsub.s32 1, %v3576_v38  ;;  %v162_v5 = vsub.s32 3, %v3576_v38 }
  0xcb   :  { %1868 = vmatpush1.bf16.msra.mxu0 %v2772_v18  ;;  %1954 = vmatpush1.bf16.msra.mxu1 %v2775_v47  ;;  %v151_v18 = vrot.slane %v146_v16, %v150_v43  ;;  %v159_v47 = vrot.slane %v146_v16, %v158_v15 }
  0xcc   :  { %1869 = vmatprep.subr.bf16.mxu0 %v2780_v19  ;;  %1955 = vmatprep.subr.bf16.mxu1 %v2783_v30  ;;  %v155_v19 = vrot.slane %v146_v16, %v154_v17  ;;  %v163_v30 = vrot.slane %v146_v16, %v162_v5 }
  0xcf   :  { %1870 = vmatpush1.bf16.msra.mxu0 %v2778_v20  ;;  %1956 = vmatpush1.bf16.msra.mxu1 %v2781_v21 }
  0xd0   :  { %1871 = vmatprep.subr.bf16.mxu0 %v2786_v22  ;;  %1957 = vmatprep.subr.bf16.mxu1 %v2789_v23 }
  0xd3   :  { %1872 = vmatpush1.bf16.msra.mxu0 %v2784_v24  ;;  %1958 = vmatpush1.bf16.msra.mxu1 %v2787_v25 }
  0xd4   :  { %1873 = vmatprep.subr.bf16.mxu0 %v2792_v26  ;;  %1959 = vmatprep.subr.bf16.mxu1 %v2795_v27 }
  0xd7   :  { %1874 = vmatpush1.bf16.msra.mxu0 %v2790_v28  ;;  %1960 = vmatpush1.bf16.msra.mxu1 %v2793_v29 }
  0xd8   :  { %1875 = vmatprep.subr.bf16.mxu0 %v2798_v31  ;;  %1961 = vmatprep.subr.bf16.mxu1 %v2801_v32 }
  0xdb   :  { %1876 = vmatpush1.bf16.msra.mxu0 %v2796_v34  ;;  %1962 = vmatpush1.bf16.msra.mxu1 %v2799_v35 }
  0xdc   :  { %1877 = vmatprep.subr.bf16.mxu0 %v2804_v36  ;;  %1963 = vmatprep.subr.bf16.mxu1 %v2807_v37 }
  0xdf   :  { %1878 = vmatpush1.bf16.msra.mxu0 %v2802_v39  ;;  %1964 = vmatpush1.bf16.msra.mxu1 %v2805_v40  ;;  %v1171_v40 = vrot.slane %v3594_v44, %v158_v15 }
  0xe0   :  { %1879 = vmatprep.subr.bf16.mxu0 %v2810_v41  ;;  %1965 = vmatprep.subr.bf16.mxu1 %v2813_v42  ;;  %v1167_v41 = vrot.slane %v3594_v44, %v154_v17  ;;  %v1175_v42 = vrot.slane %v3594_v44, %v162_v5 }
  0xe3   :  { %1880 = vmatpush1.bf16.msra.mxu0 %v2808_v46  ;;  %1966 = vmatpush1.bf16.msra.mxu1 %v2811_v48 }
  0xe4   :  { %1881 = vmatprep.subr.bf16.mxu0 %v2816_v49  ;;  %1967 = vmatprep.subr.bf16.mxu1 %v2819_v50 }
  0xe7   :  { %1882 = vmatpush1.bf16.msra.mxu0 %v2814_v51  ;;  %1968 = vmatpush1.bf16.msra.mxu1 %v2817_v52 }
  0xe8   :  { %1883 = vmatprep.subr.bf16.mxu0 %v2822_v53  ;;  %1969 = vmatprep.subr.bf16.mxu1 %v2825_v54 }
  0xeb   :  { %1884 = vmatpush1.bf16.msra.mxu0 %v2820_v55  ;;  %1970 = vmatpush1.bf16.msra.mxu1 %v2823_v56 }
  0xec   :  { %1885 = vmatprep.subr.bf16.mxu0 %v2828_v57  ;;  %1971 = vmatprep.subr.bf16.mxu1 %v2831_v58 }
  0xef   :  { %1886 = vmatpush1.bf16.msra.mxu0 %v2826_v59  ;;  %1972 = vmatpush1.bf16.msra.mxu1 %v2829_v60 }
  0xf0   :  { %1887 = vmatprep.subr.bf16.mxu0 %v2834_v61  ;;  %1973 = vmatprep.subr.bf16.mxu1 %v2837_v62 }
  0xf3   :  { %1888 = vmatpush1.bf16.msra.mxu0 %v2832_v63  ;;  %1974 = vmatpush1.bf16.msra.mxu1 %v2835_v0 }
  0xf4   :  { %1889 = vmatprep.subr.bf16.mxu0 %v2840_v1  ;;  %1975 = vmatprep.subr.bf16.mxu1 %v2843_v2 }
  0xf7   :  { %1890 = vmatpush1.bf16.msra.mxu0 %v2838_v3  ;;  %1976 = vmatpush1.bf16.msra.mxu1 %v2841_v4 }
  0xf8   :  { %1891 = vmatprep.subr.bf16.mxu0 %v2846_v6  ;;  %1977 = vmatprep.subr.bf16.mxu1 %v2849_v8 }
  0xfb   :  { %1892 = vmatpush1.bf16.msra.mxu0 %v2844_v9  ;;  %1978 = vmatpush1.bf16.msra.mxu1 %v2847_v10 }
  0xfc   :  { %1893 = vmatprep.subr.bf16.mxu0 %v2852_v11  ;;  %1979 = vmatprep.subr.bf16.mxu1 %v2855_v12 }
  0xff   :  { %1894 = vmatpush1.bf16.msra.mxu0 %v2850_v13  ;;  %1980 = vmatpush1.bf16.msra.mxu1 %v2853_v14 }
 0x102   :  { %1896 = vmatmul.mubr.bf16.vlgmr.msra.gmra.mrb[4].mxu0 %v3290_v7  ;;  %1982 = vmatmul.mubr.bf16.vlgmr.msra.gmra.mrb[4].mxu1 %v3290_v7 }
 0x155   :  { %v905_v20 = vpop.f32.mrb[0].mxu0  ;;  %v991_v21 = vpop.f32.mrb[0].mxu1 }
 0x156   :  { %v2434_v22 = vadd.f32 %v905_v20, %v151_v18  ;;  %v2438_v7 = vadd.f32 %v991_v21, %v159_v47  ;;  %v907_v23 = vpop.f32.mrb[1].mxu0  ;;  %v993_v24 = vpop.f32.mrb[1].mxu1 }
 0x157   :  { %v2435_v25 = vadd.f32 %v907_v23, %v155_v19  ;;  %v2439_v26 = vadd.f32 %v993_v24, %v163_v30  ;;  %v909_v27 = vpop.f32.mrb[2].mxu0  ;;  %v995_v28 = vpop.f32.mrb[2].mxu1 }
 0x158   :  { %v2436_v29 = vadd.f32 %v909_v27, %v151_v18  ;;  %v2440_v31 = vadd.f32 %v995_v28, %v159_v47  ;;  %v911_v32 = vpop.f32.mrb[3].mxu0  ;;  %v997_v33 = vpop.f32.mrb[3].mxu1 }
 0x159   :  { %v2426_v34 = vpack.c.bf16 %v2435_v25, %v2434_v22  ;;  %v2427_v35 = vpack.c.bf16 %v2439_v26, %v2438_v7  ;;  %v2437_v36 = vadd.f32 %v911_v32, %v155_v19  ;;  %v2441_v37 = vadd.f32 %v997_v33, %v163_v30 }
 0x15b   :  { %1024 = vst [vmem:[%s3733_s3] sm:$0xff] %v2426_v34  ;;  %1025 = vst [vmem:[%s3733_s3 + $0x8] sm:$0xff] %v2427_v35  ;;  %v2428_v38 = vpack.c.bf16 %v2437_v36, %v2436_v29  ;;  %v2429_v39 = vpack.c.bf16 %v2441_v37, %v2440_v31 }
 0x15d   :  { %1026 = vst [vmem:[%s3733_s3 + $0x10] sm:$0xff] %v2428_v38  ;;  %1027 = vst [vmem:[%s3733_s3 + $0x18] sm:$0xff] %v2429_v39 }
 0x1d5   :  { %v1897_v43 = vpop.f32.mrb[4].mxu0  ;;  %v1983_v46 = vpop.f32.mrb[4].mxu1 }
 0x1d6   :  { %v2442_v48 = vadd.f32 %v1897_v43, %v3599_v45  ;;  %v2446_v49 = vadd.f32 %v1983_v46, %v1171_v40  ;;  %v1899_v50 = vpop.f32.mrb[5].mxu0  ;;  %v1985_v51 = vpop.f32.mrb[5].mxu1 }
 0x1d7   :  { %v2443_v52 = vadd.f32 %v1899_v50, %v1167_v41  ;;  %v2447_v53 = vadd.f32 %v1985_v51, %v1175_v42  ;;  %v1901_v54 = vpop.f32.mrb[6].mxu0  ;;  %v1987_v55 = vpop.f32.mrb[6].mxu1 }
 0x1d8   :  { %v2444_v56 = vadd.f32 %v1901_v54, %v3599_v45  ;;  %v2448_v57 = vadd.f32 %v1987_v55, %v1171_v40  ;;  %v1903_v58 = vpop.f32.mrb[7].mxu0  ;;  %v1989_v59 = vpop.f32.mrb[7].mxu1 }
 0x1d9   :  { %v2430_v60 = vpack.c.bf16 %v2443_v52, %v2442_v48  ;;  %v2431_v61 = vpack.c.bf16 %v2447_v53, %v2446_v49  ;;  %v2445_v62 = vadd.f32 %v1903_v58, %v1167_v41  ;;  %v2449_v44 = vadd.f32 %v1989_v59, %v1175_v42 }
 0x1db   :  { %2422 = vst [vmem:[%s3733_s3 + $0x20] sm:$0xff] %v2430_v60  ;;  %2423 = vst [vmem:[%s3733_s3 + $0x28] sm:$0xff] %v2431_v61  ;;  %v2432_v63 = vpack.c.bf16 %v2445_v62, %v2444_v56  ;;  %v2433_v0 = vpack.c.bf16 %v2449_v44, %v2448_v57 }
 0x1dd   :  { %2424 = vst [vmem:[%s3733_s3 + $0x30] sm:$0xff] %v2432_v63  ;;  %2425 = vst [vmem:[%s3733_s3 + $0x38] sm:$0xff] %v2433_v0 }

// kernel: listener_forward.13
= control target key start
LH: loop header
LB: loop body
LE: loop exit
PB: predicated region body
PF: predicated region fallthrough
CT: control target
= control target key end

     0   :  { %v435_v1 = vmov 0.0   ;;  %vm436_vm0 = vmmov 0   ;;  %s568_s1 = inlined_call_operand.vmem [shape: bf16[256,128], index: 1, kind: input, shape index: {}]   ;;  %s569_s0 = inlined_call_operand.vmem [shape: bf16[8,256], index: 0, kind: input, shape index: {}]   ;;  %s570_s3 = inlined_call_operand.vmem [shape: bf16[128,128], index: 3, kind: input, shape index: {}]   ;;  %s571_s2 = inlined_call_operand.vmem [shape: f32[1,128], index: 2, kind: input, shape index: {}]   ;;  %s572_s5 = inlined_call_operand.vmem [shape: f32[8,128], index: 5, kind: output, shape index: {0}]   ;;  %s573_s4 = inlined_call_operand.vmem [shape: f32[1,128], index: 4, kind: input, shape index: {}]   ;;  %s574_s6 = inlined_call_operand.vmem [shape: f32[8,128], index: 6, kind: output, shape index: {1}]  }
   0x1   :  { %v409_v0 = vld [vmem:[%s568_s1 + $0x40] sm:$0xff]   ;;  %387 = vmatprep.subr.bf16.mxu1 %v435_v1  ;;  %v411_v3 = vld [vmem:[%s568_s1 + $0x48] sm:$0xff]   ;;  %v413_v5 = vld [vmem:[%s568_s1 + $0x50] sm:$0xff]   ;;  %403 = vmatprep.mubr.msk.bf16.mxu1 %vm436_vm0, %v435_v1 }
   0x2   :  { %v410_v2 = vld [vmem:[%s568_s1] sm:$0xff]   ;;  %356 = vmatprep.subr.bf16.mxu0 %v409_v0  ;;  %v412_v4 = vld [vmem:[%s568_s1 + $0x8] sm:$0xff]   ;;  %v414_v6 = vld [vmem:[%s568_s1 + $0x10] sm:$0xff]  }
   0x3   :  { %357 = vmatpush3.bf16.msra.mxu0 %v410_v2  ;;  %v415_v7 = vld [vmem:[%s568_s1 + $0x58] sm:$0xff]   ;;  %v417_v9 = vld [vmem:[%s568_s1 + $0x60] sm:$0xff]   ;;  %v419_v11 = vld [vmem:[%s568_s1 + $0x68] sm:$0xff]  }
   0x4   :  { %358 = vmatprep.subr.bf16.mxu0 %v411_v3  ;;  %v416_v8 = vld [vmem:[%s568_s1 + $0x18] sm:$0xff]   ;;  %v418_v10 = vld [vmem:[%s568_s1 + $0x20] sm:$0xff]   ;;  %v420_v15 = vld [vmem:[%s568_s1 + $0x28] sm:$0xff]  }
   0x5   :  { %v23_v12 = vld [vmem:[%s569_s0] sm:$0xff]  ;;  %v421_v16 = vld [vmem:[%s568_s1 + $0x70] sm:$0xff]   ;;  %v428_v17 = vld [vmem:[%s570_s3 + $0x8] sm:$0xff]  }
   0x6   :  { %v330_v13 = vcombine.high %v23_v12, %v23_v12  ;;  %v427_v14 = vld [vmem:[%s570_s3] sm:$0xff]   ;;  %v422_v18 = vld [vmem:[%s568_s1 + $0x30] sm:$0xff]   ;;  %v423_v19 = vld [vmem:[%s568_s1 + $0x78] sm:$0xff]   ;;  %v329_v23 = vcombine.low %v23_v12, %v23_v12 }
   0x7   :  { %359 = vmatpush3.bf16.msra.mxu0 %v412_v4  ;;  %388 = vmatpush3.bf16.msra.mxu1 %v427_v14  ;;  %v429_v20 = vld [vmem:[%s570_s3 + $0x10] sm:$0xff]   ;;  %v424_v21 = vld [vmem:[%s568_s1 + $0x38] sm:$0xff]   ;;  %v431_v24 = vld [vmem:[%s570_s3 + $0x20] sm:$0xff]  }
   0x8   :  { %360 = vmatprep.subr.bf16.mxu0 %v413_v5  ;;  %198 = vmatprep.mubr.bf16.mxu0 %v330_v13  ;;  %v430_v22 = vld [vmem:[%s570_s3 + $0x18] sm:$0xff]   ;;  %v432_v25 = vld [vmem:[%s570_s3 + $0x28] sm:$0xff]   ;;  %v433_v26 = vld [vmem:[%s570_s3 + $0x30] sm:$0xff]  }
   0x9   :  { %389 = vmatprep.subr.bf16.mxu1 %v435_v1  ;;  %v434_v27 = vld [vmem:[%s570_s3 + $0x38] sm:$0xff]   ;;  %v328_v29 = vld [vmem:[%s571_s2] ss:$0 sm:$0xff] }
   0xa   :  { %v347_v36 = vld [vmem:[%s573_s4] ss:$0 sm:$0xff] }
   0xb   :  { %361 = vmatpush3.bf16.msra.mxu0 %v414_v6  ;;  %390 = vmatpush3.bf16.msra.mxu1 %v428_v17 }
   0xc   :  { %362 = vmatprep.subr.bf16.mxu0 %v415_v7  ;;  %391 = vmatprep.subr.bf16.mxu1 %v435_v1 }
   0xf   :  { %363 = vmatpush3.bf16.msra.mxu0 %v416_v8  ;;  %392 = vmatpush3.bf16.msra.mxu1 %v429_v20 }
  0x10   :  { %364 = vmatprep.subr.bf16.mxu0 %v417_v9  ;;  %393 = vmatprep.subr.bf16.mxu1 %v435_v1 }
  0x13   :  { %365 = vmatpush3.bf16.msra.mxu0 %v418_v10  ;;  %394 = vmatpush3.bf16.msra.mxu1 %v430_v22 }
  0x14   :  { %366 = vmatprep.subr.bf16.mxu0 %v419_v11  ;;  %395 = vmatprep.subr.bf16.mxu1 %v435_v1 }
  0x17   :  { %367 = vmatpush3.bf16.msra.mxu0 %v420_v15  ;;  %396 = vmatpush3.bf16.msra.mxu1 %v431_v24 }
  0x18   :  { %368 = vmatprep.subr.bf16.mxu0 %v421_v16  ;;  %397 = vmatprep.subr.bf16.mxu1 %v435_v1 }
  0x1b   :  { %369 = vmatpush3.bf16.msra.mxu0 %v422_v18  ;;  %398 = vmatpush3.bf16.msra.mxu1 %v432_v25 }
  0x1c   :  { %370 = vmatprep.subr.bf16.mxu0 %v423_v19  ;;  %399 = vmatprep.subr.bf16.mxu1 %v435_v1 }
  0x1f   :  { %371 = vmatpush3.bf16.msra.mxu0 %v424_v21  ;;  %400 = vmatpush3.bf16.msra.mxu1 %v433_v26 }
  0x20   :  { %401 = vmatprep.subr.bf16.mxu1 %v435_v1 }
  0x22   :  { %199 = vmatmul.mubr.bf16.vlgmr.msra.gmra.mrb[0].mxu0 %v329_v23 }
  0x23   :  { %402 = vmatpush3.bf16.msra.mxu1 %v434_v27 }
  0xf5   :  { %v372_v28 = vpop.f32.mrb[0].mxu0 }
  0xf6   :  { %v373_v30 = vpop.f32.mrb[1].mxu0 }
  0xf7   :  { %v374_v31 = vadd.f32 %v373_v30, %v372_v28  ;;  %v375_v32 = vpop.f32.mrb[2].mxu0 }
  0xf8   :  { %v376_v33 = vpop.f32.mrb[3].mxu0 }
  0xf9   :  { %v201_v34 = vadd.f32 %v374_v31, %v328_v29 }
  0xfb   :  { %206 = vst [vmem:[%s572_s5] sm:$0xff] %v201_v34  ;;  %v207_v35 = vpack.c.bf16 %v201_v34, %v201_v34 }
  0xfd   :  { %404 = vmatmul.mubr.bf16.vlgmr.msra.gmra.mrb[0].mxu1 %v207_v35 }
 0x1d0   :  { %v313_v37 = vpop.f32.mrb[0].mxu1 }
 0x1d1   :  { %v314_v38 = vadd.f32 %v347_v36, %v313_v37  ;;  %v405_v39 = vpop.f32.mrb[1].mxu1 }
 0x1d2   :  { %v316_v40 = vpop.f32.mrb[2].mxu1 }
 0x1d3   :  { %319 = vst [vmem:[%s574_s6] sm:$0xff] %v314_v38  ;;  %v406_v41 = vpop.f32.mrb[3].mxu1 }

</bundles_post_ra>
